<compile_context>
chip_gen: v7x
topology: tpu7x:2x2x1
jax: 0.10.0
libtpu: 0.0.40
codegen_flags: <defaults>
</compile_context>

<pallas_src>
import jax
import jax.numpy as jnp
from jax import lax
from jax.experimental import pallas as pl
from jax.experimental.pallas import tpu as pltpu


# --------------------------------------------------------------------------
# Pallas kernel: depthwise 5x5 conv on one (batch, channel-tile) block
# --------------------------------------------------------------------------
def _dwconv5x5_kernel(xp_ref, w_ref, o_ref):
    """xp_ref: (1, H+4, W+4, TC) zero-padded input window (channels on lanes)
       w_ref : (25, 1, 1, TC)    per-channel taps, leading index = dy*5 + dx
       o_ref : (1, H, W, TC)
    """
    H, W, TC = o_ref.shape[1], o_ref.shape[2], o_ref.shape[3]
    x = xp_ref[0]            # (H+4, W+4, TC)
    wv = w_ref[...]          # (25, 1, 1, TC)
    acc = jnp.zeros((H, W, TC), jnp.float32)
    for dy in range(5):
        for dx in range(5):
            tap = wv[dy * 5 + dx]                                  # (1, 1, TC)
            acc = acc + x[dy:dy + H, dx:dx + W, :].astype(jnp.float32) * tap
    o_ref[0] = acc.astype(o_ref.dtype)


# --------------------------------------------------------------------------
# Parameter construction + forward wrapper
# --------------------------------------------------------------------------
def init_dwconv2d(key, indim):
    """Matches nn.Conv2d(indim, indim, 5, padding=2, groups=indim, bias=False)."""
    w = jax.random.normal(key, (indim, 1, 5, 5), jnp.float32) * 0.05
    # Pre-transpose once at init (perf review): (c,1,5,5) -> (25, 1, 1, c),
    # leading index = dy*5 + dx, channel on the last (lane) axis.
    wt = w.reshape(indim, 25).T.reshape(25, 1, 1, indim)
    return {"weight": w, "wt": wt}


def dwconv2d_forward(params, x, size_2d):
    """x: (n, bs, c) with n == h*w.  Returns (h*w, bs, c) like the PyTorch module."""
    h, w = size_2d
    n, bs, c = x.shape
    assert n == h * w

    # (n, bs, c) -> NHWC (bs, h, w, c): channels on the 128-lane axis.
    x_nhwc = x.reshape(h, w, bs, c).transpose(2, 0, 1, 3)
    # Single small (+2 halo) pad; ~6% extra bytes, avoids in-kernel boundary masks.
    xp = jnp.pad(x_nhwc, ((0, 0), (2, 2), (2, 2), (0, 0)))

    # Channel tiling: 128-lane tiles when possible, otherwise one full-channel block.
    tc = 128 if c % 128 == 0 else c
    grid = (bs, c // tc)

    out = pl.pallas_call(
        _dwconv5x5_kernel,
        out_shape=jax.ShapeDtypeStruct((bs, h, w, c), x.dtype),
        grid_spec=pltpu.PrefetchScalarGridSpec(
            num_scalar_prefetch=0,
            grid=grid,
            in_specs=[
                pl.BlockSpec((1, h + 4, w + 4, tc), lambda b, cc: (b, 0, 0, cc)),
                pl.BlockSpec((25, 1, 1, tc), lambda b, cc: (0, 0, 0, cc)),
            ],
            out_specs=pl.BlockSpec((1, h, w, tc), lambda b, cc: (b, 0, 0, cc)),
        ),
        compiler_params=pltpu.CompilerParams(
            dimension_semantics=("parallel", "parallel")),
    )(xp, params["wt"])
    # TODO(synk): for very large h*w, add a row-tile grid axis with halo DMA
    # (manual pltpu.make_async_copy); at these sizes full-image-per-block is
    # fine and VMEM is already bounded by the channel tiling.

    # NHWC -> (h*w, bs, c), matching PyTorch's .view(bs, c, h*w).permute(2, 0, 1).
    return out.transpose(1, 2, 0, 3).reshape(h * w, bs, c)


# --------------------------------------------------------------------------
# Independent reference (XLA depthwise conv) for a numerical sanity check
# --------------------------------------------------------------------------
def _reference_dwconv(weight, x, size_2d):
    h, w = size_2d
    n, bs, c = x.shape
    xc = x.reshape(h, w, bs, c).transpose(2, 3, 0, 1)            # (bs, c, h, w)
    out = lax.conv_general_dilated(
        xc, weight, window_strides=(1, 1), padding=((2, 2), (2, 2)),
        dimension_numbers=("NCHW", "OIHW", "NCHW"),
        feature_group_count=c, precision=lax.Precision.HIGHEST)
    return out.reshape(bs, c, h * w).transpose(2, 0, 1)


# --------------------------------------------------------------------------
if __name__ == "__main__":
    indim = 128           # channels (lane-dense: multiple of 128)
    h, w = 16, 16
    bs = 2

    kp, kx = jax.random.split(jax.random.PRNGKey(0))
    params = init_dwconv2d(kp, indim)
    x = jax.random.normal(kx, (h * w, bs, indim), jnp.float32)   # (n, bs, c)

    out = dwconv2d_forward(params, x, (h, w))
    out = jax.block_until_ready(out)

    assert out.shape == (h * w, bs, indim), out.shape
    assert bool(jnp.all(jnp.isfinite(out)))

    ref = jax.block_until_ready(_reference_dwconv(params["weight"], x, (h, w)))
    assert bool(jnp.allclose(out, ref, rtol=1e-4, atol=1e-4)), \
        float(jnp.max(jnp.abs(out - ref)))

    print("KERNEL_OK")
</pallas_src>

<mosaic_0001>
module attributes {stable_mosaic.version = 11 : i64} {
  func.func @_dwconv5x5_kernel(%arg0: i32, %arg1: i32, %arg2: memref<1x20x20x128xf32, #tpu.memory_space<vmem>>, %arg3: memref<25x1x1x128xf32, #tpu.memory_space<vmem>>, %arg4: memref<1x16x16x128xf32, #tpu.memory_space<vmem>>) attributes {dimension_semantics = [#tpu.dimension_semantics<parallel>, #tpu.dimension_semantics<parallel>], iteration_bounds = array<i64: 2, 1>, scalar_prefetch = 0 : i64, scratch_operands = 0 : i64, tpu.core_type = #tpu.core_type<tc>, window_params = [{transform_indices = @transform_0, window_bounds = array<i64: 1, 20, 20, 128>}, {transform_indices = @transform_1, window_bounds = array<i64: 25, 1, 1, 128>}, {transform_indices = @transform_2, window_bounds = array<i64: 1, 16, 16, 128>}]} {
    %c0 = arith.constant 0 : index
    %c0_0 = arith.constant 0 : index
    %c0_1 = arith.constant 0 : index
    %c0_2 = arith.constant 0 : index
    %0 = vector.load %arg2[%c0, %c0_0, %c0_1, %c0_2] : memref<1x20x20x128xf32, #tpu.memory_space<vmem>>, vector<1x20x20x128xf32>
    %1 = vector.shape_cast %0 : vector<1x20x20x128xf32> to vector<20x20x128xf32>
    %c0_3 = arith.constant 0 : index
    %c0_4 = arith.constant 0 : index
    %c0_5 = arith.constant 0 : index
    %c0_6 = arith.constant 0 : index
    %2 = vector.load %arg3[%c0_3, %c0_4, %c0_5, %c0_6] : memref<25x1x1x128xf32, #tpu.memory_space<vmem>>, vector<25x1x1x128xf32>
    %cst = arith.constant 0.000000e+00 : f32
    %3 = vector.broadcast %cst : f32 to vector<16x16x128xf32>
    %4 = vector.extract_strided_slice %2 {offsets = [0, 0, 0, 0], sizes = [1, 1, 1, 128], strides = [1, 1, 1, 1]} : vector<25x1x1x128xf32> to vector<1x1x1x128xf32>
    %5 = vector.shape_cast %4 : vector<1x1x1x128xf32> to vector<1x1x128xf32>
    %6 = vector.extract_strided_slice %1 {offsets = [0, 0, 0], sizes = [16, 16, 128], strides = [1, 1, 1]} : vector<20x20x128xf32> to vector<16x16x128xf32>
    %7 = vector.broadcast %5 : vector<1x1x128xf32> to vector<16x16x128xf32>
    %8 = arith.mulf %6, %7 : vector<16x16x128xf32>
    %9 = arith.addf %3, %8 : vector<16x16x128xf32>
    %10 = vector.extract_strided_slice %2 {offsets = [1, 0, 0, 0], sizes = [1, 1, 1, 128], strides = [1, 1, 1, 1]} : vector<25x1x1x128xf32> to vector<1x1x1x128xf32>
    %11 = vector.shape_cast %10 : vector<1x1x1x128xf32> to vector<1x1x128xf32>
    %12 = vector.extract_strided_slice %1 {offsets = [0, 1, 0], sizes = [16, 16, 128], strides = [1, 1, 1]} : vector<20x20x128xf32> to vector<16x16x128xf32>
    %13 = vector.broadcast %11 : vector<1x1x128xf32> to vector<16x16x128xf32>
    %14 = arith.mulf %12, %13 : vector<16x16x128xf32>
    %15 = arith.addf %9, %14 : vector<16x16x128xf32>
    %16 = vector.extract_strided_slice %2 {offsets = [2, 0, 0, 0], sizes = [1, 1, 1, 128], strides = [1, 1, 1, 1]} : vector<25x1x1x128xf32> to vector<1x1x1x128xf32>
    %17 = vector.shape_cast %16 : vector<1x1x1x128xf32> to vector<1x1x128xf32>
    %18 = vector.extract_strided_slice %1 {offsets = [0, 2, 0], sizes = [16, 16, 128], strides = [1, 1, 1]} : vector<20x20x128xf32> to vector<16x16x128xf32>
    %19 = vector.broadcast %17 : vector<1x1x128xf32> to vector<16x16x128xf32>
    %20 = arith.mulf %18, %19 : vector<16x16x128xf32>
    %21 = arith.addf %15, %20 : vector<16x16x128xf32>
    %22 = vector.extract_strided_slice %2 {offsets = [3, 0, 0, 0], sizes = [1, 1, 1, 128], strides = [1, 1, 1, 1]} : vector<25x1x1x128xf32> to vector<1x1x1x128xf32>
    %23 = vector.shape_cast %22 : vector<1x1x1x128xf32> to vector<1x1x128xf32>
    %24 = vector.extract_strided_slice %1 {offsets = [0, 3, 0], sizes = [16, 16, 128], strides = [1, 1, 1]} : vector<20x20x128xf32> to vector<16x16x128xf32>
    %25 = vector.broadcast %23 : vector<1x1x128xf32> to vector<16x16x128xf32>
    %26 = arith.mulf %24, %25 : vector<16x16x128xf32>
    %27 = arith.addf %21, %26 : vector<16x16x128xf32>
    %28 = vector.extract_strided_slice %2 {offsets = [4, 0, 0, 0], sizes = [1, 1, 1, 128], strides = [1, 1, 1, 1]} : vector<25x1x1x128xf32> to vector<1x1x1x128xf32>
    %29 = vector.shape_cast %28 : vector<1x1x1x128xf32> to vector<1x1x128xf32>
    %30 = vector.extract_strided_slice %1 {offsets = [0, 4, 0], sizes = [16, 16, 128], strides = [1, 1, 1]} : vector<20x20x128xf32> to vector<16x16x128xf32>
    %31 = vector.broadcast %29 : vector<1x1x128xf32> to vector<16x16x128xf32>
    %32 = arith.mulf %30, %31 : vector<16x16x128xf32>
    %33 = arith.addf %27, %32 : vector<16x16x128xf32>
    %34 = vector.extract_strided_slice %2 {offsets = [5, 0, 0, 0], sizes = [1, 1, 1, 128], strides = [1, 1, 1, 1]} : vector<25x1x1x128xf32> to vector<1x1x1x128xf32>
    %35 = vector.shape_cast %34 : vector<1x1x1x128xf32> to vector<1x1x128xf32>
    %36 = vector.extract_strided_slice %1 {offsets = [1, 0, 0], sizes = [16, 16, 128], strides = [1, 1, 1]} : vector<20x20x128xf32> to vector<16x16x128xf32>
    %37 = vector.broadcast %35 : vector<1x1x128xf32> to vector<16x16x128xf32>
    %38 = arith.mulf %36, %37 : vector<16x16x128xf32>
    %39 = arith.addf %33, %38 : vector<16x16x128xf32>
    %40 = vector.extract_strided_slice %2 {offsets = [6, 0, 0, 0], sizes = [1, 1, 1, 128], strides = [1, 1, 1, 1]} : vector<25x1x1x128xf32> to vector<1x1x1x128xf32>
    %41 = vector.shape_cast %40 : vector<1x1x1x128xf32> to vector<1x1x128xf32>
    %42 = vector.extract_strided_slice %1 {offsets = [1, 1, 0], sizes = [16, 16, 128], strides = [1, 1, 1]} : vector<20x20x128xf32> to vector<16x16x128xf32>
    %43 = vector.broadcast %41 : vector<1x1x128xf32> to vector<16x16x128xf32>
    %44 = arith.mulf %42, %43 : vector<16x16x128xf32>
    %45 = arith.addf %39, %44 : vector<16x16x128xf32>
    %46 = vector.extract_strided_slice %2 {offsets = [7, 0, 0, 0], sizes = [1, 1, 1, 128], strides = [1, 1, 1, 1]} : vector<25x1x1x128xf32> to vector<1x1x1x128xf32>
    %47 = vector.shape_cast %46 : vector<1x1x1x128xf32> to vector<1x1x128xf32>
    %48 = vector.extract_strided_slice %1 {offsets = [1, 2, 0], sizes = [16, 16, 128], strides = [1, 1, 1]} : vector<20x20x128xf32> to vector<16x16x128xf32>
    %49 = vector.broadcast %47 : vector<1x1x128xf32> to vector<16x16x128xf32>
    %50 = arith.mulf %48, %49 : vector<16x16x128xf32>
    %51 = arith.addf %45, %50 : vector<16x16x128xf32>
    %52 = vector.extract_strided_slice %2 {offsets = [8, 0, 0, 0], sizes = [1, 1, 1, 128], strides = [1, 1, 1, 1]} : vector<25x1x1x128xf32> to vector<1x1x1x128xf32>
    %53 = vector.shape_cast %52 : vector<1x1x1x128xf32> to vector<1x1x128xf32>
    %54 = vector.extract_strided_slice %1 {offsets = [1, 3, 0], sizes = [16, 16, 128], strides = [1, 1, 1]} : vector<20x20x128xf32> to vector<16x16x128xf32>
    %55 = vector.broadcast %53 : vector<1x1x128xf32> to vector<16x16x128xf32>
    %56 = arith.mulf %54, %55 : vector<16x16x128xf32>
    %57 = arith.addf %51, %56 : vector<16x16x128xf32>
    %58 = vector.extract_strided_slice %2 {offsets = [9, 0, 0, 0], sizes = [1, 1, 1, 128], strides = [1, 1, 1, 1]} : vector<25x1x1x128xf32> to vector<1x1x1x128xf32>
    %59 = vector.shape_cast %58 : vector<1x1x1x128xf32> to vector<1x1x128xf32>
    %60 = vector.extract_strided_slice %1 {offsets = [1, 4, 0], sizes = [16, 16, 128], strides = [1, 1, 1]} : vector<20x20x128xf32> to vector<16x16x128xf32>
    %61 = vector.broadcast %59 : vector<1x1x128xf32> to vector<16x16x128xf32>
    %62 = arith.mulf %60, %61 : vector<16x16x128xf32>
    %63 = arith.addf %57, %62 : vector<16x16x128xf32>
    %64 = vector.extract_strided_slice %2 {offsets = [10, 0, 0, 0], sizes = [1, 1, 1, 128], strides = [1, 1, 1, 1]} : vector<25x1x1x128xf32> to vector<1x1x1x128xf32>
    %65 = vector.shape_cast %64 : vector<1x1x1x128xf32> to vector<1x1x128xf32>
    %66 = vector.extract_strided_slice %1 {offsets = [2, 0, 0], sizes = [16, 16, 128], strides = [1, 1, 1]} : vector<20x20x128xf32> to vector<16x16x128xf32>
    %67 = vector.broadcast %65 : vector<1x1x128xf32> to vector<16x16x128xf32>
    %68 = arith.mulf %66, %67 : vector<16x16x128xf32>
    %69 = arith.addf %63, %68 : vector<16x16x128xf32>
    %70 = vector.extract_strided_slice %2 {offsets = [11, 0, 0, 0], sizes = [1, 1, 1, 128], strides = [1, 1, 1, 1]} : vector<25x1x1x128xf32> to vector<1x1x1x128xf32>
    %71 = vector.shape_cast %70 : vector<1x1x1x128xf32> to vector<1x1x128xf32>
    %72 = vector.extract_strided_slice %1 {offsets = [2, 1, 0], sizes = [16, 16, 128], strides = [1, 1, 1]} : vector<20x20x128xf32> to vector<16x16x128xf32>
    %73 = vector.broadcast %71 : vector<1x1x128xf32> to vector<16x16x128xf32>
    %74 = arith.mulf %72, %73 : vector<16x16x128xf32>
    %75 = arith.addf %69, %74 : vector<16x16x128xf32>
    %76 = vector.extract_strided_slice %2 {offsets = [12, 0, 0, 0], sizes = [1, 1, 1, 128], strides = [1, 1, 1, 1]} : vector<25x1x1x128xf32> to vector<1x1x1x128xf32>
    %77 = vector.shape_cast %76 : vector<1x1x1x128xf32> to vector<1x1x128xf32>
    %78 = vector.extract_strided_slice %1 {offsets = [2, 2, 0], sizes = [16, 16, 128], strides = [1, 1, 1]} : vector<20x20x128xf32> to vector<16x16x128xf32>
    %79 = vector.broadcast %77 : vector<1x1x128xf32> to vector<16x16x128xf32>
    %80 = arith.mulf %78, %79 : vector<16x16x128xf32>
    %81 = arith.addf %75, %80 : vector<16x16x128xf32>
    %82 = vector.extract_strided_slice %2 {offsets = [13, 0, 0, 0], sizes = [1, 1, 1, 128], strides = [1, 1, 1, 1]} : vector<25x1x1x128xf32> to vector<1x1x1x128xf32>
    %83 = vector.shape_cast %82 : vector<1x1x1x128xf32> to vector<1x1x128xf32>
    %84 = vector.extract_strided_slice %1 {offsets = [2, 3, 0], sizes = [16, 16, 128], strides = [1, 1, 1]} : vector<20x20x128xf32> to vector<16x16x128xf32>
    %85 = vector.broadcast %83 : vector<1x1x128xf32> to vector<16x16x128xf32>
    %86 = arith.mulf %84, %85 : vector<16x16x128xf32>
    %87 = arith.addf %81, %86 : vector<16x16x128xf32>
    %88 = vector.extract_strided_slice %2 {offsets = [14, 0, 0, 0], sizes = [1, 1, 1, 128], strides = [1, 1, 1, 1]} : vector<25x1x1x128xf32> to vector<1x1x1x128xf32>
    %89 = vector.shape_cast %88 : vector<1x1x1x128xf32> to vector<1x1x128xf32>
    %90 = vector.extract_strided_slice %1 {offsets = [2, 4, 0], sizes = [16, 16, 128], strides = [1, 1, 1]} : vector<20x20x128xf32> to vector<16x16x128xf32>
    %91 = vector.broadcast %89 : vector<1x1x128xf32> to vector<16x16x128xf32>
    %92 = arith.mulf %90, %91 : vector<16x16x128xf32>
    %93 = arith.addf %87, %92 : vector<16x16x128xf32>
    %94 = vector.extract_strided_slice %2 {offsets = [15, 0, 0, 0], sizes = [1, 1, 1, 128], strides = [1, 1, 1, 1]} : vector<25x1x1x128xf32> to vector<1x1x1x128xf32>
    %95 = vector.shape_cast %94 : vector<1x1x1x128xf32> to vector<1x1x128xf32>
    %96 = vector.extract_strided_slice %1 {offsets = [3, 0, 0], sizes = [16, 16, 128], strides = [1, 1, 1]} : vector<20x20x128xf32> to vector<16x16x128xf32>
    %97 = vector.broadcast %95 : vector<1x1x128xf32> to vector<16x16x128xf32>
    %98 = arith.mulf %96, %97 : vector<16x16x128xf32>
    %99 = arith.addf %93, %98 : vector<16x16x128xf32>
    %100 = vector.extract_strided_slice %2 {offsets = [16, 0, 0, 0], sizes = [1, 1, 1, 128], strides = [1, 1, 1, 1]} : vector<25x1x1x128xf32> to vector<1x1x1x128xf32>
    %101 = vector.shape_cast %100 : vector<1x1x1x128xf32> to vector<1x1x128xf32>
    %102 = vector.extract_strided_slice %1 {offsets = [3, 1, 0], sizes = [16, 16, 128], strides = [1, 1, 1]} : vector<20x20x128xf32> to vector<16x16x128xf32>
    %103 = vector.broadcast %101 : vector<1x1x128xf32> to vector<16x16x128xf32>
    %104 = arith.mulf %102, %103 : vector<16x16x128xf32>
    %105 = arith.addf %99, %104 : vector<16x16x128xf32>
    %106 = vector.extract_strided_slice %2 {offsets = [17, 0, 0, 0], sizes = [1, 1, 1, 128], strides = [1, 1, 1, 1]} : vector<25x1x1x128xf32> to vector<1x1x1x128xf32>
    %107 = vector.shape_cast %106 : vector<1x1x1x128xf32> to vector<1x1x128xf32>
    %108 = vector.extract_strided_slice %1 {offsets = [3, 2, 0], sizes = [16, 16, 128], strides = [1, 1, 1]} : vector<20x20x128xf32> to vector<16x16x128xf32>
    %109 = vector.broadcast %107 : vector<1x1x128xf32> to vector<16x16x128xf32>
    %110 = arith.mulf %108, %109 : vector<16x16x128xf32>
    %111 = arith.addf %105, %110 : vector<16x16x128xf32>
    %112 = vector.extract_strided_slice %2 {offsets = [18, 0, 0, 0], sizes = [1, 1, 1, 128], strides = [1, 1, 1, 1]} : vector<25x1x1x128xf32> to vector<1x1x1x128xf32>
    %113 = vector.shape_cast %112 : vector<1x1x1x128xf32> to vector<1x1x128xf32>
    %114 = vector.extract_strided_slice %1 {offsets = [3, 3, 0], sizes = [16, 16, 128], strides = [1, 1, 1]} : vector<20x20x128xf32> to vector<16x16x128xf32>
    %115 = vector.broadcast %113 : vector<1x1x128xf32> to vector<16x16x128xf32>
    %116 = arith.mulf %114, %115 : vector<16x16x128xf32>
    %117 = arith.addf %111, %116 : vector<16x16x128xf32>
    %118 = vector.extract_strided_slice %2 {offsets = [19, 0, 0, 0], sizes = [1, 1, 1, 128], strides = [1, 1, 1, 1]} : vector<25x1x1x128xf32> to vector<1x1x1x128xf32>
    %119 = vector.shape_cast %118 : vector<1x1x1x128xf32> to vector<1x1x128xf32>
    %120 = vector.extract_strided_slice %1 {offsets = [3, 4, 0], sizes = [16, 16, 128], strides = [1, 1, 1]} : vector<20x20x128xf32> to vector<16x16x128xf32>
    %121 = vector.broadcast %119 : vector<1x1x128xf32> to vector<16x16x128xf32>
    %122 = arith.mulf %120, %121 : vector<16x16x128xf32>
    %123 = arith.addf %117, %122 : vector<16x16x128xf32>
    %124 = vector.extract_strided_slice %2 {offsets = [20, 0, 0, 0], sizes = [1, 1, 1, 128], strides = [1, 1, 1, 1]} : vector<25x1x1x128xf32> to vector<1x1x1x128xf32>
    %125 = vector.shape_cast %124 : vector<1x1x1x128xf32> to vector<1x1x128xf32>
    %126 = vector.extract_strided_slice %1 {offsets = [4, 0, 0], sizes = [16, 16, 128], strides = [1, 1, 1]} : vector<20x20x128xf32> to vector<16x16x128xf32>
    %127 = vector.broadcast %125 : vector<1x1x128xf32> to vector<16x16x128xf32>
    %128 = arith.mulf %126, %127 : vector<16x16x128xf32>
    %129 = arith.addf %123, %128 : vector<16x16x128xf32>
    %130 = vector.extract_strided_slice %2 {offsets = [21, 0, 0, 0], sizes = [1, 1, 1, 128], strides = [1, 1, 1, 1]} : vector<25x1x1x128xf32> to vector<1x1x1x128xf32>
    %131 = vector.shape_cast %130 : vector<1x1x1x128xf32> to vector<1x1x128xf32>
    %132 = vector.extract_strided_slice %1 {offsets = [4, 1, 0], sizes = [16, 16, 128], strides = [1, 1, 1]} : vector<20x20x128xf32> to vector<16x16x128xf32>
    %133 = vector.broadcast %131 : vector<1x1x128xf32> to vector<16x16x128xf32>
    %134 = arith.mulf %132, %133 : vector<16x16x128xf32>
    %135 = arith.addf %129, %134 : vector<16x16x128xf32>
    %136 = vector.extract_strided_slice %2 {offsets = [22, 0, 0, 0], sizes = [1, 1, 1, 128], strides = [1, 1, 1, 1]} : vector<25x1x1x128xf32> to vector<1x1x1x128xf32>
    %137 = vector.shape_cast %136 : vector<1x1x1x128xf32> to vector<1x1x128xf32>
    %138 = vector.extract_strided_slice %1 {offsets = [4, 2, 0], sizes = [16, 16, 128], strides = [1, 1, 1]} : vector<20x20x128xf32> to vector<16x16x128xf32>
    %139 = vector.broadcast %137 : vector<1x1x128xf32> to vector<16x16x128xf32>
    %140 = arith.mulf %138, %139 : vector<16x16x128xf32>
    %141 = arith.addf %135, %140 : vector<16x16x128xf32>
    %142 = vector.extract_strided_slice %2 {offsets = [23, 0, 0, 0], sizes = [1, 1, 1, 128], strides = [1, 1, 1, 1]} : vector<25x1x1x128xf32> to vector<1x1x1x128xf32>
    %143 = vector.shape_cast %142 : vector<1x1x1x128xf32> to vector<1x1x128xf32>
    %144 = vector.extract_strided_slice %1 {offsets = [4, 3, 0], sizes = [16, 16, 128], strides = [1, 1, 1]} : vector<20x20x128xf32> to vector<16x16x128xf32>
    %145 = vector.broadcast %143 : vector<1x1x128xf32> to vector<16x16x128xf32>
    %146 = arith.mulf %144, %145 : vector<16x16x128xf32>
    %147 = arith.addf %141, %146 : vector<16x16x128xf32>
    %148 = vector.extract_strided_slice %2 {offsets = [24, 0, 0, 0], sizes = [1, 1, 1, 128], strides = [1, 1, 1, 1]} : vector<25x1x1x128xf32> to vector<1x1x1x128xf32>
    %149 = vector.shape_cast %148 : vector<1x1x1x128xf32> to vector<1x1x128xf32>
    %150 = vector.extract_strided_slice %1 {offsets = [4, 4, 0], sizes = [16, 16, 128], strides = [1, 1, 1]} : vector<20x20x128xf32> to vector<16x16x128xf32>
    %151 = vector.broadcast %149 : vector<1x1x128xf32> to vector<16x16x128xf32>
    %152 = arith.mulf %150, %151 : vector<16x16x128xf32>
    %153 = arith.addf %147, %152 : vector<16x16x128xf32>
    %c0_7 = arith.constant 0 : index
    %c0_8 = arith.constant 0 : index
    %c0_9 = arith.constant 0 : index
    %c0_10 = arith.constant 0 : index
    %154 = vector.load %arg4[%c0_7, %c0_8, %c0_9, %c0_10] : memref<1x16x16x128xf32, #tpu.memory_space<vmem>>, vector<1x16x16x128xf32>
    %155 = vector.shape_cast %154 : vector<1x16x16x128xf32> to vector<16x16x128xf32>
    %156 = vector.shape_cast %153 : vector<16x16x128xf32> to vector<1x16x16x128xf32>
    tpu.vector_store %arg4[%c0_7, %c0_8, %c0_9, %c0_10], %156 {strides = array<i32>} : memref<1x16x16x128xf32, #tpu.memory_space<vmem>>, vector<1x16x16x128xf32>,
    return
  }
  func.func @transform_0(%arg0: i32, %arg1: i32) -> (i32, i32, i32, i32) {
    %c0_i32 = arith.constant 0 : i32
    %c0_i32_0 = arith.constant 0 : i32
    %c0_i32_1 = arith.constant 0 : i32
    return %arg0, %c0_i32, %c0_i32_0, %arg1 : i32, i32, i32, i32
  }
  func.func @transform_1(%arg0: i32, %arg1: i32) -> (i32, i32, i32, i32) {
    %c0_i32 = arith.constant 0 : i32
    %c0_i32_0 = arith.constant 0 : i32
    %c0_i32_1 = arith.constant 0 : i32
    %c0_i32_2 = arith.constant 0 : i32
    return %c0_i32, %c0_i32_0, %c0_i32_1, %arg1 : i32, i32, i32, i32
  }
  func.func @transform_2(%arg0: i32, %arg1: i32) -> (i32, i32, i32, i32) {
    %c0_i32 = arith.constant 0 : i32
    %c0_i32_0 = arith.constant 0 : i32
    %c0_i32_1 = arith.constant 0 : i32
    return %arg0, %c0_i32, %c0_i32_0, %arg1 : i32, i32, i32, i32
  }
}

</mosaic_0001>

<bundles_post_ra>
// kernel: tpu_custom_call.1
= control target key start
LH: loop header
LB: loop body
LE: loop exit
PB: predicated region body
PF: predicated region fallthrough
CT: control target
= control target key end

     0   :  { %7 = vsyncpa [#allocation3], 0  ;;  %s15336_s0 = inlined_call_operand.vmem [shape: f32[2,20,20,128], index: 0, kind: input, shape index: {}]   ;;  %s15337_s1 = inlined_call_operand.vmem [shape: f32[25,1,1,128], index: 1, kind: input, shape index: {}]   ;;  %s15338_s2 = inlined_call_operand.hbm [shape: f32[2,16,16,128], index: 2, kind: output, shape index: {}]  }
   0x1   :  { %9 = vsyncpa [#allocation3 + $0x1], 0  ;;  %s6125_s9 = smov 0   ;;  %s6127_s10 = smov 0  }
   0x2   :  { %s6129_s11 = smov 0   ;;  %s6131_s12 = smov 0  }
   0x3   :  { %s6133_s13 = smov 0   ;;  %s6135_s14 = smov 0  }
   0x4 LB: > { %s5677_s15 = sadd.s32 4294967295, %s6105_s14   ;;  %s5678_s16 = sadd.s32 4294967294, %s6105_s14   ;;  %s6105_s14 = sphi %s6135_s14, %s15_s14   ;;  %s6101_s13 = sphi %s6133_s13, %s18142_s13   ;;  %s6097_s12 = sphi %s6131_s12, %s18141_s12   ;;  %s6093_s11 = sphi %s6129_s11, %s18140_s11   ;;  %s6089_s10 = sphi %s6127_s10, %s18139_s10   ;;  %s6085_s9 = sphi %s6125_s9, %s18138_s9  }
   0x5   : > { %s27_s17 = sadd.s32 1, %s6101_s13  ;;  %s90_s18 = sadd.s32 1, %s6093_s11 }
   0x6   : > { %p29_p0 = scmp.ge.s32.totalorder %s27_s17, 2  ;;  %p100_p1 = scmp.ne.s32.totalorder %s6093_s11, %s6089_s10 }
   0x7   : > { %p101_p2 = scmp.eq.s32.totalorder %s5677_s15, 1  ;;  %p106_p3 = scmp.ne.s32.totalorder %s6089_s10, %s6085_s9 }
   0x8   : > { %s18144_s17 = smov (%p29_p0, %s27_s17), 0  ;;  %p107_p5 = scmp.eq.s32.totalorder %s5678_s16, 1 }
   0x9   : > { %p6165_p4 = por %p101_p2, %p100_p1  ;;  %s85_s20 = ssub.s32 %s6101_s13, %s18144_s17 }
   0xa   : > { %p5682_p6 = scmp.ge.s32.totalorder %s6105_s14, 1  ;;  %p88_p7 = scmp.eq.s32.totalorder %s85_s20, 0 }
   0xb   : > { %p6172_p8 = por %p107_p5, %p106_p3  ;;  %p142_p9 = scmp.lt.s32.totalorder %s6105_s14, 3 }
   0xc   : > { %s6178_s22 = scalar_select %p88_p7, %s6093_s11, %s90_s18  }
   0xd   : > { %p143_p10 = pnand %p5682_p6, %p142_p9 }
   0xf   : > { %146 = sbr.rel (%p143_p10) target bundleno = 1088 (0x440), region = 28 }
  0x16   : > { %p170_p11 = scmp.lt.s32.totalorder %s6097_s12, 1  ;;  %v6185_v0 = vld [vmem:[%s15337_s1] ss:$0 sm:$0xff]  ;;  %v6190_v1 = vld [vmem:[%s15337_s1 + $0x1] ss:$0 sm:$0xff]  ;;  %vm438_vm0 = vcmask 1046528  }
  0x17   : > { %vm685_vm1 = vcmask 1045504   ;;  %vm932_vm2 = vcmask 1044480   ;;  %vm1179_vm3 = vcmask 1043456   ;;  %s5715_s28 = sshll.u32 %s6097_s12, 12  ;;  %s6107_s7 = smov [#allocation2]  }
  0x18   : > { %s171_s23 = scalar_select %p170_p11, %s6097_s12, 1 }
  0x19   : > { %s15274_s4 = scalar_lea.hbm %s15338_s2, %s5715_s28  ;;  %s6031_s8 = sshll.u32 %s6107_s7, 4  ;;  %s6032_s8 = int_to_ptr.vmem [resolvable:$false] %s6031_s8 }
  0x1a   : > { %s5716_s24 = smul.u32 480, %s171_s23  ;;  %s6033_s15 = scalar_lea.vmem %s6032_s8, 8192 }
  0x1c   : > { %s6195_s3 = scalar_lea.vmem %s15336_s0, %s5716_s24 }
  0x1d   : > { %v6198_v2 = vld [vmem:[%s6195_s3] sm:$0xff]  ;;  %v6201_v3 = vld [vmem:[%s6195_s3 + $0x8] sm:$0xff]  ;;  %v6204_v4 = vld [vmem:[%s6195_s3 + $0x10] sm:$0xf] }
  0x1e   : > { %15898 = vst [vmem:[#allocation5_spill] sm:$0xff] %v6198_v2  ;;  %15899 = vst [vmem:[#allocation6_spill] sm:$0xff] %v6201_v3  ;;  %v6207_v5 = vld [vmem:[%s6195_s3 + $0x18] sm:$0xff]  ;;  %v6210_v6 = vld [vmem:[%s6195_s3 + $0x20] sm:$0xff]  ;;  %v6217_v8 = vmul.f32 %v6185_v0, %v6198_v2  ;;  %v6221_v9 = vmul.f32 %v6185_v0, %v6201_v3  ;;  %v6225_v10 = vmul.f32 %v6190_v1, %v6198_v2 }
  0x1f   : > { %15900 = vst [vmem:[#allocation7_spill] sm:$0xff] %v6204_v4  ;;  %15901 = vst [vmem:[#allocation8_spill] sm:$0xff] %v6207_v5  ;;  %v6213_v7 = vld [vmem:[%s6195_s3 + $0x28] sm:$0xf]  ;;  %v6229_v11 = vmul.f32 %v6190_v1, %v6201_v3  ;;  %v6232_v12 = vld [vmem:[%s6195_s3 + $0x30] sm:$0xff]  ;;  %v6242_v15 = vmul.f32 %v6185_v0, %v6207_v5  ;;  %v6246_v16 = vmul.f32 %v6185_v0, %v6210_v6 }
  0x20   : > { %15902 = vst [vmem:[#allocation9_spill] sm:$0xff] %v6210_v6  ;;  %15903 = vst [vmem:[#allocation10_spill] sm:$0xff] %v6213_v7  ;;  %v6235_v13 = vld [vmem:[%s6195_s3 + $0x38] sm:$0xff]  ;;  %v6238_v14 = vld [vmem:[%s6195_s3 + $0x40] sm:$0xf]  ;;  %v6250_v17 = vmul.f32 %v6190_v1, %v6204_v4  ;;  %v6254_v18 = vmul.f32 %v6190_v1, %v6207_v5  ;;  %v6267_v22 = vmul.f32 %v6185_v0, %v6232_v12 }
  0x21   : > { %15904 = vst [vmem:[#allocation11_spill] sm:$0xff] %v6232_v12  ;;  %15905 = vst [vmem:[#allocation12_spill] sm:$0xff] %v6235_v13  ;;  %v6257_v19 = vld [vmem:[%s6195_s3 + $0x48] sm:$0xff]  ;;  %v6260_v20 = vld [vmem:[%s6195_s3 + $0x50] sm:$0xff]  ;;  %v6271_v23 = vmul.f32 %v6185_v0, %v6235_v13  ;;  %v6275_v24 = vmul.f32 %v6190_v1, %v6210_v6  ;;  %v6279_v25 = vmul.f32 %v6190_v1, %v6213_v7 }
  0x22   : > { %15906 = vst [vmem:[#allocation13_spill] sm:$0xff] %v6238_v14  ;;  %15907 = vst [vmem:[#allocation14_spill] sm:$0xff] %v6257_v19  ;;  %v6263_v21 = vld [vmem:[%s6195_s3 + $0x58] sm:$0xf]  ;;  %v6282_v26 = vld [vmem:[%s6195_s3 + $0x60] sm:$0xff]  ;;  %v6289_v28 = vmul.f32 %v6185_v0, %v6257_v19  ;;  %v6293_v29 = vmul.f32 %v6185_v0, %v6260_v20  ;;  %v6297_v30 = vmul.f32 %v6190_v1, %v6232_v12 }
  0x23   : > { %15908 = vst [vmem:[#allocation15_spill] sm:$0xff] %v6260_v20  ;;  %15909 = vst [vmem:[#allocation16_spill] sm:$0xff] %v6263_v21  ;;  %v6285_v27 = vld [vmem:[%s6195_s3 + $0x68] sm:$0xff]  ;;  %v6301_v31 = vmul.f32 %v6190_v1, %v6235_v13  ;;  %v6304_v32 = vld [vmem:[%s6195_s3 + $0x70] sm:$0xf]  ;;  %v6314_v35 = vmul.f32 %v6185_v0, %v6282_v26  ;;  %v6322_v37 = vmul.f32 %v6190_v1, %v6238_v14 }
  0x24   : > { %15910 = vst [vmem:[#allocation17_spill] sm:$0xff] %v6267_v22  ;;  %15911 = vst [vmem:[#allocation18_spill] sm:$0xff] %v6271_v23  ;;  %v6307_v33 = vld [vmem:[%s6195_s3 + $0x78] sm:$0xff]  ;;  %v6310_v34 = vld [vmem:[%s6195_s3 + $0x80] sm:$0xff]  ;;  %v6318_v36 = vmul.f32 %v6185_v0, %v6285_v27  ;;  %v6326_v38 = vmul.f32 %v6190_v1, %v6257_v19  ;;  %v6347_v44 = vmul.f32 %v6190_v1, %v6260_v20  ;;  %v439_v22 = vrot.slane %v6225_v10, 1 }
  0x25   : > { %15912 = vst [vmem:[#allocation19_spill] sm:$0xff] %v6282_v26  ;;  %15913 = vst [vmem:[#allocation20_spill] sm:$0xff] %v6285_v27  ;;  %v6329_v39 = vld [vmem:[%s6195_s3 + $0x88] sm:$0xf]  ;;  %v6332_v40 = vld [vmem:[%s6195_s3 + $0x90] sm:$0xff]  ;;  %v6339_v42 = vmul.f32 %v6185_v0, %v6307_v33  ;;  %v6343_v43 = vmul.f32 %v6185_v0, %v6310_v34  ;;  %v6351_v45 = vmul.f32 %v6190_v1, %v6263_v21  ;;  %v452_v10 = vrot.slane %v6322_v37, 1 }
  0x26   : > { %15914 = vst [vmem:[#allocation21_spill] sm:$0xff] %v6289_v28  ;;  %15915 = vst [vmem:[#allocation22_spill] sm:$0xff] %v6293_v29  ;;  %v6335_v41 = vld [vmem:[%s6195_s3 + $0x98] sm:$0xff]  ;;  %v6354_v46 = vld [vmem:[%s6195_s3 + $0xa8] sm:$0xff]  ;;  %v6361_v48 = vmul.f32 %v6185_v0, %v6332_v40  ;;  %v6369_v50 = vmul.f32 %v6190_v1, %v6282_v26  ;;  %v6373_v51 = vmul.f32 %v6190_v1, %v6285_v27 }
  0x27   : > { %15916 = vst [vmem:[#allocation23_spill] sm:$0xff] %v6304_v32  ;;  %15917 = vst [vmem:[#allocation24_spill] sm:$0xff] %v6307_v33  ;;  %v6357_v47 = vld [vmem:[%s6195_s3 + $0xb0] sm:$0xff]  ;;  %v6365_v49 = vmul.f32 %v6185_v0, %v6335_v41  ;;  %v6376_v52 = vld [vmem:[%s6195_s3 + $0xa0] sm:$0xf]  ;;  %v6386_v55 = vmul.f32 %v6185_v0, %v6354_v46  ;;  %v6394_v57 = vmul.f32 %v6190_v1, %v6304_v32 }
  0x28   : > { %15918 = vst [vmem:[#allocation25_spill] sm:$0xff] %v6310_v34  ;;  %15919 = vst [vmem:[#allocation26_spill] sm:$0xff] %v6314_v35  ;;  %v6379_v53 = vld [vmem:[%s6195_s3 + $0xc0] sm:$0xff]  ;;  %v6382_v54 = vld [vmem:[%s6195_s3 + $0xc8] sm:$0xff]  ;;  %v6390_v56 = vmul.f32 %v6185_v0, %v6357_v47  ;;  %v6398_v58 = vmul.f32 %v6190_v1, %v6307_v33  ;;  %v6419_v33 = vmul.f32 %v6190_v1, %v6310_v34 }
  0x29   : > { %15920 = vst [vmem:[#allocation27_spill] sm:$0xff] %v6318_v36  ;;  %15921 = vst [vmem:[#allocation28_spill] sm:$0xff] %v6329_v39  ;;  %v6401_v59 = vld [vmem:[%s6195_s3 + $0xb8] sm:$0xf]  ;;  %v6407_v61 = vld [vmem:[%s6195_s3 + $0xe0] sm:$0xff]  ;;  %v6411_v62 = vmul.f32 %v6185_v0, %v6379_v53  ;;  %v6415_v63 = vmul.f32 %v6185_v0, %v6382_v54  ;;  %v6423_v32 = vmul.f32 %v6190_v1, %v6329_v39 }
  0x2a   : > { %15922 = vst [vmem:[#allocation29_spill] sm:$0xff] %v6332_v40  ;;  %15923 = vst [vmem:[#allocation30_spill] sm:$0xff] %v6335_v41  ;;  %v6404_v60 = vld [vmem:[%s6195_s3 + $0xd8] sm:$0xff]  ;;  %v6426_v27 = vld [vmem:[%s6195_s3 + $0xf0] sm:$0xff]  ;;  %v6437_v20 = vmul.f32 %v6185_v0, %v6407_v61  ;;  %v6441_v34 = vmul.f32 %v6190_v1, %v6332_v40  ;;  %v6445_v39 = vmul.f32 %v6190_v1, %v6335_v41  ;;  %v464_v37 = vrot.slane %v6398_v58, 1 }
  0x2b   : > { %15924 = vst [vmem:[#allocation31_spill] sm:$0xff] %v6339_v42  ;;  %15925 = vst [vmem:[#allocation32_spill] sm:$0xff] %v6343_v43  ;;  %v6429_v26 = vld [vmem:[%s6195_s3 + $0xf8] sm:$0xff]  ;;  %v6433_v21 = vmul.f32 %v6185_v0, %v6404_v60  ;;  %v6448_v19 = vld [vmem:[%s6195_s3 + $0xd0] sm:$0xf]  ;;  %v6458_v12 = vmul.f32 %v6185_v0, %v6426_v27  ;;  %v6466_v41 = vmul.f32 %v6190_v1, %v6376_v52 }
  0x2c   : > { %15926 = vst [vmem:[#allocation33_spill] sm:$0xff] %v6354_v46  ;;  %15927 = vst [vmem:[#allocation34_spill] sm:$0xff] %v6357_v47  ;;  %v6451_v14 = vld [vmem:[%s6195_s3 + $0x108] sm:$0xff]  ;;  %v6454_v13 = vld [vmem:[%s6195_s3 + $0x110] sm:$0xff]  ;;  %v6462_v40 = vmul.f32 %v6185_v0, %v6429_v26  ;;  %v6470_v7 = vmul.f32 %v6190_v1, %v6354_v46  ;;  %v6491_v46 = vmul.f32 %v6190_v1, %v6357_v47 }
  0x2d   : > { %15928 = vst [vmem:[#allocation35_spill] sm:$0xff] %v6361_v48  ;;  %15929 = vst [vmem:[#allocation36_spill] sm:$0xff] %v6365_v49  ;;  %v6473_v6 = vld [vmem:[%s6195_s3 + $0xe8] sm:$0xf]  ;;  %v6526_v49 = vld [vmem:[%s6195_s3 + $0x150] sm:$0xff] }
  0x2e   : > { %15930 = vst [vmem:[#allocation37_spill] sm:$0xff] %v6376_v52  ;;  %15931 = vst [vmem:[#allocation38_spill] sm:$0xff] %v6379_v53  ;;  %v6487_v52 = vmul.f32 %v6185_v0, %v6454_v13  ;;  %v6529_v48 = vld [vmem:[%s6195_s3 + $0x158] sm:$0xff]  ;;  %v6548_v43 = vld [vmem:[%s6195_s3 + $0x130] sm:$0xf]  ;;  %v474_v58 = vrot.slane %v6470_v7, 1 }
  0x2f   : > { %15932 = vst [vmem:[#allocation39_spill] sm:$0xff] %v6382_v54  ;;  %15933 = vst [vmem:[#allocation40_spill] sm:$0xff] %v6386_v55  ;;  %v6523_v55 = vld [vmem:[%s6195_s3 + $0x118] sm:$0xf]  ;;  %v6551_v42 = vld [vmem:[%s6195_s3 + $0x168] sm:$0xff] }
  0x30   : > { %15934 = vst [vmem:[#allocation41_spill] sm:$0xff] %v6390_v56  ;;  %15935 = vst [vmem:[#allocation42_spill] sm:$0xff] %v6401_v59  ;;  %v6520_v56 = vmul.f32 %v6190_v1, %v6382_v54  ;;  %v6541_v54 = vmul.f32 %v6190_v1, %v6448_v19  ;;  %v6554_v36 = vld [vmem:[%s6195_s3 + $0x170] sm:$0xff]  ;;  %v6573_v35 = vld [vmem:[%s6195_s3 + $0x148] sm:$0xf]  ;;  %v6577_v29 = vmul.f32 %v6185_v0, %v6551_v42 }
  0x31   : > { %15936 = vst [vmem:[#allocation43_spill] sm:$0xff] %v6404_v60  ;;  %15937 = vst [vmem:[#allocation44_spill] sm:$0xff] %v6407_v61  ;;  %v6595_v28 = vld [vmem:[%s6195_s3 + $0x178] sm:$0xf] }
  0x32   : > { %15938 = vst [vmem:[#allocation45_spill] sm:$0xff] %v6411_v62  ;;  %15939 = vst [vmem:[#allocation46_spill] sm:$0xff] %v6415_v63  ;;  %v6498_v63 = vld [vmem:[%s6195_s3 + $0x100] sm:$0xf]  ;;  %v6501_v62 = vld [vmem:[%s6195_s3 + $0x138] sm:$0xff] }
  0x33   : > { %15940 = vst [vmem:[#allocation47_spill] sm:$0xff] %v6426_v27  ;;  %15941 = vst [vmem:[#allocation48_spill] sm:$0xff] %v6429_v26  ;;  %v6599_v23 = vmul.f32 %v6190_v1, %v6498_v63 }
  0x34   : > { %15942 = vst [vmem:[#allocation49_spill] sm:$0xff] %v6433_v21  ;;  %15943 = vst [vmem:[#allocation50_spill] sm:$0xff] %v6437_v20  ;;  %v6476_v20 = vld [vmem:[%s6195_s3 + $0x120] sm:$0xff]  ;;  %v6495_v21 = vmul.f32 %v6190_v1, %v6401_v59  ;;  %v6516_v59 = vmul.f32 %v6190_v1, %v6379_v53 }
  0x35   : > { %15944 = vst [vmem:[#allocation51_spill] sm:$0xff] %v6448_v19  ;;  %15945 = vst [vmem:[#allocation52_spill] sm:$0xff] %v6451_v14  ;;  %v6566_v19 = vmul.f32 %v6190_v1, %v6407_v61  ;;  %v6589_v61 = vmul.f32 %v6190_v1, %v6429_v26  ;;  %v6611_v26 = vmul.f32 %v6190_v1, %v6523_v55 }
  0x36   : > { %15946 = vst [vmem:[#allocation53_spill] sm:$0xff] %v6454_v13  ;;  %15947 = vst [vmem:[#allocation54_spill] sm:$0xff] %v6458_v12  ;;  %v6479_v12 = vld [vmem:[%s6195_s3 + $0x128] sm:$0xff] }
  0x37   : > { %15948 = vst [vmem:[#allocation55_spill] sm:$0xff] %v6462_v40  ;;  %15949 = vst [vmem:[#allocation56_spill] sm:$0xff] %v6473_v6  ;;  %v6483_v40 = vmul.f32 %v6185_v0, %v6451_v14  ;;  %v6512_v47 = vmul.f32 %v6185_v0, %v6479_v12 }
  0x38   : > { %15950 = vst [vmem:[#allocation57_spill] sm:$0xff] %v6476_v20  ;;  %15951 = vst [vmem:[#allocation58_spill] sm:$0xff] %v6479_v12 }
  0x39   : > { %15952 = vst [vmem:[#allocation59_spill] sm:$0xff] %v6483_v40  ;;  %15953 = vst [vmem:[#allocation60_spill] sm:$0xff] %v6487_v52  ;;  %v6504_v40 = vld [vmem:[%s6195_s3 + $0x140] sm:$0xff]  ;;  %v6508_v52 = vmul.f32 %v6185_v0, %v6476_v20 }
  0x3a   : > { %15954 = vst [vmem:[#allocation61_spill] sm:$0xff] %v6498_v63  ;;  %15955 = vst [vmem:[#allocation62_spill] sm:$0xff] %v6501_v62  ;;  %v6537_v53 = vmul.f32 %v6185_v0, %v6504_v40  ;;  %v6620_v63 = vmul.f32 %v6190_v1, %v6476_v20  ;;  %v6640_v20 = vmul.f32 %v6190_v1, %v6573_v35 }
  0x3b   : > { %15956 = vst [vmem:[#allocation63_spill] sm:$0xff] %v6504_v40  ;;  %15957 = vst [vmem:[#allocation64_spill] sm:$0xff] %v6508_v52  ;;  %v6533_v52 = vmul.f32 %v6185_v0, %v6501_v62 }
  0x3c   : > { %15958 = vst [vmem:[#allocation65_spill] sm:$0xff] %v6512_v47  ;;  %15959 = vst [vmem:[#allocation66_spill] sm:$0xff] %v6523_v55  ;;  %v6545_v47 = vmul.f32 %v6190_v1, %v6404_v60  ;;  %v6570_v60 = vmul.f32 %v6190_v1, %v6473_v6  ;;  %v6592_v6 = vld [vmem:[%s6195_s3 + $0x160] sm:$0xf]  ;;  %v6632_v55 = vmul.f32 %v6190_v1, %v6501_v62 }
  0x3d   : > { %15960 = vst [vmem:[#allocation67_spill] sm:$0xff] %v6526_v49  ;;  %15961 = vst [vmem:[#allocation68_spill] sm:$0xff] %v6529_v48  ;;  %v6652_v62 = vmul.f32 %v6190_v1, %v6592_v6 }
  0x3e   : > { %15962 = vst [vmem:[#allocation69_spill] sm:$0xff] %v6533_v52  ;;  %15963 = vst [vmem:[#allocation70_spill] sm:$0xff] %v6537_v53  ;;  %v6558_v52 = vmul.f32 %v6185_v0, %v6526_v49  ;;  %v6562_v53 = vmul.f32 %v6185_v0, %v6529_v48  ;;  %v484_v7 = vrot.slane %v6545_v47, 1 }
  0x3f   : > { %15964 = vst [vmem:[#allocation71_spill] sm:$0xff] %v6548_v43  ;;  %15965 = vst [vmem:[#allocation72_spill] sm:$0xff] %v6551_v42 }
  0x40   : > { %15966 = vst [vmem:[#allocation73_spill] sm:$0xff] %v6554_v36  ;;  %15967 = vst [vmem:[#allocation74_spill] sm:$0xff] %v6558_v52  ;;  %v6581_v52 = vmul.f32 %v6185_v0, %v6554_v36  ;;  %v6603_v0 = vmul.f32 %v6190_v1, %v6451_v14  ;;  %v6624_v14 = vmul.f32 %v6190_v1, %v6479_v12 }
  0x41   : > { %15968 = vst [vmem:[#allocation75_spill] sm:$0xff] %v6562_v53  ;;  %15969 = vst [vmem:[#allocation76_spill] sm:$0xff] %v6573_v35  ;;  %v6585_v53 = vmul.f32 %v6190_v1, %v6426_v27  ;;  %v6607_v27 = vmul.f32 %v6190_v1, %v6454_v13  ;;  %v6628_v13 = vmul.f32 %v6190_v1, %v6548_v43 }
  0x42   : > { %15970 = vst [vmem:[#allocation77_spill] sm:$0xff] %v6577_v29  ;;  %15971 = vst [vmem:[#allocation78_spill] sm:$0xff] %v6581_v52  ;;  %v6616_v52 = vld [vmem:[%s15337_s1 + $0x2] ss:$0 sm:$0xff]  ;;  %v6636_v29 = vmul.f32 %v6190_v1, %v6504_v40  ;;  %v6644_v12 = vmul.f32 %v6190_v1, %v6526_v49  ;;  %v6648_v43 = vmul.f32 %v6190_v1, %v6529_v48 }
  0x43   : > { %15972 = vst [vmem:[#allocation79_spill] sm:$0xff] %v6592_v6  ;;  %15973 = vst [vmem:[#allocation80_spill] sm:$0xff] %v6595_v28  ;;  %v6656_v40 = vmul.f32 %v6190_v1, %v6551_v42  ;;  %v6660_v35 = vmul.f32 %v6190_v1, %v6554_v36  ;;  %v6664_v49 = vmul.f32 %v6190_v1, %v6595_v28  ;;  %v440_v1 = vrot.slane %v6229_v11, 1 }
  0x44   : > { %v6668_v48 = vmul.f32 %v6616_v52, %v6198_v2  ;;  %v6672_v6 = vmul.f32 %v6616_v52, %v6201_v3  ;;  %v6676_v42 = vmul.f32 %v6616_v52, %v6204_v4  ;;  %v6680_v36 = vmul.f32 %v6616_v52, %v6207_v5 }
  0x45   : > { %v442_v28 = vrot.slane %v6250_v17, 1  ;;  %v444_v2 = vrot.slane %v6254_v18, 1  ;;  %v447_v3 = vrot.slane %v6279_v25, 1  ;;  %v450_v4 = vrot.slane %v6301_v31, 1 }
  0x46   : > { %15974 = vst [vmem:[#allocation81_spill] sm:$0xff] %v6668_v48  ;;  %15975 = vst [vmem:[#allocation82_spill] sm:$0xff] %v6672_v6  ;;  %v445_v48 = vrot.slane %v6275_v24, 1  ;;  %v449_v6 = vrot.slane %v6297_v30, 1  ;;  %v454_v11 = vrot.slane %v6326_v38, 1  ;;  %v455_v25 = vrot.slane %v6347_v44, 1 }
  0x47   : > { %15976 = vst [vmem:[#allocation83_spill] sm:$0xff] %v6676_v42  ;;  %v6691_v42 = vsel %vm438_vm0, %v439_v22, %v440_v1  ;;  %v6694_v5 = vsel %vm438_vm0, %v440_v1, %v442_v28  ;;  %v6709_v22 = vsel %vm438_vm0, %v450_v4, %v452_v10  ;;  %v457_v28 = vrot.slane %v6351_v45, 1 }
  0x48   : > { %v6699_v17 = vsel %vm438_vm0, %v444_v2, %v445_v48  ;;  %v6702_v18 = vsel %vm438_vm0, %v445_v48, %v447_v3  ;;  %v6705_v24 = vsel %vm438_vm0, %v449_v6, %v450_v4  ;;  %v459_v30 = vrot.slane %v6369_v50, 1 }
  0x49   : > { %v460_v31 = vrot.slane %v6373_v51, 1  ;;  %v6715_v2 = vsel %vm438_vm0, %v454_v11, %v455_v25  ;;  %v462_v3 = vrot.slane %v6394_v57, 1  ;;  %v465_v6 = vrot.slane %v6419_v33, 1 }
  0x4a   : > { %v6721_v38 = vsel %vm438_vm0, %v455_v25, %v457_v28  ;;  %v467_v44 = vrot.slane %v6423_v32, 1  ;;  %v469_v45 = vrot.slane %v6441_v34, 1  ;;  %v470_v51 = vrot.slane %v6445_v39, 1 }
  0x4b   : > { %v6724_v4 = vsel %vm438_vm0, %v459_v30, %v460_v31  ;;  %v463_v48 = vsel %vm438_vm0, %v460_v31, %v462_v3  ;;  %v466_v50 = vsel %vm438_vm0, %v464_v37, %v465_v6  ;;  %v472_v57 = vrot.slane %v6466_v41, 1 }
  0x4c   : > { %v468_v33 = vsel %vm438_vm0, %v465_v6, %v467_v44  ;;  %v475_v1 = vrot.slane %v6491_v46, 1  ;;  %v477_v10 = vrot.slane %v6495_v21, 1  ;;  %v471_v32 = vsel %vm438_vm0, %v469_v45, %v470_v51 }
  0x4d   : > { %v473_v34 = vsel %vm438_vm0, %v470_v51, %v472_v57  ;;  %v479_v11 = vrot.slane %v6516_v59, 1  ;;  %v480_v25 = vrot.slane %v6520_v56, 1  ;;  %v482_v28 = vrot.slane %v6541_v54, 1 }
  0x4e   : > { %v476_v39 = vsel %vm438_vm0, %v474_v58, %v475_v1  ;;  %v478_v41 = vsel %vm438_vm0, %v475_v1, %v477_v10  ;;  %v485_v21 = vrot.slane %v6566_v19, 1  ;;  %v487_v30 = vrot.slane %v6570_v60, 1 }
  0x4f   : > { %v481_v46 = vsel %vm438_vm0, %v479_v11, %v480_v25  ;;  %v489_v31 = vrot.slane %v6585_v53, 1  ;;  %v483_v59 = vsel %vm438_vm0, %v480_v25, %v482_v28  ;;  %v490_v56 = vrot.slane %v6589_v61, 1  ;;  %v15977_v28 = vld [vmem:[#allocation17_spill] sm:$0xff] }
  0x50   : > { %v492_v3 = vrot.slane %v6599_v23, 1  ;;  %v494_v37 = vrot.slane %v6603_v0, 1  ;;  %v486_v54 = vsel %vm438_vm0, %v484_v7, %v485_v21  ;;  %v488_v47 = vsel %vm438_vm0, %v485_v21, %v487_v30  ;;  %v15983_v21 = vld [vmem:[#allocation22_spill] sm:$0xff] }
  0x51   : > { %v495_v6 = vrot.slane %v6607_v27, 1  ;;  %v497_v19 = vrot.slane %v6611_v26, 1  ;;  %v491_v60 = vsel %vm438_vm0, %v489_v31, %v490_v56  ;;  %v499_v44 = vrot.slane %v6620_v63, 1 }
  0x52   : > { %v493_v53 = vsel %vm438_vm0, %v490_v56, %v492_v3  ;;  %v500_v61 = vrot.slane %v6624_v14, 1  ;;  %v502_v45 = vrot.slane %v6628_v13, 1  ;;  %v504_v51 = vrot.slane %v6632_v55, 1  ;;  %v15993_v3 = vld [vmem:[#allocation35_spill] sm:$0xff] }
  0x53   : > { %v496_v23 = vsel %vm438_vm0, %v494_v37, %v495_v6  ;;  %v498_v0 = vsel %vm438_vm0, %v495_v6, %v497_v19  ;;  %v505_v26 = vrot.slane %v6636_v29, 1  ;;  %v507_v57 = vrot.slane %v6640_v20, 1  ;;  %v15995_v37 = vld [vmem:[#allocation36_spill] sm:$0xff] }
  0x54   : > { %v501_v27 = vsel %vm438_vm0, %v499_v44, %v500_v61  ;;  %v509_v58 = vrot.slane %v6644_v12, 1  ;;  %v503_v63 = vsel %vm438_vm0, %v500_v61, %v502_v45  ;;  %v510_v14 = vrot.slane %v6648_v43, 1 }
  0x55   : > { %v512_v1 = vrot.slane %v6652_v62, 1  ;;  %v514_v10 = vrot.slane %v6656_v40, 1  ;;  %v506_v13 = vsel %vm438_vm0, %v504_v51, %v505_v26  ;;  %v508_v55 = vsel %vm438_vm0, %v505_v26, %v507_v57 }
  0x56   : > { %v515_v11 = vrot.slane %v6660_v35, 1  ;;  %v517_v29 = vrot.slane %v6664_v49, 1  ;;  %v511_v20 = vsel %vm438_vm0, %v509_v58, %v510_v14  ;;  %v6780_v25 = vadd.f32 %v6691_v42, %v6217_v8  ;;  %v15979_v42 = vld [vmem:[#allocation18_spill] sm:$0xff] }
  0x57   : > { %v513_v12 = vsel %vm438_vm0, %v510_v14, %v512_v1  ;;  %v6784_v43 = vadd.f32 %v6694_v5, %v6221_v9  ;;  %v6790_v35 = vadd.f32 %v6699_v17, %v6242_v15  ;;  %v6794_v49 = vadd.f32 %v6702_v18, %v6246_v16  ;;  %v15981_v9 = vld [vmem:[#allocation21_spill] sm:$0xff]  ;;  %v15985_v17 = vld [vmem:[#allocation26_spill] sm:$0xff]  ;;  %v15987_v18 = vld [vmem:[#allocation27_spill] sm:$0xff] }
  0x58   : > { %v516_v40 = vsel %vm438_vm0, %v514_v10, %v515_v11  ;;  %v518_v62 = vsel %vm438_vm0, %v515_v11, %v517_v29  ;;  %v6798_v8 = vadd.f32 %v6705_v24, %v15977_v28  ;;  %v6802_v5 = vadd.f32 %v6709_v22, %v15979_v42  ;;  %v15989_v24 = vld [vmem:[#allocation31_spill] sm:$0xff]  ;;  %v15991_v22 = vld [vmem:[#allocation32_spill] sm:$0xff] }
  0x59   : > { %v6806_v7 = vadd.f32 %v6715_v2, %v15981_v9  ;;  %v6810_v15 = vadd.f32 %v6721_v38, %v15983_v21  ;;  %v6814_v16 = vadd.f32 %v6724_v4, %v15985_v17  ;;  %v6817_v30 = vadd.f32 %v463_v48, %v15987_v18  ;;  %v15997_v38 = vld [vmem:[#allocation40_spill] sm:$0xff]  ;;  %v15999_v4 = vld [vmem:[#allocation41_spill] sm:$0xff] }
  0x5a   : > { %15978 = vst [vmem:[#allocation17_spill] sm:$0xff] %v6798_v8  ;;  %15980 = vst [vmem:[#allocation18_spill] sm:$0xff] %v6802_v5  ;;  %v6820_v31 = vadd.f32 %v466_v50, %v15989_v24  ;;  %v6823_v56 = vadd.f32 %v468_v33, %v15991_v22  ;;  %v6826_v2 = vadd.f32 %v471_v32, %v15993_v3  ;;  %v16001_v48 = vld [vmem:[#allocation45_spill] sm:$0xff]  ;;  %v16003_v50 = vld [vmem:[#allocation46_spill] sm:$0xff] }
  0x5b   : > { %15982 = vst [vmem:[#allocation21_spill] sm:$0xff] %v6806_v7  ;;  %15984 = vst [vmem:[#allocation22_spill] sm:$0xff] %v6810_v15  ;;  %v6829_v6 = vadd.f32 %v473_v34, %v15995_v37  ;;  %v6832_v19 = vadd.f32 %v476_v39, %v15997_v38  ;;  %v6835_v44 = vadd.f32 %v478_v41, %v15999_v4  ;;  %v16005_v33 = vld [vmem:[#allocation49_spill] sm:$0xff]  ;;  %v16007_v32 = vld [vmem:[#allocation50_spill] sm:$0xff] }
  0x5c   : > { %15986 = vst [vmem:[#allocation26_spill] sm:$0xff] %v6814_v16  ;;  %15988 = vst [vmem:[#allocation27_spill] sm:$0xff] %v6817_v30  ;;  %v6838_v61 = vadd.f32 %v481_v46, %v16001_v48  ;;  %v6841_v45 = vadd.f32 %v483_v59, %v16003_v50  ;;  %v6844_v51 = vadd.f32 %v486_v54, %v16005_v33  ;;  %v16009_v34 = vld [vmem:[#allocation54_spill] sm:$0xff]  ;;  %v16011_v39 = vld [vmem:[#allocation55_spill] sm:$0xff] }
  0x5d   : > { %15990 = vst [vmem:[#allocation31_spill] sm:$0xff] %v6820_v31  ;;  %15992 = vst [vmem:[#allocation32_spill] sm:$0xff] %v6823_v56  ;;  %v6847_v26 = vadd.f32 %v488_v47, %v16007_v32  ;;  %v6850_v57 = vadd.f32 %v491_v60, %v16009_v34  ;;  %v6853_v58 = vadd.f32 %v493_v53, %v16011_v39  ;;  %v16013_v41 = vld [vmem:[#allocation59_spill] sm:$0xff]  ;;  %v16015_v46 = vld [vmem:[#allocation60_spill] sm:$0xff] }
  0x5e   : > { %15994 = vst [vmem:[#allocation35_spill] sm:$0xff] %v6826_v2  ;;  %15996 = vst [vmem:[#allocation36_spill] sm:$0xff] %v6829_v6  ;;  %v6856_v14 = vadd.f32 %v496_v23, %v16013_v41  ;;  %v6859_v1 = vadd.f32 %v498_v0, %v16015_v46  ;;  %v16017_v59 = vld [vmem:[#allocation64_spill] sm:$0xff]  ;;  %v16019_v54 = vld [vmem:[#allocation65_spill] sm:$0xff] }
  0x5f   : > { %15998 = vst [vmem:[#allocation40_spill] sm:$0xff] %v6832_v19  ;;  %16000 = vst [vmem:[#allocation41_spill] sm:$0xff] %v6835_v44  ;;  %v6862_v10 = vadd.f32 %v501_v27, %v16017_v59  ;;  %v6865_v11 = vadd.f32 %v503_v63, %v16019_v54  ;;  %v16021_v47 = vld [vmem:[#allocation69_spill] sm:$0xff]  ;;  %v16023_v60 = vld [vmem:[#allocation70_spill] sm:$0xff] }
  0x60   : > { %16002 = vst [vmem:[#allocation45_spill] sm:$0xff] %v6838_v61  ;;  %16004 = vst [vmem:[#allocation46_spill] sm:$0xff] %v6841_v45  ;;  %v6868_v29 = vadd.f32 %v506_v13, %v16021_v47  ;;  %v6871_v28 = vadd.f32 %v508_v55, %v16023_v60  ;;  %v16025_v53 = vld [vmem:[#allocation74_spill] sm:$0xff]  ;;  %v16027_v23 = vld [vmem:[#allocation75_spill] sm:$0xff] }
  0x61   : > { %16006 = vst [vmem:[#allocation49_spill] sm:$0xff] %v6844_v51  ;;  %16008 = vst [vmem:[#allocation50_spill] sm:$0xff] %v6847_v26  ;;  %v6874_v42 = vadd.f32 %v511_v20, %v16025_v53  ;;  %v6877_v9 = vadd.f32 %v513_v12, %v16027_v23  ;;  %v16029_v0 = vld [vmem:[#allocation77_spill] sm:$0xff]  ;;  %v16031_v27 = vld [vmem:[#allocation78_spill] sm:$0xff] }
  0x62   : > { %16010 = vst [vmem:[#allocation54_spill] sm:$0xff] %v6850_v57  ;;  %16012 = vst [vmem:[#allocation55_spill] sm:$0xff] %v6853_v58  ;;  %v6880_v21 = vadd.f32 %v516_v40, %v16029_v0  ;;  %v6883_v17 = vadd.f32 %v518_v62, %v16031_v27  ;;  %v16033_v63 = vld [vmem:[#allocation9_spill] sm:$0xff]  ;;  %v16034_v13 = vld [vmem:[#allocation10_spill] sm:$0xff] }
  0x63   : > { %16014 = vst [vmem:[#allocation59_spill] sm:$0xff] %v6856_v14  ;;  %16016 = vst [vmem:[#allocation60_spill] sm:$0xff] %v6859_v1  ;;  %v593_v18 = vmul.f32 %v6616_v52, %v16033_v63  ;;  %v594_v24 = vmul.f32 %v6616_v52, %v16034_v13  ;;  %v16035_v55 = vld [vmem:[#allocation11_spill] sm:$0xff]  ;;  %v16036_v20 = vld [vmem:[#allocation12_spill] sm:$0xff] }
  0x64   : > { %16018 = vst [vmem:[#allocation64_spill] sm:$0xff] %v6862_v10  ;;  %16020 = vst [vmem:[#allocation65_spill] sm:$0xff] %v6865_v11  ;;  %v595_v22 = vmul.f32 %v6616_v52, %v16035_v55  ;;  %v596_v3 = vmul.f32 %v6616_v52, %v16036_v20  ;;  %v16037_v12 = vld [vmem:[#allocation13_spill] sm:$0xff]  ;;  %v16038_v40 = vld [vmem:[#allocation14_spill] sm:$0xff] }
  0x65   : > { %16022 = vst [vmem:[#allocation69_spill] sm:$0xff] %v6868_v29  ;;  %16024 = vst [vmem:[#allocation70_spill] sm:$0xff] %v6871_v28  ;;  %v597_v37 = vmul.f32 %v6616_v52, %v16037_v12  ;;  %v598_v38 = vmul.f32 %v6616_v52, %v16038_v40  ;;  %v16039_v62 = vld [vmem:[#allocation15_spill] sm:$0xff]  ;;  %v16040_v48 = vld [vmem:[#allocation16_spill] sm:$0xff]  ;;  %v692_v15 = vrot.slane %v593_v18, 2  ;;  %v694_v7 = vrot.slane %v594_v24, 2 }
  0x66   : > { %16026 = vst [vmem:[#allocation74_spill] sm:$0xff] %v6874_v42  ;;  %16028 = vst [vmem:[#allocation75_spill] sm:$0xff] %v6877_v9  ;;  %v6899_v4 = vmul.f32 %v6616_v52, %v16039_v62  ;;  %v6903_v50 = vmul.f32 %v6616_v52, %v16040_v48  ;;  %v16041_v33 = vld [vmem:[#allocation19_spill] sm:$0xff]  ;;  %v16042_v34 = vld [vmem:[#allocation20_spill] sm:$0xff]  ;;  %v697_v5 = vrot.slane %v596_v3, 2 }
  0x67   : > { %16030 = vst [vmem:[#allocation77_spill] sm:$0xff] %v6880_v21  ;;  %16032 = vst [vmem:[#allocation78_spill] sm:$0xff] %v6883_v17  ;;  %v6907_v32 = vmul.f32 %v6616_v52, %v16041_v33  ;;  %v6911_v39 = vmul.f32 %v6616_v52, %v16042_v34  ;;  %v16043_v41 = vld [vmem:[#allocation23_spill] sm:$0xff]  ;;  %v16044_v59 = vld [vmem:[#allocation24_spill] sm:$0xff] }
  0x68   : > { %v6915_v46 = vmul.f32 %v6616_v52, %v16043_v41  ;;  %v6919_v54 = vmul.f32 %v6616_v52, %v16044_v59  ;;  %v16045_v47 = vld [vmem:[#allocation25_spill] sm:$0xff]  ;;  %v16046_v53 = vld [vmem:[#allocation28_spill] sm:$0xff]  ;;  %v16048_v34 = vld [vmem:[#allocation30_spill] sm:$0xff] }
  0x69   : > { %v6923_v60 = vmul.f32 %v6616_v52, %v16045_v47  ;;  %v6927_v23 = vmul.f32 %v6616_v52, %v16046_v53  ;;  %v16047_v0 = vld [vmem:[#allocation29_spill] sm:$0xff]  ;;  %v6935_v41 = vmul.f32 %v6616_v52, %v16048_v34  ;;  %v16051_v62 = vld [vmem:[#allocation34_spill] sm:$0xff]  ;;  %v16054_v20 = vld [vmem:[#allocation39_spill] sm:$0xff] }
  0x6a   : > { %v6931_v27 = vmul.f32 %v6616_v52, %v16047_v0  ;;  %v16049_v33 = vld [vmem:[#allocation37_spill] sm:$0xff]  ;;  %v6947_v53 = vmul.f32 %v6616_v52, %v16051_v62  ;;  %v16052_v40 = vld [vmem:[#allocation42_spill] sm:$0xff]  ;;  %v16055_v55 = vld [vmem:[#allocation51_spill] sm:$0xff] }
  0x6b   : > { %v6939_v59 = vmul.f32 %v6616_v52, %v16049_v33  ;;  %v16050_v48 = vld [vmem:[#allocation33_spill] sm:$0xff]  ;;  %v6951_v0 = vmul.f32 %v6616_v52, %v16052_v40  ;;  %v16053_v12 = vld [vmem:[#allocation38_spill] sm:$0xff]  ;;  %v6959_v33 = vmul.f32 %v6616_v52, %v16054_v20  ;;  %v16056_v13 = vld [vmem:[#allocation43_spill] sm:$0xff] }
  0x6c   : > { %v6943_v47 = vmul.f32 %v6616_v52, %v16050_v48  ;;  %v6955_v34 = vmul.f32 %v6616_v52, %v16053_v12  ;;  %v6963_v48 = vmul.f32 %v6616_v52, %v16055_v55  ;;  %v6967_v62 = vmul.f32 %v6616_v52, %v16056_v13  ;;  %v16057_v63 = vld [vmem:[#allocation44_spill] sm:$0xff]  ;;  %v16059_v21 = vld [vmem:[#allocation47_spill] sm:$0xff]  ;;  %v16061_v42 = vld [vmem:[#allocation61_spill] sm:$0xff] }
  0x6d   : > { %v6971_v40 = vmul.f32 %v6616_v52, %v16057_v63  ;;  %v16058_v17 = vld [vmem:[#allocation56_spill] sm:$0xff]  ;;  %v6979_v20 = vmul.f32 %v6616_v52, %v16059_v21  ;;  %v6987_v13 = vmul.f32 %v6616_v52, %v16061_v42  ;;  %v16063_v29 = vld [vmem:[#allocation53_spill] sm:$0xff]  ;;  %v16064_v11 = vld [vmem:[#allocation66_spill] sm:$0xff]  ;;  %v716_v3 = vrot.slane %v6931_v27, 2 }
  0x6e   : > { %v6975_v12 = vmul.f32 %v6616_v52, %v16058_v17  ;;  %v16060_v9 = vld [vmem:[#allocation48_spill] sm:$0xff]  ;;  %v6995_v17 = vmul.f32 %v6616_v52, %v16063_v29  ;;  %v6999_v21 = vmul.f32 %v6616_v52, %v16064_v11  ;;  %v16065_v10 = vld [vmem:[#allocation57_spill] sm:$0xff]  ;;  %v16066_v1 = vld [vmem:[#allocation58_spill] sm:$0xff]  ;;  %v727_v27 = vrot.slane %v6959_v33, 2 }
  0x6f   : > { %v6983_v55 = vmul.f32 %v6616_v52, %v16060_v9  ;;  %v16062_v28 = vld [vmem:[#allocation52_spill] sm:$0xff]  ;;  %v7003_v9 = vmul.f32 %v6616_v52, %v16065_v10  ;;  %v7007_v42 = vmul.f32 %v6616_v52, %v16066_v1  ;;  %v16067_v14 = vld [vmem:[#allocation71_spill] sm:$0xff]  ;;  %v16068_v58 = vld [vmem:[#allocation62_spill] sm:$0xff] }
  0x70   : > { %v6991_v63 = vmul.f32 %v6616_v52, %v16062_v28  ;;  %v7011_v28 = vmul.f32 %v6616_v52, %v16067_v14  ;;  %v7015_v29 = vmul.f32 %v6616_v52, %v16068_v58  ;;  %v16069_v57 = vld [vmem:[#allocation63_spill] sm:$0xff]  ;;  %v16070_v26 = vld [vmem:[#allocation76_spill] sm:$0xff]  ;;  %v16075_v19 = vld [vmem:[#allocation73_spill] sm:$0xff] }
  0x71   : > { %v7019_v11 = vmul.f32 %v6616_v52, %v16069_v57  ;;  %v7023_v10 = vmul.f32 %v6616_v52, %v16070_v26  ;;  %v16071_v51 = vld [vmem:[#allocation67_spill] sm:$0xff]  ;;  %v16072_v45 = vld [vmem:[#allocation68_spill] sm:$0xff]  ;;  %v7043_v26 = vmul.f32 %v6616_v52, %v16075_v19  ;;  %v16077_v2 = vld [vmem:[#allocation81_spill] sm:$0xff]  ;;  %v737_v33 = vrot.slane %v6983_v55, 2 }
  0x72   : > { %v7027_v1 = vmul.f32 %v6616_v52, %v16071_v51  ;;  %v7031_v14 = vmul.f32 %v6616_v52, %v16072_v45  ;;  %v16073_v61 = vld [vmem:[#allocation79_spill] sm:$0xff]  ;;  %v16074_v44 = vld [vmem:[#allocation72_spill] sm:$0xff]  ;;  %v686_v56 = vrot.slane %v16077_v2, 2  ;;  %v16078_v45 = vld [vmem:[#allocation82_spill] sm:$0xff]  ;;  %v747_v55 = vrot.slane %v7007_v42, 2 }
  0x73   : > { %v7035_v58 = vmul.f32 %v6616_v52, %v16073_v61  ;;  %v7039_v57 = vmul.f32 %v6616_v52, %v16074_v44  ;;  %v16076_v6 = vld [vmem:[#allocation80_spill] sm:$0xff]  ;;  %v687_v31 = vrot.slane %v16078_v45, 2  ;;  %v16079_v30 = vld [vmem:[#allocation83_spill] sm:$0xff]  ;;  %v691_v61 = vrot.slane %v6680_v36, 2 }
  0x74   : > { %v7047_v51 = vmul.f32 %v6616_v52, %v16076_v6  ;;  %v689_v16 = vrot.slane %v16079_v30, 2  ;;  %v696_v44 = vrot.slane %v595_v22, 2  ;;  %v699_v52 = vrot.slane %v597_v37, 2 }
  0x75   : > { %v7054_v8 = vsel %vm685_vm1, %v686_v56, %v687_v31  ;;  %v701_v6 = vrot.slane %v598_v38, 2  ;;  %v7060_v2 = vsel %vm685_vm1, %v691_v61, %v692_v15  ;;  %v7063_v45 = vsel %vm685_vm1, %v692_v15, %v694_v7 }
  0x76   : > { %v7057_v19 = vsel %vm685_vm1, %v687_v31, %v689_v16  ;;  %v7066_v36 = vsel %vm685_vm1, %v696_v44, %v697_v5  ;;  %v702_v30 = vrot.slane %v6899_v4, 2  ;;  %v7070_v18 = vsel %vm685_vm1, %v697_v5, %v699_v52 }
  0x77   : > { %v704_v56 = vrot.slane %v6903_v50, 2  ;;  %v706_v16 = vrot.slane %v6907_v32, 2  ;;  %v707_v31 = vrot.slane %v6911_v39, 2  ;;  %v709_v7 = vrot.slane %v6915_v46, 2 }
  0x78   : > { %v7076_v61 = vsel %vm685_vm1, %v701_v6, %v702_v30  ;;  %v711_v15 = vrot.slane %v6919_v54, 2  ;;  %v712_v44 = vrot.slane %v6923_v60, 2  ;;  %v714_v22 = vrot.slane %v6927_v23, 2 }
  0x79   : > { %v7082_v24 = vsel %vm685_vm1, %v702_v30, %v704_v56  ;;  %v7085_v5 = vsel %vm685_vm1, %v706_v16, %v707_v31  ;;  %v710_v37 = vsel %vm685_vm1, %v707_v31, %v709_v7  ;;  %v717_v38 = vrot.slane %v6935_v41, 2 }
  0x7a   : > { %v713_v6 = vsel %vm685_vm1, %v711_v15, %v712_v44  ;;  %v719_v4 = vrot.slane %v6939_v59, 2  ;;  %v715_v50 = vsel %vm685_vm1, %v712_v44, %v714_v22  ;;  %v721_v32 = vrot.slane %v6943_v47, 2 }
  0x7b   : > { %v722_v39 = vrot.slane %v6947_v53, 2  ;;  %v724_v46 = vrot.slane %v6951_v0, 2  ;;  %v718_v54 = vsel %vm685_vm1, %v716_v3, %v717_v38  ;;  %v726_v23 = vrot.slane %v6955_v34, 2 }
  0x7c   : > { %v720_v60 = vsel %vm685_vm1, %v717_v38, %v719_v4  ;;  %v729_v52 = vrot.slane %v6963_v48, 2  ;;  %v731_v47 = vrot.slane %v6967_v62, 2  ;;  %v732_v0 = vrot.slane %v6971_v40, 2 }
  0x7d   : > { %v723_v41 = vsel %vm685_vm1, %v721_v32, %v722_v39  ;;  %v725_v59 = vsel %vm685_vm1, %v722_v39, %v724_v46  ;;  %v728_v53 = vsel %vm685_vm1, %v726_v23, %v727_v27  ;;  %v734_v30 = vrot.slane %v6975_v12, 2  ;;  %v16083_v23 = vld [vmem:[#allocation17_spill] sm:$0xff] }
  0x7e   : > { %v736_v56 = vrot.slane %v6979_v20, 2  ;;  %v730_v34 = vsel %vm685_vm1, %v727_v27, %v729_v52  ;;  %v739_v16 = vrot.slane %v6987_v13, 2  ;;  %v741_v31 = vrot.slane %v6991_v63, 2  ;;  %v16089_v52 = vld [vmem:[#allocation22_spill] sm:$0xff] }
  0x7f   : > { %v733_v48 = vsel %vm685_vm1, %v731_v47, %v732_v0  ;;  %v735_v62 = vsel %vm685_vm1, %v732_v0, %v734_v30  ;;  %v742_v7 = vrot.slane %v6995_v17, 2  ;;  %v744_v40 = vrot.slane %v6999_v21, 2 }
  0x80   : > { %v738_v12 = vsel %vm685_vm1, %v736_v56, %v737_v33  ;;  %v740_v20 = vsel %vm685_vm1, %v737_v33, %v739_v16  ;;  %v746_v15 = vrot.slane %v7003_v9, 2  ;;  %v749_v44 = vrot.slane %v7011_v28, 2  ;;  %v16099_v56 = vld [vmem:[#allocation35_spill] sm:$0xff]  ;;  %v16101_v33 = vld [vmem:[#allocation36_spill] sm:$0xff] }
  0x81   : > { %v743_v13 = vsel %vm685_vm1, %v741_v31, %v742_v7  ;;  %v745_v63 = vsel %vm685_vm1, %v742_v7, %v744_v40  ;;  %v751_v22 = vrot.slane %v7015_v29, 2  ;;  %v752_v21 = vrot.slane %v7019_v11, 2 }
  0x82   : > { %v748_v17 = vsel %vm685_vm1, %v746_v15, %v747_v55  ;;  %v754_v3 = vrot.slane %v7023_v10, 2  ;;  %v756_v38 = vrot.slane %v7027_v1, 2  ;;  %v750_v9 = vsel %vm685_vm1, %v747_v55, %v749_v44 }
  0x83   : > { %v757_v42 = vrot.slane %v7031_v14, 2  ;;  %v759_v4 = vrot.slane %v7035_v58, 2  ;;  %v761_v32 = vrot.slane %v7039_v57, 2  ;;  %v753_v28 = vsel %vm685_vm1, %v751_v22, %v752_v21 }
  0x84   : > { %v755_v29 = vsel %vm685_vm1, %v752_v21, %v754_v3  ;;  %v762_v39 = vrot.slane %v7043_v26, 2  ;;  %v764_v11 = vrot.slane %v7047_v51, 2  ;;  %v7141_v46 = vadd.f32 %v7054_v8, %v6780_v25  ;;  %v16085_v8 = vld [vmem:[#allocation18_spill] sm:$0xff] }
  0x85   : > { %v758_v10 = vsel %vm685_vm1, %v756_v38, %v757_v42  ;;  %v760_v1 = vsel %vm685_vm1, %v757_v42, %v759_v4  ;;  %v7145_v58 = vadd.f32 %v7057_v19, %v6784_v43  ;;  %v7151_v26 = vadd.f32 %v7060_v2, %v6790_v35  ;;  %v16087_v19 = vld [vmem:[#allocation21_spill] sm:$0xff]  ;;  %v16091_v2 = vld [vmem:[#allocation26_spill] sm:$0xff] }
  0x86   : > { %v763_v57 = vsel %vm685_vm1, %v761_v32, %v762_v39  ;;  %v765_v14 = vsel %vm685_vm1, %v762_v39, %v764_v11  ;;  %v7155_v51 = vadd.f32 %v7063_v45, %v6794_v49  ;;  %v7159_v25 = vadd.f32 %v7066_v36, %v16083_v23  ;;  %v16093_v45 = vld [vmem:[#allocation27_spill] sm:$0xff]  ;;  %v16127_v32 = vld [vmem:[#allocation69_spill] sm:$0xff] }
  0x87   : > { %16080 = vst [vmem:[#allocation81_spill] sm:$0xff] %v7145_v58  ;;  %16081 = vst [vmem:[#allocation82_spill] sm:$0xff] %v7151_v26  ;;  %v7163_v43 = vadd.f32 %v7070_v18, %v16085_v8  ;;  %v7167_v27 = vadd.f32 %v7076_v61, %v16087_v19  ;;  %v7171_v35 = vadd.f32 %v7082_v24, %v16089_v52  ;;  %v16095_v36 = vld [vmem:[#allocation31_spill] sm:$0xff]  ;;  %v16097_v18 = vld [vmem:[#allocation32_spill] sm:$0xff] }
  0x88   : > { %16082 = vst [vmem:[#allocation83_spill] sm:$0xff] %v7155_v51  ;;  %16084 = vst [vmem:[#allocation17_spill] sm:$0xff] %v7159_v25  ;;  %v7175_v49 = vadd.f32 %v7085_v5, %v16091_v2  ;;  %v7178_v47 = vadd.f32 %v710_v37, %v16093_v45  ;;  %v7181_v0 = vadd.f32 %v713_v6, %v16095_v36  ;;  %v16103_v24 = vld [vmem:[#allocation40_spill] sm:$0xff]  ;;  %v16105_v5 = vld [vmem:[#allocation41_spill] sm:$0xff] }
  0x89   : > { %16086 = vst [vmem:[#allocation18_spill] sm:$0xff] %v7163_v43  ;;  %16088 = vst [vmem:[#allocation21_spill] sm:$0xff] %v7167_v27  ;;  %v7184_v30 = vadd.f32 %v715_v50, %v16097_v18  ;;  %v7187_v61 = vadd.f32 %v718_v54, %v16099_v56  ;;  %v7190_v16 = vadd.f32 %v720_v60, %v16101_v33  ;;  %v16107_v37 = vld [vmem:[#allocation45_spill] sm:$0xff]  ;;  %v16109_v6 = vld [vmem:[#allocation46_spill] sm:$0xff] }
  0x8a   : > { %16090 = vst [vmem:[#allocation22_spill] sm:$0xff] %v7171_v35  ;;  %16092 = vst [vmem:[#allocation26_spill] sm:$0xff] %v7175_v49  ;;  %v7193_v31 = vadd.f32 %v723_v41, %v16103_v24  ;;  %v7196_v7 = vadd.f32 %v725_v59, %v16105_v5  ;;  %v7199_v40 = vadd.f32 %v728_v53, %v16107_v37  ;;  %v16111_v50 = vld [vmem:[#allocation49_spill] sm:$0xff]  ;;  %v16113_v54 = vld [vmem:[#allocation50_spill] sm:$0xff] }
  0x8b   : > { %16094 = vst [vmem:[#allocation27_spill] sm:$0xff] %v7178_v47  ;;  %16096 = vst [vmem:[#allocation31_spill] sm:$0xff] %v7181_v0  ;;  %v7202_v15 = vadd.f32 %v730_v34, %v16109_v6  ;;  %v7205_v55 = vadd.f32 %v733_v48, %v16111_v50  ;;  %v7208_v44 = vadd.f32 %v735_v62, %v16113_v54  ;;  %v5688_v60 = vld [vmem:[%s15337_s1 + $0x3] ss:$0 sm:$0xff]  ;;  %v16115_v41 = vld [vmem:[#allocation54_spill] sm:$0xff] }
  0x8c   : > { %16098 = vst [vmem:[#allocation32_spill] sm:$0xff] %v7184_v30  ;;  %16100 = vst [vmem:[#allocation35_spill] sm:$0xff] %v7187_v61  ;;  %v7214_v22 = vadd.f32 %v738_v12, %v16115_v41  ;;  %v16117_v59 = vld [vmem:[#allocation55_spill] sm:$0xff]  ;;  %v16121_v34 = vld [vmem:[#allocation60_spill] sm:$0xff]  ;;  %v7232_v39 = vadd.f32 %v753_v28, %v16127_v32 }
  0x8d   : > { %16102 = vst [vmem:[#allocation36_spill] sm:$0xff] %v7190_v16  ;;  %16104 = vst [vmem:[#allocation40_spill] sm:$0xff] %v7193_v31  ;;  %v7217_v21 = vadd.f32 %v740_v20, %v16117_v59  ;;  %v16119_v53 = vld [vmem:[#allocation59_spill] sm:$0xff]  ;;  %v7223_v38 = vadd.f32 %v745_v63, %v16121_v34  ;;  %v16123_v48 = vld [vmem:[#allocation64_spill] sm:$0xff] }
  0x8e   : > { %16106 = vst [vmem:[#allocation41_spill] sm:$0xff] %v7196_v7  ;;  %16108 = vst [vmem:[#allocation45_spill] sm:$0xff] %v7199_v40  ;;  %v7220_v3 = vadd.f32 %v743_v13, %v16119_v53  ;;  %v7226_v42 = vadd.f32 %v748_v17, %v16123_v48  ;;  %v16125_v62 = vld [vmem:[#allocation65_spill] sm:$0xff]  ;;  %v16129_v12 = vld [vmem:[#allocation70_spill] sm:$0xff] }
  0x8f   : > { %16110 = vst [vmem:[#allocation46_spill] sm:$0xff] %v7202_v15  ;;  %16112 = vst [vmem:[#allocation49_spill] sm:$0xff] %v7205_v55  ;;  %v7229_v4 = vadd.f32 %v750_v9, %v16125_v62  ;;  %v7235_v11 = vadd.f32 %v755_v29, %v16129_v12  ;;  %v16131_v20 = vld [vmem:[#allocation74_spill] sm:$0xff]  ;;  %v16133_v13 = vld [vmem:[#allocation75_spill] sm:$0xff] }
  0x90   : > { %16114 = vst [vmem:[#allocation50_spill] sm:$0xff] %v7208_v44  ;;  %16116 = vst [vmem:[#allocation54_spill] sm:$0xff] %v7214_v22  ;;  %v7238_v23 = vadd.f32 %v758_v10, %v16131_v20  ;;  %v7241_v8 = vadd.f32 %v760_v1, %v16133_v13  ;;  %v16135_v63 = vld [vmem:[#allocation77_spill] sm:$0xff]  ;;  %v16137_v17 = vld [vmem:[#allocation78_spill] sm:$0xff] }
  0x91   : > { %16118 = vst [vmem:[#allocation55_spill] sm:$0xff] %v7217_v21  ;;  %16120 = vst [vmem:[#allocation59_spill] sm:$0xff] %v7220_v3  ;;  %v7244_v19 = vadd.f32 %v763_v57, %v16135_v63  ;;  %v7247_v52 = vadd.f32 %v765_v14, %v16137_v17  ;;  %v16139_v9 = vld [vmem:[#allocation5_spill] sm:$0xff]  ;;  %v16140_v45 = vld [vmem:[#allocation6_spill] sm:$0xff] }
  0x92   : > { %16122 = vst [vmem:[#allocation60_spill] sm:$0xff] %v7223_v38  ;;  %16124 = vst [vmem:[#allocation64_spill] sm:$0xff] %v7226_v42  ;;  %v836_v2 = vmul.f32 %v5688_v60, %v16139_v9  ;;  %v837_v28 = vmul.f32 %v5688_v60, %v16140_v45  ;;  %v16141_v36 = vld [vmem:[#allocation7_spill] sm:$0xff]  ;;  %v16142_v29 = vld [vmem:[#allocation8_spill] sm:$0xff] }
  0x93   : > { %16126 = vst [vmem:[#allocation65_spill] sm:$0xff] %v7229_v4  ;;  %16128 = vst [vmem:[#allocation69_spill] sm:$0xff] %v7232_v39  ;;  %v838_v18 = vmul.f32 %v5688_v60, %v16141_v36  ;;  %v839_v56 = vmul.f32 %v5688_v60, %v16142_v29  ;;  %v16143_v33 = vld [vmem:[#allocation9_spill] sm:$0xff]  ;;  %v16144_v24 = vld [vmem:[#allocation10_spill] sm:$0xff] }
  0x94   : > { %16130 = vst [vmem:[#allocation70_spill] sm:$0xff] %v7235_v11  ;;  %16132 = vst [vmem:[#allocation74_spill] sm:$0xff] %v7238_v23  ;;  %v840_v10 = vmul.f32 %v5688_v60, %v16143_v33  ;;  %v841_v5 = vmul.f32 %v5688_v60, %v16144_v24  ;;  %v16145_v1 = vld [vmem:[#allocation11_spill] sm:$0xff]  ;;  %v16146_v6 = vld [vmem:[#allocation12_spill] sm:$0xff]  ;;  %v934_v35 = vrot.slane %v837_v28, 3 }
  0x95   : > { %16134 = vst [vmem:[#allocation75_spill] sm:$0xff] %v7241_v8  ;;  %16136 = vst [vmem:[#allocation77_spill] sm:$0xff] %v7244_v19  ;;  %v842_v37 = vmul.f32 %v5688_v60, %v16145_v1  ;;  %v843_v57 = vmul.f32 %v5688_v60, %v16146_v6  ;;  %v16147_v50 = vld [vmem:[#allocation13_spill] sm:$0xff]  ;;  %v16148_v14 = vld [vmem:[#allocation14_spill] sm:$0xff]  ;;  %v936_v27 = vrot.slane %v838_v18, 3 }
  0x96   : > { %16138 = vst [vmem:[#allocation78_spill] sm:$0xff] %v7247_v52  ;;  %v844_v54 = vmul.f32 %v5688_v60, %v16147_v50  ;;  %v845_v41 = vmul.f32 %v5688_v60, %v16148_v14  ;;  %v16149_v59 = vld [vmem:[#allocation15_spill] sm:$0xff]  ;;  %v16150_v34 = vld [vmem:[#allocation16_spill] sm:$0xff]  ;;  %v16155_v45 = vld [vmem:[#allocation25_spill] sm:$0xff]  ;;  %v939_v43 = vrot.slane %v840_v10, 3  ;;  %v941_v25 = vrot.slane %v841_v5, 3 }
  0x97   : > { %v7260_v53 = vmul.f32 %v5688_v60, %v16149_v59  ;;  %v7263_v48 = vmul.f32 %v5688_v60, %v16150_v34  ;;  %v16151_v62 = vld [vmem:[#allocation19_spill] sm:$0xff]  ;;  %v16152_v12 = vld [vmem:[#allocation20_spill] sm:$0xff]  ;;  %v7278_v36 = vmul.f32 %v5688_v60, %v16155_v45  ;;  %v16157_v24 = vld [vmem:[#allocation29_spill] sm:$0xff]  ;;  %v944_v51 = vrot.slane %v843_v57, 3 }
  0x98   : > { %v7266_v32 = vmul.f32 %v5688_v60, %v16151_v62  ;;  %v7269_v20 = vmul.f32 %v5688_v60, %v16152_v12  ;;  %v16153_v13 = vld [vmem:[#allocation23_spill] sm:$0xff]  ;;  %v16154_v17 = vld [vmem:[#allocation24_spill] sm:$0xff]  ;;  %v7284_v1 = vmul.f32 %v5688_v60, %v16157_v24  ;;  %v16158_v6 = vld [vmem:[#allocation30_spill] sm:$0xff]  ;;  %v946_v26 = vrot.slane %v844_v54, 3 }
  0x99   : > { %v7272_v63 = vmul.f32 %v5688_v60, %v16153_v13  ;;  %v7275_v9 = vmul.f32 %v5688_v60, %v16154_v17  ;;  %v16156_v29 = vld [vmem:[#allocation28_spill] sm:$0xff]  ;;  %v7287_v50 = vmul.f32 %v5688_v60, %v16158_v6  ;;  %v16159_v14 = vld [vmem:[#allocation37_spill] sm:$0xff]  ;;  %v16161_v12 = vld [vmem:[#allocation34_spill] sm:$0xff]  ;;  %v949_v28 = vrot.slane %v7260_v53, 3 }
  0x9a   : > { %v7281_v33 = vmul.f32 %v5688_v60, %v16156_v29  ;;  %v7290_v59 = vmul.f32 %v5688_v60, %v16159_v14  ;;  %v16160_v34 = vld [vmem:[#allocation33_spill] sm:$0xff]  ;;  %v7296_v13 = vmul.f32 %v5688_v60, %v16161_v12  ;;  %v16162_v17 = vld [vmem:[#allocation42_spill] sm:$0xff]  ;;  %v16164_v24 = vld [vmem:[#allocation39_spill] sm:$0xff]  ;;  %v7390_v18 = vsel %vm932_vm2, %v944_v51, %v946_v26 }
  0x9b   : > { %v7293_v62 = vmul.f32 %v5688_v60, %v16160_v34  ;;  %v7299_v45 = vmul.f32 %v5688_v60, %v16162_v17  ;;  %v16163_v29 = vld [vmem:[#allocation38_spill] sm:$0xff]  ;;  %v7305_v19 = vmul.f32 %v5688_v60, %v16164_v24  ;;  %v16165_v6 = vld [vmem:[#allocation51_spill] sm:$0xff]  ;;  %v16167_v34 = vld [vmem:[#allocation44_spill] sm:$0xff]  ;;  %v959_v5 = vrot.slane %v7278_v36, 3 }
  0x9c   : > { %v7302_v52 = vmul.f32 %v5688_v60, %v16163_v29  ;;  %v7308_v8 = vmul.f32 %v5688_v60, %v16165_v6  ;;  %v16166_v14 = vld [vmem:[#allocation43_spill] sm:$0xff]  ;;  %v7314_v11 = vmul.f32 %v5688_v60, %v16167_v34  ;;  %v16168_v12 = vld [vmem:[#allocation56_spill] sm:$0xff]  ;;  %v16171_v24 = vld [vmem:[#allocation61_spill] sm:$0xff]  ;;  %v963_v57 = vrot.slane %v7284_v1, 3 }
  0x9d   : > { %v7311_v23 = vmul.f32 %v5688_v60, %v16166_v14  ;;  %v7317_v39 = vmul.f32 %v5688_v60, %v16168_v12  ;;  %v16169_v17 = vld [vmem:[#allocation47_spill] sm:$0xff]  ;;  %v16170_v29 = vld [vmem:[#allocation48_spill] sm:$0xff]  ;;  %v7326_v38 = vmul.f32 %v5688_v60, %v16171_v24  ;;  %v16173_v14 = vld [vmem:[#allocation53_spill] sm:$0xff]  ;;  %v964_v53 = vrot.slane %v7287_v50, 3 }
  0x9e   : > { %v7320_v4 = vmul.f32 %v5688_v60, %v16169_v17  ;;  %v7323_v42 = vmul.f32 %v5688_v60, %v16170_v29  ;;  %v16172_v6 = vld [vmem:[#allocation52_spill] sm:$0xff]  ;;  %v7332_v21 = vmul.f32 %v5688_v60, %v16173_v14  ;;  %v16174_v34 = vld [vmem:[#allocation66_spill] sm:$0xff]  ;;  %v16175_v12 = vld [vmem:[#allocation57_spill] sm:$0xff]  ;;  %v973_v1 = vrot.slane %v7302_v52, 3 }
  0x9f   : > { %v7329_v3 = vmul.f32 %v5688_v60, %v16172_v6  ;;  %v7335_v22 = vmul.f32 %v5688_v60, %v16174_v34  ;;  %v7338_v44 = vmul.f32 %v5688_v60, %v16175_v12  ;;  %v16176_v17 = vld [vmem:[#allocation58_spill] sm:$0xff]  ;;  %v16177_v29 = vld [vmem:[#allocation71_spill] sm:$0xff]  ;;  %v16180_v14 = vld [vmem:[#allocation76_spill] sm:$0xff]  ;;  %v965_v36 = vsel %vm932_vm2, %v963_v57, %v964_v53 }
  0xa0   : > { %v7341_v55 = vmul.f32 %v5688_v60, %v16176_v17  ;;  %v7344_v15 = vmul.f32 %v5688_v60, %v16177_v29  ;;  %v16178_v24 = vld [vmem:[#allocation62_spill] sm:$0xff]  ;;  %v16179_v6 = vld [vmem:[#allocation63_spill] sm:$0xff]  ;;  %v7353_v31 = vmul.f32 %v5688_v60, %v16180_v14  ;;  %v16182_v12 = vld [vmem:[#allocation68_spill] sm:$0xff]  ;;  %v933_v14 = vrot.slane %v836_v2, 3 }
  0xa1   : > { %v7347_v40 = vmul.f32 %v5688_v60, %v16178_v24  ;;  %v7350_v7 = vmul.f32 %v5688_v60, %v16179_v6  ;;  %v16181_v34 = vld [vmem:[#allocation67_spill] sm:$0xff]  ;;  %v7359_v61 = vmul.f32 %v5688_v60, %v16182_v12  ;;  %v16184_v29 = vld [vmem:[#allocation72_spill] sm:$0xff]  ;;  %v16185_v24 = vld [vmem:[#allocation73_spill] sm:$0xff]  ;;  %v943_v12 = vrot.slane %v842_v37, 3 }
  0xa2   : > { %v7356_v16 = vmul.f32 %v5688_v60, %v16181_v34  ;;  %v16183_v17 = vld [vmem:[#allocation79_spill] sm:$0xff]  ;;  %v7365_v0 = vmul.f32 %v5688_v60, %v16184_v29  ;;  %v7368_v47 = vmul.f32 %v5688_v60, %v16185_v24  ;;  %v16186_v6 = vld [vmem:[#allocation80_spill] sm:$0xff]  ;;  %v938_v34 = vrot.slane %v839_v56, 3 }
  0xa3   : > { %v7362_v30 = vmul.f32 %v5688_v60, %v16183_v17  ;;  %v7371_v49 = vmul.f32 %v5688_v60, %v16186_v6  ;;  %v7374_v17 = vsel %vm932_vm2, %v933_v14, %v934_v35  ;;  %v7377_v29 = vsel %vm932_vm2, %v934_v35, %v936_v27 }
  0xa4   : > { %v948_v24 = vrot.slane %v845_v41, 3  ;;  %v7380_v58 = vsel %vm932_vm2, %v938_v34, %v939_v43  ;;  %v7383_v60 = vsel %vm932_vm2, %v939_v43, %v941_v25  ;;  %v7386_v2 = vsel %vm932_vm2, %v943_v12, %v944_v51 }
  0xa5   : > { %v951_v56 = vrot.slane %v7263_v48, 3  ;;  %v953_v27 = vrot.slane %v7266_v32, 3  ;;  %v954_v35 = vrot.slane %v7269_v20, 3  ;;  %v956_v25 = vrot.slane %v7272_v63, 3 }
  0xa6   : > { %v7396_v10 = vsel %vm932_vm2, %v948_v24, %v949_v28  ;;  %v958_v43 = vrot.slane %v7275_v9, 3  ;;  %v961_v51 = vrot.slane %v7281_v33, 3  ;;  %v966_v48 = vrot.slane %v7290_v59, 3 }
  0xa7   : > { %v7402_v37 = vsel %vm932_vm2, %v949_v28, %v951_v56  ;;  %v7405_v26 = vsel %vm932_vm2, %v953_v27, %v954_v35  ;;  %v957_v54 = vsel %vm932_vm2, %v954_v35, %v956_v25  ;;  %v968_v20 = vrot.slane %v7293_v62, 3 }
  0xa8   : > { %v960_v41 = vsel %vm932_vm2, %v958_v43, %v959_v5  ;;  %v962_v32 = vsel %vm932_vm2, %v959_v5, %v961_v51  ;;  %v969_v63 = vrot.slane %v7296_v13, 3  ;;  %v971_v9 = vrot.slane %v7299_v45, 3 }
  0xa9   : > { %v967_v33 = vsel %vm932_vm2, %v964_v53, %v966_v48  ;;  %v974_v14 = vrot.slane %v7305_v19, 3  ;;  %v976_v24 = vrot.slane %v7308_v8, 3  ;;  %v978_v62 = vrot.slane %v7311_v23, 3 }
  0xaa   : > { %v970_v50 = vsel %vm932_vm2, %v968_v20, %v969_v63  ;;  %v972_v59 = vsel %vm932_vm2, %v969_v63, %v971_v9  ;;  %v979_v45 = vrot.slane %v7314_v11, 3  ;;  %v981_v34 = vrot.slane %v7317_v39, 3  ;;  %v16188_v9 = vld [vmem:[#allocation82_spill] sm:$0xff] }
  0xab   : > { %v975_v13 = vsel %vm932_vm2, %v973_v1, %v974_v14  ;;  %v983_v12 = vrot.slane %v7320_v4, 3  ;;  %v977_v52 = vsel %vm932_vm2, %v974_v14, %v976_v24  ;;  %v984_v19 = vrot.slane %v7323_v42, 3  ;;  %v16190_v14 = vld [vmem:[#allocation17_spill] sm:$0xff] }
  0xac   : > { %v986_v28 = vrot.slane %v7326_v38, 3  ;;  %v988_v56 = vrot.slane %v7329_v3, 3  ;;  %v980_v8 = vsel %vm932_vm2, %v978_v62, %v979_v45  ;;  %v982_v23 = vsel %vm932_vm2, %v979_v45, %v981_v34  ;;  %v16192_v24 = vld [vmem:[#allocation21_spill] sm:$0xff]  ;;  %v16194_v45 = vld [vmem:[#allocation22_spill] sm:$0xff] }
  0xad   : > { %v989_v27 = vrot.slane %v7332_v21, 3  ;;  %v991_v11 = vrot.slane %v7335_v22, 3  ;;  %v985_v39 = vsel %vm932_vm2, %v983_v12, %v984_v19  ;;  %v993_v35 = vrot.slane %v7338_v44, 3  ;;  %v16196_v34 = vld [vmem:[#allocation26_spill] sm:$0xff]  ;;  %v16198_v12 = vld [vmem:[#allocation27_spill] sm:$0xff] }
  0xae   : > { %v987_v4 = vsel %vm932_vm2, %v984_v19, %v986_v28  ;;  %v994_v42 = vrot.slane %v7341_v55, 3  ;;  %v996_v25 = vrot.slane %v7344_v15, 3  ;;  %v998_v43 = vrot.slane %v7347_v40, 3 }
  0xaf   : > { %v990_v38 = vsel %vm932_vm2, %v988_v56, %v989_v27  ;;  %v992_v3 = vsel %vm932_vm2, %v989_v27, %v991_v11  ;;  %v999_v22 = vrot.slane %v7350_v7, 3  ;;  %v1001_v5 = vrot.slane %v7353_v31, 3  ;;  %v16204_v27 = vld [vmem:[#allocation35_spill] sm:$0xff]  ;;  %v16206_v11 = vld [vmem:[#allocation36_spill] sm:$0xff] }
  0xb0   : > { %v995_v21 = vsel %vm932_vm2, %v993_v35, %v994_v42  ;;  %v1003_v51 = vrot.slane %v7356_v16, 3  ;;  %v997_v44 = vsel %vm932_vm2, %v994_v42, %v996_v25  ;;  %v1004_v55 = vrot.slane %v7359_v61, 3  ;;  %v16187_v61 = vld [vmem:[#allocation81_spill] sm:$0xff] }
  0xb1   : > { %v1006_v57 = vrot.slane %v7362_v30, 3  ;;  %v1008_v53 = vrot.slane %v7365_v0, 3  ;;  %v1000_v15 = vsel %vm932_vm2, %v998_v43, %v999_v22  ;;  %v1002_v40 = vsel %vm932_vm2, %v999_v22, %v1001_v5 }
  0xb2   : > { %v1009_v48 = vrot.slane %v7368_v47, 3  ;;  %v1011_v7 = vrot.slane %v7371_v49, 3  ;;  %v1005_v31 = vsel %vm932_vm2, %v1003_v51, %v1004_v55  ;;  %v7461_v20 = vadd.f32 %v7374_v17, %v7141_v46  ;;  %v16189_v49 = vld [vmem:[#allocation83_spill] sm:$0xff]  ;;  %v16191_v17 = vld [vmem:[#allocation18_spill] sm:$0xff] }
  0xb3   : > { %v1007_v16 = vsel %vm932_vm2, %v1004_v55, %v1006_v57  ;;  %v7465_v30 = vadd.f32 %v7377_v29, %v16187_v61  ;;  %v7471_v47 = vadd.f32 %v7380_v58, %v16188_v9  ;;  %v7475_v1 = vadd.f32 %v7383_v60, %v16189_v49  ;;  %v16224_v55 = vld [vmem:[#allocation59_spill] sm:$0xff]  ;;  %v16234_v49 = vld [vmem:[#allocation70_spill] sm:$0xff] }
  0xb4   : > { %v1010_v0 = vsel %vm932_vm2, %v1008_v53, %v1009_v48  ;;  %v1012_v63 = vsel %vm932_vm2, %v1009_v48, %v1011_v7  ;;  %v7479_v46 = vadd.f32 %v7386_v2, %v16190_v14  ;;  %v7483_v29 = vadd.f32 %v7390_v18, %v16191_v17  ;;  %v16200_v2 = vld [vmem:[#allocation31_spill] sm:$0xff]  ;;  %v16202_v18 = vld [vmem:[#allocation32_spill] sm:$0xff]  ;;  %v16230_v7 = vld [vmem:[#allocation65_spill] sm:$0xff] }
  0xb5   : > { %v7487_v62 = vadd.f32 %v7396_v10, %v16192_v24  ;;  %v7491_v58 = vadd.f32 %v7402_v37, %v16194_v45  ;;  %v7495_v60 = vadd.f32 %v7405_v26, %v16196_v34  ;;  %v7498_v19 = vadd.f32 %v957_v54, %v16198_v12  ;;  %v16208_v37 = vld [vmem:[#allocation40_spill] sm:$0xff]  ;;  %v16210_v26 = vld [vmem:[#allocation41_spill] sm:$0xff]  ;;  %v16238_v17 = vld [vmem:[#allocation75_spill] sm:$0xff] }
  0xb6   : > { %v7501_v28 = vadd.f32 %v960_v41, %v16200_v2  ;;  %v7504_v56 = vadd.f32 %v962_v32, %v16202_v18  ;;  %v7507_v10 = vadd.f32 %v965_v36, %v16204_v27  ;;  %v7510_v35 = vadd.f32 %v967_v33, %v16206_v11  ;;  %v16212_v54 = vld [vmem:[#allocation45_spill] sm:$0xff]  ;;  %v16214_v41 = vld [vmem:[#allocation46_spill] sm:$0xff]  ;;  %v16228_v53 = vld [vmem:[#allocation64_spill] sm:$0xff] }
  0xb7   : > { %16193 = vst [vmem:[#allocation5_spill] sm:$0xff] %v7487_v62  ;;  %16195 = vst [vmem:[#allocation6_spill] sm:$0xff] %v7491_v58  ;;  %v7513_v42 = vadd.f32 %v970_v50, %v16208_v37  ;;  %v7516_v25 = vadd.f32 %v972_v59, %v16210_v26  ;;  %v7519_v43 = vadd.f32 %v975_v13, %v16212_v54  ;;  %v16216_v32 = vld [vmem:[#allocation49_spill] sm:$0xff]  ;;  %v16218_v36 = vld [vmem:[#allocation50_spill] sm:$0xff] }
  0xb8   : > { %16197 = vst [vmem:[#allocation7_spill] sm:$0xff] %v7495_v60  ;;  %16199 = vst [vmem:[#allocation8_spill] sm:$0xff] %v7498_v19  ;;  %v7522_v22 = vadd.f32 %v977_v52, %v16214_v41  ;;  %v7525_v5 = vadd.f32 %v980_v8, %v16216_v32  ;;  %v7528_v51 = vadd.f32 %v982_v23, %v16218_v36  ;;  %v7533_v33 = vld [vmem:[%s15337_s1 + $0x4] ss:$0 sm:$0xff]  ;;  %v16220_v50 = vld [vmem:[#allocation54_spill] sm:$0xff] }
  0xb9   : > { %16201 = vst [vmem:[#allocation9_spill] sm:$0xff] %v7501_v28  ;;  %16203 = vst [vmem:[#allocation10_spill] sm:$0xff] %v7504_v56  ;;  %v7536_v59 = vadd.f32 %v985_v39, %v16220_v50  ;;  %v16222_v13 = vld [vmem:[#allocation55_spill] sm:$0xff]  ;;  %v7542_v57 = vadd.f32 %v990_v38, %v16224_v55  ;;  %v16226_v8 = vld [vmem:[#allocation60_spill] sm:$0xff]  ;;  %v7548_v48 = vadd.f32 %v995_v21, %v16228_v53 }
  0xba   : > { %16205 = vst [vmem:[#allocation11_spill] sm:$0xff] %v7507_v10  ;;  %16207 = vst [vmem:[#allocation12_spill] sm:$0xff] %v7510_v35  ;;  %v7539_v52 = vadd.f32 %v987_v4, %v16222_v13  ;;  %v7545_v23 = vadd.f32 %v992_v3, %v16226_v8  ;;  %v7551_v61 = vadd.f32 %v997_v44, %v16230_v7  ;;  %v16232_v39 = vld [vmem:[#allocation69_spill] sm:$0xff]  ;;  %v16236_v38 = vld [vmem:[#allocation74_spill] sm:$0xff] }
  0xbb   : > { %16209 = vst [vmem:[#allocation13_spill] sm:$0xff] %v7513_v42  ;;  %16211 = vst [vmem:[#allocation14_spill] sm:$0xff] %v7516_v25  ;;  %v7554_v9 = vadd.f32 %v1000_v15, %v16232_v39  ;;  %v7557_v4 = vadd.f32 %v1002_v40, %v16234_v49  ;;  %v7560_v14 = vadd.f32 %v1005_v31, %v16236_v38  ;;  %v16240_v21 = vld [vmem:[#allocation77_spill] sm:$0xff]  ;;  %v16242_v45 = vld [vmem:[#allocation78_spill] sm:$0xff] }
  0xbc   : > { %16213 = vst [vmem:[#allocation15_spill] sm:$0xff] %v7519_v43  ;;  %16215 = vst [vmem:[#allocation16_spill] sm:$0xff] %v7522_v22  ;;  %v7563_v3 = vadd.f32 %v1007_v16, %v16238_v17  ;;  %v7566_v24 = vadd.f32 %v1010_v0, %v16240_v21  ;;  %v7569_v44 = vadd.f32 %v1012_v63, %v16242_v45  ;;  %v5774_v15 = vld [vmem:[%s6195_s3] sm:$0xff]  ;;  %v5775_v40 = vld [vmem:[%s6195_s3 + $0x8] sm:$0xff] }
  0xbd   : > { %16217 = vst [vmem:[#allocation19_spill] sm:$0xff] %v7525_v5  ;;  %16219 = vst [vmem:[#allocation20_spill] sm:$0xff] %v7528_v51  ;;  %v7573_v34 = vmul.f32 %v5774_v15, %v7533_v33  ;;  %v7577_v31 = vmul.f32 %v5775_v40, %v7533_v33  ;;  %v5776_v12 = vld [vmem:[%s6195_s3 + $0x10] sm:$0xf]  ;;  %v7584_v0 = vld [vmem:[%s6195_s3 + $0x18] sm:$0xff] }
  0xbe   : > { %16221 = vst [vmem:[#allocation23_spill] sm:$0xff] %v7536_v59  ;;  %16223 = vst [vmem:[#allocation24_spill] sm:$0xff] %v7539_v52  ;;  %v7581_v16 = vmul.f32 %v5776_v12, %v7533_v33  ;;  %v7588_v63 = vmul.f32 %v7584_v0, %v7533_v33  ;;  %v7591_v2 = vld [vmem:[%s6195_s3 + $0x20] sm:$0xff]  ;;  %v7598_v27 = vld [vmem:[%s6195_s3 + $0x28] sm:$0xf] }
  0xbf   : > { %16225 = vst [vmem:[#allocation25_spill] sm:$0xff] %v7542_v57  ;;  %16227 = vst [vmem:[#allocation28_spill] sm:$0xff] %v7545_v23  ;;  %v7595_v18 = vmul.f32 %v7591_v2, %v7533_v33  ;;  %v7602_v11 = vmul.f32 %v7598_v27, %v7533_v33  ;;  %v7605_v37 = vld [vmem:[%s6195_s3 + $0x30] sm:$0xff]  ;;  %v7612_v54 = vld [vmem:[%s6195_s3 + $0x38] sm:$0xff]  ;;  %v1181_v19 = vrot.slane %v7577_v31, 4 }
  0xc0   : > { %16229 = vst [vmem:[#allocation29_spill] sm:$0xff] %v7548_v48  ;;  %16231 = vst [vmem:[#allocation30_spill] sm:$0xff] %v7551_v61  ;;  %v7609_v26 = vmul.f32 %v7605_v37, %v7533_v33  ;;  %v7616_v41 = vmul.f32 %v7612_v54, %v7533_v33  ;;  %v7619_v32 = vld [vmem:[%s6195_s3 + $0x40] sm:$0xf]  ;;  %v7626_v50 = vld [vmem:[%s6195_s3 + $0x48] sm:$0xff]  ;;  %v1185_v60 = vrot.slane %v7588_v63, 4 }
  0xc1   : > { %16233 = vst [vmem:[#allocation37_spill] sm:$0xff] %v7554_v9  ;;  %16235 = vst [vmem:[#allocation33_spill] sm:$0xff] %v7557_v4  ;;  %v7623_v36 = vmul.f32 %v7619_v32, %v7533_v33  ;;  %v7630_v13 = vmul.f32 %v7626_v50, %v7533_v33  ;;  %v7633_v55 = vld [vmem:[%s6195_s3 + $0x50] sm:$0xff]  ;;  %v7640_v53 = vld [vmem:[%s6195_s3 + $0x58] sm:$0xf]  ;;  %v1188_v58 = vrot.slane %v7602_v11, 4 }
  0xc2   : > { %16237 = vst [vmem:[#allocation34_spill] sm:$0xff] %v7560_v14  ;;  %16239 = vst [vmem:[#allocation42_spill] sm:$0xff] %v7563_v3  ;;  %v7637_v8 = vmul.f32 %v7633_v55, %v7533_v33  ;;  %v7644_v7 = vmul.f32 %v7640_v53, %v7533_v33  ;;  %v7647_v39 = vld [vmem:[%s6195_s3 + $0x60] sm:$0xff]  ;;  %v7654_v38 = vld [vmem:[%s6195_s3 + $0x68] sm:$0xff] }
  0xc3   : > { %16241 = vst [vmem:[#allocation38_spill] sm:$0xff] %v7566_v24  ;;  %16243 = vst [vmem:[#allocation39_spill] sm:$0xff] %v7569_v44  ;;  %v7651_v49 = vmul.f32 %v7647_v39, %v7533_v33  ;;  %v7658_v17 = vmul.f32 %v7654_v38, %v7533_v33  ;;  %v7661_v21 = vld [vmem:[%s6195_s3 + $0x70] sm:$0xf]  ;;  %v7668_v15 = vld [vmem:[%s6195_s3 + $0x78] sm:$0xff]  ;;  %v1195_v63 = vrot.slane %v7630_v13, 4 }
  0xc4   : > { %16244 = vst [vmem:[#allocation51_spill] sm:$0xff] %v7584_v0  ;;  %16245 = vst [vmem:[#allocation43_spill] sm:$0xff] %v7591_v2  ;;  %v7665_v45 = vmul.f32 %v7661_v21, %v7533_v33  ;;  %v7672_v40 = vmul.f32 %v7668_v15, %v7533_v33  ;;  %v7675_v12 = vld [vmem:[%s6195_s3 + $0x80] sm:$0xff]  ;;  %v7738_v2 = vld [vmem:[%s6195_s3 + $0xc8] sm:$0xff]  ;;  %v1198_v11 = vrot.slane %v7644_v7, 4 }
  0xc5   : > { %16246 = vst [vmem:[#allocation44_spill] sm:$0xff] %v7598_v27  ;;  %16247 = vst [vmem:[#allocation56_spill] sm:$0xff] %v7605_v37  ;;  %v7689_v27 = vld [vmem:[%s6195_s3 + $0x90] sm:$0xff]  ;;  %v7731_v37 = vld [vmem:[%s6195_s3 + $0xc0] sm:$0xff] }
  0xc6   : > { %16248 = vst [vmem:[#allocation47_spill] sm:$0xff] %v7612_v54  ;;  %16249 = vst [vmem:[#allocation48_spill] sm:$0xff] %v7619_v32  ;;  %v7682_v32 = vld [vmem:[%s6195_s3 + $0x88] sm:$0xf]  ;;  %v7724_v54 = vld [vmem:[%s6195_s3 + $0xb8] sm:$0xf] }
  0xc7   : > { %16250 = vst [vmem:[#allocation61_spill] sm:$0xff] %v7626_v50  ;;  %16251 = vst [vmem:[#allocation52_spill] sm:$0xff] %v7633_v55  ;;  %v7710_v55 = vld [vmem:[%s6195_s3 + $0xa8] sm:$0xff]  ;;  %v7717_v50 = vld [vmem:[%s6195_s3 + $0xb0] sm:$0xff] }
  0xc8   : > { %16252 = vst [vmem:[#allocation53_spill] sm:$0xff] %v7640_v53  ;;  %16253 = vst [vmem:[#allocation57_spill] sm:$0xff] %v7647_v39  ;;  %v7679_v53 = vmul.f32 %v7675_v12, %v7533_v33  ;;  %v7703_v39 = vld [vmem:[%s6195_s3 + $0xa0] sm:$0xf]  ;;  %v7745_v0 = vld [vmem:[%s6195_s3 + $0xd0] sm:$0xf] }
  0xc9   : > { %16254 = vst [vmem:[#allocation58_spill] sm:$0xff] %v7654_v38  ;;  %16255 = vst [vmem:[#allocation62_spill] sm:$0xff] %v7661_v21  ;;  %v7686_v21 = vmul.f32 %v7682_v32, %v7533_v33  ;;  %v7696_v38 = vld [vmem:[%s6195_s3 + $0x98] sm:$0xff]  ;;  %v7759_v24 = vld [vmem:[%s6195_s3 + $0xe0] sm:$0xff] }
  0xca   : > { %16256 = vst [vmem:[#allocation63_spill] sm:$0xff] %v7668_v15  ;;  %16257 = vst [vmem:[#allocation67_spill] sm:$0xff] %v7675_v12  ;;  %v7693_v15 = vmul.f32 %v7689_v27, %v7533_v33  ;;  %v7700_v12 = vmul.f32 %v7696_v38, %v7533_v33  ;;  %v7752_v44 = vld [vmem:[%s6195_s3 + $0xd8] sm:$0xff]  ;;  %v7766_v3 = vld [vmem:[%s6195_s3 + $0xe8] sm:$0xf] }
  0xcb   : > { %16258 = vst [vmem:[#allocation68_spill] sm:$0xff] %v7682_v32  ;;  %16259 = vst [vmem:[#allocation80_spill] sm:$0xff] %v7689_v27  ;;  %v7707_v32 = vmul.f32 %v7703_v39, %v7533_v33  ;;  %v7714_v27 = vmul.f32 %v7710_v55, %v7533_v33  ;;  %v7773_v14 = vld [vmem:[%s6195_s3 + $0xf0] sm:$0xff]  ;;  %v7780_v4 = vld [vmem:[%s6195_s3 + $0xf8] sm:$0xff] }
  0xcc   : > { %16260 = vst [vmem:[#allocation81_spill] sm:$0xff] %v7696_v38  ;;  %16261 = vst [vmem:[#allocation82_spill] sm:$0xff] %v7703_v39  ;;  %v7721_v38 = vmul.f32 %v7717_v50, %v7533_v33  ;;  %v7728_v39 = vmul.f32 %v7724_v54, %v7533_v33  ;;  %v7787_v9 = vld [vmem:[%s6195_s3 + $0x100] sm:$0xf]  ;;  %v7794_v61 = vld [vmem:[%s6195_s3 + $0x108] sm:$0xff]  ;;  %v1210_v7 = vrot.slane %v7693_v15, 4 }
  0xcd   : > { %16262 = vst [vmem:[#allocation83_spill] sm:$0xff] %v7710_v55  ;;  %16263 = vst [vmem:[#allocation17_spill] sm:$0xff] %v7717_v50  ;;  %v7735_v55 = vmul.f32 %v7731_v37, %v7533_v33  ;;  %v7742_v50 = vmul.f32 %v7738_v2, %v7533_v33  ;;  %v7801_v48 = vld [vmem:[%s6195_s3 + $0x110] sm:$0xff]  ;;  %v16276_v23 = vld [vmem:[#allocation66_spill] sm:$0xff] }
  0xce   : > { %16264 = vst [vmem:[#allocation18_spill] sm:$0xff] %v7724_v54  ;;  %16265 = vst [vmem:[#allocation21_spill] sm:$0xff] %v7731_v37  ;;  %v7749_v54 = vmul.f32 %v7745_v0, %v7533_v33  ;;  %v7756_v37 = vmul.f32 %v7752_v44, %v7533_v33  ;;  %v7809_v57 = vmul.f32 %v7533_v33, %v16276_v23  ;;  %v7819_v59 = vld [vmem:[%s6195_s3 + $0x128] sm:$0xff]  ;;  %v16279_v51 = vld [vmem:[#allocation71_spill] sm:$0xff] }
  0xcf   : > { %16266 = vst [vmem:[#allocation22_spill] sm:$0xff] %v7738_v2  ;;  %16267 = vst [vmem:[#allocation26_spill] sm:$0xff] %v7745_v0  ;;  %v7763_v2 = vmul.f32 %v7759_v24, %v7533_v33  ;;  %v7770_v0 = vmul.f32 %v7766_v3, %v7533_v33  ;;  %v7830_v5 = vld [vmem:[%s6195_s3 + $0x138] sm:$0xff]  ;;  %v7837_v22 = vld [vmem:[%s6195_s3 + $0x140] sm:$0xff] }
  0xd0   : > { %16268 = vst [vmem:[#allocation27_spill] sm:$0xff] %v7752_v44  ;;  %16269 = vst [vmem:[#allocation31_spill] sm:$0xff] %v7759_v24  ;;  %v7777_v44 = vmul.f32 %v7773_v14, %v7533_v33  ;;  %v7784_v24 = vmul.f32 %v7780_v4, %v7533_v33  ;;  %v7834_v23 = vmul.f32 %v7830_v5, %v7533_v33  ;;  %v16282_v43 = vld [vmem:[#allocation76_spill] sm:$0xff]  ;;  %v7848_v25 = vld [vmem:[%s6195_s3 + $0x150] sm:$0xff] }
  0xd1   : > { %16270 = vst [vmem:[#allocation32_spill] sm:$0xff] %v7766_v3  ;;  %16271 = vst [vmem:[#allocation35_spill] sm:$0xff] %v7773_v14  ;;  %v7791_v3 = vmul.f32 %v7787_v9, %v7533_v33  ;;  %v7798_v14 = vmul.f32 %v7794_v61, %v7533_v33  ;;  %v7855_v42 = vld [vmem:[%s6195_s3 + $0x158] sm:$0xff]  ;;  %v16285_v35 = vld [vmem:[#allocation79_spill] sm:$0xff] }
  0xd2   : > { %16272 = vst [vmem:[#allocation36_spill] sm:$0xff] %v7780_v4  ;;  %16273 = vst [vmem:[#allocation40_spill] sm:$0xff] %v7787_v9  ;;  %v7805_v4 = vmul.f32 %v7801_v48, %v7533_v33  ;;  %v7812_v9 = vld [vmem:[%s6195_s3 + $0x120] sm:$0xff]  ;;  %v16286_v10 = vld [vmem:[#allocation72_spill] sm:$0xff] }
  0xd3   : > { %16274 = vst [vmem:[#allocation41_spill] sm:$0xff] %v7794_v61  ;;  %16275 = vst [vmem:[#allocation45_spill] sm:$0xff] %v7801_v48  ;;  %v7816_v52 = vmul.f32 %v7812_v9, %v7533_v33  ;;  %v7823_v61 = vmul.f32 %v7819_v59, %v7533_v33  ;;  %v7827_v48 = vmul.f32 %v7533_v33, %v16279_v51  ;;  %v16287_v56 = vld [vmem:[#allocation73_spill] sm:$0xff] }
  0xd4   : > { %16277 = vst [vmem:[#allocation46_spill] sm:$0xff] %v7812_v9  ;;  %16278 = vst [vmem:[#allocation49_spill] sm:$0xff] %v7819_v59  ;;  %v7841_v9 = vmul.f32 %v7837_v22, %v7533_v33  ;;  %v7845_v59 = vmul.f32 %v7533_v33, %v16282_v43  ;;  %v7852_v51 = vmul.f32 %v7848_v25, %v7533_v33 }
  0xd5   : > { %16280 = vst [vmem:[#allocation50_spill] sm:$0xff] %v7830_v5  ;;  %16281 = vst [vmem:[#allocation54_spill] sm:$0xff] %v7837_v22  ;;  %v7859_v5 = vmul.f32 %v7855_v42, %v7533_v33  ;;  %v7863_v22 = vmul.f32 %v7533_v33, %v16285_v35  ;;  %v7867_v43 = vmul.f32 %v7533_v33, %v16286_v10  ;;  %v1183_v35 = vrot.slane %v7581_v16, 4 }
  0xd6   : > { %16283 = vst [vmem:[#allocation55_spill] sm:$0xff] %v7848_v25  ;;  %16284 = vst [vmem:[#allocation59_spill] sm:$0xff] %v7855_v42  ;;  %v7871_v28 = vmul.f32 %v7533_v33, %v16287_v56  ;;  %v7875_v25 = vmul.f32 %v7533_v33, %v16186_v6  ;;  %v1180_v42 = vrot.slane %v7573_v34, 4  ;;  %v1186_v10 = vrot.slane %v7595_v18, 4 }
  0xd7   : > { %v1190_v56 = vrot.slane %v7609_v26, 4  ;;  %v7888_v6 = vsel %vm1179_vm3, %v1181_v19, %v1183_v35  ;;  %v1191_v33 = vrot.slane %v7616_v41, 4  ;;  %v1193_v34 = vrot.slane %v7623_v36, 4 }
  0xd8   : > { %v7885_v62 = vsel %vm1179_vm3, %v1180_v42, %v1181_v19  ;;  %v7893_v31 = vsel %vm1179_vm3, %v1185_v60, %v1186_v10  ;;  %v7896_v16 = vsel %vm1179_vm3, %v1186_v10, %v1188_v58  ;;  %v1196_v18 = vrot.slane %v7637_v8, 4 }
  0xd9   : > { %v7901_v42 = vsel %vm1179_vm3, %v1190_v56, %v1191_v33  ;;  %v7904_v19 = vsel %vm1179_vm3, %v1191_v33, %v1193_v34  ;;  %v1200_v26 = vrot.slane %v7651_v49, 4  ;;  %v1201_v58 = vrot.slane %v7658_v17, 4 }
  0xda   : > { %v7909_v60 = vsel %vm1179_vm3, %v1195_v63, %v1196_v18  ;;  %v1203_v41 = vrot.slane %v7665_v45, 4  ;;  %v1205_v36 = vrot.slane %v7672_v40, 4  ;;  %v7915_v13 = vsel %vm1179_vm3, %v1196_v18, %v1198_v11 }
  0xdb   : > { %v1206_v8 = vrot.slane %v7679_v53, 4  ;;  %v1208_v35 = vrot.slane %v7686_v21, 4  ;;  %v1202_v49 = vsel %vm1179_vm3, %v1200_v26, %v1201_v58  ;;  %v1211_v56 = vrot.slane %v7700_v12, 4 }
  0xdc   : > { %v1204_v10 = vsel %vm1179_vm3, %v1201_v58, %v1203_v41  ;;  %v1213_v17 = vrot.slane %v7707_v32, 4  ;;  %v1215_v33 = vrot.slane %v7714_v27, 4  ;;  %v1216_v53 = vrot.slane %v7721_v38, 4 }
  0xdd   : > { %v1207_v45 = vsel %vm1179_vm3, %v1205_v36, %v1206_v8  ;;  %v1209_v40 = vsel %vm1179_vm3, %v1206_v8, %v1208_v35  ;;  %v1212_v21 = vsel %vm1179_vm3, %v1210_v7, %v1211_v56  ;;  %v1218_v34 = vrot.slane %v7728_v39, 4 }
  0xde   : > { %v1214_v15 = vsel %vm1179_vm3, %v1211_v56, %v1213_v17  ;;  %v1220_v63 = vrot.slane %v7735_v55, 4  ;;  %v1217_v12 = vsel %vm1179_vm3, %v1215_v33, %v1216_v53  ;;  %v1221_v32 = vrot.slane %v7742_v50, 4 }
  0xdf   : > { %v1223_v18 = vrot.slane %v7749_v54, 4  ;;  %v1225_v11 = vrot.slane %v7756_v37, 4  ;;  %v1219_v27 = vsel %vm1179_vm3, %v1216_v53, %v1218_v34  ;;  %v1226_v38 = vrot.slane %v7763_v2, 4 }
  0xe0   : > { %v1228_v26 = vrot.slane %v7770_v0, 4  ;;  %v1230_v58 = vrot.slane %v7777_v44, 4  ;;  %v1222_v39 = vsel %vm1179_vm3, %v1220_v63, %v1221_v32  ;;  %v1231_v41 = vrot.slane %v7784_v24, 4 }
  0xe1   : > { %v1224_v55 = vsel %vm1179_vm3, %v1221_v32, %v1223_v18  ;;  %v1233_v50 = vrot.slane %v7791_v3, 4  ;;  %v1227_v54 = vsel %vm1179_vm3, %v1225_v11, %v1226_v38  ;;  %v1235_v36 = vrot.slane %v7798_v14, 4  ;;  %v16291_v18 = vld [vmem:[#allocation8_spill] sm:$0xff] }
  0xe2   : > { %v1229_v37 = vsel %vm1179_vm3, %v1226_v38, %v1228_v26  ;;  %v1236_v2 = vrot.slane %v7805_v4, 4  ;;  %v1232_v0 = vsel %vm1179_vm3, %v1230_v58, %v1231_v41  ;;  %v1238_v8 = vrot.slane %v7809_v57, 4  ;;  %v16293_v38 = vld [vmem:[#allocation10_spill] sm:$0xff] }
  0xe3   : > { %v1234_v44 = vsel %vm1179_vm3, %v1231_v41, %v1233_v50  ;;  %v1240_v35 = vrot.slane %v7816_v52, 4  ;;  %v1241_v3 = vrot.slane %v7823_v61, 4  ;;  %v1243_v7 = vrot.slane %v7827_v48, 4 }
  0xe4   : > { %v1237_v24 = vsel %vm1179_vm3, %v1235_v36, %v1236_v2  ;;  %v1245_v56 = vrot.slane %v7834_v23, 4  ;;  %v1239_v14 = vsel %vm1179_vm3, %v1236_v2, %v1238_v8  ;;  %v1246_v4 = vrot.slane %v7841_v9, 4 }
  0xe5   : > { %v1248_v17 = vrot.slane %v7845_v59, 4  ;;  %v1250_v33 = vrot.slane %v7852_v51, 4  ;;  %v1242_v57 = vsel %vm1179_vm3, %v1240_v35, %v1241_v3  ;;  %v1244_v52 = vsel %vm1179_vm3, %v1241_v3, %v1243_v7 }
  0xe6   : > { %v1251_v53 = vrot.slane %v7859_v5, 4  ;;  %v1253_v61 = vrot.slane %v7863_v22, 4  ;;  %v1247_v48 = vsel %vm1179_vm3, %v1245_v56, %v1246_v4  ;;  %v1255_v34 = vrot.slane %v7867_v43, 4 }
  0xe7   : > { %v1249_v23 = vsel %vm1179_vm3, %v1246_v4, %v1248_v17  ;;  %v1256_v9 = vrot.slane %v7871_v28, 4  ;;  %v1258_v63 = vrot.slane %v7875_v25, 4  ;;  %v7973_v32 = vadd.f32 %v7885_v62, %v7461_v20 }
  0xe8   : > { %v1252_v59 = vsel %vm1179_vm3, %v1250_v33, %v1251_v53  ;;  %v1254_v51 = vsel %vm1179_vm3, %v1251_v53, %v1253_v61  ;;  %v7978_v5 = vadd.f32 %v7888_v6, %v7465_v30  ;;  %v7982_v43 = vadd.f32 %v7893_v31, %v7471_v47  ;;  %v16288_v30 = vld [vmem:[#allocation5_spill] sm:$0xff]  ;;  %v16289_v47 = vld [vmem:[#allocation6_spill] sm:$0xff] }
  0xe9   : > { %v1257_v22 = vsel %vm1179_vm3, %v1255_v34, %v1256_v9  ;;  %v7986_v28 = vadd.f32 %v7896_v16, %v7475_v1  ;;  %v1259_v25 = vsel %vm1179_vm3, %v1256_v9, %v1258_v63  ;;  %v7991_v20 = vadd.f32 %v7901_v42, %v7479_v46  ;;  %v16290_v1 = vld [vmem:[#allocation7_spill] sm:$0xff]  ;;  %v16292_v46 = vld [vmem:[#allocation9_spill] sm:$0xff]  ;;  %v16310_v33 = vld [vmem:[#allocation30_spill] sm:$0xff] }
  0xea   : > { %v7995_v62 = vadd.f32 %v7904_v19, %v7483_v29  ;;  %v7999_v6 = vadd.f32 %v7909_v60, %v16288_v30  ;;  %v8003_v31 = vadd.f32 %v7915_v13, %v16289_v47  ;;  %v8006_v16 = vadd.f32 %v1202_v49, %v16290_v1  ;;  %v16294_v19 = vld [vmem:[#allocation11_spill] sm:$0xff]  ;;  %v16295_v60 = vld [vmem:[#allocation12_spill] sm:$0xff]  ;;  %v16296_v13 = vld [vmem:[#allocation13_spill] sm:$0xff] }
  0xeb   : > { %v8009_v11 = vadd.f32 %v1204_v10, %v16291_v18  ;;  %v8012_v42 = vadd.f32 %v1207_v45, %v16292_v46  ;;  %v8015_v29 = vadd.f32 %v1209_v40, %v16293_v38  ;;  %v8018_v26 = vadd.f32 %v1212_v21, %v16294_v19  ;;  %v16297_v49 = vld [vmem:[#allocation14_spill] sm:$0xff]  ;;  %v16298_v10 = vld [vmem:[#allocation15_spill] sm:$0xff]  ;;  %v16299_v45 = vld [vmem:[#allocation16_spill] sm:$0xff] }
  0xec   : > { %v8021_v58 = vadd.f32 %v1214_v15, %v16295_v60  ;;  %v8024_v41 = vadd.f32 %v1217_v12, %v16296_v13  ;;  %v8027_v50 = vadd.f32 %v1219_v27, %v16297_v49  ;;  %v8030_v36 = vadd.f32 %v1222_v39, %v16298_v10  ;;  %v16300_v40 = vld [vmem:[#allocation19_spill] sm:$0xff]  ;;  %v5690_v21 = vld [vmem:[%s15337_s1 + $0x5] ss:$0 sm:$0xff]  ;;  %v16301_v15 = vld [vmem:[#allocation20_spill] sm:$0xff] }
  0xed   : > { %v8033_v2 = vadd.f32 %v1224_v55, %v16299_v45  ;;  %v8036_v8 = vadd.f32 %v1227_v54, %v16300_v40  ;;  %v8042_v35 = vadd.f32 %v1229_v37, %v16301_v15  ;;  %v16302_v12 = vld [vmem:[#allocation23_spill] sm:$0xff]  ;;  %v16303_v27 = vld [vmem:[#allocation24_spill] sm:$0xff]  ;;  %v16304_v39 = vld [vmem:[#allocation25_spill] sm:$0xff]  ;;  %v8060_v53 = vadd.f32 %v1244_v52, %v16310_v33 }
  0xee   : > { %v8045_v3 = vadd.f32 %v1232_v0, %v16302_v12  ;;  %v8048_v7 = vadd.f32 %v1234_v44, %v16303_v27  ;;  %v8051_v56 = vadd.f32 %v1237_v24, %v16304_v39  ;;  %v16306_v55 = vld [vmem:[#allocation28_spill] sm:$0xff]  ;;  %v16308_v54 = vld [vmem:[#allocation29_spill] sm:$0xff]  ;;  %v16316_v44 = vld [vmem:[#allocation34_spill] sm:$0xff] }
  0xef   : > { %v8054_v4 = vadd.f32 %v1239_v14, %v16306_v55  ;;  %v8057_v17 = vadd.f32 %v1242_v57, %v16308_v54  ;;  %16311 = vst [vmem:[#allocation69_spill] sm:$0xff] %v8060_v53  ;;  %v16312_v37 = vld [vmem:[#allocation37_spill] sm:$0xff]  ;;  %v8069_v9 = vadd.f32 %v1252_v59, %v16316_v44  ;;  %v16318_v24 = vld [vmem:[#allocation42_spill] sm:$0xff]  ;;  %v16322_v57 = vld [vmem:[#allocation39_spill] sm:$0xff] }
  0xf0   : > { %16305 = vst [vmem:[#allocation60_spill] sm:$0xff] %v8051_v56  ;;  %v8063_v61 = vadd.f32 %v1247_v48, %v16312_v37  ;;  %v16314_v0 = vld [vmem:[#allocation33_spill] sm:$0xff]  ;;  %v8072_v63 = vadd.f32 %v1254_v51, %v16318_v24  ;;  %v16320_v14 = vld [vmem:[#allocation38_spill] sm:$0xff]  ;;  %v8078_v47 = vadd.f32 %v1259_v25, %v16322_v57  ;;  %v16324_v52 = vld [vmem:[#allocation51_spill] sm:$0xff] }
  0xf1   : > { %16307 = vst [vmem:[#allocation64_spill] sm:$0xff] %v8054_v4  ;;  %16309 = vst [vmem:[#allocation65_spill] sm:$0xff] %v8057_v17  ;;  %v8066_v34 = vadd.f32 %v1249_v23, %v16314_v0  ;;  %v8075_v30 = vadd.f32 %v1257_v22, %v16320_v14  ;;  %v1330_v1 = vmul.f32 %v16324_v52, %v5690_v21  ;;  %v16325_v48 = vld [vmem:[#allocation43_spill] sm:$0xff]  ;;  %v16326_v46 = vld [vmem:[#allocation56_spill] sm:$0xff] }
  0xf2   : > { %16313 = vst [vmem:[#allocation70_spill] sm:$0xff] %v8063_v61  ;;  %16317 = vst [vmem:[#allocation75_spill] sm:$0xff] %v8069_v9  ;;  %v1331_v18 = vmul.f32 %v16325_v48, %v5690_v21  ;;  %v1332_v23 = vmul.f32 %v16326_v46, %v5690_v21  ;;  %v16327_v38 = vld [vmem:[#allocation47_spill] sm:$0xff]  ;;  %v16328_v59 = vld [vmem:[#allocation61_spill] sm:$0xff] }
  0xf3   : > { %16315 = vst [vmem:[#allocation74_spill] sm:$0xff] %v8066_v34  ;;  %16319 = vst [vmem:[#allocation77_spill] sm:$0xff] %v8072_v63  ;;  %v1333_v19 = vmul.f32 %v16327_v38, %v5690_v21  ;;  %v1334_v60 = vmul.f32 %v16328_v59, %v5690_v21  ;;  %v16329_v13 = vld [vmem:[#allocation52_spill] sm:$0xff]  ;;  %v16330_v49 = vld [vmem:[#allocation57_spill] sm:$0xff] }
  0xf4   : > { %16321 = vst [vmem:[#allocation78_spill] sm:$0xff] %v8075_v30  ;;  %16323 = vst [vmem:[#allocation66_spill] sm:$0xff] %v8078_v47  ;;  %v1335_v51 = vmul.f32 %v16329_v13, %v5690_v21  ;;  %v1336_v22 = vmul.f32 %v16330_v49, %v5690_v21  ;;  %v16331_v10 = vld [vmem:[#allocation58_spill] sm:$0xff]  ;;  %v16332_v25 = vld [vmem:[#allocation63_spill] sm:$0xff] }
  0xf5   : > { %v1337_v45 = vmul.f32 %v16331_v10, %v5690_v21  ;;  %v1338_v40 = vmul.f32 %v16332_v25, %v5690_v21  ;;  %v16333_v15 = vld [vmem:[#allocation67_spill] sm:$0xff]  ;;  %v16334_v27 = vld [vmem:[#allocation80_spill] sm:$0xff]  ;;  %v16335_v55 = vld [vmem:[#allocation81_spill] sm:$0xff] }
  0xf6   : > { %v1339_v12 = vmul.f32 %v16333_v15, %v5690_v21  ;;  %v1340_v39 = vmul.f32 %v16334_v27, %v5690_v21  ;;  %v1341_v54 = vmul.f32 %v16335_v55, %v5690_v21  ;;  %v16336_v33 = vld [vmem:[#allocation83_spill] sm:$0xff]  ;;  %v16337_v0 = vld [vmem:[#allocation17_spill] sm:$0xff]  ;;  %v16340_v49 = vld [vmem:[#allocation22_spill] sm:$0xff] }
  0xf7   : > { %v1342_v37 = vmul.f32 %v16336_v33, %v5690_v21  ;;  %v1343_v44 = vmul.f32 %v16337_v0, %v5690_v21  ;;  %v16338_v24 = vld [vmem:[#allocation21_spill] sm:$0xff]  ;;  %v1345_v13 = vmul.f32 %v16340_v49, %v5690_v21  ;;  %v16341_v10 = vld [vmem:[#allocation27_spill] sm:$0xff]  ;;  %v8103_v46 = vld [vmem:[%s6195_s3 + $0x188] sm:$0xff] }
  0xf8   : > { %v1344_v14 = vmul.f32 %v16338_v24, %v5690_v21  ;;  %v8096_v57 = vld [vmem:[%s6195_s3 + $0x180] sm:$0xff]  ;;  %v1346_v25 = vmul.f32 %v16341_v10, %v5690_v21  ;;  %v16342_v59 = vld [vmem:[#allocation31_spill] sm:$0xff]  ;;  %16344 = vst [vmem:[#allocation76_spill] sm:$0xff] %v8103_v46  ;;  %v16345_v55 = vld [vmem:[#allocation36_spill] sm:$0xff] }
  0xf9   : > { %16339 = vst [vmem:[#allocation71_spill] sm:$0xff] %v8096_v57  ;;  %v1347_v15 = vmul.f32 %v16342_v59, %v5690_v21  ;;  %v16343_v38 = vld [vmem:[#allocation35_spill] sm:$0xff]  ;;  %v1349_v33 = vmul.f32 %v16345_v55, %v5690_v21  ;;  %v16346_v48 = vld [vmem:[#allocation41_spill] sm:$0xff]  ;;  %v16348_v47 = vld [vmem:[#allocation46_spill] sm:$0xff] }
  0xfa   : > { %v1348_v27 = vmul.f32 %v16343_v38, %v5690_v21  ;;  %v1350_v0 = vmul.f32 %v16346_v48, %v5690_v21  ;;  %v16347_v52 = vld [vmem:[#allocation45_spill] sm:$0xff]  ;;  %v1352_v30 = vmul.f32 %v16348_v47, %v5690_v21  ;;  %v16350_v49 = vld [vmem:[#allocation50_spill] sm:$0xff]  ;;  %v16352_v53 = vld [vmem:[#allocation55_spill] sm:$0xff]  ;;  %v1360_v47 = vmul.f32 %v5690_v21, %v8096_v57 }
  0xfb   : > { %v1351_v24 = vmul.f32 %v16347_v52, %v5690_v21  ;;  %v16349_v63 = vld [vmem:[#allocation49_spill] sm:$0xff]  ;;  %v1354_v34 = vmul.f32 %v16350_v49, %v5690_v21  ;;  %v16351_v61 = vld [vmem:[#allocation54_spill] sm:$0xff]  ;;  %v1356_v59 = vmul.f32 %v16352_v53, %v5690_v21  ;;  %v16353_v17 = vld [vmem:[#allocation59_spill] sm:$0xff]  ;;  %v8125_v49 = vadd.f32 %v1330_v1, %v7973_v32 }
  0xfc   : > { %v1353_v9 = vmul.f32 %v16349_v63, %v5690_v21  ;;  %v1355_v10 = vmul.f32 %v16351_v61, %v5690_v21  ;;  %v1357_v38 = vmul.f32 %v16353_v17, %v5690_v21  ;;  %v8115_v4 = vld [vmem:[%s6195_s3 + $0x168] sm:$0xff]  ;;  %v8119_v56 = vld [vmem:[%s6195_s3 + $0x170] sm:$0xff]  ;;  %v1361_v63 = vmul.f32 %v5690_v21, %v8103_v46  ;;  %v16375_v1 = vld [vmem:[#allocation64_spill] sm:$0xff] }
  0xfd   : > { %16354 = vst [vmem:[#allocation79_spill] sm:$0xff] %v8115_v4  ;;  %v1358_v55 = vmul.f32 %v8115_v4, %v5690_v21  ;;  %16355 = vst [vmem:[#allocation72_spill] sm:$0xff] %v8119_v56  ;;  %v1359_v52 = vmul.f32 %v8119_v56, %v5690_v21  ;;  %v8128_v61 = vadd.f32 %v1331_v18, %v7978_v5  ;;  %v16377_v18 = vld [vmem:[#allocation65_spill] sm:$0xff] }
  0xfe   : > { %v8131_v17 = vadd.f32 %v1332_v23, %v7982_v43  ;;  %v8134_v53 = vadd.f32 %v1333_v19, %v7986_v28  ;;  %v8137_v4 = vadd.f32 %v1334_v60, %v7991_v20  ;;  %v8140_v56 = vadd.f32 %v1335_v51, %v7995_v62  ;;  %v16379_v19 = vld [vmem:[#allocation69_spill] sm:$0xff] }
  0xff   : > { %v8143_v21 = vadd.f32 %v1336_v22, %v7999_v6  ;;  %v8146_v32 = vadd.f32 %v1337_v45, %v8003_v31  ;;  %v8149_v5 = vadd.f32 %v1338_v40, %v8006_v16  ;;  %v8152_v43 = vadd.f32 %v1339_v12, %v8009_v11  ;;  %v16395_v12 = vld [vmem:[#allocation44_spill] sm:$0xff] }
 0x100   : > { %16356 = vst [vmem:[#allocation73_spill] sm:$0xff] %v8140_v56  ;;  %v8155_v28 = vadd.f32 %v1340_v39, %v8012_v42  ;;  %v8158_v20 = vadd.f32 %v1341_v54, %v8015_v29  ;;  %v8161_v62 = vadd.f32 %v1342_v37, %v8018_v26  ;;  %v8164_v6 = vadd.f32 %v1343_v44, %v8021_v58  ;;  %v8184_v26 = vld [vmem:[%s15337_s1 + $0x6] ss:$0 sm:$0xff] }
 0x101   : > { %16357 = vst [vmem:[#allocation5_spill] sm:$0xff] %v8143_v21  ;;  %16358 = vst [vmem:[#allocation6_spill] sm:$0xff] %v8146_v32  ;;  %v8167_v31 = vadd.f32 %v1344_v14, %v8024_v41  ;;  %v8170_v16 = vadd.f32 %v1345_v13, %v8027_v50  ;;  %v8173_v11 = vadd.f32 %v1346_v25, %v8030_v36  ;;  %v16373_v36 = vld [vmem:[#allocation60_spill] sm:$0xff] }
 0x102   : > { %16359 = vst [vmem:[#allocation7_spill] sm:$0xff] %v8149_v5  ;;  %16360 = vst [vmem:[#allocation8_spill] sm:$0xff] %v8152_v43  ;;  %v8176_v42 = vadd.f32 %v1347_v15, %v8033_v2  ;;  %v8179_v29 = vadd.f32 %v1348_v27, %v8036_v8  ;;  %v8187_v58 = vadd.f32 %v1349_v33, %v8042_v35  ;;  %v16381_v35 = vld [vmem:[#allocation70_spill] sm:$0xff]  ;;  %v16399_v33 = vld [vmem:[#allocation61_spill] sm:$0xff] }
 0x103   : > { %16361 = vst [vmem:[#allocation9_spill] sm:$0xff] %v8155_v28  ;;  %16362 = vst [vmem:[#allocation10_spill] sm:$0xff] %v8158_v20  ;;  %v8190_v41 = vadd.f32 %v1350_v0, %v8045_v3  ;;  %v8193_v50 = vadd.f32 %v1351_v24, %v8048_v7  ;;  %v8196_v2 = vadd.f32 %v1352_v30, %v16373_v36  ;;  %v16383_v3 = vld [vmem:[#allocation74_spill] sm:$0xff]  ;;  %v16385_v7 = vld [vmem:[#allocation75_spill] sm:$0xff] }
 0x104   : > { %16363 = vst [vmem:[#allocation11_spill] sm:$0xff] %v8161_v62  ;;  %16364 = vst [vmem:[#allocation12_spill] sm:$0xff] %v8164_v6  ;;  %v8199_v8 = vadd.f32 %v1353_v9, %v16375_v1  ;;  %v8202_v23 = vadd.f32 %v1354_v34, %v16377_v18  ;;  %v8205_v60 = vadd.f32 %v1355_v10, %v16379_v19  ;;  %v16387_v30 = vld [vmem:[#allocation77_spill] sm:$0xff]  ;;  %v16389_v9 = vld [vmem:[#allocation78_spill] sm:$0xff] }
 0x105   : > { %16365 = vst [vmem:[#allocation13_spill] sm:$0xff] %v8167_v31  ;;  %16366 = vst [vmem:[#allocation14_spill] sm:$0xff] %v8170_v16  ;;  %v8208_v13 = vadd.f32 %v1356_v59, %v16381_v35  ;;  %v8211_v51 = vadd.f32 %v1357_v38, %v16383_v3  ;;  %v8214_v22 = vadd.f32 %v1358_v55, %v16385_v7  ;;  %v16391_v34 = vld [vmem:[#allocation66_spill] sm:$0xff]  ;;  %v16393_v10 = vld [vmem:[#allocation51_spill] sm:$0xff] }
 0x106   : > { %16367 = vst [vmem:[#allocation15_spill] sm:$0xff] %v8173_v11  ;;  %16368 = vst [vmem:[#allocation16_spill] sm:$0xff] %v8176_v42  ;;  %v8217_v45 = vadd.f32 %v1359_v52, %v16387_v30  ;;  %v8220_v25 = vadd.f32 %v1360_v47, %v16389_v9  ;;  %v8223_v40 = vadd.f32 %v1361_v63, %v16391_v34  ;;  %v16394_v59 = vld [vmem:[#allocation43_spill] sm:$0xff]  ;;  %v16396_v52 = vld [vmem:[#allocation56_spill] sm:$0xff] }
 0x107   : > { %16369 = vst [vmem:[#allocation19_spill] sm:$0xff] %v8179_v29  ;;  %16370 = vst [vmem:[#allocation20_spill] sm:$0xff] %v8187_v58  ;;  %v8227_v15 = vmul.f32 %v16393_v10, %v8184_v26  ;;  %v8231_v38 = vmul.f32 %v16394_v59, %v8184_v26  ;;  %v1402_v27 = vmul.f32 %v16395_v12, %v8184_v26  ;;  %v16397_v47 = vld [vmem:[#allocation47_spill] sm:$0xff]  ;;  %v16398_v63 = vld [vmem:[#allocation48_spill] sm:$0xff] }
 0x108   : > { %16371 = vst [vmem:[#allocation23_spill] sm:$0xff] %v8190_v41  ;;  %16372 = vst [vmem:[#allocation24_spill] sm:$0xff] %v8193_v50  ;;  %v8237_v39 = vmul.f32 %v16396_v52, %v8184_v26  ;;  %v8241_v55 = vmul.f32 %v16397_v47, %v8184_v26  ;;  %v8245_v54 = vmul.f32 %v16398_v63, %v8184_v26  ;;  %v16400_v0 = vld [vmem:[#allocation52_spill] sm:$0xff]  ;;  %v16401_v24 = vld [vmem:[#allocation53_spill] sm:$0xff] }
 0x109   : > { %16374 = vst [vmem:[#allocation25_spill] sm:$0xff] %v8196_v2  ;;  %16376 = vst [vmem:[#allocation28_spill] sm:$0xff] %v8199_v8  ;;  %v8249_v37 = vmul.f32 %v16399_v33, %v8184_v26  ;;  %v8253_v44 = vmul.f32 %v16400_v0, %v8184_v26  ;;  %v8257_v14 = vmul.f32 %v16401_v24, %v8184_v26  ;;  %v16402_v36 = vld [vmem:[#allocation57_spill] sm:$0xff]  ;;  %v16403_v18 = vld [vmem:[#allocation58_spill] sm:$0xff]  ;;  %v1497_v43 = vrot.slane %v8231_v38, 1 }
 0x10a   : > { %16378 = vst [vmem:[#allocation29_spill] sm:$0xff] %v8202_v23  ;;  %16380 = vst [vmem:[#allocation30_spill] sm:$0xff] %v8205_v60  ;;  %v8261_v1 = vmul.f32 %v16402_v36, %v8184_v26  ;;  %v8265_v19 = vmul.f32 %v16403_v18, %v8184_v26  ;;  %v16404_v35 = vld [vmem:[#allocation62_spill] sm:$0xff]  ;;  %v16405_v7 = vld [vmem:[#allocation63_spill] sm:$0xff]  ;;  %v8423_v28 = vmul.f32 %v8184_v26, %v8096_v57  ;;  %v1499_v5 = vrot.slane %v1402_v27, 1 }
 0x10b   : > { %16382 = vst [vmem:[#allocation37_spill] sm:$0xff] %v8208_v13  ;;  %16384 = vst [vmem:[#allocation33_spill] sm:$0xff] %v8211_v51  ;;  %v8269_v3 = vmul.f32 %v16404_v35, %v8184_v26  ;;  %v8273_v30 = vmul.f32 %v16405_v7, %v8184_v26  ;;  %v16406_v9 = vld [vmem:[#allocation67_spill] sm:$0xff]  ;;  %v16407_v24 = vld [vmem:[#allocation68_spill] sm:$0xff]  ;;  %v1502_v32 = vrot.slane %v8241_v55, 1  ;;  %v1504_v57 = vrot.slane %v8245_v54, 1 }
 0x10c   : > { %16386 = vst [vmem:[#allocation34_spill] sm:$0xff] %v8214_v22  ;;  %16388 = vst [vmem:[#allocation42_spill] sm:$0xff] %v8217_v45  ;;  %v8277_v34 = vmul.f32 %v16406_v9, %v8184_v26  ;;  %v8281_v36 = vmul.f32 %v16407_v24, %v8184_v26  ;;  %v16408_v0 = vld [vmem:[#allocation80_spill] sm:$0xff]  ;;  %v16409_v33 = vld [vmem:[#allocation81_spill] sm:$0xff]  ;;  %v1506_v21 = vrot.slane %v8249_v37, 1  ;;  %v8443_v56 = vsel %vm438_vm0, %v1497_v43, %v1499_v5 }
 0x10d   : > { %16390 = vst [vmem:[#allocation38_spill] sm:$0xff] %v8220_v25  ;;  %16392 = vst [vmem:[#allocation39_spill] sm:$0xff] %v8223_v40  ;;  %v8285_v18 = vmul.f32 %v16408_v0, %v8184_v26  ;;  %v8289_v35 = vmul.f32 %v16409_v33, %v8184_v26  ;;  %v16410_v63 = vld [vmem:[#allocation82_spill] sm:$0xff]  ;;  %v16411_v9 = vld [vmem:[#allocation83_spill] sm:$0xff]  ;;  %v8451_v27 = vsel %vm438_vm0, %v1502_v32, %v1504_v57  ;;  %v1512_v55 = vrot.slane %v8265_v19, 1 }
 0x10e   : > { %v8293_v7 = vmul.f32 %v16410_v63, %v8184_v26  ;;  %v8297_v47 = vmul.f32 %v16411_v9, %v8184_v26  ;;  %v16412_v24 = vld [vmem:[#allocation17_spill] sm:$0xff]  ;;  %v16413_v0 = vld [vmem:[#allocation18_spill] sm:$0xff]  ;;  %v8352_v8 = vld [vmem:[%s6195_s3 + $0x118] sm:$0xf]  ;;  %v1516_v54 = vrot.slane %v8273_v30, 1  ;;  %v1517_v57 = vrot.slane %v8277_v34, 1 }
 0x10f   : > { %v8301_v52 = vmul.f32 %v16412_v24, %v8184_v26  ;;  %v8305_v12 = vmul.f32 %v16413_v0, %v8184_v26  ;;  %v16414_v33 = vld [vmem:[#allocation21_spill] sm:$0xff]  ;;  %v16415_v63 = vld [vmem:[#allocation22_spill] sm:$0xff]  ;;  %v16417_v24 = vld [vmem:[#allocation27_spill] sm:$0xff]  ;;  %16424 = vst [vmem:[#allocation60_spill] sm:$0xff] %v8352_v8  ;;  %v1521_v37 = vrot.slane %v8285_v18, 1 }
 0x110   : > { %v8309_v59 = vmul.f32 %v16414_v33, %v8184_v26  ;;  %v8313_v10 = vmul.f32 %v16415_v63, %v8184_v26  ;;  %v16416_v9 = vld [vmem:[#allocation26_spill] sm:$0xff]  ;;  %v8321_v25 = vmul.f32 %v16417_v24, %v8184_v26  ;;  %v16418_v0 = vld [vmem:[#allocation31_spill] sm:$0xff]  ;;  %v16419_v33 = vld [vmem:[#allocation32_spill] sm:$0xff]  ;;  %v1518_v19 = vsel %vm438_vm0, %v1516_v54, %v1517_v57 }
 0x111   : > { %v8317_v40 = vmul.f32 %v16416_v9, %v8184_v26  ;;  %v8325_v45 = vmul.f32 %v16418_v0, %v8184_v26  ;;  %v8329_v22 = vmul.f32 %v16419_v33, %v8184_v26  ;;  %v16420_v63 = vld [vmem:[#allocation35_spill] sm:$0xff]  ;;  %v16421_v9 = vld [vmem:[#allocation36_spill] sm:$0xff]  ;;  %v8345_v0 = vmul.f32 %v16346_v48, %v8184_v26  ;;  %v16423_v33 = vld [vmem:[#allocation45_spill] sm:$0xff] }
 0x112   : > { %v8333_v51 = vmul.f32 %v16420_v63, %v8184_v26  ;;  %v8337_v13 = vmul.f32 %v16421_v9, %v8184_v26  ;;  %v16422_v24 = vld [vmem:[#allocation40_spill] sm:$0xff]  ;;  %v8349_v23 = vmul.f32 %v16423_v33, %v8184_v26  ;;  %v8356_v63 = vmul.f32 %v8352_v8, %v8184_v26  ;;  %v16425_v9 = vld [vmem:[#allocation46_spill] sm:$0xff]  ;;  %v16426_v2 = vld [vmem:[#allocation49_spill] sm:$0xff] }
 0x113   : > { %v8341_v60 = vmul.f32 %v16422_v24, %v8184_v26  ;;  %v8360_v24 = vmul.f32 %v16425_v9, %v8184_v26  ;;  %v8364_v50 = vmul.f32 %v16426_v2, %v8184_v26  ;;  %v8367_v48 = vld [vmem:[%s6195_s3 + $0x190] sm:$0xf]  ;;  %v16428_v8 = vld [vmem:[#allocation50_spill] sm:$0xff]  ;;  %v1527_v30 = vrot.slane %v8301_v52, 1 }
 0x114   : > { %v8370_v41 = vld [vmem:[%s6195_s3 + $0x130] sm:$0xf]  ;;  %v8378_v58 = vmul.f32 %v16428_v8, %v8184_v26  ;;  %v16429_v29 = vld [vmem:[#allocation54_spill] sm:$0xff]  ;;  %v8400_v8 = vld [vmem:[%s6195_s3 + $0x160] sm:$0xf]  ;;  %v1529_v34 = vrot.slane %v8305_v12, 1 }
 0x115   : > { %16427 = vst [vmem:[#allocation64_spill] sm:$0xff] %v8370_v41  ;;  %v8374_v33 = vmul.f32 %v8370_v41, %v8184_v26  ;;  %v8382_v9 = vmul.f32 %v16429_v29, %v8184_v26  ;;  %v8385_v42 = vld [vmem:[%s6195_s3 + $0x148] sm:$0xf]  ;;  %v16431_v11 = vld [vmem:[#allocation55_spill] sm:$0xff]  ;;  %16433 = vst [vmem:[#allocation69_spill] sm:$0xff] %v8400_v8  ;;  %v8404_v29 = vmul.f32 %v8400_v8, %v8184_v26  ;;  %v1537_v12 = vrot.slane %v8325_v45, 1 }
 0x116   : > { %16430 = vst [vmem:[#allocation65_spill] sm:$0xff] %v8385_v42  ;;  %v8389_v2 = vmul.f32 %v8385_v42, %v8184_v26  ;;  %v8393_v16 = vmul.f32 %v16431_v11, %v8184_v26  ;;  %v16432_v41 = vld [vmem:[#allocation59_spill] sm:$0xff]  ;;  %v16435_v42 = vld [vmem:[#allocation72_spill] sm:$0xff]  ;;  %v8427_v8 = vmul.f32 %v8184_v26, %v8103_v46  ;;  %v1544_v54 = vrot.slane %v8341_v60, 1 }
 0x117   : > { %v8397_v31 = vmul.f32 %v16432_v41, %v8184_v26  ;;  %v16434_v6 = vld [vmem:[#allocation79_spill] sm:$0xff]  ;;  %v8412_v20 = vmul.f32 %v16435_v42, %v8184_v26  ;;  %v8415_v11 = vld [vmem:[%s6195_s3 + $0x178] sm:$0xf]  ;;  %v1496_v42 = vrot.slane %v8227_v15, 1  ;;  %v1509_v15 = vrot.slane %v8257_v14, 1 }
 0x118   : > { %v8408_v62 = vmul.f32 %v16434_v6, %v8184_v26  ;;  %16436 = vst [vmem:[#allocation70_spill] sm:$0xff] %v8415_v11  ;;  %v8419_v41 = vmul.f32 %v8415_v11, %v8184_v26  ;;  %v8431_v6 = vmul.f32 %v8184_v26, %v8367_v48  ;;  %v1501_v11 = vrot.slane %v8237_v39, 1 }
 0x119   : > { %v8440_v46 = vsel %vm438_vm0, %v1496_v42, %v1497_v43  ;;  %v1507_v26 = vrot.slane %v8253_v44, 1  ;;  %v1511_v39 = vrot.slane %v8261_v1, 1  ;;  %v1514_v43 = vrot.slane %v8269_v3, 1 }
 0x11a   : > { %v8448_v38 = vsel %vm438_vm0, %v1501_v11, %v1502_v32  ;;  %v1519_v32 = vrot.slane %v8281_v36, 1  ;;  %v1524_v14 = vrot.slane %v8293_v7, 1  ;;  %v1526_v1 = vrot.slane %v8297_v47, 1 }
 0x11b   : > { %v8456_v42 = vsel %vm438_vm0, %v1506_v21, %v1507_v26  ;;  %v8459_v5 = vsel %vm438_vm0, %v1507_v26, %v1509_v15  ;;  %v8464_v11 = vsel %vm438_vm0, %v1511_v39, %v1512_v55  ;;  %v8470_v44 = vsel %vm438_vm0, %v1512_v55, %v1514_v43 }
 0x11c   : > { %v1522_v21 = vrot.slane %v8289_v35, 1  ;;  %v1520_v3 = vsel %vm438_vm0, %v1517_v57, %v1519_v32  ;;  %v1531_v26 = vrot.slane %v8309_v59, 1  ;;  %v1532_v35 = vrot.slane %v8313_v10, 1 }
 0x11d   : > { %v1528_v7 = vsel %vm438_vm0, %v1526_v1, %v1527_v30  ;;  %v1530_v47 = vsel %vm438_vm0, %v1527_v30, %v1529_v34  ;;  %v1534_v15 = vrot.slane %v8317_v40, 1  ;;  %v1536_v39 = vrot.slane %v8321_v25, 1 }
 0x11e   : > { %v1523_v36 = vsel %vm438_vm0, %v1521_v37, %v1522_v21  ;;  %v1525_v18 = vsel %vm438_vm0, %v1522_v21, %v1524_v14  ;;  %v1533_v52 = vsel %vm438_vm0, %v1531_v26, %v1532_v35  ;;  %v1539_v55 = vrot.slane %v8329_v22, 1 }
 0x11f   : > { %v1541_v43 = vrot.slane %v8333_v51, 1  ;;  %v1535_v59 = vsel %vm438_vm0, %v1532_v35, %v1534_v15  ;;  %v1542_v10 = vrot.slane %v8337_v13, 1  ;;  %v1546_v57 = vrot.slane %v8345_v0, 1 }
 0x120   : > { %v1538_v40 = vsel %vm438_vm0, %v1536_v39, %v1537_v12  ;;  %v1540_v25 = vsel %vm438_vm0, %v1537_v12, %v1539_v55  ;;  %v1547_v32 = vrot.slane %v8349_v23, 1  ;;  %v1549_v45 = vrot.slane %v8356_v63, 1 }
 0x121   : > { %v1543_v22 = vsel %vm438_vm0, %v1541_v43, %v1542_v10  ;;  %v1545_v51 = vsel %vm438_vm0, %v1542_v10, %v1544_v54  ;;  %v1551_v37 = vrot.slane %v8360_v24, 1  ;;  %v1552_v13 = vrot.slane %v8364_v50, 1  ;;  %v16448_v43 = vld [vmem:[#allocation8_spill] sm:$0xff]  ;;  %v16452_v54 = vld [vmem:[#allocation10_spill] sm:$0xff] }
 0x122   : > { %v1548_v60 = vsel %vm438_vm0, %v1546_v57, %v1547_v32  ;;  %v1550_v0 = vsel %vm438_vm0, %v1547_v32, %v1549_v45  ;;  %v1554_v21 = vrot.slane %v8374_v33, 1  ;;  %v1556_v14 = vrot.slane %v8378_v58, 1  ;;  %v16454_v57 = vld [vmem:[#allocation11_spill] sm:$0xff] }
 0x123   : > { %v1553_v23 = vsel %vm438_vm0, %v1551_v37, %v1552_v13  ;;  %v1557_v63 = vrot.slane %v8382_v9, 1  ;;  %v1559_v1 = vrot.slane %v8389_v2, 1  ;;  %v1561_v30 = vrot.slane %v8393_v16, 1 }
 0x124   : > { %v1555_v24 = vsel %vm438_vm0, %v1552_v13, %v1554_v21  ;;  %v1562_v50 = vrot.slane %v8397_v31, 1  ;;  %v1564_v34 = vrot.slane %v8404_v29, 1  ;;  %v1566_v26 = vrot.slane %v8408_v62, 1 }
 0x125   : > { %v1558_v33 = vsel %vm438_vm0, %v1556_v14, %v1557_v63  ;;  %v1560_v58 = vsel %vm438_vm0, %v1557_v63, %v1559_v1  ;;  %v1567_v35 = vrot.slane %v8412_v20, 1  ;;  %v1569_v9 = vrot.slane %v8419_v41, 1 }
 0x126   : > { %v1563_v2 = vsel %vm438_vm0, %v1561_v30, %v1562_v50  ;;  %v1565_v16 = vsel %vm438_vm0, %v1562_v50, %v1564_v34  ;;  %v1571_v15 = vrot.slane %v8423_v28, 1  ;;  %v1572_v31 = vrot.slane %v8427_v8, 1 }
 0x127   : > { %v1568_v29 = vsel %vm438_vm0, %v1566_v26, %v1567_v35  ;;  %v1570_v62 = vsel %vm438_vm0, %v1567_v35, %v1569_v9  ;;  %v1574_v39 = vrot.slane %v8431_v6, 1  ;;  %v8528_v12 = vadd.f32 %v8440_v46, %v8125_v49  ;;  %v16440_v49 = vld [vmem:[#allocation73_spill] sm:$0xff]  ;;  %v16480_v9 = vld [vmem:[#allocation30_spill] sm:$0xff] }
 0x128   : > { %v1573_v20 = vsel %vm438_vm0, %v1571_v15, %v1572_v31  ;;  %v8533_v41 = vadd.f32 %v8443_v56, %v8128_v61  ;;  %v8537_v28 = vadd.f32 %v8448_v38, %v8131_v17  ;;  %v8541_v8 = vadd.f32 %v8451_v27, %v8134_v53  ;;  %v16442_v56 = vld [vmem:[#allocation5_spill] sm:$0xff]  ;;  %v16444_v17 = vld [vmem:[#allocation6_spill] sm:$0xff]  ;;  %v16446_v53 = vld [vmem:[#allocation7_spill] sm:$0xff] }
 0x129   : > { %v1575_v6 = vsel %vm438_vm0, %v1572_v31, %v1574_v39  ;;  %v8546_v46 = vadd.f32 %v8456_v42, %v8137_v4  ;;  %v8550_v55 = vadd.f32 %v8459_v5, %v16440_v49  ;;  %v8554_v61 = vadd.f32 %v8464_v11, %v16442_v56  ;;  %v16450_v4 = vld [vmem:[#allocation9_spill] sm:$0xff]  ;;  %v16456_v11 = vld [vmem:[#allocation12_spill] sm:$0xff] }
 0x12a   : > { %16437 = vst [vmem:[#allocation74_spill] sm:$0xff] %v8537_v28  ;;  %16438 = vst [vmem:[#allocation75_spill] sm:$0xff] %v8541_v8  ;;  %v8558_v38 = vadd.f32 %v8470_v44, %v16444_v17  ;;  %v8561_v27 = vadd.f32 %v1518_v19, %v16446_v53  ;;  %v8564_v10 = vadd.f32 %v1520_v3, %v16448_v43  ;;  %v16458_v44 = vld [vmem:[#allocation13_spill] sm:$0xff]  ;;  %v16460_v19 = vld [vmem:[#allocation14_spill] sm:$0xff] }
 0x12b   : > { %16439 = vst [vmem:[#allocation77_spill] sm:$0xff] %v8546_v46  ;;  %16441 = vst [vmem:[#allocation78_spill] sm:$0xff] %v8550_v55  ;;  %v8567_v42 = vadd.f32 %v1523_v36, %v16450_v4  ;;  %v8570_v5 = vadd.f32 %v1525_v18, %v16452_v54  ;;  %v8573_v32 = vadd.f32 %v1528_v7, %v16454_v57  ;;  %v16462_v3 = vld [vmem:[#allocation15_spill] sm:$0xff]  ;;  %v16464_v36 = vld [vmem:[#allocation16_spill] sm:$0xff] }
 0x12c   : > { %16443 = vst [vmem:[#allocation66_spill] sm:$0xff] %v8554_v61  ;;  %16445 = vst [vmem:[#allocation73_spill] sm:$0xff] %v8558_v38  ;;  %v8576_v45 = vadd.f32 %v1530_v47, %v16456_v11  ;;  %v8579_v37 = vadd.f32 %v1533_v52, %v16458_v44  ;;  %v8582_v13 = vadd.f32 %v1535_v59, %v16460_v19  ;;  %v16466_v18 = vld [vmem:[#allocation19_spill] sm:$0xff]  ;;  %v5692_v7 = vld [vmem:[%s15337_s1 + $0x7] ss:$0 sm:$0xff] }
 0x12d   : > { %16447 = vst [vmem:[#allocation5_spill] sm:$0xff] %v8561_v27  ;;  %16449 = vst [vmem:[#allocation6_spill] sm:$0xff] %v8564_v10  ;;  %v8585_v21 = vadd.f32 %v1538_v40, %v16462_v3  ;;  %v8588_v14 = vadd.f32 %v1540_v25, %v16464_v36  ;;  %v8591_v63 = vadd.f32 %v1543_v22, %v16466_v18  ;;  %v16468_v47 = vld [vmem:[#allocation20_spill] sm:$0xff]  ;;  %v16470_v52 = vld [vmem:[#allocation23_spill] sm:$0xff] }
 0x12e   : > { %16451 = vst [vmem:[#allocation7_spill] sm:$0xff] %v8567_v42  ;;  %16453 = vst [vmem:[#allocation8_spill] sm:$0xff] %v8570_v5  ;;  %v8597_v1 = vadd.f32 %v1545_v51, %v16468_v47  ;;  %v8600_v30 = vadd.f32 %v1548_v60, %v16470_v52  ;;  %v16472_v59 = vld [vmem:[#allocation24_spill] sm:$0xff]  ;;  %v16474_v40 = vld [vmem:[#allocation25_spill] sm:$0xff]  ;;  %v8615_v15 = vadd.f32 %v1560_v58, %v16480_v9 }
 0x12f   : > { %16455 = vst [vmem:[#allocation9_spill] sm:$0xff] %v8573_v32  ;;  %16457 = vst [vmem:[#allocation10_spill] sm:$0xff] %v8576_v45  ;;  %v8603_v50 = vadd.f32 %v1550_v0, %v16472_v59  ;;  %v8606_v34 = vadd.f32 %v1553_v23, %v16474_v40  ;;  %v16476_v25 = vld [vmem:[#allocation28_spill] sm:$0xff]  ;;  %v16478_v22 = vld [vmem:[#allocation29_spill] sm:$0xff] }
 0x130   : > { %16459 = vst [vmem:[#allocation11_spill] sm:$0xff] %v8579_v37  ;;  %16461 = vst [vmem:[#allocation12_spill] sm:$0xff] %v8582_v13  ;;  %v8609_v26 = vadd.f32 %v1555_v24, %v16476_v25  ;;  %v8612_v35 = vadd.f32 %v1558_v33, %v16478_v22  ;;  %v16482_v51 = vld [vmem:[#allocation37_spill] sm:$0xff]  ;;  %v16486_v0 = vld [vmem:[#allocation34_spill] sm:$0xff] }
 0x131   : > { %16463 = vst [vmem:[#allocation13_spill] sm:$0xff] %v8585_v21  ;;  %16465 = vst [vmem:[#allocation14_spill] sm:$0xff] %v8588_v14  ;;  %v8618_v31 = vadd.f32 %v1563_v2, %v16482_v51  ;;  %v16484_v60 = vld [vmem:[#allocation33_spill] sm:$0xff]  ;;  %v8624_v49 = vadd.f32 %v1568_v29, %v16486_v0  ;;  %v16488_v23 = vld [vmem:[#allocation42_spill] sm:$0xff] }
 0x132   : > { %16467 = vst [vmem:[#allocation15_spill] sm:$0xff] %v8591_v63  ;;  %16469 = vst [vmem:[#allocation16_spill] sm:$0xff] %v8597_v1  ;;  %v8621_v39 = vadd.f32 %v1565_v16, %v16484_v60  ;;  %v8627_v56 = vadd.f32 %v1570_v62, %v16488_v23  ;;  %v16490_v24 = vld [vmem:[#allocation38_spill] sm:$0xff]  ;;  %v16492_v33 = vld [vmem:[#allocation39_spill] sm:$0xff] }
 0x133   : > { %16471 = vst [vmem:[#allocation19_spill] sm:$0xff] %v8600_v30  ;;  %16473 = vst [vmem:[#allocation20_spill] sm:$0xff] %v8603_v50  ;;  %v8630_v17 = vadd.f32 %v1573_v20, %v16490_v24  ;;  %v8633_v53 = vadd.f32 %v1575_v6, %v16492_v33  ;;  %v16494_v58 = vld [vmem:[#allocation51_spill] sm:$0xff]  ;;  %v16496_v54 = vld [vmem:[#allocation44_spill] sm:$0xff] }
 0x134   : > { %16475 = vst [vmem:[#allocation23_spill] sm:$0xff] %v8606_v34  ;;  %16477 = vst [vmem:[#allocation24_spill] sm:$0xff] %v8609_v26  ;;  %v1646_v43 = vmul.f32 %v16494_v58, %v5692_v7  ;;  %v16495_v4 = vld [vmem:[#allocation43_spill] sm:$0xff]  ;;  %v1648_v57 = vmul.f32 %v16496_v54, %v5692_v7  ;;  %v16497_v16 = vld [vmem:[#allocation56_spill] sm:$0xff] }
 0x135   : > { %16479 = vst [vmem:[#allocation25_spill] sm:$0xff] %v8612_v35  ;;  %16481 = vst [vmem:[#allocation28_spill] sm:$0xff] %v8615_v15  ;;  %v1647_v2 = vmul.f32 %v16495_v4, %v5692_v7  ;;  %v1649_v11 = vmul.f32 %v16497_v16, %v5692_v7  ;;  %v16498_v44 = vld [vmem:[#allocation47_spill] sm:$0xff]  ;;  %v16499_v19 = vld [vmem:[#allocation48_spill] sm:$0xff] }
 0x136   : > { %16483 = vst [vmem:[#allocation29_spill] sm:$0xff] %v8618_v31  ;;  %16485 = vst [vmem:[#allocation30_spill] sm:$0xff] %v8621_v39  ;;  %v1650_v29 = vmul.f32 %v16498_v44, %v5692_v7  ;;  %v1651_v3 = vmul.f32 %v16499_v19, %v5692_v7  ;;  %v16500_v62 = vld [vmem:[#allocation61_spill] sm:$0xff]  ;;  %v16501_v18 = vld [vmem:[#allocation52_spill] sm:$0xff]  ;;  %v1745_v61 = vrot.slane %v1648_v57, 2 }
 0x137   : > { %16487 = vst [vmem:[#allocation37_spill] sm:$0xff] %v8624_v49  ;;  %16489 = vst [vmem:[#allocation33_spill] sm:$0xff] %v8627_v56  ;;  %v1652_v36 = vmul.f32 %v16500_v62, %v5692_v7  ;;  %v1653_v20 = vmul.f32 %v16501_v18, %v5692_v7  ;;  %v16502_v47 = vld [vmem:[#allocation53_spill] sm:$0xff]  ;;  %v16504_v40 = vld [vmem:[#allocation58_spill] sm:$0xff]  ;;  %v1743_v38 = vrot.slane %v1647_v2, 2 }
 0x138   : > { %16491 = vst [vmem:[#allocation34_spill] sm:$0xff] %v8630_v17  ;;  %16493 = vst [vmem:[#allocation42_spill] sm:$0xff] %v8633_v53  ;;  %v1654_v52 = vmul.f32 %v16502_v47, %v5692_v7  ;;  %v16503_v6 = vld [vmem:[#allocation57_spill] sm:$0xff]  ;;  %v8646_v25 = vmul.f32 %v16504_v40, %v5692_v7  ;;  %v16505_v22 = vld [vmem:[#allocation62_spill] sm:$0xff]  ;;  %v1748_v55 = vrot.slane %v1650_v29, 2  ;;  %v1750_v46 = vrot.slane %v1651_v3, 2 }
 0x139   : > { %v1655_v59 = vmul.f32 %v16503_v6, %v5692_v7  ;;  %v1657_v9 = vmul.f32 %v16505_v22, %v5692_v7  ;;  %v16506_v51 = vld [vmem:[#allocation63_spill] sm:$0xff]  ;;  %v16508_v24 = vld [vmem:[#allocation68_spill] sm:$0xff]  ;;  %v16510_v54 = vld [vmem:[#allocation81_spill] sm:$0xff] }
 0x13a   : > { %v8650_v60 = vmul.f32 %v16506_v51, %v5692_v7  ;;  %v16507_v0 = vld [vmem:[#allocation67_spill] sm:$0xff]  ;;  %v8656_v33 = vmul.f32 %v16508_v24, %v5692_v7  ;;  %v16509_v58 = vld [vmem:[#allocation80_spill] sm:$0xff]  ;;  %v8662_v16 = vmul.f32 %v16510_v54, %v5692_v7  ;;  %v16511_v44 = vld [vmem:[#allocation82_spill] sm:$0xff]  ;;  %v1755_v28 = vrot.slane %v1654_v52, 2 }
 0x13b   : > { %v8653_v23 = vmul.f32 %v16507_v0, %v5692_v7  ;;  %v8659_v4 = vmul.f32 %v16509_v58, %v5692_v7  ;;  %v8665_v19 = vmul.f32 %v16511_v44, %v5692_v7  ;;  %v16512_v62 = vld [vmem:[#allocation83_spill] sm:$0xff]  ;;  %v16513_v47 = vld [vmem:[#allocation17_spill] sm:$0xff]  ;;  %v16514_v40 = vld [vmem:[#allocation18_spill] sm:$0xff]  ;;  %v1758_v2 = vrot.slane %v8646_v25, 2 }
 0x13c   : > { %v8668_v18 = vmul.f32 %v16512_v62, %v5692_v7  ;;  %v8671_v6 = vmul.f32 %v16513_v47, %v5692_v7  ;;  %v8674_v22 = vmul.f32 %v16514_v40, %v5692_v7  ;;  %v16515_v51 = vld [vmem:[#allocation21_spill] sm:$0xff]  ;;  %v16516_v24 = vld [vmem:[#allocation22_spill] sm:$0xff]  ;;  %v16518_v44 = vld [vmem:[#allocation27_spill] sm:$0xff]  ;;  %v1760_v29 = vrot.slane %v1657_v9, 2 }
 0x13d   : > { %v8677_v0 = vmul.f32 %v16515_v51, %v5692_v7  ;;  %v8680_v58 = vmul.f32 %v16516_v24, %v5692_v7  ;;  %v16517_v54 = vld [vmem:[#allocation26_spill] sm:$0xff]  ;;  %v8686_v17 = vmul.f32 %v16518_v44, %v5692_v7  ;;  %v16519_v62 = vld [vmem:[#allocation31_spill] sm:$0xff]  ;;  %v16520_v47 = vld [vmem:[#allocation32_spill] sm:$0xff]  ;;  %v1763_v3 = vrot.slane %v8653_v23, 2 }
 0x13e   : > { %v8683_v53 = vmul.f32 %v16517_v54, %v5692_v7  ;;  %v8689_v56 = vmul.f32 %v16519_v62, %v5692_v7  ;;  %v8692_v49 = vmul.f32 %v16520_v47, %v5692_v7  ;;  %v16521_v40 = vld [vmem:[#allocation35_spill] sm:$0xff]  ;;  %v16522_v51 = vld [vmem:[#allocation36_spill] sm:$0xff]  ;;  %v16524_v54 = vld [vmem:[#allocation41_spill] sm:$0xff]  ;;  %v1772_v52 = vrot.slane %v8668_v18, 2 }
 0x13f   : > { %v8695_v39 = vmul.f32 %v16521_v40, %v5692_v7  ;;  %v8698_v31 = vmul.f32 %v16522_v51, %v5692_v7  ;;  %v16523_v24 = vld [vmem:[#allocation40_spill] sm:$0xff]  ;;  %v8704_v35 = vmul.f32 %v16524_v54, %v5692_v7  ;;  %v16525_v44 = vld [vmem:[#allocation45_spill] sm:$0xff]  ;;  %v16527_v47 = vld [vmem:[#allocation46_spill] sm:$0xff]  ;;  %v1773_v9 = vrot.slane %v8671_v6, 2 }
 0x140   : > { %v8701_v15 = vmul.f32 %v16523_v24, %v5692_v7  ;;  %v8707_v26 = vmul.f32 %v16525_v44, %v5692_v7  ;;  %v16526_v62 = vld [vmem:[#allocation60_spill] sm:$0xff]  ;;  %v8713_v50 = vmul.f32 %v16527_v47, %v5692_v7  ;;  %v16528_v40 = vld [vmem:[#allocation49_spill] sm:$0xff]  ;;  %v16530_v24 = vld [vmem:[#allocation50_spill] sm:$0xff] }
 0x141   : > { %v8710_v34 = vmul.f32 %v16526_v62, %v5692_v7  ;;  %v8716_v30 = vmul.f32 %v16528_v40, %v5692_v7  ;;  %v16529_v51 = vld [vmem:[#allocation64_spill] sm:$0xff]  ;;  %v8722_v63 = vmul.f32 %v16530_v24, %v5692_v7  ;;  %v16531_v54 = vld [vmem:[#allocation54_spill] sm:$0xff]  ;;  %v16532_v44 = vld [vmem:[#allocation65_spill] sm:$0xff] }
 0x142   : > { %v8719_v1 = vmul.f32 %v16529_v51, %v5692_v7  ;;  %v8725_v14 = vmul.f32 %v16531_v54, %v5692_v7  ;;  %v8728_v21 = vmul.f32 %v16532_v44, %v5692_v7  ;;  %v16533_v62 = vld [vmem:[#allocation55_spill] sm:$0xff]  ;;  %v16535_v40 = vld [vmem:[#allocation69_spill] sm:$0xff]  ;;  %v16537_v24 = vld [vmem:[#allocation72_spill] sm:$0xff] }
 0x143   : > { %v8731_v13 = vmul.f32 %v16533_v62, %v5692_v7  ;;  %v16534_v47 = vld [vmem:[#allocation59_spill] sm:$0xff]  ;;  %v8737_v45 = vmul.f32 %v16535_v40, %v5692_v7  ;;  %v8743_v5 = vmul.f32 %v16537_v24, %v5692_v7  ;;  %v16538_v54 = vld [vmem:[#allocation70_spill] sm:$0xff]  ;;  %v16540_v62 = vld [vmem:[#allocation76_spill] sm:$0xff]  ;;  %v1742_v40 = vrot.slane %v1646_v43, 2 }
 0x144   : > { %v8734_v37 = vmul.f32 %v16534_v47, %v5692_v7  ;;  %v16536_v51 = vld [vmem:[#allocation79_spill] sm:$0xff]  ;;  %v8746_v42 = vmul.f32 %v16538_v54, %v5692_v7  ;;  %v8752_v27 = vmul.f32 %v5692_v7, %v16540_v62  ;;  %v8755_v47 = vmul.f32 %v5692_v7, %v8367_v48 }
 0x145   : > { %v8740_v32 = vmul.f32 %v16536_v51, %v5692_v7  ;;  %v16539_v44 = vld [vmem:[#allocation71_spill] sm:$0xff]  ;;  %v1747_v51 = vrot.slane %v1649_v11, 2  ;;  %v1752_v24 = vrot.slane %v1652_v36, 2  ;;  %v8758_v8 = vsel %vm685_vm1, %v1742_v40, %v1743_v38 }
 0x146   : > { %v8749_v10 = vmul.f32 %v5692_v7, %v16539_v44  ;;  %v8761_v54 = vsel %vm685_vm1, %v1743_v38, %v1745_v61  ;;  %v1753_v44 = vrot.slane %v1653_v20, 2  ;;  %v8767_v7 = vsel %vm685_vm1, %v1748_v55, %v1750_v46 }
 0x147   : > { %v8764_v62 = vsel %vm685_vm1, %v1747_v51, %v1748_v55  ;;  %v1757_v43 = vrot.slane %v1655_v59, 2  ;;  %v1762_v61 = vrot.slane %v8650_v60, 2  ;;  %v1765_v46 = vrot.slane %v8656_v33, 2 }
 0x148   : > { %v8771_v57 = vsel %vm685_vm1, %v1752_v24, %v1753_v44  ;;  %v8774_v11 = vsel %vm685_vm1, %v1753_v44, %v1755_v28  ;;  %v1767_v55 = vrot.slane %v8659_v4, 2  ;;  %v8784_v36 = vsel %vm685_vm1, %v1758_v2, %v1760_v29 }
 0x149   : > { %v8778_v38 = vsel %vm685_vm1, %v1757_v43, %v1758_v2  ;;  %v1768_v20 = vrot.slane %v8662_v16, 2  ;;  %v1770_v28 = vrot.slane %v8665_v19, 2  ;;  %v1764_v59 = vsel %vm685_vm1, %v1762_v61, %v1763_v3 }
 0x14a   : > { %v1766_v25 = vsel %vm685_vm1, %v1763_v3, %v1765_v46  ;;  %v1775_v60 = vrot.slane %v8674_v22, 2  ;;  %v1777_v4 = vrot.slane %v8677_v0, 2  ;;  %v1778_v16 = vrot.slane %v8680_v58, 2 }
 0x14b   : > { %v1769_v23 = vsel %vm685_vm1, %v1767_v55, %v1768_v20  ;;  %v1771_v33 = vsel %vm685_vm1, %v1768_v20, %v1770_v28  ;;  %v1774_v19 = vsel %vm685_vm1, %v1772_v52, %v1773_v9  ;;  %v1780_v51 = vrot.slane %v8683_v53, 2 }
 0x14c   : > { %v1776_v18 = vsel %vm685_vm1, %v1773_v9, %v1775_v60  ;;  %v1782_v44 = vrot.slane %v8686_v17, 2  ;;  %v1779_v6 = vsel %vm685_vm1, %v1777_v4, %v1778_v16  ;;  %v1783_v22 = vrot.slane %v8689_v56, 2 }
 0x14d   : > { %v1785_v40 = vrot.slane %v8692_v49, 2  ;;  %v1787_v24 = vrot.slane %v8695_v39, 2  ;;  %v1781_v0 = vsel %vm685_vm1, %v1778_v16, %v1780_v51  ;;  %v1788_v58 = vrot.slane %v8698_v31, 2  ;;  %v16541_v51 = vld [vmem:[#allocation74_spill] sm:$0xff] }
 0x14e   : > { %v1790_v43 = vrot.slane %v8701_v15, 2  ;;  %v1792_v2 = vrot.slane %v8704_v35, 2  ;;  %v1784_v53 = vsel %vm685_vm1, %v1782_v44, %v1783_v22  ;;  %v1793_v29 = vrot.slane %v8707_v26, 2 }
 0x14f   : > { %v1786_v17 = vsel %vm685_vm1, %v1783_v22, %v1785_v40  ;;  %v1795_v56 = vrot.slane %v8710_v34, 2  ;;  %v1789_v49 = vsel %vm685_vm1, %v1787_v24, %v1788_v58  ;;  %v1797_v61 = vrot.slane %v8713_v50, 2  ;;  %v16543_v22 = vld [vmem:[#allocation77_spill] sm:$0xff] }
 0x150   : > { %v1791_v39 = vsel %vm685_vm1, %v1788_v58, %v1790_v43  ;;  %v1798_v31 = vrot.slane %v8716_v30, 2  ;;  %v1794_v15 = vsel %vm685_vm1, %v1792_v2, %v1793_v29  ;;  %v1800_v3 = vrot.slane %v8719_v1, 2  ;;  %v16551_v43 = vld [vmem:[#allocation6_spill] sm:$0xff] }
 0x151   : > { %v1796_v35 = vsel %vm685_vm1, %v1793_v29, %v1795_v56  ;;  %v1802_v46 = vrot.slane %v8722_v63, 2  ;;  %v1803_v34 = vrot.slane %v8725_v14, 2  ;;  %v1805_v55 = vrot.slane %v8728_v21, 2  ;;  %v16555_v56 = vld [vmem:[#allocation8_spill] sm:$0xff] }
 0x152   : > { %v1799_v26 = vsel %vm685_vm1, %v1797_v61, %v1798_v31  ;;  %v1807_v20 = vrot.slane %v8731_v13, 2  ;;  %v1801_v50 = vsel %vm685_vm1, %v1798_v31, %v1800_v3  ;;  %v1808_v30 = vrot.slane %v8734_v37, 2  ;;  %v16557_v61 = vld [vmem:[#allocation9_spill] sm:$0xff] }
 0x153   : > { %v1810_v28 = vrot.slane %v8737_v45, 2  ;;  %v1812_v52 = vrot.slane %v8740_v32, 2  ;;  %v1804_v1 = vsel %vm685_vm1, %v1802_v46, %v1803_v34  ;;  %v1806_v63 = vsel %vm685_vm1, %v1803_v34, %v1805_v55 }
 0x154   : > { %v1813_v9 = vrot.slane %v8743_v5, 2  ;;  %v1815_v14 = vrot.slane %v8746_v42, 2  ;;  %v1809_v21 = vsel %vm685_vm1, %v1807_v20, %v1808_v30  ;;  %v1817_v60 = vrot.slane %v8749_v10, 2 }
 0x155   : > { %v1811_v13 = vsel %vm685_vm1, %v1808_v30, %v1810_v28  ;;  %v1818_v37 = vrot.slane %v8752_v27, 2  ;;  %v1820_v4 = vrot.slane %v8755_v47, 2  ;;  %v8842_v16 = vadd.f32 %v8758_v8, %v8528_v12  ;;  %v16542_v27 = vld [vmem:[#allocation75_spill] sm:$0xff]  ;;  %v16544_v8 = vld [vmem:[#allocation78_spill] sm:$0xff] }
 0x156   : > { %v1814_v45 = vsel %vm685_vm1, %v1812_v52, %v1813_v9  ;;  %v1816_v32 = vsel %vm685_vm1, %v1813_v9, %v1815_v14  ;;  %v8847_v5 = vadd.f32 %v8761_v54, %v8533_v41  ;;  %v8851_v10 = vadd.f32 %v8764_v62, %v16541_v51  ;;  %v16545_v41 = vld [vmem:[#allocation66_spill] sm:$0xff]  ;;  %v16547_v62 = vld [vmem:[#allocation73_spill] sm:$0xff]  ;;  %v16577_v52 = vld [vmem:[#allocation23_spill] sm:$0xff] }
 0x157   : > { %v1819_v42 = vsel %vm685_vm1, %v1817_v60, %v1818_v37  ;;  %v8855_v44 = vadd.f32 %v8767_v7, %v16542_v27  ;;  %v1821_v47 = vsel %vm685_vm1, %v1818_v37, %v1820_v4  ;;  %v8860_v12 = vadd.f32 %v8771_v57, %v16543_v22  ;;  %v16549_v7 = vld [vmem:[#allocation5_spill] sm:$0xff]  ;;  %v16553_v57 = vld [vmem:[#allocation7_spill] sm:$0xff]  ;;  %v16583_v4 = vld [vmem:[#allocation28_spill] sm:$0xff] }
 0x158   : > { %v8864_v40 = vadd.f32 %v8774_v11, %v16544_v8  ;;  %v8868_v54 = vadd.f32 %v8778_v38, %v16545_v41  ;;  %v8872_v24 = vadd.f32 %v8784_v36, %v16547_v62  ;;  %v8875_v58 = vadd.f32 %v1764_v59, %v16549_v7  ;;  %v16559_v38 = vld [vmem:[#allocation10_spill] sm:$0xff]  ;;  %v16561_v36 = vld [vmem:[#allocation11_spill] sm:$0xff]  ;;  %v16563_v59 = vld [vmem:[#allocation12_spill] sm:$0xff] }
 0x159   : > { %v8878_v2 = vadd.f32 %v1766_v25, %v16551_v43  ;;  %v8881_v29 = vadd.f32 %v1769_v23, %v16553_v57  ;;  %v8884_v11 = vadd.f32 %v1771_v33, %v16555_v56  ;;  %v8887_v31 = vadd.f32 %v1774_v19, %v16557_v61  ;;  %v16565_v25 = vld [vmem:[#allocation13_spill] sm:$0xff]  ;;  %v16567_v23 = vld [vmem:[#allocation14_spill] sm:$0xff]  ;;  %v16569_v33 = vld [vmem:[#allocation15_spill] sm:$0xff] }
 0x15a   : > { %16546 = vst [vmem:[#allocation38_spill] sm:$0xff] %v8868_v54  ;;  %16548 = vst [vmem:[#allocation39_spill] sm:$0xff] %v8872_v24  ;;  %v8890_v3 = vadd.f32 %v1776_v18, %v16559_v38  ;;  %v8893_v46 = vadd.f32 %v1779_v6, %v16561_v36  ;;  %v8896_v34 = vadd.f32 %v1781_v0, %v16563_v59  ;;  %v8910_v19 = vld [vmem:[%s15337_s1 + $0x8] ss:$0 sm:$0xff]  ;;  %v16571_v18 = vld [vmem:[#allocation16_spill] sm:$0xff] }
 0x15b   : > { %16550 = vst [vmem:[#allocation51_spill] sm:$0xff] %v8875_v58  ;;  %16552 = vst [vmem:[#allocation43_spill] sm:$0xff] %v8878_v2  ;;  %v8899_v55 = vadd.f32 %v1784_v53, %v16565_v25  ;;  %v8902_v20 = vadd.f32 %v1786_v17, %v16567_v23  ;;  %v8905_v30 = vadd.f32 %v1789_v49, %v16569_v33  ;;  %v16573_v0 = vld [vmem:[#allocation19_spill] sm:$0xff]  ;;  %v16575_v53 = vld [vmem:[#allocation20_spill] sm:$0xff] }
 0x15c   : > { %16554 = vst [vmem:[#allocation44_spill] sm:$0xff] %v8881_v29  ;;  %16556 = vst [vmem:[#allocation56_spill] sm:$0xff] %v8884_v11  ;;  %v8913_v6 = vadd.f32 %v1791_v39, %v16571_v18  ;;  %v8916_v28 = vadd.f32 %v1794_v15, %v16573_v0  ;;  %v8919_v17 = vadd.f32 %v1796_v35, %v16575_v53  ;;  %v16579_v49 = vld [vmem:[#allocation24_spill] sm:$0xff]  ;;  %v16581_v60 = vld [vmem:[#allocation25_spill] sm:$0xff] }
 0x15d   : > { %16558 = vst [vmem:[#allocation47_spill] sm:$0xff] %v8887_v31  ;;  %16560 = vst [vmem:[#allocation48_spill] sm:$0xff] %v8890_v3  ;;  %v8922_v9 = vadd.f32 %v1799_v26, %v16577_v52  ;;  %v8925_v14 = vadd.f32 %v1801_v50, %v16579_v49  ;;  %v8928_v37 = vadd.f32 %v1804_v1, %v16581_v60  ;;  %v16585_v15 = vld [vmem:[#allocation29_spill] sm:$0xff]  ;;  %v16587_v27 = vld [vmem:[#allocation30_spill] sm:$0xff] }
 0x15e   : > { %16562 = vst [vmem:[#allocation61_spill] sm:$0xff] %v8893_v46  ;;  %16564 = vst [vmem:[#allocation52_spill] sm:$0xff] %v8896_v34  ;;  %v8931_v39 = vadd.f32 %v1806_v63, %v16583_v4  ;;  %v8934_v51 = vadd.f32 %v1809_v21, %v16585_v15  ;;  %v8937_v35 = vadd.f32 %v1811_v13, %v16587_v27  ;;  %v16589_v26 = vld [vmem:[#allocation37_spill] sm:$0xff]  ;;  %v16593_v1 = vld [vmem:[#allocation34_spill] sm:$0xff] }
 0x15f   : > { %16566 = vst [vmem:[#allocation53_spill] sm:$0xff] %v8899_v55  ;;  %16568 = vst [vmem:[#allocation57_spill] sm:$0xff] %v8902_v20  ;;  %v8940_v22 = vadd.f32 %v1814_v45, %v16589_v26  ;;  %v16591_v8 = vld [vmem:[#allocation33_spill] sm:$0xff]  ;;  %v8946_v41 = vadd.f32 %v1819_v42, %v16593_v1  ;;  %v16595_v62 = vld [vmem:[#allocation42_spill] sm:$0xff] }
 0x160   : > { %16570 = vst [vmem:[#allocation58_spill] sm:$0xff] %v8905_v30  ;;  %16572 = vst [vmem:[#allocation62_spill] sm:$0xff] %v8913_v6  ;;  %v8943_v50 = vadd.f32 %v1816_v32, %v16591_v8  ;;  %v8949_v63 = vadd.f32 %v1821_v47, %v16595_v62  ;;  %v8952_v21 = vld [vmem:[%s6195_s3 + $0x18] sm:$0xff]  ;;  %v8959_v45 = vld [vmem:[%s6195_s3 + $0x20] sm:$0xff] }
 0x161   : > { %16574 = vst [vmem:[#allocation63_spill] sm:$0xff] %v8916_v28  ;;  %16576 = vst [vmem:[#allocation67_spill] sm:$0xff] %v8919_v17  ;;  %v8956_v13 = vmul.f32 %v8952_v21, %v8910_v19  ;;  %v8963_v32 = vmul.f32 %v8959_v45, %v8910_v19  ;;  %v8966_v42 = vld [vmem:[%s6195_s3 + $0x28] sm:$0xf]  ;;  %v8973_v7 = vld [vmem:[%s6195_s3 + $0x30] sm:$0xff] }
 0x162   : > { %16578 = vst [vmem:[#allocation68_spill] sm:$0xff] %v8922_v9  ;;  %16580 = vst [vmem:[#allocation80_spill] sm:$0xff] %v8925_v14  ;;  %v8970_v47 = vmul.f32 %v8966_v42, %v8910_v19  ;;  %v8977_v43 = vmul.f32 %v8973_v7, %v8910_v19  ;;  %v8980_v57 = vld [vmem:[%s6195_s3 + $0x38] sm:$0xff]  ;;  %v8987_v61 = vld [vmem:[%s6195_s3 + $0x40] sm:$0xf] }
 0x163   : > { %16582 = vst [vmem:[#allocation81_spill] sm:$0xff] %v8928_v37  ;;  %16584 = vst [vmem:[#allocation82_spill] sm:$0xff] %v8931_v39  ;;  %v8984_v56 = vmul.f32 %v8980_v57, %v8910_v19  ;;  %v8991_v38 = vmul.f32 %v8987_v61, %v8910_v19  ;;  %v8994_v36 = vld [vmem:[%s6195_s3 + $0x48] sm:$0xff]  ;;  %v9001_v25 = vld [vmem:[%s6195_s3 + $0x50] sm:$0xff]  ;;  %v1988_v2 = vrot.slane %v8956_v13, 3 }
 0x164   : > { %16586 = vst [vmem:[#allocation83_spill] sm:$0xff] %v8934_v51  ;;  %16588 = vst [vmem:[#allocation17_spill] sm:$0xff] %v8937_v35  ;;  %v8998_v59 = vmul.f32 %v8994_v36, %v8910_v19  ;;  %v9005_v23 = vmul.f32 %v9001_v25, %v8910_v19  ;;  %v9008_v33 = vld [vmem:[%s6195_s3 + $0x58] sm:$0xf]  ;;  %v9015_v0 = vld [vmem:[%s6195_s3 + $0x60] sm:$0xff]  ;;  %v1991_v58 = vrot.slane %v8970_v47, 3 }
 0x165   : > { %16590 = vst [vmem:[#allocation18_spill] sm:$0xff] %v8940_v22  ;;  %16592 = vst [vmem:[#allocation21_spill] sm:$0xff] %v8943_v50  ;;  %v9012_v18 = vmul.f32 %v9008_v33, %v8910_v19  ;;  %v9019_v53 = vmul.f32 %v9015_v0, %v8910_v19  ;;  %v9022_v52 = vld [vmem:[%s6195_s3 + $0x68] sm:$0xff]  ;;  %v9029_v60 = vld [vmem:[%s6195_s3 + $0x70] sm:$0xf]  ;;  %v1994_v24 = vrot.slane %v8984_v56, 3 }
 0x166   : > { %16594 = vst [vmem:[#allocation22_spill] sm:$0xff] %v8946_v41  ;;  %16596 = vst [vmem:[#allocation26_spill] sm:$0xff] %v8949_v63  ;;  %v9026_v49 = vmul.f32 %v9022_v52, %v8910_v19  ;;  %v9033_v4 = vmul.f32 %v9029_v60, %v8910_v19  ;;  %v9036_v15 = vld [vmem:[%s6195_s3 + $0x78] sm:$0xff]  ;;  %v9043_v26 = vld [vmem:[%s6195_s3 + $0x80] sm:$0xff]  ;;  %v1998_v54 = vrot.slane %v8998_v59, 3  ;;  %v1999_v13 = vrot.slane %v9005_v23, 3 }
 0x167   : > { %16597 = vst [vmem:[#allocation27_spill] sm:$0xff] %v8952_v21  ;;  %16598 = vst [vmem:[#allocation31_spill] sm:$0xff] %v8959_v45  ;;  %v9040_v27 = vmul.f32 %v9036_v15, %v8910_v19  ;;  %v9047_v8 = vmul.f32 %v9043_v26, %v8910_v19  ;;  %v9050_v1 = vld [vmem:[%s6195_s3 + $0x88] sm:$0xf]  ;;  %v9127_v45 = vld [vmem:[%s6195_s3 + $0xe0] sm:$0xff]  ;;  %v2003_v56 = vrot.slane %v9019_v53, 3 }
 0x168   : > { %16599 = vst [vmem:[#allocation32_spill] sm:$0xff] %v8966_v42  ;;  %16600 = vst [vmem:[#allocation35_spill] sm:$0xff] %v8973_v7  ;;  %v9054_v62 = vmul.f32 %v9050_v1, %v8910_v19  ;;  %v9113_v7 = vld [vmem:[%s6195_s3 + $0xd0] sm:$0xf]  ;;  %v9120_v42 = vld [vmem:[%s6195_s3 + $0xd8] sm:$0xff]  ;;  %v2006_v59 = vrot.slane %v9033_v4, 3 }
 0x169   : > { %16601 = vst [vmem:[#allocation36_spill] sm:$0xff] %v8980_v57  ;;  %16602 = vst [vmem:[#allocation40_spill] sm:$0xff] %v8987_v61  ;;  %v9099_v61 = vld [vmem:[%s6195_s3 + $0xc0] sm:$0xff]  ;;  %v9106_v57 = vld [vmem:[%s6195_s3 + $0xc8] sm:$0xff]  ;;  %v2008_v23 = vrot.slane %v9040_v27, 3 }
 0x16a   : > { %16603 = vst [vmem:[#allocation41_spill] sm:$0xff] %v8994_v36  ;;  %16604 = vst [vmem:[#allocation45_spill] sm:$0xff] %v9001_v25  ;;  %v9085_v25 = vld [vmem:[%s6195_s3 + $0xb0] sm:$0xff]  ;;  %v9092_v36 = vld [vmem:[%s6195_s3 + $0xb8] sm:$0xf] }
 0x16b   : > { %16605 = vst [vmem:[#allocation46_spill] sm:$0xff] %v9008_v33  ;;  %16606 = vst [vmem:[#allocation49_spill] sm:$0xff] %v9015_v0  ;;  %v9071_v0 = vld [vmem:[%s6195_s3 + $0xa0] sm:$0xf]  ;;  %v9078_v33 = vld [vmem:[%s6195_s3 + $0xa8] sm:$0xff] }
 0x16c   : > { %16607 = vst [vmem:[#allocation50_spill] sm:$0xff] %v9022_v52  ;;  %16608 = vst [vmem:[#allocation54_spill] sm:$0xff] %v9029_v60  ;;  %v9057_v60 = vld [vmem:[%s6195_s3 + $0x90] sm:$0xff]  ;;  %v9064_v52 = vld [vmem:[%s6195_s3 + $0x98] sm:$0xff] }
 0x16d   : > { %16609 = vst [vmem:[#allocation55_spill] sm:$0xff] %v9036_v15  ;;  %16610 = vst [vmem:[#allocation59_spill] sm:$0xff] %v9043_v26  ;;  %v9061_v15 = vmul.f32 %v9057_v60, %v8910_v19  ;;  %v9068_v26 = vmul.f32 %v9064_v52, %v8910_v19  ;;  %v9134_v21 = vld [vmem:[%s6195_s3 + $0xe8] sm:$0xf]  ;;  %v9141_v63 = vld [vmem:[%s6195_s3 + $0xf0] sm:$0xff] }
 0x16e   : > { %16611 = vst [vmem:[#allocation74_spill] sm:$0xff] %v9050_v1  ;;  %16612 = vst [vmem:[#allocation75_spill] sm:$0xff] %v9057_v60  ;;  %v9075_v1 = vmul.f32 %v9071_v0, %v8910_v19  ;;  %v9082_v60 = vmul.f32 %v9078_v33, %v8910_v19  ;;  %v9148_v41 = vld [vmem:[%s6195_s3 + $0xf8] sm:$0xff]  ;;  %v9155_v50 = vld [vmem:[%s6195_s3 + $0x100] sm:$0xf] }
 0x16f   : > { %16613 = vst [vmem:[#allocation77_spill] sm:$0xff] %v9064_v52  ;;  %16614 = vst [vmem:[#allocation78_spill] sm:$0xff] %v9071_v0  ;;  %v9089_v52 = vmul.f32 %v9085_v25, %v8910_v19  ;;  %v9096_v0 = vmul.f32 %v9092_v36, %v8910_v19  ;;  %v9162_v22 = vld [vmem:[%s6195_s3 + $0x108] sm:$0xff]  ;;  %v9169_v35 = vld [vmem:[%s6195_s3 + $0x110] sm:$0xff]  ;;  %v2013_v53 = vrot.slane %v9061_v15, 3 }
 0x170   : > { %16615 = vst [vmem:[#allocation66_spill] sm:$0xff] %v9078_v33  ;;  %16616 = vst [vmem:[#allocation73_spill] sm:$0xff] %v9085_v25  ;;  %v9103_v33 = vmul.f32 %v9099_v61, %v8910_v19  ;;  %v9110_v25 = vmul.f32 %v9106_v57, %v8910_v19  ;;  %v16629_v51 = vld [vmem:[#allocation60_spill] sm:$0xff]  ;;  %v9187_v14 = vld [vmem:[%s6195_s3 + $0x128] sm:$0xff]  ;;  %v2018_v4 = vrot.slane %v9082_v60, 3 }
 0x171   : > { %16617 = vst [vmem:[#allocation5_spill] sm:$0xff] %v9092_v36  ;;  %16618 = vst [vmem:[#allocation6_spill] sm:$0xff] %v9099_v61  ;;  %v9117_v36 = vmul.f32 %v9113_v7, %v8910_v19  ;;  %v9124_v61 = vmul.f32 %v9120_v42, %v8910_v19  ;;  %v9177_v39 = vmul.f32 %v16629_v51, %v8910_v19  ;;  %v16632_v9 = vld [vmem:[#allocation64_spill] sm:$0xff]  ;;  %v9205_v28 = vld [vmem:[%s6195_s3 + $0x140] sm:$0xff] }
 0x172   : > { %16619 = vst [vmem:[#allocation7_spill] sm:$0xff] %v9106_v57  ;;  %16620 = vst [vmem:[#allocation8_spill] sm:$0xff] %v9113_v7  ;;  %v9131_v57 = vmul.f32 %v9127_v45, %v8910_v19  ;;  %v9138_v7 = vmul.f32 %v9134_v21, %v8910_v19  ;;  %v9198_v17 = vld [vmem:[%s6195_s3 + $0x138] sm:$0xff]  ;;  %v16635_v6 = vld [vmem:[#allocation65_spill] sm:$0xff] }
 0x173   : > { %16621 = vst [vmem:[#allocation9_spill] sm:$0xff] %v9120_v42  ;;  %16622 = vst [vmem:[#allocation10_spill] sm:$0xff] %v9127_v45  ;;  %v9145_v42 = vmul.f32 %v9141_v63, %v8910_v19  ;;  %v9152_v45 = vmul.f32 %v9148_v41, %v8910_v19  ;;  %v9202_v51 = vmul.f32 %v9198_v17, %v8910_v19  ;;  %v9216_v30 = vld [vmem:[%s6195_s3 + $0x150] sm:$0xff]  ;;  %v9223_v20 = vld [vmem:[%s6195_s3 + $0x158] sm:$0xff] }
 0x174   : > { %16623 = vst [vmem:[#allocation11_spill] sm:$0xff] %v9134_v21  ;;  %16624 = vst [vmem:[#allocation12_spill] sm:$0xff] %v9141_v63  ;;  %v9159_v21 = vmul.f32 %v9155_v50, %v8910_v19  ;;  %v9166_v63 = vmul.f32 %v9162_v22, %v8910_v19  ;;  %v16638_v55 = vld [vmem:[#allocation69_spill] sm:$0xff]  ;;  %v16639_v34 = vld [vmem:[#allocation79_spill] sm:$0xff] }
 0x175   : > { %16625 = vst [vmem:[#allocation13_spill] sm:$0xff] %v9148_v41  ;;  %16626 = vst [vmem:[#allocation14_spill] sm:$0xff] %v9155_v50  ;;  %v9173_v41 = vmul.f32 %v9169_v35, %v8910_v19  ;;  %v9180_v50 = vld [vmem:[%s6195_s3 + $0x120] sm:$0xff]  ;;  %v16640_v46 = vld [vmem:[#allocation72_spill] sm:$0xff] }
 0x176   : > { %16627 = vst [vmem:[#allocation15_spill] sm:$0xff] %v9162_v22  ;;  %16628 = vst [vmem:[#allocation16_spill] sm:$0xff] %v9169_v35  ;;  %v9184_v37 = vmul.f32 %v9180_v50, %v8910_v19  ;;  %v9191_v22 = vmul.f32 %v9187_v14, %v8910_v19  ;;  %v9195_v35 = vmul.f32 %v16632_v9, %v8910_v19  ;;  %v16642_v11 = vld [vmem:[#allocation71_spill] sm:$0xff]  ;;  %v16643_v29 = vld [vmem:[#allocation76_spill] sm:$0xff] }
 0x177   : > { %16630 = vst [vmem:[#allocation19_spill] sm:$0xff] %v9180_v50  ;;  %16631 = vst [vmem:[#allocation20_spill] sm:$0xff] %v9187_v14  ;;  %v9209_v50 = vmul.f32 %v9205_v28, %v8910_v19  ;;  %v9213_v14 = vmul.f32 %v16635_v6, %v8910_v19  ;;  %v9220_v9 = vmul.f32 %v9216_v30, %v8910_v19 }
 0x178   : > { %16633 = vst [vmem:[#allocation23_spill] sm:$0xff] %v9198_v17  ;;  %16634 = vst [vmem:[#allocation24_spill] sm:$0xff] %v9205_v28  ;;  %v9227_v17 = vmul.f32 %v9223_v20, %v8910_v19  ;;  %v9231_v28 = vmul.f32 %v16638_v55, %v8910_v19  ;;  %v9235_v6 = vmul.f32 %v16639_v34, %v8910_v19 }
 0x179   : > { %16636 = vst [vmem:[#allocation25_spill] sm:$0xff] %v9216_v30  ;;  %16637 = vst [vmem:[#allocation28_spill] sm:$0xff] %v9223_v20  ;;  %v9239_v3 = vmul.f32 %v16640_v46, %v8910_v19  ;;  %v16641_v30 = vld [vmem:[#allocation70_spill] sm:$0xff]  ;;  %v9247_v20 = vmul.f32 %v8910_v19, %v16642_v11  ;;  %v9251_v55 = vmul.f32 %v8910_v19, %v16643_v29  ;;  %v1989_v46 = vrot.slane %v8963_v32, 3 }
 0x17a   : > { %v9243_v31 = vmul.f32 %v16641_v30, %v8910_v19  ;;  %v9255_v34 = vmul.f32 %v8910_v19, %v8367_v48  ;;  %v1993_v30 = vrot.slane %v8977_v43, 3  ;;  %v1996_v11 = vrot.slane %v8991_v38, 3 }
 0x17b   : > { %v9265_v29 = vsel %vm932_vm2, %v1988_v2, %v1989_v46  ;;  %v9268_v19 = vsel %vm932_vm2, %v1989_v46, %v1991_v58  ;;  %v2001_v32 = vrot.slane %v9012_v18, 3  ;;  %v2004_v38 = vrot.slane %v9026_v49, 3 }
 0x17c   : > { %v9273_v47 = vsel %vm932_vm2, %v1993_v30, %v1994_v24  ;;  %v9276_v43 = vsel %vm932_vm2, %v1994_v24, %v1996_v11  ;;  %v9281_v2 = vsel %vm932_vm2, %v1998_v54, %v1999_v13  ;;  %v2009_v24 = vrot.slane %v9047_v8, 3 }
 0x17d   : > { %v9284_v58 = vsel %vm932_vm2, %v1999_v13, %v2001_v32  ;;  %v9289_v30 = vsel %vm932_vm2, %v2003_v56, %v2004_v38  ;;  %v2011_v18 = vrot.slane %v9054_v62, 3  ;;  %v9295_v49 = vsel %vm932_vm2, %v2004_v38, %v2006_v59 }
 0x17e   : > { %v2014_v54 = vrot.slane %v9068_v26, 3  ;;  %v2016_v46 = vrot.slane %v9075_v1, 3  ;;  %v2010_v27 = vsel %vm932_vm2, %v2008_v23, %v2009_v24  ;;  %v2019_v13 = vrot.slane %v9089_v52, 3 }
 0x17f   : > { %v2012_v11 = vsel %vm932_vm2, %v2009_v24, %v2011_v18  ;;  %v2021_v8 = vrot.slane %v9096_v0, 3  ;;  %v2023_v32 = vrot.slane %v9103_v33, 3  ;;  %v2024_v26 = vrot.slane %v9110_v25, 3 }
 0x180   : > { %v2015_v62 = vsel %vm932_vm2, %v2013_v53, %v2014_v54  ;;  %v2017_v15 = vsel %vm932_vm2, %v2014_v54, %v2016_v46  ;;  %v2020_v1 = vsel %vm932_vm2, %v2018_v4, %v2019_v13  ;;  %v2026_v56 = vrot.slane %v9117_v36, 3 }
 0x181   : > { %v2022_v60 = vsel %vm932_vm2, %v2019_v13, %v2021_v8  ;;  %v2028_v38 = vrot.slane %v9124_v61, 3  ;;  %v2025_v52 = vsel %vm932_vm2, %v2023_v32, %v2024_v26  ;;  %v2029_v0 = vrot.slane %v9131_v57, 3 }
 0x182   : > { %v2031_v59 = vrot.slane %v9138_v7, 3  ;;  %v2033_v23 = vrot.slane %v9145_v42, 3  ;;  %v2027_v33 = vsel %vm932_vm2, %v2024_v26, %v2026_v56  ;;  %v2034_v25 = vrot.slane %v9152_v45, 3 }
 0x183   : > { %v2036_v24 = vrot.slane %v9159_v21, 3  ;;  %v2038_v18 = vrot.slane %v9166_v63, 3  ;;  %v2030_v36 = vsel %vm932_vm2, %v2028_v38, %v2029_v0  ;;  %v2039_v53 = vrot.slane %v9173_v41, 3 }
 0x184   : > { %v2032_v61 = vsel %vm932_vm2, %v2029_v0, %v2031_v59  ;;  %v2041_v57 = vrot.slane %v9177_v39, 3  ;;  %v2035_v7 = vsel %vm932_vm2, %v2033_v23, %v2034_v25  ;;  %v2043_v54 = vrot.slane %v9184_v37, 3  ;;  %v16653_v23 = vld [vmem:[#allocation43_spill] sm:$0xff] }
 0x185   : > { %v2037_v42 = vsel %vm932_vm2, %v2034_v25, %v2036_v24  ;;  %v2044_v45 = vrot.slane %v9191_v22, 3  ;;  %v2040_v21 = vsel %vm932_vm2, %v2038_v18, %v2039_v53  ;;  %v2046_v46 = vrot.slane %v9195_v35, 3  ;;  %v16657_v24 = vld [vmem:[#allocation56_spill] sm:$0xff] }
 0x186   : > { %v2042_v63 = vsel %vm932_vm2, %v2039_v53, %v2041_v57  ;;  %v2048_v4 = vrot.slane %v9202_v51, 3  ;;  %v2049_v39 = vrot.slane %v9209_v50, 3  ;;  %v2051_v13 = vrot.slane %v9213_v14, 3 }
 0x187   : > { %v2045_v41 = vsel %vm932_vm2, %v2043_v54, %v2044_v45  ;;  %v2053_v8 = vrot.slane %v9220_v9, 3  ;;  %v2047_v37 = vsel %vm932_vm2, %v2044_v45, %v2046_v46  ;;  %v2054_v22 = vrot.slane %v9227_v17, 3 }
 0x188   : > { %v2056_v32 = vrot.slane %v9231_v28, 3  ;;  %v2058_v26 = vrot.slane %v9235_v6, 3  ;;  %v2050_v35 = vsel %vm932_vm2, %v2048_v4, %v2049_v39  ;;  %v2052_v51 = vsel %vm932_vm2, %v2049_v39, %v2051_v13  ;;  %v16675_v39 = vld [vmem:[#allocation63_spill] sm:$0xff] }
 0x189   : > { %v2059_v56 = vrot.slane %v9239_v3, 3  ;;  %v2061_v50 = vrot.slane %v9243_v31, 3  ;;  %v2055_v14 = vsel %vm932_vm2, %v2053_v8, %v2054_v22  ;;  %v2063_v38 = vrot.slane %v9247_v20, 3  ;;  %v16677_v13 = vld [vmem:[#allocation67_spill] sm:$0xff]  ;;  %v16679_v8 = vld [vmem:[#allocation68_spill] sm:$0xff] }
 0x18a   : > { %v2057_v9 = vsel %vm932_vm2, %v2054_v22, %v2056_v32  ;;  %v2064_v17 = vrot.slane %v9251_v55, 3  ;;  %v2066_v0 = vrot.slane %v9255_v34, 3  ;;  %v9353_v59 = vadd.f32 %v9265_v29, %v8842_v16  ;;  %v16681_v22 = vld [vmem:[#allocation80_spill] sm:$0xff]  ;;  %v16683_v32 = vld [vmem:[#allocation81_spill] sm:$0xff] }
 0x18b   : > { %v2060_v28 = vsel %vm932_vm2, %v2058_v26, %v2059_v56  ;;  %v2062_v6 = vsel %vm932_vm2, %v2059_v56, %v2061_v50  ;;  %v9358_v3 = vadd.f32 %v9268_v19, %v8847_v5  ;;  %v9362_v20 = vadd.f32 %v9273_v47, %v8851_v10  ;;  %v16647_v5 = vld [vmem:[#allocation38_spill] sm:$0xff]  ;;  %v16649_v10 = vld [vmem:[#allocation39_spill] sm:$0xff] }
 0x18c   : > { %v2065_v31 = vsel %vm932_vm2, %v2063_v38, %v2064_v17  ;;  %v9366_v55 = vadd.f32 %v9276_v43, %v8855_v44  ;;  %v2067_v34 = vsel %vm932_vm2, %v2064_v17, %v2066_v0  ;;  %v9371_v16 = vadd.f32 %v9281_v2, %v8860_v12  ;;  %v16651_v44 = vld [vmem:[#allocation51_spill] sm:$0xff]  ;;  %v16655_v12 = vld [vmem:[#allocation44_spill] sm:$0xff]  ;;  %v16685_v56 = vld [vmem:[#allocation82_spill] sm:$0xff] }
 0x18d   : > { %v9375_v29 = vadd.f32 %v9284_v58, %v8864_v40  ;;  %v9379_v19 = vadd.f32 %v9289_v30, %v16647_v5  ;;  %v9383_v47 = vadd.f32 %v9295_v49, %v16649_v10  ;;  %v9386_v43 = vadd.f32 %v2010_v27, %v16651_v44  ;;  %v16659_v58 = vld [vmem:[#allocation47_spill] sm:$0xff]  ;;  %v16661_v30 = vld [vmem:[#allocation48_spill] sm:$0xff]  ;;  %v16663_v49 = vld [vmem:[#allocation61_spill] sm:$0xff] }
 0x18e   : > { %16644 = vst [vmem:[#allocation29_spill] sm:$0xff] %v9366_v55  ;;  %16645 = vst [vmem:[#allocation30_spill] sm:$0xff] %v9371_v16  ;;  %v9389_v25 = vadd.f32 %v2012_v11, %v16653_v23  ;;  %v9392_v2 = vadd.f32 %v2015_v62, %v16655_v12  ;;  %v9395_v40 = vadd.f32 %v2017_v15, %v16657_v24  ;;  %v16665_v27 = vld [vmem:[#allocation52_spill] sm:$0xff]  ;;  %v16667_v11 = vld [vmem:[#allocation53_spill] sm:$0xff] }
 0x18f   : > { %16646 = vst [vmem:[#allocation37_spill] sm:$0xff] %v9375_v29  ;;  %16648 = vst [vmem:[#allocation33_spill] sm:$0xff] %v9379_v19  ;;  %v9398_v18 = vadd.f32 %v2020_v1, %v16659_v58  ;;  %v9401_v53 = vadd.f32 %v2022_v60, %v16661_v30  ;;  %v9404_v57 = vadd.f32 %v2025_v52, %v16663_v49  ;;  %v16669_v62 = vld [vmem:[#allocation57_spill] sm:$0xff]  ;;  %v16671_v15 = vld [vmem:[#allocation58_spill] sm:$0xff] }
 0x190   : > { %16650 = vst [vmem:[#allocation34_spill] sm:$0xff] %v9383_v47  ;;  %16652 = vst [vmem:[#allocation42_spill] sm:$0xff] %v9386_v43  ;;  %v9407_v54 = vadd.f32 %v2027_v33, %v16665_v27  ;;  %v9410_v45 = vadd.f32 %v2030_v36, %v16667_v11  ;;  %v9413_v46 = vadd.f32 %v2032_v61, %v16669_v62  ;;  %v9421_v1 = vld [vmem:[%s15337_s1 + $0x9] ss:$0 sm:$0xff]  ;;  %v16706_v11 = vld [vmem:[#allocation45_spill] sm:$0xff] }
 0x191   : > { %16654 = vst [vmem:[#allocation79_spill] sm:$0xff] %v9389_v25  ;;  %16656 = vst [vmem:[#allocation72_spill] sm:$0xff] %v9392_v2  ;;  %v9416_v4 = vadd.f32 %v2035_v7, %v16671_v15  ;;  %v16673_v60 = vld [vmem:[#allocation62_spill] sm:$0xff]  ;;  %v9427_v33 = vadd.f32 %v2040_v21, %v16675_v39  ;;  %v9430_v36 = vadd.f32 %v2042_v63, %v16677_v13  ;;  %v16689_v21 = vld [vmem:[#allocation17_spill] sm:$0xff] }
 0x192   : > { %16658 = vst [vmem:[#allocation71_spill] sm:$0xff] %v9395_v40  ;;  %16660 = vst [vmem:[#allocation76_spill] sm:$0xff] %v9398_v18  ;;  %v9424_v52 = vadd.f32 %v2037_v42, %v16673_v60  ;;  %v9433_v61 = vadd.f32 %v2045_v41, %v16679_v8  ;;  %v9436_v7 = vadd.f32 %v2047_v37, %v16681_v22  ;;  %v16687_v42 = vld [vmem:[#allocation83_spill] sm:$0xff]  ;;  %v16691_v63 = vld [vmem:[#allocation18_spill] sm:$0xff] }
 0x193   : > { %16662 = vst [vmem:[#allocation38_spill] sm:$0xff] %v9401_v53  ;;  %16664 = vst [vmem:[#allocation39_spill] sm:$0xff] %v9404_v57  ;;  %v9439_v26 = vadd.f32 %v2050_v35, %v16683_v32  ;;  %v9442_v50 = vadd.f32 %v2052_v51, %v16685_v56  ;;  %v9445_v38 = vadd.f32 %v2055_v14, %v16687_v42  ;;  %v16693_v41 = vld [vmem:[#allocation21_spill] sm:$0xff]  ;;  %v16695_v37 = vld [vmem:[#allocation22_spill] sm:$0xff] }
 0x194   : > { %16666 = vst [vmem:[#allocation51_spill] sm:$0xff] %v9407_v54  ;;  %16668 = vst [vmem:[#allocation43_spill] sm:$0xff] %v9410_v45  ;;  %v9448_v17 = vadd.f32 %v2057_v9, %v16689_v21  ;;  %v9451_v0 = vadd.f32 %v2060_v28, %v16691_v63  ;;  %v9454_v5 = vadd.f32 %v2062_v6, %v16693_v41  ;;  %v16697_v35 = vld [vmem:[#allocation26_spill] sm:$0xff]  ;;  %v16699_v51 = vld [vmem:[#allocation27_spill] sm:$0xff] }
 0x195   : > { %16670 = vst [vmem:[#allocation44_spill] sm:$0xff] %v9413_v46  ;;  %16672 = vst [vmem:[#allocation56_spill] sm:$0xff] %v9416_v4  ;;  %v9457_v10 = vadd.f32 %v2065_v31, %v16695_v37  ;;  %v9460_v44 = vadd.f32 %v2067_v34, %v16697_v35  ;;  %v2138_v23 = vmul.f32 %v16699_v51, %v9421_v1  ;;  %v16700_v14 = vld [vmem:[#allocation31_spill] sm:$0xff]  ;;  %v16701_v9 = vld [vmem:[#allocation32_spill] sm:$0xff] }
 0x196   : > { %16674 = vst [vmem:[#allocation47_spill] sm:$0xff] %v9424_v52  ;;  %16676 = vst [vmem:[#allocation48_spill] sm:$0xff] %v9427_v33  ;;  %v2139_v12 = vmul.f32 %v16700_v14, %v9421_v1  ;;  %v2140_v24 = vmul.f32 %v16701_v9, %v9421_v1  ;;  %v16702_v28 = vld [vmem:[#allocation35_spill] sm:$0xff]  ;;  %v16703_v6 = vld [vmem:[#allocation36_spill] sm:$0xff]  ;;  %v9480_v62 = vmul.f32 %v16706_v11, %v9421_v1 }
 0x197   : > { %16678 = vst [vmem:[#allocation61_spill] sm:$0xff] %v9430_v36  ;;  %16680 = vst [vmem:[#allocation52_spill] sm:$0xff] %v9433_v61  ;;  %v2141_v58 = vmul.f32 %v16702_v28, %v9421_v1  ;;  %v2142_v30 = vmul.f32 %v16703_v6, %v9421_v1  ;;  %v16704_v31 = vld [vmem:[#allocation40_spill] sm:$0xff]  ;;  %v16705_v34 = vld [vmem:[#allocation41_spill] sm:$0xff]  ;;  %v2234_v2 = vrot.slane %v2138_v23, 4 }
 0x198   : > { %16682 = vst [vmem:[#allocation53_spill] sm:$0xff] %v9436_v7  ;;  %16684 = vst [vmem:[#allocation57_spill] sm:$0xff] %v9439_v26  ;;  %v2143_v49 = vmul.f32 %v16704_v31, %v9421_v1  ;;  %v9476_v27 = vmul.f32 %v16705_v34, %v9421_v1  ;;  %v16707_v15 = vld [vmem:[#allocation46_spill] sm:$0xff]  ;;  %v16708_v39 = vld [vmem:[#allocation49_spill] sm:$0xff]  ;;  %v2235_v25 = vrot.slane %v2139_v12, 4 }
 0x199   : > { %16686 = vst [vmem:[#allocation58_spill] sm:$0xff] %v9442_v50  ;;  %16688 = vst [vmem:[#allocation62_spill] sm:$0xff] %v9445_v38  ;;  %v2146_v60 = vmul.f32 %v16707_v15, %v9421_v1  ;;  %v9486_v13 = vmul.f32 %v16708_v39, %v9421_v1  ;;  %v16709_v8 = vld [vmem:[#allocation50_spill] sm:$0xff]  ;;  %v16711_v42 = vld [vmem:[#allocation55_spill] sm:$0xff]  ;;  %v2239_v43 = vrot.slane %v2141_v58, 4  ;;  %v2240_v47 = vrot.slane %v2142_v30, 4 }
 0x19a   : > { %16690 = vst [vmem:[#allocation63_spill] sm:$0xff] %v9448_v17  ;;  %16692 = vst [vmem:[#allocation67_spill] sm:$0xff] %v9451_v0  ;;  %v9490_v22 = vmul.f32 %v16709_v8, %v9421_v1  ;;  %v16710_v32 = vld [vmem:[#allocation54_spill] sm:$0xff]  ;;  %v9498_v21 = vmul.f32 %v16711_v42, %v9421_v1  ;;  %v16712_v63 = vld [vmem:[#allocation59_spill] sm:$0xff]  ;;  %v2242_v19 = vrot.slane %v2143_v49, 4  ;;  %v2244_v29 = vrot.slane %v9476_v27, 4 }
 0x19b   : > { %16694 = vst [vmem:[#allocation68_spill] sm:$0xff] %v9454_v5  ;;  %16696 = vst [vmem:[#allocation80_spill] sm:$0xff] %v9457_v10  ;;  %v9494_v56 = vmul.f32 %v16710_v32, %v9421_v1  ;;  %v9502_v41 = vmul.f32 %v16712_v63, %v9421_v1  ;;  %v16713_v37 = vld [vmem:[#allocation74_spill] sm:$0xff]  ;;  %v16714_v51 = vld [vmem:[#allocation75_spill] sm:$0xff]  ;;  %v2247_v55 = vrot.slane %v2146_v60, 4  ;;  %v2249_v23 = vrot.slane %v9486_v13, 4 }
 0x19c   : > { %16698 = vst [vmem:[#allocation81_spill] sm:$0xff] %v9460_v44  ;;  %v9506_v35 = vmul.f32 %v16713_v37, %v9421_v1  ;;  %v9510_v14 = vmul.f32 %v16714_v51, %v9421_v1  ;;  %v16715_v9 = vld [vmem:[#allocation77_spill] sm:$0xff]  ;;  %v16716_v15 = vld [vmem:[#allocation78_spill] sm:$0xff]  ;;  %v16721_v34 = vld [vmem:[#allocation7_spill] sm:$0xff]  ;;  %v2250_v12 = vrot.slane %v9490_v22, 4  ;;  %v2254_v58 = vrot.slane %v9498_v21, 4 }
 0x19d   : > { %v9514_v32 = vmul.f32 %v16715_v9, %v9421_v1  ;;  %v9518_v31 = vmul.f32 %v16716_v15, %v9421_v1  ;;  %v16717_v42 = vld [vmem:[#allocation66_spill] sm:$0xff]  ;;  %v16718_v8 = vld [vmem:[#allocation73_spill] sm:$0xff]  ;;  %v9538_v15 = vmul.f32 %v16721_v34, %v9421_v1  ;;  %v16722_v6 = vld [vmem:[#allocation8_spill] sm:$0xff] }
 0x19e   : > { %v9522_v63 = vmul.f32 %v16717_v42, %v9421_v1  ;;  %v9526_v37 = vmul.f32 %v16718_v8, %v9421_v1  ;;  %v16719_v39 = vld [vmem:[#allocation5_spill] sm:$0xff]  ;;  %v16720_v11 = vld [vmem:[#allocation6_spill] sm:$0xff]  ;;  %v9542_v42 = vmul.f32 %v16722_v6, %v9421_v1  ;;  %v16725_v10 = vld [vmem:[#allocation11_spill] sm:$0xff]  ;;  %v2259_v30 = vrot.slane %v9510_v14, 4 }
 0x19f   : > { %v9530_v51 = vmul.f32 %v16719_v39, %v9421_v1  ;;  %v9534_v9 = vmul.f32 %v16720_v11, %v9421_v1  ;;  %v16723_v28 = vld [vmem:[#allocation9_spill] sm:$0xff]  ;;  %v16724_v44 = vld [vmem:[#allocation10_spill] sm:$0xff]  ;;  %v9554_v11 = vmul.f32 %v16725_v10, %v9421_v1  ;;  %v16726_v5 = vld [vmem:[#allocation12_spill] sm:$0xff] }
 0x1a0   : > { %v9546_v8 = vmul.f32 %v16723_v28, %v9421_v1  ;;  %v9550_v39 = vmul.f32 %v16724_v44, %v9421_v1  ;;  %v9558_v34 = vmul.f32 %v16726_v5, %v9421_v1  ;;  %v16727_v6 = vld [vmem:[#allocation13_spill] sm:$0xff]  ;;  %v16728_v28 = vld [vmem:[#allocation14_spill] sm:$0xff]  ;;  %v16729_v44 = vld [vmem:[#allocation15_spill] sm:$0xff]  ;;  %v2265_v60 = vrot.slane %v9526_v37, 4 }
 0x1a1   : > { %v9562_v0 = vmul.f32 %v16727_v6, %v9421_v1  ;;  %v9566_v17 = vmul.f32 %v16728_v28, %v9421_v1  ;;  %v9570_v38 = vmul.f32 %v16729_v44, %v9421_v1  ;;  %v16730_v10 = vld [vmem:[#allocation16_spill] sm:$0xff]  ;;  %v16732_v6 = vld [vmem:[#allocation19_spill] sm:$0xff]  ;;  %v16738_v46 = vld [vmem:[#allocation25_spill] sm:$0xff]  ;;  %v2267_v13 = vrot.slane %v9530_v51, 4 }
 0x1a2   : > { %v9574_v50 = vmul.f32 %v16730_v10, %v9421_v1  ;;  %v16731_v5 = vld [vmem:[#allocation60_spill] sm:$0xff]  ;;  %v9582_v7 = vmul.f32 %v16732_v6, %v9421_v1  ;;  %v16735_v10 = vld [vmem:[#allocation23_spill] sm:$0xff]  ;;  %v16737_v6 = vld [vmem:[#allocation65_spill] sm:$0xff]  ;;  %v2269_v21 = vrot.slane %v9534_v9, 4  ;;  %v2275_v51 = vrot.slane %v9550_v39, 4 }
 0x1a3   : > { %v9578_v26 = vmul.f32 %v16731_v5, %v9421_v1  ;;  %v16733_v28 = vld [vmem:[#allocation20_spill] sm:$0xff]  ;;  %v9594_v33 = vmul.f32 %v16735_v10, %v9421_v1  ;;  %v9602_v4 = vmul.f32 %v16737_v6, %v9421_v1  ;;  %v16740_v54 = vld [vmem:[#allocation69_spill] sm:$0xff]  ;;  %v9617_v57 = vld [vmem:[%s6195_s3 + $0x168] sm:$0xff]  ;;  %v2277_v14 = vrot.slane %v9554_v11, 4 }
 0x1a4   : > { %v9586_v61 = vmul.f32 %v16733_v28, %v9421_v1  ;;  %v16734_v44 = vld [vmem:[#allocation64_spill] sm:$0xff]  ;;  %v9606_v28 = vmul.f32 %v16738_v46, %v9421_v1  ;;  %v9614_v10 = vmul.f32 %v16740_v54, %v9421_v1  ;;  %16741 = vst [vmem:[#allocation82_spill] sm:$0xff] %v9617_v57  ;;  %v9624_v6 = vld [vmem:[%s6195_s3 + $0x170] sm:$0xff]  ;;  %v16743_v53 = vld [vmem:[#allocation70_spill] sm:$0xff] }
 0x1a5   : > { %v9590_v36 = vmul.f32 %v16734_v44, %v9421_v1  ;;  %v16736_v5 = vld [vmem:[#allocation24_spill] sm:$0xff]  ;;  %16742 = vst [vmem:[#allocation83_spill] sm:$0xff] %v9624_v6  ;;  %v9628_v46 = vmul.f32 %v9624_v6, %v9421_v1  ;;  %v9635_v18 = vld [vmem:[%s6195_s3 + $0x180] sm:$0xff]  ;;  %v9642_v40 = vld [vmem:[%s6195_s3 + $0x188] sm:$0xff]  ;;  %v9650_v6 = vmul.f32 %v9421_v1, %v8367_v48  ;;  %v9661_v48 = vsel %vm1179_vm3, %v2239_v43, %v2240_v47 }
 0x1a6   : > { %v9598_v52 = vmul.f32 %v16736_v5, %v9421_v1  ;;  %v16739_v45 = vld [vmem:[#allocation28_spill] sm:$0xff]  ;;  %v9621_v5 = vmul.f32 %v9617_v57, %v9421_v1  ;;  %16744 = vst [vmem:[#allocation17_spill] sm:$0xff] %v9635_v18  ;;  %v9639_v54 = vmul.f32 %v9635_v18, %v9421_v1  ;;  %16745 = vst [vmem:[#allocation18_spill] sm:$0xff] %v9642_v40  ;;  %v2287_v39 = vrot.slane %v9578_v26, 4 }
 0x1a7   : > { %v9610_v44 = vmul.f32 %v16739_v45, %v9421_v1  ;;  %v9632_v45 = vmul.f32 %v16743_v53, %v9421_v1  ;;  %v9646_v57 = vmul.f32 %v9642_v40, %v9421_v1  ;;  %v2237_v53 = vrot.slane %v2140_v24, 4 }
 0x1a8   : > { %v9654_v18 = vsel %vm1179_vm3, %v2234_v2, %v2235_v25  ;;  %v2245_v40 = vrot.slane %v9480_v62, 4  ;;  %v9664_v1 = vsel %vm1179_vm3, %v2240_v47, %v2242_v19  ;;  %v9677_v43 = vsel %vm1179_vm3, %v2249_v23, %v2250_v12 }
 0x1a9   : > { %v9657_v16 = vsel %vm1179_vm3, %v2235_v25, %v2237_v53  ;;  %v2252_v25 = vrot.slane %v9494_v56, 4  ;;  %v2255_v19 = vrot.slane %v9502_v41, 4  ;;  %v2257_v47 = vrot.slane %v9506_v35, 4 }
 0x1aa   : > { %v9669_v24 = vsel %vm1179_vm3, %v2244_v29, %v2245_v40  ;;  %v9672_v2 = vsel %vm1179_vm3, %v2245_v40, %v2247_v55  ;;  %v2260_v29 = vrot.slane %v9514_v32, 4  ;;  %v2262_v55 = vrot.slane %v9518_v31, 4 }
 0x1ab   : > { %v9683_v49 = vsel %vm1179_vm3, %v2250_v12, %v2252_v25  ;;  %v2264_v40 = vrot.slane %v9522_v63, 4  ;;  %v2256_v27 = vsel %vm1179_vm3, %v2254_v58, %v2255_v19  ;;  %v2258_v62 = vsel %vm1179_vm3, %v2255_v19, %v2257_v47 }
 0x1ac   : > { %v2261_v22 = vsel %vm1179_vm3, %v2259_v30, %v2260_v29  ;;  %v2263_v56 = vsel %vm1179_vm3, %v2260_v29, %v2262_v55  ;;  %v2270_v32 = vrot.slane %v9538_v15, 4  ;;  %v2268_v63 = vsel %vm1179_vm3, %v2265_v60, %v2267_v13 }
 0x1ad   : > { %v2266_v31 = vsel %vm1179_vm3, %v2264_v40, %v2265_v60  ;;  %v2272_v41 = vrot.slane %v9542_v42, 4  ;;  %v2274_v35 = vrot.slane %v9546_v8, 4  ;;  %v2279_v53 = vrot.slane %v9558_v34, 4 }
 0x1ae   : > { %v2271_v37 = vsel %vm1179_vm3, %v2269_v21, %v2270_v32  ;;  %v2280_v15 = vrot.slane %v9562_v0, 4  ;;  %v2282_v23 = vrot.slane %v9566_v17, 4  ;;  %v2284_v12 = vrot.slane %v9570_v38, 4 }
 0x1af   : > { %v2273_v9 = vsel %vm1179_vm3, %v2270_v32, %v2272_v41  ;;  %v2276_v42 = vsel %vm1179_vm3, %v2274_v35, %v2275_v51  ;;  %v2278_v8 = vsel %vm1179_vm3, %v2275_v51, %v2277_v14  ;;  %v2285_v25 = vrot.slane %v9574_v50, 4  ;;  %v16747_v35 = vld [vmem:[#allocation30_spill] sm:$0xff] }
 0x1b0   : > { %v2281_v11 = vsel %vm1179_vm3, %v2279_v53, %v2280_v15  ;;  %v2283_v34 = vsel %vm1179_vm3, %v2280_v15, %v2282_v23  ;;  %v2289_v58 = vrot.slane %v9582_v7, 4  ;;  %v2290_v0 = vrot.slane %v9586_v61, 4  ;;  %v16752_v53 = vld [vmem:[#allocation79_spill] sm:$0xff] }
 0x1b1   : > { %v2286_v17 = vsel %vm1179_vm3, %v2284_v12, %v2285_v25  ;;  %v2288_v38 = vsel %vm1179_vm3, %v2285_v25, %v2287_v39  ;;  %v2292_v19 = vrot.slane %v9590_v36, 4  ;;  %v2294_v47 = vrot.slane %v9594_v33, 4  ;;  %v16754_v12 = vld [vmem:[#allocation71_spill] sm:$0xff]  ;;  %v16755_v25 = vld [vmem:[#allocation76_spill] sm:$0xff] }
 0x1b2   : > { %v2291_v50 = vsel %vm1179_vm3, %v2289_v58, %v2290_v0  ;;  %v2295_v26 = vrot.slane %v9598_v52, 4  ;;  %v2297_v30 = vrot.slane %v9602_v4, 4  ;;  %v2299_v29 = vrot.slane %v9606_v28, 4 }
 0x1b3   : > { %v2293_v7 = vsel %vm1179_vm3, %v2290_v0, %v2292_v19  ;;  %v2300_v61 = vrot.slane %v9610_v44, 4  ;;  %v2302_v55 = vrot.slane %v9614_v10, 4  ;;  %v2304_v40 = vrot.slane %v9621_v5, 4 }
 0x1b4   : > { %v2296_v36 = vsel %vm1179_vm3, %v2294_v47, %v2295_v26  ;;  %v2298_v33 = vsel %vm1179_vm3, %v2295_v26, %v2297_v30  ;;  %v2305_v60 = vrot.slane %v9628_v46, 4  ;;  %v2307_v52 = vrot.slane %v9632_v45, 4 }
 0x1b5   : > { %v2301_v4 = vsel %vm1179_vm3, %v2299_v29, %v2300_v61  ;;  %v2303_v28 = vsel %vm1179_vm3, %v2300_v61, %v2302_v55  ;;  %v2309_v13 = vrot.slane %v9639_v54, 4  ;;  %v2310_v44 = vrot.slane %v9646_v57, 4  ;;  %v16746_v57 = vld [vmem:[#allocation29_spill] sm:$0xff] }
 0x1b6   : > { %v2306_v10 = vsel %vm1179_vm3, %v2304_v40, %v2305_v60  ;;  %v2308_v5 = vsel %vm1179_vm3, %v2305_v60, %v2307_v52  ;;  %v2312_v21 = vrot.slane %v9650_v6, 4  ;;  %v9741_v32 = vadd.f32 %v9654_v18, %v9353_v59  ;;  %v16748_v18 = vld [vmem:[#allocation37_spill] sm:$0xff] }
 0x1b7   : > { %v2311_v45 = vsel %vm1179_vm3, %v2309_v13, %v2310_v44  ;;  %v9746_v46 = vadd.f32 %v9657_v16, %v9358_v3  ;;  %v9750_v54 = vadd.f32 %v9661_v48, %v9362_v20  ;;  %v9754_v41 = vadd.f32 %v9664_v1, %v16746_v57  ;;  %v16749_v3 = vld [vmem:[#allocation33_spill] sm:$0xff]  ;;  %v16750_v20 = vld [vmem:[#allocation34_spill] sm:$0xff] }
 0x1b8   : > { %v2313_v6 = vsel %vm1179_vm3, %v2310_v44, %v2312_v21  ;;  %v9759_v59 = vadd.f32 %v9669_v24, %v16747_v35  ;;  %v9763_v51 = vadd.f32 %v9672_v2, %v16748_v18  ;;  %v9767_v16 = vadd.f32 %v9677_v43, %v16749_v3  ;;  %v16751_v1 = vld [vmem:[#allocation42_spill] sm:$0xff]  ;;  %v16753_v24 = vld [vmem:[#allocation72_spill] sm:$0xff] }
 0x1b9   : > { %v9771_v48 = vadd.f32 %v9683_v49, %v16750_v20  ;;  %v9774_v14 = vadd.f32 %v2256_v27, %v16751_v1  ;;  %v9777_v15 = vadd.f32 %v2258_v62, %v16752_v53  ;;  %v9780_v23 = vadd.f32 %v2261_v22, %v16753_v24  ;;  %v16756_v43 = vld [vmem:[#allocation38_spill] sm:$0xff]  ;;  %v16757_v49 = vld [vmem:[#allocation39_spill] sm:$0xff]  ;;  %v16760_v22 = vld [vmem:[#allocation44_spill] sm:$0xff] }
 0x1ba   : > { %v9783_v2 = vadd.f32 %v2263_v56, %v16754_v12  ;;  %v9786_v39 = vadd.f32 %v2266_v31, %v16755_v25  ;;  %v9789_v58 = vadd.f32 %v2268_v63, %v16756_v43  ;;  %v9792_v0 = vadd.f32 %v2271_v37, %v16757_v49  ;;  %v16758_v27 = vld [vmem:[#allocation51_spill] sm:$0xff]  ;;  %v16761_v56 = vld [vmem:[#allocation56_spill] sm:$0xff]  ;;  %v5695_v31 = vld [vmem:[%s15337_s1 + $0xa] ss:$0 sm:$0xff] }
 0x1bb   : > { %v9795_v19 = vadd.f32 %v2273_v9, %v16758_v27  ;;  %v16759_v62 = vld [vmem:[#allocation43_spill] sm:$0xff]  ;;  %v9801_v26 = vadd.f32 %v2278_v8, %v16760_v22  ;;  %v9804_v30 = vadd.f32 %v2281_v11, %v16761_v56  ;;  %v16763_v37 = vld [vmem:[#allocation48_spill] sm:$0xff]  ;;  %v16764_v9 = vld [vmem:[#allocation61_spill] sm:$0xff] }
 0x1bc   : > { %v9798_v47 = vadd.f32 %v2276_v42, %v16759_v62  ;;  %v16762_v63 = vld [vmem:[#allocation47_spill] sm:$0xff]  ;;  %v9813_v61 = vadd.f32 %v2286_v17, %v16763_v37  ;;  %v9816_v55 = vadd.f32 %v2288_v38, %v16764_v9  ;;  %v16766_v42 = vld [vmem:[#allocation52_spill] sm:$0xff]  ;;  %v16768_v8 = vld [vmem:[#allocation53_spill] sm:$0xff] }
 0x1bd   : > { %v9810_v29 = vadd.f32 %v2283_v34, %v16762_v63  ;;  %v9819_v40 = vadd.f32 %v2291_v50, %v16766_v42  ;;  %v9822_v60 = vadd.f32 %v2293_v7, %v16768_v8  ;;  %v16770_v11 = vld [vmem:[#allocation57_spill] sm:$0xff]  ;;  %v16772_v13 = vld [vmem:[#allocation58_spill] sm:$0xff]  ;;  %v16776_v17 = vld [vmem:[#allocation63_spill] sm:$0xff] }
 0x1be   : > { %16765 = vst [vmem:[#allocation21_spill] sm:$0xff] %v9816_v55  ;;  %v9825_v52 = vadd.f32 %v2296_v36, %v16770_v11  ;;  %v9828_v44 = vadd.f32 %v2298_v33, %v16772_v13  ;;  %v16774_v34 = vld [vmem:[#allocation62_spill] sm:$0xff]  ;;  %v9834_v57 = vadd.f32 %v2303_v28, %v16776_v17  ;;  %v16778_v38 = vld [vmem:[#allocation67_spill] sm:$0xff]  ;;  %v16780_v50 = vld [vmem:[#allocation68_spill] sm:$0xff] }
 0x1bf   : > { %16767 = vst [vmem:[#allocation22_spill] sm:$0xff] %v9819_v40  ;;  %16769 = vst [vmem:[#allocation26_spill] sm:$0xff] %v9822_v60  ;;  %v9831_v21 = vadd.f32 %v2301_v4, %v16774_v34  ;;  %v9837_v35 = vadd.f32 %v2306_v10, %v16778_v38  ;;  %v9840_v18 = vadd.f32 %v2308_v5, %v16780_v50  ;;  %v16782_v7 = vld [vmem:[#allocation80_spill] sm:$0xff]  ;;  %v16784_v36 = vld [vmem:[#allocation81_spill] sm:$0xff] }
 0x1c0   : > { %16771 = vst [vmem:[#allocation27_spill] sm:$0xff] %v9825_v52  ;;  %16773 = vst [vmem:[#allocation31_spill] sm:$0xff] %v9828_v44  ;;  %v9843_v3 = vadd.f32 %v2311_v45, %v16782_v7  ;;  %v9846_v20 = vadd.f32 %v2313_v6, %v16784_v36  ;;  %v16786_v33 = vld [vmem:[#allocation35_spill] sm:$0xff]  ;;  %v16787_v4 = vld [vmem:[#allocation36_spill] sm:$0xff] }
 0x1c1   : > { %16775 = vst [vmem:[#allocation32_spill] sm:$0xff] %v9831_v21  ;;  %16777 = vst [vmem:[#allocation60_spill] sm:$0xff] %v9834_v57  ;;  %v2384_v1 = vmul.f32 %v16786_v33, %v5695_v31  ;;  %v2385_v53 = vmul.f32 %v16787_v4, %v5695_v31  ;;  %v16788_v24 = vld [vmem:[#allocation41_spill] sm:$0xff]  ;;  %v16791_v49 = vld [vmem:[#allocation50_spill] sm:$0xff] }
 0x1c2   : > { %16779 = vst [vmem:[#allocation64_spill] sm:$0xff] %v9837_v35  ;;  %16781 = vst [vmem:[#allocation65_spill] sm:$0xff] %v9840_v18  ;;  %v2386_v28 = vmul.f32 %v16788_v24, %v5695_v31  ;;  %v16789_v12 = vld [vmem:[#allocation45_spill] sm:$0xff]  ;;  %v2389_v5 = vmul.f32 %v16791_v49, %v5695_v31  ;;  %v16792_v27 = vld [vmem:[#allocation55_spill] sm:$0xff] }
 0x1c3   : > { %16783 = vst [vmem:[#allocation69_spill] sm:$0xff] %v9843_v3  ;;  %16785 = vst [vmem:[#allocation70_spill] sm:$0xff] %v9846_v20  ;;  %v2387_v25 = vmul.f32 %v16789_v12, %v5695_v31  ;;  %v16790_v10 = vld [vmem:[#allocation49_spill] sm:$0xff]  ;;  %v2390_v45 = vmul.f32 %v16792_v27, %v5695_v31  ;;  %v16793_v62 = vld [vmem:[#allocation59_spill] sm:$0xff] }
 0x1c4   : > { %v2388_v43 = vmul.f32 %v16790_v10, %v5695_v31  ;;  %v2391_v22 = vmul.f32 %v16793_v62, %v5695_v31  ;;  %v16794_v6 = vld [vmem:[#allocation75_spill] sm:$0xff]  ;;  %v16795_v63 = vld [vmem:[#allocation77_spill] sm:$0xff]  ;;  %v16796_v9 = vld [vmem:[#allocation66_spill] sm:$0xff] }
 0x1c5   : > { %v2392_v56 = vmul.f32 %v16794_v6, %v5695_v31  ;;  %v2393_v37 = vmul.f32 %v16795_v63, %v5695_v31  ;;  %v2394_v42 = vmul.f32 %v16796_v9, %v5695_v31  ;;  %v16797_v8 = vld [vmem:[#allocation73_spill] sm:$0xff]  ;;  %v16798_v13 = vld [vmem:[#allocation6_spill] sm:$0xff]  ;;  %v16799_v17 = vld [vmem:[#allocation7_spill] sm:$0xff] }
 0x1c6   : > { %v2395_v11 = vmul.f32 %v16797_v8, %v5695_v31  ;;  %v2396_v34 = vmul.f32 %v16798_v13, %v5695_v31  ;;  %v2397_v38 = vmul.f32 %v16799_v17, %v5695_v31  ;;  %v16800_v50 = vld [vmem:[#allocation9_spill] sm:$0xff]  ;;  %v9864_v36 = vld [vmem:[%s6195_s3 + $0x198] sm:$0xff]  ;;  %v16802_v49 = vld [vmem:[#allocation10_spill] sm:$0xff] }
 0x1c7   : > { %v2398_v7 = vmul.f32 %v16800_v50, %v5695_v31  ;;  %16801 = vst [vmem:[#allocation29_spill] sm:$0xff] %v9864_v36  ;;  %v2399_v27 = vmul.f32 %v16802_v49, %v5695_v31  ;;  %v16803_v10 = vld [vmem:[#allocation12_spill] sm:$0xff]  ;;  %v16804_v12 = vld [vmem:[#allocation13_spill] sm:$0xff]  ;;  %v16805_v24 = vld [vmem:[#allocation15_spill] sm:$0xff] }
 0x1c8   : > { %v2400_v62 = vmul.f32 %v16803_v10, %v5695_v31  ;;  %v2401_v6 = vmul.f32 %v16804_v12, %v5695_v31  ;;  %v2402_v63 = vmul.f32 %v16805_v24, %v5695_v31  ;;  %v9871_v4 = vld [vmem:[%s6195_s3 + $0x1a0] sm:$0xff]  ;;  %v16807_v9 = vld [vmem:[#allocation16_spill] sm:$0xff]  ;;  %v16808_v33 = vld [vmem:[#allocation19_spill] sm:$0xff] }
 0x1c9   : > { %16806 = vst [vmem:[#allocation30_spill] sm:$0xff] %v9871_v4  ;;  %v2403_v8 = vmul.f32 %v16807_v9, %v5695_v31  ;;  %v2404_v13 = vmul.f32 %v16808_v33, %v5695_v31  ;;  %v16809_v20 = vld [vmem:[#allocation20_spill] sm:$0xff]  ;;  %v16810_v3 = vld [vmem:[#allocation23_spill] sm:$0xff]  ;;  %v16812_v57 = vld [vmem:[#allocation25_spill] sm:$0xff]  ;;  %v2414_v33 = vmul.f32 %v5695_v31, %v9864_v36 }
 0x1ca   : > { %v2405_v17 = vmul.f32 %v16809_v20, %v5695_v31  ;;  %v2406_v50 = vmul.f32 %v16810_v3, %v5695_v31  ;;  %v16811_v18 = vld [vmem:[#allocation24_spill] sm:$0xff]  ;;  %v2408_v49 = vmul.f32 %v16812_v57, %v5695_v31  ;;  %v16814_v44 = vld [vmem:[#allocation82_spill] sm:$0xff]  ;;  %v16815_v52 = vld [vmem:[#allocation83_spill] sm:$0xff]  ;;  %v2415_v20 = vmul.f32 %v5695_v31, %v9871_v4 }
 0x1cb   : > { %v2407_v35 = vmul.f32 %v16811_v18, %v5695_v31  ;;  %v16813_v21 = vld [vmem:[#allocation28_spill] sm:$0xff]  ;;  %v2410_v12 = vmul.f32 %v16814_v44, %v5695_v31  ;;  %v2411_v24 = vmul.f32 %v16815_v52, %v5695_v31  ;;  %v16816_v60 = vld [vmem:[#allocation17_spill] sm:$0xff]  ;;  %v16817_v55 = vld [vmem:[#allocation18_spill] sm:$0xff]  ;;  %v9887_v3 = vadd.f32 %v2384_v1, %v9741_v32 }
 0x1cc   : > { %v2409_v10 = vmul.f32 %v16813_v21, %v5695_v31  ;;  %v2412_v40 = vmul.f32 %v16816_v60, %v5695_v31  ;;  %v2413_v9 = vmul.f32 %v16817_v55, %v5695_v31  ;;  %v9890_v18 = vadd.f32 %v2385_v53, %v9746_v46  ;;  %v16835_v1 = vld [vmem:[#allocation22_spill] sm:$0xff] }
 0x1cd   : > { %v9893_v21 = vadd.f32 %v2386_v28, %v9750_v54  ;;  %v9896_v44 = vadd.f32 %v2387_v25, %v9754_v41  ;;  %v9899_v60 = vadd.f32 %v2388_v43, %v9759_v59  ;;  %v9902_v55 = vadd.f32 %v2389_v5, %v9763_v51  ;;  %v16837_v53 = vld [vmem:[#allocation26_spill] sm:$0xff]  ;;  %v16839_v28 = vld [vmem:[#allocation27_spill] sm:$0xff] }
 0x1ce   : > { %v9905_v31 = vadd.f32 %v2390_v45, %v9767_v16  ;;  %v9908_v32 = vadd.f32 %v2391_v22, %v9771_v48  ;;  %v9911_v46 = vadd.f32 %v2392_v56, %v9774_v14  ;;  %v9914_v54 = vadd.f32 %v2393_v37, %v9777_v15  ;;  %v16841_v43 = vld [vmem:[#allocation31_spill] sm:$0xff] }
 0x1cf   : > { %v9917_v41 = vadd.f32 %v2394_v42, %v9780_v23  ;;  %v9920_v59 = vadd.f32 %v2395_v11, %v9783_v2  ;;  %v9923_v51 = vadd.f32 %v2396_v34, %v9786_v39  ;;  %v9926_v16 = vadd.f32 %v2397_v38, %v9789_v58  ;;  %v9946_v39 = vld [vmem:[%s15337_s1 + $0xb] ss:$0 sm:$0xff] }
 0x1d0   : > { %16818 = vst [vmem:[#allocation37_spill] sm:$0xff] %v9905_v31  ;;  %16819 = vst [vmem:[#allocation33_spill] sm:$0xff] %v9908_v32  ;;  %v9929_v48 = vadd.f32 %v2398_v7, %v9792_v0  ;;  %v9932_v14 = vadd.f32 %v2399_v27, %v9795_v19  ;;  %v9935_v15 = vadd.f32 %v2400_v62, %v9798_v47  ;;  %v16833_v19 = vld [vmem:[#allocation21_spill] sm:$0xff]  ;;  %v16847_v62 = vld [vmem:[#allocation64_spill] sm:$0xff] }
 0x1d1   : > { %16820 = vst [vmem:[#allocation34_spill] sm:$0xff] %v9911_v46  ;;  %16821 = vst [vmem:[#allocation42_spill] sm:$0xff] %v9914_v54  ;;  %v9938_v23 = vadd.f32 %v2401_v6, %v9801_v26  ;;  %v9941_v2 = vadd.f32 %v2402_v63, %v9804_v30  ;;  %v9949_v58 = vadd.f32 %v2403_v8, %v9810_v29  ;;  %v16843_v29 = vld [vmem:[#allocation32_spill] sm:$0xff]  ;;  %v16849_v6 = vld [vmem:[#allocation65_spill] sm:$0xff] }
 0x1d2   : > { %16822 = vst [vmem:[#allocation79_spill] sm:$0xff] %v9917_v41  ;;  %16823 = vst [vmem:[#allocation72_spill] sm:$0xff] %v9920_v59  ;;  %v9952_v0 = vadd.f32 %v2404_v13, %v9813_v61  ;;  %v9955_v47 = vadd.f32 %v2405_v17, %v16833_v19  ;;  %v9958_v26 = vadd.f32 %v2406_v50, %v16835_v1  ;;  %v16845_v61 = vld [vmem:[#allocation60_spill] sm:$0xff]  ;;  %v16860_v13 = vld [vmem:[#allocation46_spill] sm:$0xff] }
 0x1d3   : > { %16824 = vst [vmem:[#allocation71_spill] sm:$0xff] %v9923_v51  ;;  %16825 = vst [vmem:[#allocation76_spill] sm:$0xff] %v9926_v16  ;;  %v9961_v30 = vadd.f32 %v2407_v35, %v16837_v53  ;;  %v9964_v25 = vadd.f32 %v2408_v49, %v16839_v28  ;;  %v9967_v5 = vadd.f32 %v2409_v10, %v16841_v43  ;;  %v16851_v35 = vld [vmem:[#allocation69_spill] sm:$0xff]  ;;  %v16853_v49 = vld [vmem:[#allocation70_spill] sm:$0xff] }
 0x1d4   : > { %16826 = vst [vmem:[#allocation38_spill] sm:$0xff] %v9929_v48  ;;  %16827 = vst [vmem:[#allocation39_spill] sm:$0xff] %v9932_v14  ;;  %v9970_v27 = vadd.f32 %v2410_v12, %v16843_v29  ;;  %v9973_v45 = vadd.f32 %v2411_v24, %v16845_v61  ;;  %v9976_v22 = vadd.f32 %v2412_v40, %v16847_v62  ;;  %v16855_v10 = vld [vmem:[#allocation35_spill] sm:$0xff]  ;;  %v16856_v12 = vld [vmem:[#allocation36_spill] sm:$0xff] }
 0x1d5   : > { %16828 = vst [vmem:[#allocation51_spill] sm:$0xff] %v9935_v15  ;;  %16829 = vst [vmem:[#allocation43_spill] sm:$0xff] %v9938_v23  ;;  %v9979_v56 = vadd.f32 %v2413_v9, %v16849_v6  ;;  %v9982_v63 = vadd.f32 %v2414_v33, %v16851_v35  ;;  %v9985_v37 = vadd.f32 %v2415_v20, %v16853_v49  ;;  %v16857_v40 = vld [vmem:[#allocation40_spill] sm:$0xff]  ;;  %v16858_v9 = vld [vmem:[#allocation41_spill] sm:$0xff] }
 0x1d6   : > { %16830 = vst [vmem:[#allocation44_spill] sm:$0xff] %v9941_v2  ;;  %16831 = vst [vmem:[#allocation56_spill] sm:$0xff] %v9949_v58  ;;  %v9989_v42 = vmul.f32 %v16855_v10, %v9946_v39  ;;  %v9993_v24 = vmul.f32 %v16856_v12, %v9946_v39  ;;  %v9997_v8 = vmul.f32 %v16857_v40, %v9946_v39  ;;  %v16859_v33 = vld [vmem:[#allocation45_spill] sm:$0xff]  ;;  %v16862_v50 = vld [vmem:[#allocation50_spill] sm:$0xff] }
 0x1d7   : > { %16832 = vst [vmem:[#allocation47_spill] sm:$0xff] %v9952_v0  ;;  %16834 = vst [vmem:[#allocation48_spill] sm:$0xff] %v9955_v47  ;;  %v10001_v11 = vmul.f32 %v16858_v9, %v9946_v39  ;;  %v10005_v20 = vmul.f32 %v16859_v33, %v9946_v39  ;;  %v10009_v34 = vmul.f32 %v16860_v13, %v9946_v39  ;;  %v16861_v17 = vld [vmem:[#allocation49_spill] sm:$0xff]  ;;  %v16863_v19 = vld [vmem:[#allocation54_spill] sm:$0xff] }
 0x1d8   : > { %16836 = vst [vmem:[#allocation61_spill] sm:$0xff] %v9958_v26  ;;  %16838 = vst [vmem:[#allocation52_spill] sm:$0xff] %v9961_v30  ;;  %v10013_v38 = vmul.f32 %v16861_v17, %v9946_v39  ;;  %v10017_v7 = vmul.f32 %v16862_v50, %v9946_v39  ;;  %v10021_v1 = vmul.f32 %v16863_v19, %v9946_v39  ;;  %v16864_v53 = vld [vmem:[#allocation55_spill] sm:$0xff]  ;;  %v16866_v61 = vld [vmem:[#allocation74_spill] sm:$0xff]  ;;  %v2551_v54 = vrot.slane %v9993_v24, 1 }
 0x1d9   : > { %16840 = vst [vmem:[#allocation53_spill] sm:$0xff] %v9964_v25  ;;  %16842 = vst [vmem:[#allocation57_spill] sm:$0xff] %v9967_v5  ;;  %v10025_v28 = vmul.f32 %v16864_v53, %v9946_v39  ;;  %v16865_v43 = vld [vmem:[#allocation59_spill] sm:$0xff]  ;;  %v10033_v62 = vmul.f32 %v16866_v61, %v9946_v39  ;;  %v16868_v49 = vld [vmem:[#allocation77_spill] sm:$0xff]  ;;  %v10190_v41 = vmul.f32 %v9946_v39, %v9864_v36  ;;  %v2553_v46 = vrot.slane %v9997_v8, 1 }
 0x1da   : > { %16844 = vst [vmem:[#allocation58_spill] sm:$0xff] %v9970_v27  ;;  %16846 = vst [vmem:[#allocation62_spill] sm:$0xff] %v9973_v45  ;;  %v10029_v29 = vmul.f32 %v16865_v43, %v9946_v39  ;;  %v16867_v6 = vld [vmem:[#allocation75_spill] sm:$0xff]  ;;  %v10041_v10 = vmul.f32 %v16868_v49, %v9946_v39  ;;  %v16869_v12 = vld [vmem:[#allocation78_spill] sm:$0xff]  ;;  %v2556_v32 = vrot.slane %v10005_v20, 1  ;;  %v2558_v36 = vrot.slane %v10009_v34, 1 }
 0x1db   : > { %16848 = vst [vmem:[#allocation63_spill] sm:$0xff] %v9976_v22  ;;  %16850 = vst [vmem:[#allocation67_spill] sm:$0xff] %v9979_v56  ;;  %v10037_v35 = vmul.f32 %v16867_v6, %v9946_v39  ;;  %v10045_v40 = vmul.f32 %v16869_v12, %v9946_v39  ;;  %v16870_v9 = vld [vmem:[#allocation66_spill] sm:$0xff]  ;;  %v16871_v13 = vld [vmem:[#allocation73_spill] sm:$0xff]  ;;  %v2560_v31 = vrot.slane %v10013_v38, 1  ;;  %v2563_v24 = vrot.slane %v10021_v1, 1 }
 0x1dc   : > { %16852 = vst [vmem:[#allocation68_spill] sm:$0xff] %v9982_v63  ;;  %16854 = vst [vmem:[#allocation80_spill] sm:$0xff] %v9985_v37  ;;  %v10049_v33 = vmul.f32 %v16870_v9, %v9946_v39  ;;  %v10053_v17 = vmul.f32 %v16871_v13, %v9946_v39  ;;  %v16872_v50 = vld [vmem:[#allocation5_spill] sm:$0xff]  ;;  %v16873_v53 = vld [vmem:[#allocation6_spill] sm:$0xff]  ;;  %v2565_v20 = vrot.slane %v10025_v28, 1  ;;  %v2566_v34 = vrot.slane %v10029_v29, 1 }
 0x1dd   : > { %v10057_v19 = vmul.f32 %v16872_v50, %v9946_v39  ;;  %v10061_v43 = vmul.f32 %v16873_v53, %v9946_v39  ;;  %v16874_v61 = vld [vmem:[#allocation7_spill] sm:$0xff]  ;;  %v16875_v49 = vld [vmem:[#allocation8_spill] sm:$0xff]  ;;  %v16876_v9 = vld [vmem:[#allocation9_spill] sm:$0xff]  ;;  %v2570_v38 = vrot.slane %v10037_v35, 1 }
 0x1de   : > { %v10065_v6 = vmul.f32 %v16874_v61, %v9946_v39  ;;  %v10069_v12 = vmul.f32 %v16875_v49, %v9946_v39  ;;  %v10073_v13 = vmul.f32 %v16876_v9, %v9946_v39  ;;  %v16877_v50 = vld [vmem:[#allocation10_spill] sm:$0xff]  ;;  %v16878_v53 = vld [vmem:[#allocation11_spill] sm:$0xff]  ;;  %v16879_v61 = vld [vmem:[#allocation12_spill] sm:$0xff] }
 0x1df   : > { %v10077_v37 = vmul.f32 %v16877_v50, %v9946_v39  ;;  %v10081_v63 = vmul.f32 %v16878_v53, %v9946_v39  ;;  %v10085_v56 = vmul.f32 %v16879_v61, %v9946_v39  ;;  %v16880_v49 = vld [vmem:[#allocation13_spill] sm:$0xff]  ;;  %v16881_v9 = vld [vmem:[#allocation14_spill] sm:$0xff]  ;;  %v16882_v50 = vld [vmem:[#allocation15_spill] sm:$0xff]  ;;  %v2578_v28 = vrot.slane %v10057_v19, 1 }
 0x1e0   : > { %v10089_v22 = vmul.f32 %v16880_v49, %v9946_v39  ;;  %v10093_v45 = vmul.f32 %v16881_v9, %v9946_v39  ;;  %v10097_v27 = vmul.f32 %v16882_v50, %v9946_v39  ;;  %v16883_v53 = vld [vmem:[#allocation16_spill] sm:$0xff]  ;;  %v16885_v49 = vld [vmem:[#allocation19_spill] sm:$0xff]  ;;  %v10137_v2 = vld [vmem:[%s6195_s3 + $0x148] sm:$0xf]  ;;  %v2580_v29 = vrot.slane %v10061_v43, 1 }
 0x1e1   : > { %v10101_v5 = vmul.f32 %v16883_v53, %v9946_v39  ;;  %v10104_v25 = vld [vmem:[%s6195_s3 + $0x118] sm:$0xf]  ;;  %v10112_v9 = vmul.f32 %v16885_v49, %v9946_v39  ;;  %v10119_v50 = vld [vmem:[%s6195_s3 + $0x130] sm:$0xf]  ;;  %v10134_v49 = vld [vmem:[%s6195_s3 + $0x1a8] sm:$0xf] }
 0x1e2   : > { %16884 = vst [vmem:[#allocation81_spill] sm:$0xff] %v10104_v25  ;;  %v10108_v61 = vmul.f32 %v10104_v25, %v9946_v39  ;;  %v16886_v30 = vld [vmem:[#allocation20_spill] sm:$0xff]  ;;  %16887 = vst [vmem:[#allocation25_spill] sm:$0xff] %v10119_v50  ;;  %v10123_v53 = vmul.f32 %v10119_v50, %v9946_v39  ;;  %v16888_v47 = vld [vmem:[#allocation23_spill] sm:$0xff]  ;;  %v10145_v50 = vmul.f32 %v16812_v57, %v9946_v39 }
 0x1e3   : > { %v10116_v26 = vmul.f32 %v16886_v30, %v9946_v39  ;;  %v10127_v25 = vmul.f32 %v16888_v47, %v9946_v39  ;;  %v16889_v0 = vld [vmem:[#allocation24_spill] sm:$0xff]  ;;  %16890 = vst [vmem:[#allocation21_spill] sm:$0xff] %v10137_v2  ;;  %v10141_v30 = vmul.f32 %v10137_v2, %v9946_v39  ;;  %v10152_v15 = vld [vmem:[%s6195_s3 + $0x160] sm:$0xf]  ;;  %v16893_v14 = vld [vmem:[#allocation82_spill] sm:$0xff]  ;;  %v10164_v2 = vmul.f32 %v16815_v52, %v9946_v39 }
 0x1e4   : > { %v10131_v58 = vmul.f32 %v16889_v0, %v9946_v39  ;;  %v16891_v23 = vld [vmem:[#allocation28_spill] sm:$0xff]  ;;  %16892 = vst [vmem:[#allocation22_spill] sm:$0xff] %v10152_v15  ;;  %v10156_v0 = vmul.f32 %v10152_v15, %v9946_v39  ;;  %v10160_v48 = vmul.f32 %v16893_v14, %v9946_v39  ;;  %v16895_v16 = vld [vmem:[#allocation17_spill] sm:$0xff]  ;;  %v16896_v15 = vld [vmem:[#allocation18_spill] sm:$0xff] }
 0x1e5   : > { %v10149_v47 = vmul.f32 %v16891_v23, %v9946_v39  ;;  %v10167_v57 = vld [vmem:[%s6195_s3 + $0x178] sm:$0xf]  ;;  %v10175_v51 = vmul.f32 %v16895_v16, %v9946_v39  ;;  %v10179_v59 = vmul.f32 %v16896_v15, %v9946_v39  ;;  %v10182_v14 = vld [vmem:[%s6195_s3 + $0x190] sm:$0xf]  ;;  %v10198_v16 = vmul.f32 %v9946_v39, %v10134_v49 }
 0x1e6   : > { %16894 = vst [vmem:[#allocation26_spill] sm:$0xff] %v10167_v57  ;;  %v10171_v23 = vmul.f32 %v10167_v57, %v9946_v39  ;;  %16897 = vst [vmem:[#allocation27_spill] sm:$0xff] %v10182_v14  ;;  %v10186_v52 = vmul.f32 %v10182_v14, %v9946_v39  ;;  %v10194_v57 = vmul.f32 %v9946_v39, %v9871_v4  ;;  %v2550_v15 = vrot.slane %v9989_v42, 1 }
 0x1e7   : > { %v2555_v14 = vrot.slane %v10001_v11, 1  ;;  %v10211_v39 = vsel %vm438_vm0, %v2551_v54, %v2553_v46  ;;  %v2561_v42 = vrot.slane %v10017_v7, 1  ;;  %v10219_v11 = vsel %vm438_vm0, %v2556_v32, %v2558_v36 }
 0x1e8   : > { %v10208_v4 = vsel %vm438_vm0, %v2550_v15, %v2551_v54  ;;  %v2568_v54 = vrot.slane %v10033_v62, 1  ;;  %v2571_v36 = vrot.slane %v10041_v10, 1  ;;  %v2575_v7 = vrot.slane %v10049_v33, 1 }
 0x1e9   : > { %v10216_v8 = vsel %vm438_vm0, %v2555_v14, %v2556_v32  ;;  %v10224_v15 = vsel %vm438_vm0, %v2560_v31, %v2561_v42  ;;  %v10227_v46 = vsel %vm438_vm0, %v2561_v42, %v2563_v24  ;;  %v10232_v14 = vsel %vm438_vm0, %v2565_v20, %v2566_v34 }
 0x1ea   : > { %v2573_v32 = vrot.slane %v10045_v40, 1  ;;  %v10238_v1 = vsel %vm438_vm0, %v2566_v34, %v2568_v54  ;;  %v2576_v31 = vrot.slane %v10053_v17, 1  ;;  %v2572_v62 = vsel %vm438_vm0, %v2570_v38, %v2571_v36 }
 0x1eb   : > { %v2581_v42 = vrot.slane %v10065_v6, 1  ;;  %v2583_v10 = vrot.slane %v10069_v12, 1  ;;  %v2585_v24 = vrot.slane %v10073_v13, 1  ;;  %v2586_v17 = vrot.slane %v10077_v37, 1 }
 0x1ec   : > { %v2574_v35 = vsel %vm438_vm0, %v2571_v36, %v2573_v32  ;;  %v2577_v40 = vsel %vm438_vm0, %v2575_v7, %v2576_v31  ;;  %v2579_v33 = vsel %vm438_vm0, %v2576_v31, %v2578_v28  ;;  %v2588_v20 = vrot.slane %v10081_v63, 1 }
 0x1ed   : > { %v2582_v19 = vsel %vm438_vm0, %v2580_v29, %v2581_v42  ;;  %v2584_v43 = vsel %vm438_vm0, %v2581_v42, %v2583_v10  ;;  %v2590_v34 = vrot.slane %v10085_v56, 1  ;;  %v2587_v6 = vsel %vm438_vm0, %v2585_v24, %v2586_v17 }
 0x1ee   : > { %v2591_v12 = vrot.slane %v10089_v22, 1  ;;  %v2593_v54 = vrot.slane %v10093_v45, 1  ;;  %v2595_v38 = vrot.slane %v10097_v27, 1  ;;  %v2589_v13 = vsel %vm438_vm0, %v2586_v17, %v2588_v20 }
 0x1ef   : > { %v2596_v37 = vrot.slane %v10101_v5, 1  ;;  %v2598_v36 = vrot.slane %v10108_v61, 1  ;;  %v2600_v32 = vrot.slane %v10112_v9, 1  ;;  %v2601_v7 = vrot.slane %v10116_v26, 1 }
 0x1f0   : > { %v2592_v63 = vsel %vm438_vm0, %v2590_v34, %v2591_v12  ;;  %v2594_v56 = vsel %vm438_vm0, %v2591_v12, %v2593_v54  ;;  %v2603_v22 = vrot.slane %v10123_v53, 1  ;;  %v2605_v31 = vrot.slane %v10127_v25, 1 }
 0x1f1   : > { %v2597_v45 = vsel %vm438_vm0, %v2595_v38, %v2596_v37  ;;  %v2599_v27 = vsel %vm438_vm0, %v2596_v37, %v2598_v36  ;;  %v2606_v5 = vrot.slane %v10131_v58, 1  ;;  %v2602_v61 = vsel %vm438_vm0, %v2600_v32, %v2601_v7  ;;  %v16904_v38 = vld [vmem:[#allocation42_spill] sm:$0xff]  ;;  %v16908_v36 = vld [vmem:[#allocation72_spill] sm:$0xff] }
 0x1f2   : > { %v2604_v9 = vsel %vm438_vm0, %v2601_v7, %v2603_v22  ;;  %v2608_v28 = vrot.slane %v10141_v30, 1  ;;  %v2610_v29 = vrot.slane %v10145_v50, 1  ;;  %v2611_v53 = vrot.slane %v10149_v47, 1 }
 0x1f3   : > { %v2607_v26 = vsel %vm438_vm0, %v2605_v31, %v2606_v5  ;;  %v2613_v42 = vrot.slane %v10156_v0, 1  ;;  %v2615_v10 = vrot.slane %v10160_v48, 1  ;;  %v2616_v58 = vrot.slane %v10164_v2, 1 }
 0x1f4   : > { %v2609_v25 = vsel %vm438_vm0, %v2606_v5, %v2608_v28  ;;  %v2618_v24 = vrot.slane %v10171_v23, 1  ;;  %v2620_v17 = vrot.slane %v10175_v51, 1  ;;  %v2612_v30 = vsel %vm438_vm0, %v2610_v29, %v2611_v53 }
 0x1f5   : > { %v2614_v50 = vsel %vm438_vm0, %v2611_v53, %v2613_v42  ;;  %v2621_v20 = vrot.slane %v10179_v59, 1  ;;  %v2623_v47 = vrot.slane %v10186_v52, 1  ;;  %v2617_v0 = vsel %vm438_vm0, %v2615_v10, %v2616_v58  ;;  %v16930_v42 = vld [vmem:[#allocation61_spill] sm:$0xff] }
 0x1f6   : > { %v2619_v48 = vsel %vm438_vm0, %v2616_v58, %v2618_v24  ;;  %v2625_v34 = vrot.slane %v10190_v41, 1  ;;  %v2626_v2 = vrot.slane %v10194_v57, 1  ;;  %v2628_v12 = vrot.slane %v10198_v16, 1  ;;  %v16934_v24 = vld [vmem:[#allocation53_spill] sm:$0xff] }
 0x1f7   : > { %v2622_v23 = vsel %vm438_vm0, %v2620_v17, %v2621_v20  ;;  %v2624_v51 = vsel %vm438_vm0, %v2621_v20, %v2623_v47  ;;  %v10296_v54 = vadd.f32 %v10208_v4, %v9887_v3  ;;  %v10301_v59 = vadd.f32 %v10211_v39, %v9890_v18  ;;  %v16898_v18 = vld [vmem:[#allocation37_spill] sm:$0xff] }
 0x1f8   : > { %v2627_v52 = vsel %vm438_vm0, %v2625_v34, %v2626_v2  ;;  %v10305_v41 = vadd.f32 %v10216_v8, %v9893_v21  ;;  %v10309_v57 = vadd.f32 %v10219_v11, %v9896_v44  ;;  %v2629_v16 = vsel %vm438_vm0, %v2626_v2, %v2628_v12  ;;  %v16900_v21 = vld [vmem:[#allocation33_spill] sm:$0xff]  ;;  %v16902_v44 = vld [vmem:[#allocation34_spill] sm:$0xff]  ;;  %v16944_v12 = vld [vmem:[#allocation67_spill] sm:$0xff] }
 0x1f9   : > { %v10314_v3 = vadd.f32 %v10224_v15, %v9899_v60  ;;  %v10318_v4 = vadd.f32 %v10227_v46, %v9902_v55  ;;  %v10322_v39 = vadd.f32 %v10232_v14, %v16898_v18  ;;  %v10326_v8 = vadd.f32 %v10238_v1, %v16900_v21  ;;  %v16906_v60 = vld [vmem:[#allocation79_spill] sm:$0xff]  ;;  %v16912_v14 = vld [vmem:[#allocation76_spill] sm:$0xff]  ;;  %v16914_v1 = vld [vmem:[#allocation38_spill] sm:$0xff] }
 0x1fa   : > { %v10329_v11 = vadd.f32 %v2572_v62, %v16902_v44  ;;  %v10332_v37 = vadd.f32 %v2574_v35, %v16904_v38  ;;  %v10335_v15 = vadd.f32 %v2577_v40, %v16906_v60  ;;  %v10338_v55 = vadd.f32 %v2579_v33, %v16908_v36  ;;  %v16910_v46 = vld [vmem:[#allocation71_spill] sm:$0xff]  ;;  %v16922_v33 = vld [vmem:[#allocation44_spill] sm:$0xff]  ;;  %v16936_v20 = vld [vmem:[#allocation57_spill] sm:$0xff] }
 0x1fb   : > { %16899 = vst [vmem:[#allocation31_spill] sm:$0xff] %v10322_v39  ;;  %16901 = vst [vmem:[#allocation32_spill] sm:$0xff] %v10326_v8  ;;  %v10341_v32 = vadd.f32 %v2582_v19, %v16910_v46  ;;  %v10344_v7 = vadd.f32 %v2584_v43, %v16912_v14  ;;  %v10347_v22 = vadd.f32 %v2587_v6, %v16914_v1  ;;  %v16916_v62 = vld [vmem:[#allocation39_spill] sm:$0xff]  ;;  %v10364_v19 = vld [vmem:[%s15337_s1 + $0xc] ss:$0 sm:$0xff] }
 0x1fc   : > { %16903 = vst [vmem:[#allocation60_spill] sm:$0xff] %v10329_v11  ;;  %16905 = vst [vmem:[#allocation64_spill] sm:$0xff] %v10332_v37  ;;  %v10350_v31 = vadd.f32 %v2589_v13, %v16916_v62  ;;  %v16918_v35 = vld [vmem:[#allocation51_spill] sm:$0xff]  ;;  %v10359_v29 = vadd.f32 %v2597_v45, %v16922_v33  ;;  %v16924_v43 = vld [vmem:[#allocation56_spill] sm:$0xff]  ;;  %v10376_v10 = vadd.f32 %v2607_v26, %v16930_v42 }
 0x1fd   : > { %16907 = vst [vmem:[#allocation65_spill] sm:$0xff] %v10335_v15  ;;  %16909 = vst [vmem:[#allocation69_spill] sm:$0xff] %v10338_v55  ;;  %v10353_v5 = vadd.f32 %v2592_v63, %v16918_v35  ;;  %v16920_v40 = vld [vmem:[#allocation43_spill] sm:$0xff]  ;;  %v10367_v6 = vadd.f32 %v2599_v27, %v16924_v43  ;;  %v16928_v63 = vld [vmem:[#allocation48_spill] sm:$0xff]  ;;  %v10382_v17 = vadd.f32 %v2612_v30, %v16934_v24 }
 0x1fe   : > { %16911 = vst [vmem:[#allocation70_spill] sm:$0xff] %v10341_v32  ;;  %16913 = vst [vmem:[#allocation35_spill] sm:$0xff] %v10344_v7  ;;  %v10356_v28 = vadd.f32 %v2594_v56, %v16920_v40  ;;  %v16926_v13 = vld [vmem:[#allocation47_spill] sm:$0xff]  ;;  %v10373_v56 = vadd.f32 %v2604_v9, %v16928_v63  ;;  %v16932_v45 = vld [vmem:[#allocation52_spill] sm:$0xff]  ;;  %v10385_v27 = vadd.f32 %v2614_v50, %v16936_v20 }
 0x1ff   : > { %16915 = vst [vmem:[#allocation36_spill] sm:$0xff] %v10347_v22  ;;  %16917 = vst [vmem:[#allocation40_spill] sm:$0xff] %v10350_v31  ;;  %v10370_v53 = vadd.f32 %v2602_v61, %v16926_v13  ;;  %v10379_v58 = vadd.f32 %v2609_v25, %v16932_v45  ;;  %v16938_v61 = vld [vmem:[#allocation58_spill] sm:$0xff]  ;;  %v16942_v26 = vld [vmem:[#allocation63_spill] sm:$0xff]  ;;  %v10397_v25 = vadd.f32 %v2624_v51, %v16944_v12 }
 0x200   : > { %16919 = vst [vmem:[#allocation41_spill] sm:$0xff] %v10353_v5  ;;  %16921 = vst [vmem:[#allocation45_spill] sm:$0xff] %v10356_v28  ;;  %v10388_v47 = vadd.f32 %v2617_v0, %v16938_v61  ;;  %v16940_v34 = vld [vmem:[#allocation62_spill] sm:$0xff]  ;;  %v10394_v2 = vadd.f32 %v2622_v23, %v16942_v26  ;;  %v16946_v30 = vld [vmem:[#allocation68_spill] sm:$0xff] }
 0x201   : > { %16923 = vst [vmem:[#allocation46_spill] sm:$0xff] %v10359_v29  ;;  %16925 = vst [vmem:[#allocation49_spill] sm:$0xff] %v10367_v6  ;;  %v10391_v9 = vadd.f32 %v2619_v48, %v16940_v34  ;;  %v10400_v18 = vadd.f32 %v2627_v52, %v16946_v30  ;;  %v16948_v21 = vld [vmem:[#allocation80_spill] sm:$0xff]  ;;  %v10406_v0 = vld [vmem:[%s6195_s3 + $0x30] sm:$0xff] }
 0x202   : > { %16927 = vst [vmem:[#allocation50_spill] sm:$0xff] %v10370_v53  ;;  %16929 = vst [vmem:[#allocation54_spill] sm:$0xff] %v10373_v56  ;;  %v10403_v50 = vadd.f32 %v2629_v16, %v16948_v21  ;;  %v10410_v48 = vmul.f32 %v10406_v0, %v10364_v19  ;;  %v10413_v23 = vld [vmem:[%s6195_s3 + $0x38] sm:$0xff]  ;;  %v10420_v52 = vld [vmem:[%s6195_s3 + $0x40] sm:$0xf] }
 0x203   : > { %16931 = vst [vmem:[#allocation55_spill] sm:$0xff] %v10376_v10  ;;  %16933 = vst [vmem:[#allocation59_spill] sm:$0xff] %v10379_v58  ;;  %v10417_v51 = vmul.f32 %v10413_v23, %v10364_v19  ;;  %v10424_v16 = vmul.f32 %v10420_v52, %v10364_v19  ;;  %v10427_v44 = vld [vmem:[%s6195_s3 + $0x48] sm:$0xff]  ;;  %v10434_v60 = vld [vmem:[%s6195_s3 + $0x50] sm:$0xff] }
 0x204   : > { %16935 = vst [vmem:[#allocation74_spill] sm:$0xff] %v10382_v17  ;;  %16937 = vst [vmem:[#allocation75_spill] sm:$0xff] %v10385_v27  ;;  %v10431_v38 = vmul.f32 %v10427_v44, %v10364_v19  ;;  %v10438_v36 = vmul.f32 %v10434_v60, %v10364_v19  ;;  %v10441_v46 = vld [vmem:[%s6195_s3 + $0x58] sm:$0xf]  ;;  %v10448_v1 = vld [vmem:[%s6195_s3 + $0x60] sm:$0xff]  ;;  %v2796_v37 = vrot.slane %v10410_v48, 2 }
 0x205   : > { %16939 = vst [vmem:[#allocation77_spill] sm:$0xff] %v10388_v47  ;;  %16941 = vst [vmem:[#allocation78_spill] sm:$0xff] %v10391_v9  ;;  %v10445_v14 = vmul.f32 %v10441_v46, %v10364_v19  ;;  %v10452_v62 = vmul.f32 %v10448_v1, %v10364_v19  ;;  %v10455_v35 = vld [vmem:[%s6195_s3 + $0x68] sm:$0xff]  ;;  %v10462_v33 = vld [vmem:[%s6195_s3 + $0x70] sm:$0xf]  ;;  %v2799_v11 = vrot.slane %v10424_v16, 2 }
 0x206   : > { %16943 = vst [vmem:[#allocation66_spill] sm:$0xff] %v10394_v2  ;;  %16945 = vst [vmem:[#allocation73_spill] sm:$0xff] %v10397_v25  ;;  %v10459_v40 = vmul.f32 %v10455_v35, %v10364_v19  ;;  %v10466_v43 = vmul.f32 %v10462_v33, %v10364_v19  ;;  %v10469_v13 = vld [vmem:[%s6195_s3 + $0x78] sm:$0xff]  ;;  %v10476_v42 = vld [vmem:[%s6195_s3 + $0x80] sm:$0xff]  ;;  %v2802_v8 = vrot.slane %v10438_v36, 2 }
 0x207   : > { %16947 = vst [vmem:[#allocation5_spill] sm:$0xff] %v10400_v18  ;;  %16949 = vst [vmem:[#allocation6_spill] sm:$0xff] %v10403_v50  ;;  %v10473_v63 = vmul.f32 %v10469_v13, %v10364_v19  ;;  %v10480_v45 = vmul.f32 %v10476_v42, %v10364_v19  ;;  %v10483_v24 = vld [vmem:[%s6195_s3 + $0x88] sm:$0xf]  ;;  %v10490_v61 = vld [vmem:[%s6195_s3 + $0x90] sm:$0xff]  ;;  %v2806_v39 = vrot.slane %v10452_v62, 2 }
 0x208   : > { %16950 = vst [vmem:[#allocation7_spill] sm:$0xff] %v10406_v0  ;;  %16951 = vst [vmem:[#allocation8_spill] sm:$0xff] %v10413_v23  ;;  %v10487_v20 = vmul.f32 %v10483_v24, %v10364_v19  ;;  %v10494_v34 = vmul.f32 %v10490_v61, %v10364_v19  ;;  %v10497_v26 = vld [vmem:[%s6195_s3 + $0x98] sm:$0xff]  ;;  %v10504_v30 = vld [vmem:[%s6195_s3 + $0xa0] sm:$0xf]  ;;  %v2807_v48 = vrot.slane %v10459_v40, 2 }
 0x209   : > { %16952 = vst [vmem:[#allocation9_spill] sm:$0xff] %v10420_v52  ;;  %16953 = vst [vmem:[#allocation10_spill] sm:$0xff] %v10427_v44  ;;  %v10501_v12 = vmul.f32 %v10497_v26, %v10364_v19  ;;  %v10508_v21 = vmul.f32 %v10504_v30, %v10364_v19  ;;  %v10567_v44 = vld [vmem:[%s6195_s3 + $0xe8] sm:$0xf]  ;;  %v10574_v52 = vld [vmem:[%s6195_s3 + $0xf0] sm:$0xff]  ;;  %v2811_v36 = vrot.slane %v10473_v63, 2 }
 0x20a   : > { %16954 = vst [vmem:[#allocation11_spill] sm:$0xff] %v10434_v60  ;;  %16955 = vst [vmem:[#allocation12_spill] sm:$0xff] %v10441_v46  ;;  %v10553_v46 = vld [vmem:[%s6195_s3 + $0xd8] sm:$0xff]  ;;  %v10560_v60 = vld [vmem:[%s6195_s3 + $0xe0] sm:$0xff]  ;;  %v2814_v62 = vrot.slane %v10487_v20, 2  ;;  %v2816_v40 = vrot.slane %v10494_v34, 2 }
 0x20b   : > { %16956 = vst [vmem:[#allocation13_spill] sm:$0xff] %v10448_v1  ;;  %16957 = vst [vmem:[#allocation14_spill] sm:$0xff] %v10455_v35  ;;  %v10539_v35 = vld [vmem:[%s6195_s3 + $0xc8] sm:$0xff]  ;;  %v10546_v1 = vld [vmem:[%s6195_s3 + $0xd0] sm:$0xf] }
 0x20c   : > { %16958 = vst [vmem:[#allocation15_spill] sm:$0xff] %v10462_v33  ;;  %16959 = vst [vmem:[#allocation16_spill] sm:$0xff] %v10469_v13  ;;  %v10525_v13 = vld [vmem:[%s6195_s3 + $0xb8] sm:$0xf]  ;;  %v10532_v33 = vld [vmem:[%s6195_s3 + $0xc0] sm:$0xff] }
 0x20d   : > { %16960 = vst [vmem:[#allocation19_spill] sm:$0xff] %v10476_v42  ;;  %16961 = vst [vmem:[#allocation20_spill] sm:$0xff] %v10483_v24  ;;  %v10511_v24 = vld [vmem:[%s6195_s3 + $0xa8] sm:$0xff]  ;;  %v10518_v42 = vld [vmem:[%s6195_s3 + $0xb0] sm:$0xff] }
 0x20e   : > { %16962 = vst [vmem:[#allocation23_spill] sm:$0xff] %v10490_v61  ;;  %16963 = vst [vmem:[#allocation24_spill] sm:$0xff] %v10497_v26  ;;  %v10515_v61 = vmul.f32 %v10511_v24, %v10364_v19  ;;  %v10522_v26 = vmul.f32 %v10518_v42, %v10364_v19  ;;  %v10581_v23 = vld [vmem:[%s6195_s3 + $0xf8] sm:$0xff]  ;;  %v10588_v0 = vld [vmem:[%s6195_s3 + $0x100] sm:$0xf] }
 0x20f   : > { %16964 = vst [vmem:[#allocation28_spill] sm:$0xff] %v10504_v30  ;;  %16965 = vst [vmem:[#allocation37_spill] sm:$0xff] %v10511_v24  ;;  %v10529_v30 = vmul.f32 %v10525_v13, %v10364_v19  ;;  %v10536_v24 = vmul.f32 %v10532_v33, %v10364_v19  ;;  %v10595_v50 = vld [vmem:[%s6195_s3 + $0x108] sm:$0xff]  ;;  %v10602_v18 = vld [vmem:[%s6195_s3 + $0x110] sm:$0xff] }
 0x210   : > { %16966 = vst [vmem:[#allocation33_spill] sm:$0xff] %v10518_v42  ;;  %16967 = vst [vmem:[#allocation34_spill] sm:$0xff] %v10525_v13  ;;  %v10543_v42 = vmul.f32 %v10539_v35, %v10364_v19  ;;  %v10550_v13 = vmul.f32 %v10546_v1, %v10364_v19  ;;  %v16979_v25 = vld [vmem:[#allocation81_spill] sm:$0xff]  ;;  %v10620_v47 = vld [vmem:[%s6195_s3 + $0x128] sm:$0xff] }
 0x211   : > { %16968 = vst [vmem:[#allocation42_spill] sm:$0xff] %v10532_v33  ;;  %16969 = vst [vmem:[#allocation79_spill] sm:$0xff] %v10539_v35  ;;  %v10557_v33 = vmul.f32 %v10553_v46, %v10364_v19  ;;  %v10564_v35 = vmul.f32 %v10560_v60, %v10364_v19  ;;  %v10610_v2 = vmul.f32 %v16979_v25, %v10364_v19  ;;  %v16982_v27 = vld [vmem:[#allocation25_spill] sm:$0xff]  ;;  %v10631_v17 = vld [vmem:[%s6195_s3 + $0x138] sm:$0xff]  ;;  %v2826_v20 = vrot.slane %v10536_v24, 2 }
 0x212   : > { %16970 = vst [vmem:[#allocation72_spill] sm:$0xff] %v10546_v1  ;;  %16971 = vst [vmem:[#allocation71_spill] sm:$0xff] %v10553_v46  ;;  %v10571_v1 = vmul.f32 %v10567_v44, %v10364_v19  ;;  %v10578_v46 = vmul.f32 %v10574_v52, %v10364_v19  ;;  %v10635_v25 = vmul.f32 %v10631_v17, %v10364_v19  ;;  %v10638_v58 = vld [vmem:[%s6195_s3 + $0x140] sm:$0xff]  ;;  %v10649_v56 = vld [vmem:[%s6195_s3 + $0x150] sm:$0xff] }
 0x213   : > { %16972 = vst [vmem:[#allocation76_spill] sm:$0xff] %v10560_v60  ;;  %16973 = vst [vmem:[#allocation38_spill] sm:$0xff] %v10567_v44  ;;  %v10585_v60 = vmul.f32 %v10581_v23, %v10364_v19  ;;  %v10592_v44 = vmul.f32 %v10588_v0, %v10364_v19  ;;  %v16985_v10 = vld [vmem:[#allocation21_spill] sm:$0xff]  ;;  %v10656_v53 = vld [vmem:[%s6195_s3 + $0x158] sm:$0xff] }
 0x214   : > { %16974 = vst [vmem:[#allocation39_spill] sm:$0xff] %v10574_v52  ;;  %16975 = vst [vmem:[#allocation51_spill] sm:$0xff] %v10581_v23  ;;  %v10599_v52 = vmul.f32 %v10595_v50, %v10364_v19  ;;  %v10606_v23 = vmul.f32 %v10602_v18, %v10364_v19  ;;  %v16988_v6 = vld [vmem:[#allocation22_spill] sm:$0xff]  ;;  %v16990_v28 = vld [vmem:[#allocation83_spill] sm:$0xff] }
 0x215   : > { %16976 = vst [vmem:[#allocation43_spill] sm:$0xff] %v10588_v0  ;;  %16977 = vst [vmem:[#allocation44_spill] sm:$0xff] %v10595_v50  ;;  %v10613_v0 = vld [vmem:[%s6195_s3 + $0x120] sm:$0xff]  ;;  %v10624_v50 = vmul.f32 %v10620_v47, %v10364_v19  ;;  %v16989_v29 = vld [vmem:[#allocation82_spill] sm:$0xff]  ;;  %v10672_v5 = vmul.f32 %v16990_v28, %v10364_v19 }
 0x216   : > { %16978 = vst [vmem:[#allocation56_spill] sm:$0xff] %v10602_v18  ;;  %16980 = vst [vmem:[#allocation47_spill] sm:$0xff] %v10613_v0  ;;  %v10617_v9 = vmul.f32 %v10613_v0, %v10364_v19  ;;  %v10628_v18 = vmul.f32 %v16982_v27, %v10364_v19  ;;  %v10642_v0 = vmul.f32 %v10638_v58, %v10364_v19  ;;  %v16992_v22 = vld [vmem:[#allocation17_spill] sm:$0xff]  ;;  %v16993_v7 = vld [vmem:[#allocation18_spill] sm:$0xff] }
 0x217   : > { %16981 = vst [vmem:[#allocation48_spill] sm:$0xff] %v10620_v47  ;;  %16983 = vst [vmem:[#allocation61_spill] sm:$0xff] %v10631_v17  ;;  %v10646_v47 = vmul.f32 %v16985_v10, %v10364_v19  ;;  %v10653_v27 = vmul.f32 %v10649_v56, %v10364_v19  ;;  %v10660_v17 = vmul.f32 %v10656_v53, %v10364_v19  ;;  %v16994_v32 = vld [vmem:[#allocation27_spill] sm:$0xff]  ;;  %v16995_v55 = vld [vmem:[#allocation29_spill] sm:$0xff] }
 0x218   : > { %16984 = vst [vmem:[#allocation52_spill] sm:$0xff] %v10638_v58  ;;  %16986 = vst [vmem:[#allocation53_spill] sm:$0xff] %v10649_v56  ;;  %v10664_v58 = vmul.f32 %v16988_v6, %v10364_v19  ;;  %v10668_v10 = vmul.f32 %v16989_v29, %v10364_v19  ;;  %v16991_v56 = vld [vmem:[#allocation26_spill] sm:$0xff]  ;;  %v10684_v6 = vmul.f32 %v16993_v7, %v10364_v19  ;;  %v2797_v7 = vrot.slane %v10417_v51, 2 }
 0x219   : > { %16987 = vst [vmem:[#allocation57_spill] sm:$0xff] %v10656_v53  ;;  %v10676_v31 = vmul.f32 %v16991_v56, %v10364_v19  ;;  %v10680_v53 = vmul.f32 %v16992_v22, %v10364_v19  ;;  %v10688_v29 = vmul.f32 %v16994_v32, %v10364_v19  ;;  %v10692_v28 = vmul.f32 %v10364_v19, %v16995_v55  ;;  %v16996_v15 = vld [vmem:[#allocation30_spill] sm:$0xff] }
 0x21a   : > { %v10696_v56 = vmul.f32 %v10364_v19, %v16996_v15  ;;  %v10700_v22 = vmul.f32 %v10364_v19, %v10134_v49  ;;  %v2801_v32 = vrot.slane %v10431_v38, 2  ;;  %v2804_v55 = vrot.slane %v10445_v14, 2 }
 0x21b   : > { %v10710_v15 = vsel %vm685_vm1, %v2796_v37, %v2797_v7  ;;  %v10713_v19 = vsel %vm685_vm1, %v2797_v7, %v2799_v11  ;;  %v2809_v51 = vrot.slane %v10466_v43, 2  ;;  %v2812_v14 = vrot.slane %v10480_v45, 2 }
 0x21c   : > { %v10718_v16 = vsel %vm685_vm1, %v2801_v32, %v2802_v8  ;;  %v10721_v38 = vsel %vm685_vm1, %v2802_v8, %v2804_v55  ;;  %v10726_v37 = vsel %vm685_vm1, %v2806_v39, %v2807_v48  ;;  %v2817_v8 = vrot.slane %v10501_v12, 2 }
 0x21d   : > { %v10729_v11 = vsel %vm685_vm1, %v2807_v48, %v2809_v51  ;;  %v10734_v32 = vsel %vm685_vm1, %v2811_v36, %v2812_v14  ;;  %v2819_v55 = vrot.slane %v10508_v21, 2  ;;  %v2821_v43 = vrot.slane %v10515_v61, 2 }
 0x21e   : > { %v10740_v63 = vsel %vm685_vm1, %v2812_v14, %v2814_v62  ;;  %v2822_v39 = vrot.slane %v10522_v26, 2  ;;  %v2824_v45 = vrot.slane %v10529_v30, 2  ;;  %v2818_v34 = vsel %vm685_vm1, %v2816_v40, %v2817_v8 }
 0x21f   : > { %v2820_v7 = vsel %vm685_vm1, %v2817_v8, %v2819_v55  ;;  %v2827_v48 = vrot.slane %v10543_v42, 2  ;;  %v2829_v12 = vrot.slane %v10550_v13, 2  ;;  %v2831_v51 = vrot.slane %v10557_v33, 2 }
 0x220   : > { %v2823_v21 = vsel %vm685_vm1, %v2821_v43, %v2822_v39  ;;  %v2825_v61 = vsel %vm685_vm1, %v2822_v39, %v2824_v45  ;;  %v2832_v26 = vrot.slane %v10564_v35, 2  ;;  %v2834_v36 = vrot.slane %v10571_v1, 2 }
 0x221   : > { %v2828_v30 = vsel %vm685_vm1, %v2826_v20, %v2827_v48  ;;  %v2830_v24 = vsel %vm685_vm1, %v2827_v48, %v2829_v12  ;;  %v2836_v14 = vrot.slane %v10578_v46, 2  ;;  %v2837_v13 = vrot.slane %v10585_v60, 2 }
 0x222   : > { %v2833_v42 = vsel %vm685_vm1, %v2831_v51, %v2832_v26  ;;  %v2839_v62 = vrot.slane %v10592_v44, 2  ;;  %v2841_v40 = vrot.slane %v10599_v52, 2  ;;  %v2835_v33 = vsel %vm685_vm1, %v2832_v26, %v2834_v36 }
 0x223   : > { %v2842_v35 = vrot.slane %v10606_v23, 2  ;;  %v2844_v8 = vrot.slane %v10610_v2, 2  ;;  %v2846_v55 = vrot.slane %v10617_v9, 2  ;;  %v2838_v1 = vsel %vm685_vm1, %v2836_v14, %v2837_v13 }
 0x224   : > { %v2840_v46 = vsel %vm685_vm1, %v2837_v13, %v2839_v62  ;;  %v2847_v43 = vrot.slane %v10624_v50, 2  ;;  %v2849_v60 = vrot.slane %v10628_v18, 2  ;;  %v2851_v39 = vrot.slane %v10635_v25, 2 }
 0x225   : > { %v2843_v44 = vsel %vm685_vm1, %v2841_v40, %v2842_v35  ;;  %v2845_v52 = vsel %vm685_vm1, %v2842_v35, %v2844_v8  ;;  %v2852_v23 = vrot.slane %v10642_v0, 2  ;;  %v2854_v45 = vrot.slane %v10646_v47, 2  ;;  %v17006_v40 = vld [vmem:[#allocation64_spill] sm:$0xff]  ;;  %v17010_v8 = vld [vmem:[#allocation69_spill] sm:$0xff] }
 0x226   : > { %v2848_v2 = vsel %vm685_vm1, %v2846_v55, %v2847_v43  ;;  %v2850_v9 = vsel %vm685_vm1, %v2847_v43, %v2849_v60  ;;  %v2856_v20 = vrot.slane %v10653_v27, 2  ;;  %v2857_v18 = vrot.slane %v10660_v17, 2 }
 0x227   : > { %v2853_v50 = vsel %vm685_vm1, %v2851_v39, %v2852_v23  ;;  %v2859_v48 = vrot.slane %v10664_v58, 2  ;;  %v2861_v12 = vrot.slane %v10668_v10, 2  ;;  %v2855_v25 = vsel %vm685_vm1, %v2852_v23, %v2854_v45 }
 0x228   : > { %v2862_v0 = vrot.slane %v10672_v5, 2  ;;  %v2864_v51 = vrot.slane %v10676_v31, 2  ;;  %v2866_v26 = vrot.slane %v10680_v53, 2  ;;  %v2858_v47 = vsel %vm685_vm1, %v2856_v20, %v2857_v18 }
 0x229   : > { %v2860_v27 = vsel %vm685_vm1, %v2857_v18, %v2859_v48  ;;  %v2867_v36 = vrot.slane %v10684_v6, 2  ;;  %v2869_v17 = vrot.slane %v10688_v29, 2  ;;  %v2871_v14 = vrot.slane %v10692_v28, 2  ;;  %v17028_v18 = vld [vmem:[#allocation50_spill] sm:$0xff] }
 0x22a   : > { %v2863_v58 = vsel %vm685_vm1, %v2861_v12, %v2862_v0  ;;  %v2865_v10 = vsel %vm685_vm1, %v2862_v0, %v2864_v51  ;;  %v2872_v5 = vrot.slane %v10696_v56, 2  ;;  %v2874_v13 = vrot.slane %v10700_v22, 2  ;;  %v17030_v48 = vld [vmem:[#allocation54_spill] sm:$0xff]  ;;  %v17032_v12 = vld [vmem:[#allocation55_spill] sm:$0xff] }
 0x22b   : > { %v2868_v31 = vsel %vm685_vm1, %v2866_v26, %v2867_v36  ;;  %v2870_v53 = vsel %vm685_vm1, %v2867_v36, %v2869_v17  ;;  %v10798_v62 = vadd.f32 %v10710_v15, %v10296_v54  ;;  %v10803_v29 = vadd.f32 %v10713_v19, %v10301_v59  ;;  %v17000_v59 = vld [vmem:[#allocation31_spill] sm:$0xff]  ;;  %v17036_v51 = vld [vmem:[#allocation74_spill] sm:$0xff] }
 0x22c   : > { %v2873_v6 = vsel %vm685_vm1, %v2871_v14, %v2872_v5  ;;  %v10807_v28 = vadd.f32 %v10718_v16, %v10305_v41  ;;  %v10811_v56 = vadd.f32 %v10721_v38, %v10309_v57  ;;  %v2875_v22 = vsel %vm685_vm1, %v2872_v5, %v2874_v13  ;;  %v17002_v41 = vld [vmem:[#allocation32_spill] sm:$0xff]  ;;  %v17034_v0 = vld [vmem:[#allocation59_spill] sm:$0xff] }
 0x22d   : > { %v10816_v54 = vadd.f32 %v10726_v37, %v10314_v3  ;;  %v10820_v15 = vadd.f32 %v10729_v11, %v10318_v4  ;;  %v10824_v19 = vadd.f32 %v10734_v32, %v17000_v59  ;;  %v10828_v16 = vadd.f32 %v10740_v63, %v17002_v41  ;;  %v17004_v57 = vld [vmem:[#allocation60_spill] sm:$0xff]  ;;  %v17008_v3 = vld [vmem:[#allocation65_spill] sm:$0xff]  ;;  %v17012_v11 = vld [vmem:[#allocation70_spill] sm:$0xff] }
 0x22e   : > { %16997 = vst [vmem:[#allocation58_spill] sm:$0xff] %v10811_v56  ;;  %v10831_v38 = vadd.f32 %v2818_v34, %v17004_v57  ;;  %v10834_v35 = vadd.f32 %v2820_v7, %v17006_v40  ;;  %v10837_v37 = vadd.f32 %v2823_v21, %v17008_v3  ;;  %v10840_v4 = vadd.f32 %v2825_v61, %v17010_v8  ;;  %v17014_v32 = vld [vmem:[#allocation35_spill] sm:$0xff]  ;;  %v17016_v63 = vld [vmem:[#allocation36_spill] sm:$0xff]  ;;  %v17020_v7 = vld [vmem:[#allocation41_spill] sm:$0xff] }
 0x22f   : > { %16998 = vst [vmem:[#allocation62_spill] sm:$0xff] %v10816_v54  ;;  %16999 = vst [vmem:[#allocation63_spill] sm:$0xff] %v10820_v15  ;;  %v10843_v55 = vadd.f32 %v2828_v30, %v17012_v11  ;;  %v10846_v43 = vadd.f32 %v2830_v24, %v17014_v32  ;;  %v10849_v60 = vadd.f32 %v2833_v42, %v17016_v63  ;;  %v17018_v34 = vld [vmem:[#allocation40_spill] sm:$0xff]  ;;  %v17022_v21 = vld [vmem:[#allocation45_spill] sm:$0xff] }
 0x230   : > { %17001 = vst [vmem:[#allocation67_spill] sm:$0xff] %v10824_v19  ;;  %17003 = vst [vmem:[#allocation68_spill] sm:$0xff] %v10828_v16  ;;  %v10852_v39 = vadd.f32 %v2835_v33, %v17018_v34  ;;  %v10855_v23 = vadd.f32 %v2838_v1, %v17020_v7  ;;  %v10858_v45 = vadd.f32 %v2840_v46, %v17022_v21  ;;  %v17024_v61 = vld [vmem:[#allocation46_spill] sm:$0xff]  ;;  %v17026_v24 = vld [vmem:[#allocation49_spill] sm:$0xff] }
 0x231   : > { %17005 = vst [vmem:[#allocation80_spill] sm:$0xff] %v10831_v38  ;;  %17007 = vst [vmem:[#allocation82_spill] sm:$0xff] %v10834_v35  ;;  %v10861_v20 = vadd.f32 %v2843_v44, %v17024_v61  ;;  %v10866_v30 = vld [vmem:[%s15337_s1 + $0xd] ss:$0 sm:$0xff]  ;;  %v10869_v42 = vadd.f32 %v2845_v52, %v17026_v24  ;;  %v10872_v33 = vadd.f32 %v2848_v2, %v17028_v18  ;;  %v17038_v36 = vld [vmem:[#allocation75_spill] sm:$0xff] }
 0x232   : > { %17009 = vst [vmem:[#allocation83_spill] sm:$0xff] %v10837_v37  ;;  %17011 = vst [vmem:[#allocation17_spill] sm:$0xff] %v10840_v4  ;;  %v10875_v1 = vadd.f32 %v2850_v9, %v17030_v48  ;;  %v10878_v46 = vadd.f32 %v2853_v50, %v17032_v12  ;;  %v10881_v44 = vadd.f32 %v2855_v25, %v17034_v0  ;;  %v17040_v52 = vld [vmem:[#allocation77_spill] sm:$0xff]  ;;  %v17042_v2 = vld [vmem:[#allocation78_spill] sm:$0xff] }
 0x233   : > { %17013 = vst [vmem:[#allocation18_spill] sm:$0xff] %v10843_v55  ;;  %17015 = vst [vmem:[#allocation31_spill] sm:$0xff] %v10846_v43  ;;  %v10884_v26 = vadd.f32 %v2858_v47, %v17036_v51  ;;  %v10887_v17 = vadd.f32 %v2860_v27, %v17038_v36  ;;  %v10890_v14 = vadd.f32 %v2863_v58, %v17040_v52  ;;  %v17044_v9 = vld [vmem:[#allocation66_spill] sm:$0xff]  ;;  %v17046_v50 = vld [vmem:[#allocation73_spill] sm:$0xff] }
 0x234   : > { %17017 = vst [vmem:[#allocation32_spill] sm:$0xff] %v10849_v60  ;;  %17019 = vst [vmem:[#allocation60_spill] sm:$0xff] %v10852_v39  ;;  %v10893_v5 = vadd.f32 %v2865_v10, %v17042_v2  ;;  %v10896_v13 = vadd.f32 %v2868_v31, %v17044_v9  ;;  %v10899_v59 = vadd.f32 %v2870_v53, %v17046_v50  ;;  %v17048_v25 = vld [vmem:[#allocation5_spill] sm:$0xff]  ;;  %v17050_v47 = vld [vmem:[#allocation6_spill] sm:$0xff] }
 0x235   : > { %17021 = vst [vmem:[#allocation64_spill] sm:$0xff] %v10855_v23  ;;  %17023 = vst [vmem:[#allocation65_spill] sm:$0xff] %v10858_v45  ;;  %v10902_v41 = vadd.f32 %v2873_v6, %v17048_v25  ;;  %v10905_v57 = vadd.f32 %v2875_v22, %v17050_v47  ;;  %v17052_v27 = vld [vmem:[#allocation7_spill] sm:$0xff]  ;;  %v17053_v58 = vld [vmem:[#allocation8_spill] sm:$0xff] }
 0x236   : > { %17025 = vst [vmem:[#allocation69_spill] sm:$0xff] %v10861_v20  ;;  %17027 = vst [vmem:[#allocation70_spill] sm:$0xff] %v10869_v42  ;;  %v2946_v40 = vmul.f32 %v17052_v27, %v10866_v30  ;;  %v2947_v3 = vmul.f32 %v17053_v58, %v10866_v30  ;;  %v17054_v10 = vld [vmem:[#allocation9_spill] sm:$0xff]  ;;  %v17055_v31 = vld [vmem:[#allocation10_spill] sm:$0xff] }
 0x237   : > { %17029 = vst [vmem:[#allocation35_spill] sm:$0xff] %v10872_v33  ;;  %17031 = vst [vmem:[#allocation36_spill] sm:$0xff] %v10875_v1  ;;  %v2948_v8 = vmul.f32 %v17054_v10, %v10866_v30  ;;  %v2949_v11 = vmul.f32 %v17055_v31, %v10866_v30  ;;  %v17056_v53 = vld [vmem:[#allocation11_spill] sm:$0xff]  ;;  %v17057_v6 = vld [vmem:[#allocation12_spill] sm:$0xff] }
 0x238   : > { %17033 = vst [vmem:[#allocation40_spill] sm:$0xff] %v10878_v46  ;;  %17035 = vst [vmem:[#allocation41_spill] sm:$0xff] %v10881_v44  ;;  %v2950_v32 = vmul.f32 %v17056_v53, %v10866_v30  ;;  %v2951_v63 = vmul.f32 %v17057_v6, %v10866_v30  ;;  %v17058_v22 = vld [vmem:[#allocation13_spill] sm:$0xff]  ;;  %v17059_v7 = vld [vmem:[#allocation14_spill] sm:$0xff]  ;;  %v3042_v35 = vrot.slane %v2946_v40, 3  ;;  %v3043_v38 = vrot.slane %v2947_v3, 3 }
 0x239   : > { %17037 = vst [vmem:[#allocation45_spill] sm:$0xff] %v10884_v26  ;;  %17039 = vst [vmem:[#allocation46_spill] sm:$0xff] %v10887_v17  ;;  %v10921_v34 = vmul.f32 %v17058_v22, %v10866_v30  ;;  %v10925_v21 = vmul.f32 %v17059_v7, %v10866_v30  ;;  %v17060_v61 = vld [vmem:[#allocation15_spill] sm:$0xff]  ;;  %v17061_v18 = vld [vmem:[#allocation16_spill] sm:$0xff]  ;;  %v3047_v16 = vrot.slane %v2949_v11, 3 }
 0x23a   : > { %17041 = vst [vmem:[#allocation49_spill] sm:$0xff] %v10890_v14  ;;  %17043 = vst [vmem:[#allocation50_spill] sm:$0xff] %v10893_v5  ;;  %v2954_v24 = vmul.f32 %v17060_v61, %v10866_v30  ;;  %v10931_v48 = vmul.f32 %v17061_v18, %v10866_v30  ;;  %v17062_v12 = vld [vmem:[#allocation19_spill] sm:$0xff]  ;;  %v17063_v51 = vld [vmem:[#allocation20_spill] sm:$0xff]  ;;  %v3048_v19 = vrot.slane %v2950_v32, 3  ;;  %v3050_v15 = vrot.slane %v2951_v63, 3 }
 0x23b   : > { %17045 = vst [vmem:[#allocation54_spill] sm:$0xff] %v10896_v13  ;;  %17047 = vst [vmem:[#allocation55_spill] sm:$0xff] %v10899_v59  ;;  %v10935_v0 = vmul.f32 %v17062_v12, %v10866_v30  ;;  %v10939_v36 = vmul.f32 %v17063_v51, %v10866_v30  ;;  %v17064_v52 = vld [vmem:[#allocation23_spill] sm:$0xff]  ;;  %v17065_v9 = vld [vmem:[#allocation24_spill] sm:$0xff]  ;;  %v11099_v54 = vsel %vm932_vm2, %v3042_v35, %v3043_v38 }
 0x23c   : > { %17049 = vst [vmem:[#allocation59_spill] sm:$0xff] %v10902_v41  ;;  %17051 = vst [vmem:[#allocation74_spill] sm:$0xff] %v10905_v57  ;;  %v10943_v2 = vmul.f32 %v17064_v52, %v10866_v30  ;;  %v10947_v50 = vmul.f32 %v17065_v9, %v10866_v30  ;;  %v17066_v25 = vld [vmem:[#allocation28_spill] sm:$0xff]  ;;  %v17067_v18 = vld [vmem:[#allocation37_spill] sm:$0xff]  ;;  %v3055_v56 = vrot.slane %v2954_v24, 3  ;;  %v11109_v40 = vsel %vm932_vm2, %v3048_v19, %v3050_v15 }
 0x23d   : > { %v10951_v47 = vmul.f32 %v17066_v25, %v10866_v30  ;;  %v10955_v12 = vmul.f32 %v17067_v18, %v10866_v30  ;;  %v17068_v61 = vld [vmem:[#allocation33_spill] sm:$0xff]  ;;  %v17069_v7 = vld [vmem:[#allocation34_spill] sm:$0xff]  ;;  %v17071_v6 = vld [vmem:[#allocation79_spill] sm:$0xff]  ;;  %v3057_v3 = vrot.slane %v10931_v48, 3 }
 0x23e   : > { %v10959_v51 = vmul.f32 %v17068_v61, %v10866_v30  ;;  %v10963_v52 = vmul.f32 %v17069_v7, %v10866_v30  ;;  %v17070_v22 = vld [vmem:[#allocation42_spill] sm:$0xff]  ;;  %v10971_v25 = vmul.f32 %v17071_v6, %v10866_v30  ;;  %v17072_v53 = vld [vmem:[#allocation72_spill] sm:$0xff]  ;;  %v17073_v31 = vld [vmem:[#allocation71_spill] sm:$0xff]  ;;  %v3063_v15 = vrot.slane %v10947_v50, 3 }
 0x23f   : > { %v10967_v9 = vmul.f32 %v17070_v22, %v10866_v30  ;;  %v10975_v18 = vmul.f32 %v17072_v53, %v10866_v30  ;;  %v10979_v61 = vmul.f32 %v17073_v31, %v10866_v30  ;;  %v17074_v10 = vld [vmem:[#allocation76_spill] sm:$0xff]  ;;  %v17075_v58 = vld [vmem:[#allocation38_spill] sm:$0xff]  ;;  %v17076_v27 = vld [vmem:[#allocation39_spill] sm:$0xff]  ;;  %v3067_v32 = vrot.slane %v10955_v12, 3 }
 0x240   : > { %v10983_v7 = vmul.f32 %v17074_v10, %v10866_v30  ;;  %v10987_v22 = vmul.f32 %v17075_v58, %v10866_v30  ;;  %v10991_v6 = vmul.f32 %v17076_v27, %v10866_v30  ;;  %v17077_v53 = vld [vmem:[#allocation51_spill] sm:$0xff]  ;;  %v17079_v10 = vld [vmem:[#allocation44_spill] sm:$0xff]  ;;  %v17081_v27 = vld [vmem:[#allocation81_spill] sm:$0xff]  ;;  %v3073_v48 = vrot.slane %v10971_v25, 3 }
 0x241   : > { %v10995_v57 = vmul.f32 %v17077_v53, %v10866_v30  ;;  %v17078_v31 = vld [vmem:[#allocation43_spill] sm:$0xff]  ;;  %v11003_v59 = vmul.f32 %v17079_v10, %v10866_v30  ;;  %v17080_v58 = vld [vmem:[#allocation56_spill] sm:$0xff]  ;;  %v11011_v5 = vmul.f32 %v17081_v27, %v10866_v30  ;;  %v17084_v10 = vld [vmem:[#allocation25_spill] sm:$0xff] }
 0x242   : > { %v10999_v41 = vmul.f32 %v17078_v31, %v10866_v30  ;;  %v11007_v13 = vmul.f32 %v17080_v58, %v10866_v30  ;;  %v17082_v53 = vld [vmem:[#allocation47_spill] sm:$0xff]  ;;  %v17083_v31 = vld [vmem:[#allocation48_spill] sm:$0xff]  ;;  %v11023_v26 = vmul.f32 %v17084_v10, %v10866_v30  ;;  %v17085_v58 = vld [vmem:[#allocation61_spill] sm:$0xff]  ;;  %v3080_v50 = vrot.slane %v10987_v22, 3 }
 0x243   : > { %v11015_v14 = vmul.f32 %v17082_v53, %v10866_v30  ;;  %v11019_v17 = vmul.f32 %v17083_v31, %v10866_v30  ;;  %v11027_v44 = vmul.f32 %v17085_v58, %v10866_v30  ;;  %v17086_v27 = vld [vmem:[#allocation52_spill] sm:$0xff]  ;;  %v17087_v53 = vld [vmem:[#allocation21_spill] sm:$0xff]  ;;  %v17090_v20 = vld [vmem:[#allocation22_spill] sm:$0xff] }
 0x244   : > { %v11031_v46 = vmul.f32 %v17086_v27, %v10866_v30  ;;  %v11035_v1 = vmul.f32 %v17087_v53, %v10866_v30  ;;  %v17088_v33 = vld [vmem:[#allocation53_spill] sm:$0xff]  ;;  %v11047_v58 = vmul.f32 %v17090_v20, %v10866_v30  ;;  %v11050_v45 = vld [vmem:[%s6195_s3 + $0x168] sm:$0xff]  ;;  %v11057_v53 = vld [vmem:[%s6195_s3 + $0x170] sm:$0xff] }
 0x245   : > { %v11039_v31 = vmul.f32 %v17088_v33, %v10866_v30  ;;  %v17089_v42 = vld [vmem:[#allocation57_spill] sm:$0xff]  ;;  %17091 = vst [vmem:[#allocation75_spill] sm:$0xff] %v11050_v45  ;;  %v11054_v27 = vmul.f32 %v11050_v45, %v10866_v30  ;;  %17092 = vst [vmem:[#allocation77_spill] sm:$0xff] %v11057_v53  ;;  %v11061_v33 = vmul.f32 %v11057_v53, %v10866_v30  ;;  %v17093_v23 = vld [vmem:[#allocation26_spill] sm:$0xff] }
 0x246   : > { %v11043_v10 = vmul.f32 %v17089_v42, %v10866_v30  ;;  %v11065_v42 = vmul.f32 %v17093_v23, %v10866_v30  ;;  %v11068_v39 = vld [vmem:[%s6195_s3 + $0x180] sm:$0xff]  ;;  %v11075_v60 = vld [vmem:[%s6195_s3 + $0x188] sm:$0xff]  ;;  %v17096_v43 = vld [vmem:[#allocation27_spill] sm:$0xff] }
 0x247   : > { %17094 = vst [vmem:[#allocation78_spill] sm:$0xff] %v11068_v39  ;;  %v11072_v20 = vmul.f32 %v11068_v39, %v10866_v30  ;;  %17095 = vst [vmem:[#allocation66_spill] sm:$0xff] %v11075_v60  ;;  %v11079_v45 = vmul.f32 %v11075_v60, %v10866_v30  ;;  %v11083_v53 = vmul.f32 %v17096_v43, %v10866_v30  ;;  %v17097_v55 = vld [vmem:[#allocation29_spill] sm:$0xff]  ;;  %v17098_v4 = vld [vmem:[#allocation30_spill] sm:$0xff]  ;;  %v3045_v60 = vrot.slane %v2948_v8, 3 }
 0x248   : > { %v11087_v23 = vmul.f32 %v10866_v30, %v17097_v55  ;;  %v11091_v37 = vmul.f32 %v10866_v30, %v17098_v4  ;;  %v11095_v39 = vmul.f32 %v10866_v30, %v10134_v49  ;;  %v3052_v43 = vrot.slane %v10921_v34, 3 }
 0x249   : > { %v11102_v55 = vsel %vm932_vm2, %v3043_v38, %v3045_v60  ;;  %v3053_v4 = vrot.slane %v10925_v21, 3  ;;  %v11106_v30 = vsel %vm932_vm2, %v3047_v16, %v3048_v19  ;;  %v3058_v8 = vrot.slane %v10935_v0, 3 }
 0x24a   : > { %v3060_v38 = vrot.slane %v10939_v36, 3  ;;  %v3062_v60 = vrot.slane %v10943_v2, 3  ;;  %v3065_v19 = vrot.slane %v10951_v47, 3  ;;  %v3072_v34 = vrot.slane %v10967_v9, 3 }
 0x24b   : > { %v11114_v11 = vsel %vm932_vm2, %v3052_v43, %v3053_v4  ;;  %v11117_v35 = vsel %vm932_vm2, %v3053_v4, %v3055_v56  ;;  %v11122_v16 = vsel %vm932_vm2, %v3057_v3, %v3058_v8  ;;  %v3068_v43 = vrot.slane %v10959_v51, 3 }
 0x24c   : > { %v11128_v63 = vsel %vm932_vm2, %v3058_v8, %v3060_v38  ;;  %v3070_v56 = vrot.slane %v10963_v52, 3  ;;  %v3064_v21 = vsel %vm932_vm2, %v3062_v60, %v3063_v15  ;;  %v3066_v24 = vsel %vm932_vm2, %v3063_v15, %v3065_v19 }
 0x24d   : > { %v3075_v0 = vrot.slane %v10975_v18, 3  ;;  %v3069_v36 = vsel %vm932_vm2, %v3067_v32, %v3068_v43  ;;  %v3077_v2 = vrot.slane %v10979_v61, 3  ;;  %v3078_v51 = vrot.slane %v10983_v7, 3 }
 0x24e   : > { %v3071_v12 = vsel %vm932_vm2, %v3068_v43, %v3070_v56  ;;  %v3074_v52 = vsel %vm932_vm2, %v3072_v34, %v3073_v48  ;;  %v3082_v47 = vrot.slane %v10991_v6, 3  ;;  %v3083_v18 = vrot.slane %v10995_v57, 3 }
 0x24f   : > { %v3076_v9 = vsel %vm932_vm2, %v3073_v48, %v3075_v0  ;;  %v3079_v25 = vsel %vm932_vm2, %v3077_v2, %v3078_v51  ;;  %v3085_v4 = vrot.slane %v10999_v41, 3  ;;  %v3087_v3 = vrot.slane %v11003_v59, 3 }
 0x250   : > { %v3081_v61 = vsel %vm932_vm2, %v3078_v51, %v3080_v50  ;;  %v3088_v7 = vrot.slane %v11007_v13, 3  ;;  %v3090_v8 = vrot.slane %v11011_v5, 3  ;;  %v3092_v38 = vrot.slane %v11015_v14, 3 }
 0x251   : > { %v3084_v22 = vsel %vm932_vm2, %v3082_v47, %v3083_v18  ;;  %v3086_v6 = vsel %vm932_vm2, %v3083_v18, %v3085_v4  ;;  %v3093_v60 = vrot.slane %v11019_v17, 3  ;;  %v3095_v57 = vrot.slane %v11023_v26, 3  ;;  %v17102_v18 = vld [vmem:[#allocation62_spill] sm:$0xff] }
 0x252   : > { %v3089_v41 = vsel %vm932_vm2, %v3087_v3, %v3088_v7  ;;  %v3091_v59 = vsel %vm932_vm2, %v3088_v7, %v3090_v8  ;;  %v3097_v15 = vrot.slane %v11027_v44, 3  ;;  %v3098_v13 = vrot.slane %v11031_v46, 3  ;;  %v17112_v7 = vld [vmem:[#allocation82_spill] sm:$0xff] }
 0x253   : > { %v3094_v5 = vsel %vm932_vm2, %v3092_v38, %v3093_v60  ;;  %v3096_v14 = vsel %vm932_vm2, %v3093_v60, %v3095_v57  ;;  %v3100_v19 = vrot.slane %v11035_v1, 3  ;;  %v3102_v32 = vrot.slane %v11039_v31, 3  ;;  %v17116_v60 = vld [vmem:[#allocation17_spill] sm:$0xff]  ;;  %v17118_v57 = vld [vmem:[#allocation18_spill] sm:$0xff] }
 0x254   : > { %v3099_v17 = vsel %vm932_vm2, %v3097_v15, %v3098_v13  ;;  %v3103_v26 = vrot.slane %v11043_v10, 3  ;;  %v3105_v43 = vrot.slane %v11047_v58, 3  ;;  %v3107_v56 = vrot.slane %v11054_v27, 3 }
 0x255   : > { %v3101_v44 = vsel %vm932_vm2, %v3098_v13, %v3100_v19  ;;  %v3108_v46 = vrot.slane %v11061_v33, 3  ;;  %v3110_v34 = vrot.slane %v11065_v42, 3  ;;  %v3112_v48 = vrot.slane %v11072_v20, 3 }
 0x256   : > { %v3104_v1 = vsel %vm932_vm2, %v3102_v32, %v3103_v26  ;;  %v3106_v31 = vsel %vm932_vm2, %v3103_v26, %v3105_v43  ;;  %v3113_v0 = vrot.slane %v11079_v45, 3  ;;  %v3115_v10 = vrot.slane %v11083_v53, 3 }
 0x257   : > { %v3109_v58 = vsel %vm932_vm2, %v3107_v56, %v3108_v46  ;;  %v3111_v27 = vsel %vm932_vm2, %v3108_v46, %v3110_v34  ;;  %v3117_v2 = vrot.slane %v11087_v23, 3  ;;  %v3118_v33 = vrot.slane %v11091_v37, 3  ;;  %v17100_v37 = vld [vmem:[#allocation58_spill] sm:$0xff]  ;;  %v17134_v46 = vld [vmem:[#allocation35_spill] sm:$0xff]  ;;  %v17136_v34 = vld [vmem:[#allocation36_spill] sm:$0xff] }
 0x258   : > { %v3114_v42 = vsel %vm932_vm2, %v3112_v48, %v3113_v0  ;;  %v3116_v20 = vsel %vm932_vm2, %v3113_v0, %v3115_v10  ;;  %v3120_v51 = vrot.slane %v11095_v39, 3  ;;  %v11186_v50 = vadd.f32 %v11099_v54, %v10798_v62  ;;  %v17104_v54 = vld [vmem:[#allocation63_spill] sm:$0xff]  ;;  %v17138_v48 = vld [vmem:[#allocation40_spill] sm:$0xff]  ;;  %v17140_v0 = vld [vmem:[#allocation41_spill] sm:$0xff] }
 0x259   : > { %v3119_v45 = vsel %vm932_vm2, %v3117_v2, %v3118_v33  ;;  %v11191_v53 = vadd.f32 %v11102_v55, %v10803_v29  ;;  %v11195_v23 = vadd.f32 %v11106_v30, %v10807_v28  ;;  %v11199_v47 = vadd.f32 %v11109_v40, %v17100_v37  ;;  %v17106_v29 = vld [vmem:[#allocation67_spill] sm:$0xff]  ;;  %v17108_v28 = vld [vmem:[#allocation68_spill] sm:$0xff]  ;;  %v17142_v10 = vld [vmem:[#allocation45_spill] sm:$0xff] }
 0x25a   : > { %v3121_v39 = vsel %vm932_vm2, %v3118_v33, %v3120_v51  ;;  %v11204_v62 = vadd.f32 %v11114_v11, %v17102_v18  ;;  %v11208_v4 = vadd.f32 %v11117_v35, %v17104_v54  ;;  %v11212_v55 = vadd.f32 %v11122_v16, %v17106_v29  ;;  %v17110_v40 = vld [vmem:[#allocation80_spill] sm:$0xff]  ;;  %v17114_v11 = vld [vmem:[#allocation83_spill] sm:$0xff]  ;;  %v17144_v33 = vld [vmem:[#allocation46_spill] sm:$0xff] }
 0x25b   : > { %17099 = vst [vmem:[#allocation73_spill] sm:$0xff] %v11195_v23  ;;  %17101 = vst [vmem:[#allocation5_spill] sm:$0xff] %v11199_v47  ;;  %v11216_v30 = vadd.f32 %v11128_v63, %v17108_v28  ;;  %v11219_v3 = vadd.f32 %v3064_v21, %v17110_v40  ;;  %v11222_v8 = vadd.f32 %v3066_v24, %v17112_v7  ;;  %v17120_v16 = vld [vmem:[#allocation31_spill] sm:$0xff]  ;;  %v17122_v63 = vld [vmem:[#allocation32_spill] sm:$0xff] }
 0x25c   : > { %17103 = vst [vmem:[#allocation6_spill] sm:$0xff] %v11204_v62  ;;  %17105 = vst [vmem:[#allocation29_spill] sm:$0xff] %v11208_v4  ;;  %v11225_v38 = vadd.f32 %v3069_v36, %v17114_v11  ;;  %v11228_v35 = vadd.f32 %v3071_v12, %v17116_v60  ;;  %v11231_v15 = vadd.f32 %v3074_v52, %v17118_v57  ;;  %v17124_v21 = vld [vmem:[#allocation60_spill] sm:$0xff]  ;;  %v17128_v36 = vld [vmem:[#allocation65_spill] sm:$0xff] }
 0x25d   : > { %17107 = vst [vmem:[#allocation30_spill] sm:$0xff] %v11212_v55  ;;  %17109 = vst [vmem:[#allocation58_spill] sm:$0xff] %v11216_v30  ;;  %v11234_v13 = vadd.f32 %v3076_v9, %v17120_v16  ;;  %v11237_v19 = vadd.f32 %v3079_v25, %v17122_v63  ;;  %v11240_v32 = vadd.f32 %v3081_v61, %v17124_v21  ;;  %v17126_v24 = vld [vmem:[#allocation64_spill] sm:$0xff]  ;;  %v17130_v12 = vld [vmem:[#allocation69_spill] sm:$0xff] }
 0x25e   : > { %17111 = vst [vmem:[#allocation62_spill] sm:$0xff] %v11219_v3  ;;  %17113 = vst [vmem:[#allocation63_spill] sm:$0xff] %v11222_v8  ;;  %v11243_v26 = vadd.f32 %v3084_v22, %v17126_v24  ;;  %v11246_v43 = vadd.f32 %v3086_v6, %v17128_v36  ;;  %v11249_v56 = vadd.f32 %v3089_v41, %v17130_v12  ;;  %v11254_v52 = vld [vmem:[%s15337_s1 + $0xe] ss:$0 sm:$0xff]  ;;  %v17166_v12 = vld [vmem:[#allocation15_spill] sm:$0xff] }
 0x25f   : > { %17115 = vst [vmem:[#allocation67_spill] sm:$0xff] %v11225_v38  ;;  %17117 = vst [vmem:[#allocation68_spill] sm:$0xff] %v11228_v35  ;;  %v17132_v9 = vld [vmem:[#allocation70_spill] sm:$0xff]  ;;  %v11260_v61 = vadd.f32 %v3094_v5, %v17134_v46  ;;  %v11263_v22 = vadd.f32 %v3096_v14, %v17136_v34  ;;  %v11266_v6 = vadd.f32 %v3099_v17, %v17138_v48  ;;  %v17152_v17 = vld [vmem:[#allocation55_spill] sm:$0xff] }
 0x260   : > { %17119 = vst [vmem:[#allocation80_spill] sm:$0xff] %v11231_v15  ;;  %17121 = vst [vmem:[#allocation82_spill] sm:$0xff] %v11234_v13  ;;  %v11257_v25 = vadd.f32 %v3091_v59, %v17132_v9  ;;  %v11269_v41 = vadd.f32 %v3101_v44, %v17140_v0  ;;  %v11272_v2 = vadd.f32 %v3104_v1, %v17142_v10  ;;  %v17146_v59 = vld [vmem:[#allocation49_spill] sm:$0xff]  ;;  %v17148_v5 = vld [vmem:[#allocation50_spill] sm:$0xff] }
 0x261   : > { %17123 = vst [vmem:[#allocation83_spill] sm:$0xff] %v11237_v19  ;;  %17125 = vst [vmem:[#allocation17_spill] sm:$0xff] %v11240_v32  ;;  %v11275_v51 = vadd.f32 %v3106_v31, %v17144_v33  ;;  %v11278_v37 = vadd.f32 %v3109_v58, %v17146_v59  ;;  %v11281_v18 = vadd.f32 %v3111_v27, %v17148_v5  ;;  %v17150_v14 = vld [vmem:[#allocation54_spill] sm:$0xff]  ;;  %v17154_v44 = vld [vmem:[#allocation59_spill] sm:$0xff] }
 0x262   : > { %17127 = vst [vmem:[#allocation18_spill] sm:$0xff] %v11243_v26  ;;  %17129 = vst [vmem:[#allocation31_spill] sm:$0xff] %v11246_v43  ;;  %v11284_v54 = vadd.f32 %v3114_v42, %v17150_v14  ;;  %v11287_v29 = vadd.f32 %v3116_v20, %v17152_v17  ;;  %v11290_v28 = vadd.f32 %v3119_v45, %v17154_v44  ;;  %v17156_v1 = vld [vmem:[#allocation74_spill] sm:$0xff]  ;;  %v17158_v31 = vld [vmem:[#allocation7_spill] sm:$0xff] }
 0x263   : > { %17131 = vst [vmem:[#allocation32_spill] sm:$0xff] %v11249_v56  ;;  %17133 = vst [vmem:[#allocation60_spill] sm:$0xff] %v11257_v25  ;;  %v11293_v40 = vadd.f32 %v3121_v39, %v17156_v1  ;;  %v3192_v7 = vmul.f32 %v17158_v31, %v11254_v52  ;;  %v17159_v58 = vld [vmem:[#allocation8_spill] sm:$0xff]  ;;  %v17160_v27 = vld [vmem:[#allocation9_spill] sm:$0xff]  ;;  %v3200_v9 = vmul.f32 %v17166_v12, %v11254_v52 }
 0x264   : > { %17135 = vst [vmem:[#allocation64_spill] sm:$0xff] %v11260_v61  ;;  %17137 = vst [vmem:[#allocation65_spill] sm:$0xff] %v11263_v22  ;;  %v3193_v11 = vmul.f32 %v17159_v58, %v11254_v52  ;;  %v3194_v60 = vmul.f32 %v17160_v27, %v11254_v52  ;;  %v17161_v42 = vld [vmem:[#allocation10_spill] sm:$0xff]  ;;  %v17162_v20 = vld [vmem:[#allocation11_spill] sm:$0xff] }
 0x265   : > { %17139 = vst [vmem:[#allocation69_spill] sm:$0xff] %v11266_v6  ;;  %17141 = vst [vmem:[#allocation70_spill] sm:$0xff] %v11269_v41  ;;  %v3195_v57 = vmul.f32 %v17161_v42, %v11254_v52  ;;  %v3196_v16 = vmul.f32 %v17162_v20, %v11254_v52  ;;  %v17163_v45 = vld [vmem:[#allocation12_spill] sm:$0xff]  ;;  %v17164_v39 = vld [vmem:[#allocation13_spill] sm:$0xff]  ;;  %v3288_v38 = vrot.slane %v3192_v7, 4 }
 0x266   : > { %17143 = vst [vmem:[#allocation35_spill] sm:$0xff] %v11272_v2  ;;  %17145 = vst [vmem:[#allocation36_spill] sm:$0xff] %v11275_v51  ;;  %v3197_v63 = vmul.f32 %v17163_v45, %v11254_v52  ;;  %v3198_v21 = vmul.f32 %v17164_v39, %v11254_v52  ;;  %v17165_v24 = vld [vmem:[#allocation14_spill] sm:$0xff]  ;;  %v17167_v46 = vld [vmem:[#allocation16_spill] sm:$0xff]  ;;  %v3289_v8 = vrot.slane %v3193_v11, 4 }
 0x267   : > { %17147 = vst [vmem:[#allocation40_spill] sm:$0xff] %v11278_v37  ;;  %17149 = vst [vmem:[#allocation41_spill] sm:$0xff] %v11281_v18  ;;  %v3199_v36 = vmul.f32 %v17165_v24, %v11254_v52  ;;  %v3201_v34 = vmul.f32 %v17167_v46, %v11254_v52  ;;  %v17168_v48 = vld [vmem:[#allocation19_spill] sm:$0xff]  ;;  %v17169_v10 = vld [vmem:[#allocation20_spill] sm:$0xff]  ;;  %v3293_v3 = vrot.slane %v3195_v57, 4  ;;  %v3294_v30 = vrot.slane %v3196_v16, 4 }
 0x268   : > { %17151 = vst [vmem:[#allocation45_spill] sm:$0xff] %v11284_v54  ;;  %17153 = vst [vmem:[#allocation46_spill] sm:$0xff] %v11287_v29  ;;  %v11317_v0 = vmul.f32 %v17168_v48, %v11254_v52  ;;  %v11321_v33 = vmul.f32 %v17169_v10, %v11254_v52  ;;  %v17170_v59 = vld [vmem:[#allocation23_spill] sm:$0xff]  ;;  %v17171_v14 = vld [vmem:[#allocation24_spill] sm:$0xff]  ;;  %v3296_v55 = vrot.slane %v3197_v63, 4  ;;  %v3298_v4 = vrot.slane %v3198_v21, 4 }
 0x269   : > { %17155 = vst [vmem:[#allocation49_spill] sm:$0xff] %v11290_v28  ;;  %17157 = vst [vmem:[#allocation50_spill] sm:$0xff] %v11293_v40  ;;  %v11325_v5 = vmul.f32 %v17170_v59, %v11254_v52  ;;  %v11329_v17 = vmul.f32 %v17171_v14, %v11254_v52  ;;  %v17172_v44 = vld [vmem:[#allocation28_spill] sm:$0xff]  ;;  %v17173_v31 = vld [vmem:[#allocation37_spill] sm:$0xff]  ;;  %v3299_v47 = vrot.slane %v3199_v36, 4  ;;  %v11480_v23 = vsel %vm1179_vm3, %v3293_v3, %v3294_v30 }
 0x26a   : > { %v11333_v1 = vmul.f32 %v17172_v44, %v11254_v52  ;;  %v11337_v58 = vmul.f32 %v17173_v31, %v11254_v52  ;;  %v17174_v27 = vld [vmem:[#allocation33_spill] sm:$0xff]  ;;  %v17175_v12 = vld [vmem:[#allocation34_spill] sm:$0xff]  ;;  %v17177_v48 = vld [vmem:[#allocation79_spill] sm:$0xff]  ;;  %v3304_v7 = vrot.slane %v11317_v0, 4 }
 0x26b   : > { %v11341_v45 = vmul.f32 %v17174_v27, %v11254_v52  ;;  %v11345_v10 = vmul.f32 %v17175_v12, %v11254_v52  ;;  %v17176_v59 = vld [vmem:[#allocation42_spill] sm:$0xff]  ;;  %v11353_v44 = vmul.f32 %v17177_v48, %v11254_v52  ;;  %v17178_v46 = vld [vmem:[#allocation72_spill] sm:$0xff]  ;;  %v17179_v24 = vld [vmem:[#allocation71_spill] sm:$0xff]  ;;  %v11487_v11 = vsel %vm1179_vm3, %v3298_v4, %v3299_v47 }
 0x26c   : > { %v11349_v14 = vmul.f32 %v17176_v59, %v11254_v52  ;;  %v11357_v31 = vmul.f32 %v17178_v46, %v11254_v52  ;;  %v11361_v27 = vmul.f32 %v17179_v24, %v11254_v52  ;;  %v17180_v39 = vld [vmem:[#allocation76_spill] sm:$0xff]  ;;  %v17181_v20 = vld [vmem:[#allocation38_spill] sm:$0xff]  ;;  %v17182_v42 = vld [vmem:[#allocation39_spill] sm:$0xff]  ;;  %v3309_v3 = vrot.slane %v11329_v17, 4 }
 0x26d   : > { %v11365_v12 = vmul.f32 %v17180_v39, %v11254_v52  ;;  %v11369_v59 = vmul.f32 %v17181_v20, %v11254_v52  ;;  %v11373_v48 = vmul.f32 %v17182_v42, %v11254_v52  ;;  %v17183_v40 = vld [vmem:[#allocation51_spill] sm:$0xff]  ;;  %v17185_v29 = vld [vmem:[#allocation44_spill] sm:$0xff]  ;;  %v17187_v18 = vld [vmem:[#allocation81_spill] sm:$0xff]  ;;  %v3314_v4 = vrot.slane %v11341_v45, 4 }
 0x26e   : > { %v11377_v46 = vmul.f32 %v17183_v40, %v11254_v52  ;;  %v17184_v28 = vld [vmem:[#allocation43_spill] sm:$0xff]  ;;  %v11385_v39 = vmul.f32 %v17185_v29, %v11254_v52  ;;  %v17186_v54 = vld [vmem:[#allocation56_spill] sm:$0xff]  ;;  %v11393_v42 = vmul.f32 %v17187_v18, %v11254_v52  ;;  %v17190_v29 = vld [vmem:[#allocation25_spill] sm:$0xff]  ;;  %v3318_v63 = vrot.slane %v11349_v14, 4 }
 0x26f   : > { %v11381_v24 = vmul.f32 %v17184_v28, %v11254_v52  ;;  %v11389_v20 = vmul.f32 %v17186_v54, %v11254_v52  ;;  %v17188_v37 = vld [vmem:[#allocation47_spill] sm:$0xff]  ;;  %v17189_v28 = vld [vmem:[#allocation48_spill] sm:$0xff]  ;;  %v11405_v2 = vmul.f32 %v17190_v29, %v11254_v52  ;;  %v17191_v54 = vld [vmem:[#allocation61_spill] sm:$0xff]  ;;  %v3324_v17 = vrot.slane %v11365_v12, 4 }
 0x270   : > { %v11397_v40 = vmul.f32 %v17188_v37, %v11254_v52  ;;  %v11401_v51 = vmul.f32 %v17189_v28, %v11254_v52  ;;  %v11409_v41 = vmul.f32 %v17191_v54, %v11254_v52  ;;  %v17192_v18 = vld [vmem:[#allocation52_spill] sm:$0xff]  ;;  %v17193_v37 = vld [vmem:[#allocation21_spill] sm:$0xff]  ;;  %v17196_v56 = vld [vmem:[#allocation22_spill] sm:$0xff]  ;;  %v3328_v45 = vrot.slane %v11373_v48, 4 }
 0x271   : > { %v11413_v6 = vmul.f32 %v17192_v18, %v11254_v52  ;;  %v11417_v22 = vmul.f32 %v17193_v37, %v11254_v52  ;;  %v17194_v28 = vld [vmem:[#allocation53_spill] sm:$0xff]  ;;  %v11429_v54 = vmul.f32 %v17196_v56, %v11254_v52  ;;  %v17197_v43 = vld [vmem:[#allocation75_spill] sm:$0xff]  ;;  %v17199_v32 = vld [vmem:[#allocation26_spill] sm:$0xff]  ;;  %v3334_v12 = vrot.slane %v11389_v20, 4 }
 0x272   : > { %v11421_v61 = vmul.f32 %v17194_v28, %v11254_v52  ;;  %v17195_v25 = vld [vmem:[#allocation57_spill] sm:$0xff]  ;;  %v11433_v18 = vmul.f32 %v17197_v43, %v11254_v52  ;;  %v11441_v28 = vmul.f32 %v17199_v32, %v11254_v52  ;;  %v17200_v19 = vld [vmem:[#allocation78_spill] sm:$0xff]  ;;  %v17202_v15 = vld [vmem:[#allocation27_spill] sm:$0xff] }
 0x273   : > { %v11425_v29 = vmul.f32 %v17195_v25, %v11254_v52  ;;  %v17198_v26 = vld [vmem:[#allocation77_spill] sm:$0xff]  ;;  %v11445_v25 = vmul.f32 %v17200_v19, %v11254_v52  ;;  %v17201_v13 = vld [vmem:[#allocation66_spill] sm:$0xff]  ;;  %v11453_v43 = vmul.f32 %v17202_v15, %v11254_v52  ;;  %v11456_v35 = vld [vmem:[%s6195_s3 + $0x198] sm:$0xff]  ;;  %v3291_v15 = vrot.slane %v3194_v60, 4 }
 0x274   : > { %v11437_v37 = vmul.f32 %v17198_v26, %v11254_v52  ;;  %v11449_v56 = vmul.f32 %v17201_v13, %v11254_v52  ;;  %17203 = vst [vmem:[#allocation54_spill] sm:$0xff] %v11456_v35  ;;  %v11460_v26 = vmul.f32 %v11456_v35, %v11254_v52  ;;  %v11463_v32 = vld [vmem:[%s6195_s3 + $0x1a0] sm:$0xff]  ;;  %v11471_v13 = vmul.f32 %v11254_v52, %v10134_v49 }
 0x275   : > { %17204 = vst [vmem:[#allocation55_spill] sm:$0xff] %v11463_v32  ;;  %v11467_v19 = vmul.f32 %v11463_v32, %v11254_v52  ;;  %v11474_v35 = vsel %vm1179_vm3, %v3288_v38, %v3289_v8  ;;  %v11477_v62 = vsel %vm1179_vm3, %v3289_v8, %v3291_v15  ;;  %v3301_v32 = vrot.slane %v3200_v9, 4 }
 0x276   : > { %v11483_v49 = vsel %vm1179_vm3, %v3294_v30, %v3296_v55  ;;  %v3303_v52 = vrot.slane %v3201_v34, 4  ;;  %v3306_v8 = vrot.slane %v11321_v33, 4  ;;  %v3308_v60 = vrot.slane %v11325_v5, 4 }
 0x277   : > { %v11490_v38 = vsel %vm1179_vm3, %v3299_v47, %v3301_v32  ;;  %v3311_v55 = vrot.slane %v11333_v1, 4  ;;  %v3313_v30 = vrot.slane %v11337_v58, 4  ;;  %v3316_v47 = vrot.slane %v11345_v10, 4 }
 0x278   : > { %v11495_v57 = vsel %vm1179_vm3, %v3303_v52, %v3304_v7  ;;  %v11501_v16 = vsel %vm1179_vm3, %v3304_v7, %v3306_v8  ;;  %v3310_v21 = vsel %vm1179_vm3, %v3308_v60, %v3309_v3  ;;  %v3319_v9 = vrot.slane %v11353_v44, 4 }
 0x279   : > { %v3312_v36 = vsel %vm1179_vm3, %v3309_v3, %v3311_v55  ;;  %v3321_v34 = vrot.slane %v11357_v31, 4  ;;  %v3315_v0 = vsel %vm1179_vm3, %v3313_v30, %v3314_v4  ;;  %v3317_v33 = vsel %vm1179_vm3, %v3314_v4, %v3316_v47 }
 0x27a   : > { %v3323_v5 = vrot.slane %v11361_v27, 4  ;;  %v3320_v1 = vsel %vm1179_vm3, %v3318_v63, %v3319_v9  ;;  %v3326_v58 = vrot.slane %v11369_v59, 4  ;;  %v3329_v31 = vrot.slane %v11377_v46, 4 }
 0x27b   : > { %v3322_v14 = vsel %vm1179_vm3, %v3319_v9, %v3321_v34  ;;  %v3331_v44 = vrot.slane %v11381_v24, 4  ;;  %v3333_v32 = vrot.slane %v11385_v39, 4  ;;  %v3336_v15 = vrot.slane %v11393_v42, 4 }
 0x27c   : > { %v3325_v10 = vsel %vm1179_vm3, %v3323_v5, %v3324_v17  ;;  %v3327_v27 = vsel %vm1179_vm3, %v3324_v17, %v3326_v58  ;;  %v3338_v52 = vrot.slane %v11397_v40, 4  ;;  %v3330_v59 = vsel %vm1179_vm3, %v3328_v45, %v3329_v31  ;;  %v17205_v17 = vld [vmem:[#allocation73_spill] sm:$0xff]  ;;  %v17207_v45 = vld [vmem:[#allocation6_spill] sm:$0xff] }
 0x27d   : > { %v3332_v48 = vsel %vm1179_vm3, %v3329_v31, %v3331_v44  ;;  %v3339_v7 = vrot.slane %v11401_v51, 4  ;;  %v3341_v46 = vrot.slane %v11405_v2, 4  ;;  %v3335_v24 = vsel %vm1179_vm3, %v3333_v32, %v3334_v12 }
 0x27e   : > { %v3337_v39 = vsel %vm1179_vm3, %v3334_v12, %v3336_v15  ;;  %v3343_v8 = vrot.slane %v11409_v41, 4  ;;  %v3344_v20 = vrot.slane %v11413_v6, 4  ;;  %v3346_v60 = vrot.slane %v11417_v22, 4  ;;  %v17212_v12 = vld [vmem:[#allocation63_spill] sm:$0xff] }
 0x27f   : > { %v3340_v42 = vsel %vm1179_vm3, %v3338_v52, %v3339_v7  ;;  %v3342_v40 = vsel %vm1179_vm3, %v3339_v7, %v3341_v46  ;;  %v3348_v3 = vrot.slane %v11421_v61, 4  ;;  %v3349_v2 = vrot.slane %v11425_v29, 4  ;;  %v17214_v7 = vld [vmem:[#allocation68_spill] sm:$0xff] }
 0x280   : > { %v3345_v51 = vsel %vm1179_vm3, %v3343_v8, %v3344_v20  ;;  %v3351_v55 = vrot.slane %v11429_v54, 4  ;;  %v3353_v30 = vrot.slane %v11433_v18, 4  ;;  %v3347_v41 = vsel %vm1179_vm3, %v3344_v20, %v3346_v60  ;;  %v17215_v46 = vld [vmem:[#allocation80_spill] sm:$0xff] }
 0x281   : > { %v3354_v6 = vrot.slane %v11437_v37, 4  ;;  %v3356_v4 = vrot.slane %v11441_v28, 4  ;;  %v3358_v47 = vrot.slane %v11445_v25, 4  ;;  %v3350_v22 = vsel %vm1179_vm3, %v3348_v3, %v3349_v2 }
 0x282   : > { %v3352_v61 = vsel %vm1179_vm3, %v3349_v2, %v3351_v55  ;;  %v3359_v63 = vrot.slane %v11449_v56, 4  ;;  %v3361_v29 = vrot.slane %v11453_v43, 4  ;;  %v3363_v9 = vrot.slane %v11460_v26, 4 }
 0x283   : > { %v3355_v54 = vsel %vm1179_vm3, %v3353_v30, %v3354_v6  ;;  %v3357_v18 = vsel %vm1179_vm3, %v3354_v6, %v3356_v4  ;;  %v3364_v37 = vrot.slane %v11467_v19, 4  ;;  %v3366_v34 = vrot.slane %v11471_v13, 4  ;;  %v17206_v19 = vld [vmem:[#allocation5_spill] sm:$0xff] }
 0x284   : > { %v3360_v28 = vsel %vm1179_vm3, %v3358_v47, %v3359_v63  ;;  %v3362_v25 = vsel %vm1179_vm3, %v3359_v63, %v3361_v29  ;;  %v11559_v5 = vadd.f32 %v11474_v35, %v11186_v50  ;;  %v11564_v56 = vadd.f32 %v11477_v62, %v11191_v53  ;;  %v17208_v35 = vld [vmem:[#allocation29_spill] sm:$0xff]  ;;  %v17209_v53 = vld [vmem:[#allocation30_spill] sm:$0xff] }
 0x285   : > { %v3365_v43 = vsel %vm1179_vm3, %v3363_v9, %v3364_v37  ;;  %v11568_v26 = vadd.f32 %v11480_v23, %v17205_v17  ;;  %v11572_v58 = vadd.f32 %v11483_v49, %v17206_v19  ;;  %v3367_v13 = vsel %vm1179_vm3, %v3364_v37, %v3366_v34  ;;  %v17210_v23 = vld [vmem:[#allocation58_spill] sm:$0xff]  ;;  %v17232_v37 = vld [vmem:[#allocation36_spill] sm:$0xff] }
 0x286   : > { %v11577_v50 = vadd.f32 %v11487_v11, %v17207_v45  ;;  %v11581_v31 = vadd.f32 %v11490_v38, %v17208_v35  ;;  %v11585_v62 = vadd.f32 %v11495_v57, %v17209_v53  ;;  %v11589_v44 = vadd.f32 %v11501_v16, %v17210_v23  ;;  %v17211_v49 = vld [vmem:[#allocation62_spill] sm:$0xff]  ;;  %v17213_v11 = vld [vmem:[#allocation67_spill] sm:$0xff] }
 0x287   : > { %v11592_v32 = vadd.f32 %v3310_v21, %v17211_v49  ;;  %v11595_v15 = vadd.f32 %v3312_v36, %v17212_v12  ;;  %v11598_v52 = vadd.f32 %v3315_v0, %v17213_v11  ;;  %v11601_v38 = vadd.f32 %v3317_v33, %v17214_v7  ;;  %v17216_v57 = vld [vmem:[#allocation82_spill] sm:$0xff]  ;;  %v17217_v16 = vld [vmem:[#allocation83_spill] sm:$0xff]  ;;  %v17218_v21 = vld [vmem:[#allocation17_spill] sm:$0xff] }
 0x288   : > { %v11604_v8 = vadd.f32 %v3320_v1, %v17215_v46  ;;  %v11607_v20 = vadd.f32 %v3322_v14, %v17216_v57  ;;  %v11610_v60 = vadd.f32 %v3325_v10, %v17217_v16  ;;  %v11613_v3 = vadd.f32 %v3327_v27, %v17218_v21  ;;  %v17219_v36 = vld [vmem:[#allocation18_spill] sm:$0xff]  ;;  %v17220_v0 = vld [vmem:[#allocation31_spill] sm:$0xff]  ;;  %v17221_v33 = vld [vmem:[#allocation32_spill] sm:$0xff] }
 0x289   : > { %v11616_v2 = vadd.f32 %v3330_v59, %v17219_v36  ;;  %v11619_v55 = vadd.f32 %v3332_v48, %v17220_v0  ;;  %v11622_v30 = vadd.f32 %v3335_v24, %v17221_v33  ;;  %v5700_v1 = vld [vmem:[%s15337_s1 + $0xf] ss:$0 sm:$0xff]  ;;  %v17222_v14 = vld [vmem:[#allocation60_spill] sm:$0xff]  ;;  %v17224_v27 = vld [vmem:[#allocation65_spill] sm:$0xff]  ;;  %v11646_v34 = vadd.f32 %v3352_v61, %v17232_v37 }
 0x28a   : > { %v11628_v6 = vadd.f32 %v3337_v39, %v17222_v14  ;;  %v17223_v10 = vld [vmem:[#allocation64_spill] sm:$0xff]  ;;  %v11634_v47 = vadd.f32 %v3342_v40, %v17224_v27  ;;  %v17226_v59 = vld [vmem:[#allocation69_spill] sm:$0xff]  ;;  %v17228_v48 = vld [vmem:[#allocation70_spill] sm:$0xff] }
 0x28b   : > { %v11631_v4 = vadd.f32 %v3340_v42, %v17223_v10  ;;  %v11637_v63 = vadd.f32 %v3345_v51, %v17226_v59  ;;  %v11640_v29 = vadd.f32 %v3347_v41, %v17228_v48  ;;  %v17230_v24 = vld [vmem:[#allocation35_spill] sm:$0xff]  ;;  %17233 = vst [vmem:[#allocation9_spill] sm:$0xff] %v11646_v34  ;;  %v17234_v39 = vld [vmem:[#allocation40_spill] sm:$0xff]  ;;  %v17236_v42 = vld [vmem:[#allocation41_spill] sm:$0xff] }
 0x28c   : > { %17225 = vst [vmem:[#allocation59_spill] sm:$0xff] %v11634_v47  ;;  %v11643_v9 = vadd.f32 %v3350_v22, %v17230_v24  ;;  %v11649_v17 = vadd.f32 %v3355_v54, %v17234_v39  ;;  %v11652_v19 = vadd.f32 %v3357_v18, %v17236_v42  ;;  %v17238_v40 = vld [vmem:[#allocation45_spill] sm:$0xff]  ;;  %v17240_v51 = vld [vmem:[#allocation46_spill] sm:$0xff]  ;;  %v17247_v54 = vld [vmem:[#allocation11_spill] sm:$0xff] }
 0x28d   : > { %17227 = vst [vmem:[#allocation74_spill] sm:$0xff] %v11637_v63  ;;  %17229 = vst [vmem:[#allocation7_spill] sm:$0xff] %v11640_v29  ;;  %v11655_v45 = vadd.f32 %v3360_v28, %v17238_v40  ;;  %v11658_v35 = vadd.f32 %v3362_v25, %v17240_v51  ;;  %v17242_v41 = vld [vmem:[#allocation49_spill] sm:$0xff]  ;;  %v17244_v22 = vld [vmem:[#allocation50_spill] sm:$0xff]  ;;  %v3439_v12 = vmul.f32 %v17247_v54, %v5700_v1 }
 0x28e   : > { %17231 = vst [vmem:[#allocation8_spill] sm:$0xff] %v11643_v9  ;;  %17235 = vst [vmem:[#allocation12_spill] sm:$0xff] %v11649_v17  ;;  %v11661_v53 = vadd.f32 %v3365_v43, %v17242_v41  ;;  %v11664_v23 = vadd.f32 %v3367_v13, %v17244_v22  ;;  %v17246_v61 = vld [vmem:[#allocation10_spill] sm:$0xff]  ;;  %v17248_v11 = vld [vmem:[#allocation13_spill] sm:$0xff] }
 0x28f   : > { %17237 = vst [vmem:[#allocation15_spill] sm:$0xff] %v11652_v19  ;;  %17239 = vst [vmem:[#allocation20_spill] sm:$0xff] %v11655_v45  ;;  %v3438_v49 = vmul.f32 %v17246_v61, %v5700_v1  ;;  %v3440_v18 = vmul.f32 %v17248_v11, %v5700_v1  ;;  %v17249_v7 = vld [vmem:[#allocation14_spill] sm:$0xff]  ;;  %v17250_v28 = vld [vmem:[#allocation16_spill] sm:$0xff] }
 0x290   : > { %17241 = vst [vmem:[#allocation28_spill] sm:$0xff] %v11658_v35  ;;  %17243 = vst [vmem:[#allocation34_spill] sm:$0xff] %v11661_v53  ;;  %v3441_v46 = vmul.f32 %v17249_v7, %v5700_v1  ;;  %v3442_v57 = vmul.f32 %v17250_v28, %v5700_v1  ;;  %v17251_v16 = vld [vmem:[#allocation19_spill] sm:$0xff]  ;;  %v17253_v36 = vld [vmem:[#allocation24_spill] sm:$0xff] }
 0x291   : > { %17245 = vst [vmem:[#allocation72_spill] sm:$0xff] %v11664_v23  ;;  %v3443_v25 = vmul.f32 %v17251_v16, %v5700_v1  ;;  %v17252_v21 = vld [vmem:[#allocation23_spill] sm:$0xff]  ;;  %v3445_v0 = vmul.f32 %v17253_v36, %v5700_v1  ;;  %v17254_v13 = vld [vmem:[#allocation37_spill] sm:$0xff]  ;;  %v17256_v27 = vld [vmem:[#allocation42_spill] sm:$0xff] }
 0x292   : > { %v3444_v43 = vmul.f32 %v17252_v21, %v5700_v1  ;;  %v3446_v33 = vmul.f32 %v17254_v13, %v5700_v1  ;;  %v17255_v14 = vld [vmem:[#allocation33_spill] sm:$0xff]  ;;  %v3448_v59 = vmul.f32 %v17256_v27, %v5700_v1  ;;  %v17257_v48 = vld [vmem:[#allocation79_spill] sm:$0xff]  ;;  %v17259_v42 = vld [vmem:[#allocation76_spill] sm:$0xff] }
 0x293   : > { %v3447_v10 = vmul.f32 %v17255_v14, %v5700_v1  ;;  %v3449_v24 = vmul.f32 %v17257_v48, %v5700_v1  ;;  %v17258_v37 = vld [vmem:[#allocation71_spill] sm:$0xff]  ;;  %v3451_v40 = vmul.f32 %v17259_v42, %v5700_v1  ;;  %v17263_v11 = vld [vmem:[#allocation44_spill] sm:$0xff]  ;;  %v17268_v48 = vld [vmem:[#allocation61_spill] sm:$0xff] }
 0x294   : > { %v3450_v39 = vmul.f32 %v17258_v37, %v5700_v1  ;;  %v17260_v51 = vld [vmem:[#allocation39_spill] sm:$0xff]  ;;  %v3454_v7 = vmul.f32 %v17263_v11, %v5700_v1  ;;  %v17264_v28 = vld [vmem:[#allocation56_spill] sm:$0xff]  ;;  %v3458_v37 = vmul.f32 %v17268_v48, %v5700_v1  ;;  %v17270_v53 = vld [vmem:[#allocation53_spill] sm:$0xff] }
 0x295   : > { %v3452_v41 = vmul.f32 %v17260_v51, %v5700_v1  ;;  %v11682_v22 = vld [vmem:[%s6195_s3 + $0x1b0] sm:$0xff]  ;;  %v3455_v16 = vmul.f32 %v17264_v28, %v5700_v1  ;;  %v11689_v13 = vld [vmem:[%s6195_s3 + $0x1b8] sm:$0xff]  ;;  %v3460_v51 = vmul.f32 %v17270_v53, %v5700_v1  ;;  %v17271_v35 = vld [vmem:[#allocation57_spill] sm:$0xff]  ;;  %v11705_v53 = vadd.f32 %v3438_v49, %v11559_v5 }
 0x296   : > { %17261 = vst [vmem:[#allocation38_spill] sm:$0xff] %v11682_v22  ;;  %v17262_v61 = vld [vmem:[#allocation51_spill] sm:$0xff]  ;;  %17266 = vst [vmem:[#allocation43_spill] sm:$0xff] %v11689_v13  ;;  %v17267_v14 = vld [vmem:[#allocation48_spill] sm:$0xff]  ;;  %v3461_v45 = vmul.f32 %v17271_v35, %v5700_v1  ;;  %v3468_v48 = vmul.f32 %v5700_v1, %v11682_v22  ;;  %v11708_v35 = vadd.f32 %v3439_v12, %v11564_v56 }
 0x297   : > { %v3453_v54 = vmul.f32 %v17262_v61, %v5700_v1  ;;  %v17265_v21 = vld [vmem:[#allocation47_spill] sm:$0xff]  ;;  %v3457_v27 = vmul.f32 %v17267_v14, %v5700_v1  ;;  %v17269_v23 = vld [vmem:[#allocation52_spill] sm:$0xff]  ;;  %v17273_v17 = vld [vmem:[#allocation77_spill] sm:$0xff]  ;;  %v11726_v5 = vadd.f32 %v3445_v0, %v11589_v44  ;;  %v11729_v56 = vadd.f32 %v3446_v33, %v11592_v32 }
 0x298   : > { %v3456_v36 = vmul.f32 %v17265_v21, %v5700_v1  ;;  %v3459_v42 = vmul.f32 %v17269_v23, %v5700_v1  ;;  %v17272_v19 = vld [vmem:[#allocation75_spill] sm:$0xff]  ;;  %v3463_v11 = vmul.f32 %v17273_v17, %v5700_v1  ;;  %v17274_v34 = vld [vmem:[#allocation78_spill] sm:$0xff]  ;;  %v3469_v23 = vmul.f32 %v5700_v1, %v11689_v13  ;;  %v17307_v33 = vld [vmem:[#allocation20_spill] sm:$0xff] }
 0x299   : > { %v3462_v61 = vmul.f32 %v17272_v19, %v5700_v1  ;;  %v3464_v28 = vmul.f32 %v17274_v34, %v5700_v1  ;;  %v17275_v9 = vld [vmem:[#allocation66_spill] sm:$0xff]  ;;  %v17277_v47 = vld [vmem:[#allocation55_spill] sm:$0xff]  ;;  %v11711_v17 = vadd.f32 %v3440_v18, %v11568_v26  ;;  %v11714_v34 = vadd.f32 %v3441_v46, %v11572_v58  ;;  %17279 = vst [vmem:[#allocation25_spill] sm:$0xff] %v11726_v5  ;;  %v17299_v18 = vld [vmem:[#allocation8_spill] sm:$0xff] }
 0x29a   : > { %v3465_v21 = vmul.f32 %v17275_v9, %v5700_v1  ;;  %v17276_v29 = vld [vmem:[#allocation54_spill] sm:$0xff]  ;;  %v3467_v14 = vmul.f32 %v17277_v47, %v5700_v1  ;;  %v11720_v47 = vadd.f32 %v3443_v25, %v11581_v31  ;;  %17280 = vst [vmem:[#allocation21_spill] sm:$0xff] %v11729_v56  ;;  %v11732_v26 = vadd.f32 %v3447_v10, %v11595_v15 }
 0x29b   : > { %v3466_v63 = vmul.f32 %v17276_v29, %v5700_v1  ;;  %v11717_v29 = vadd.f32 %v3442_v57, %v11577_v50  ;;  %v11723_v1 = vadd.f32 %v3444_v43, %v11585_v62  ;;  %v11735_v58 = vadd.f32 %v3448_v59, %v11598_v52  ;;  %v17301_v57 = vld [vmem:[#allocation9_spill] sm:$0xff]  ;;  %v17305_v43 = vld [vmem:[#allocation15_spill] sm:$0xff]  ;;  %v17309_v59 = vld [vmem:[#allocation28_spill] sm:$0xff] }
 0x29c   : > { %17281 = vst [vmem:[#allocation22_spill] sm:$0xff] %v11732_v26  ;;  %v11738_v50 = vadd.f32 %v3449_v24, %v11601_v38  ;;  %v11741_v31 = vadd.f32 %v3450_v39, %v11604_v8  ;;  %v11744_v62 = vadd.f32 %v3451_v40, %v11607_v20  ;;  %v11747_v44 = vadd.f32 %v3452_v41, %v11610_v60  ;;  %v11764_v8 = vld [vmem:[%s15337_s1 + $0x10] ss:$0 sm:$0xff]  ;;  %v17311_v24 = vld [vmem:[#allocation34_spill] sm:$0xff]  ;;  %v17313_v40 = vld [vmem:[#allocation72_spill] sm:$0xff] }
 0x29d   : > { %17278 = vst [vmem:[#allocation81_spill] sm:$0xff] %v11723_v1  ;;  %17282 = vst [vmem:[#allocation26_spill] sm:$0xff] %v11735_v58  ;;  %v11750_v32 = vadd.f32 %v3453_v54, %v11613_v3  ;;  %v11753_v15 = vadd.f32 %v3454_v7, %v11616_v2  ;;  %v11756_v52 = vadd.f32 %v3455_v16, %v11619_v55  ;;  %v17293_v3 = vld [vmem:[#allocation59_spill] sm:$0xff]  ;;  %v17295_v55 = vld [vmem:[#allocation74_spill] sm:$0xff] }
 0x29e   : > { %17283 = vst [vmem:[#allocation27_spill] sm:$0xff] %v11738_v50  ;;  %17284 = vst [vmem:[#allocation73_spill] sm:$0xff] %v11741_v31  ;;  %v11759_v38 = vadd.f32 %v3456_v36, %v11622_v30  ;;  %v11767_v20 = vadd.f32 %v3457_v27, %v11628_v6  ;;  %v11770_v60 = vadd.f32 %v3458_v37, %v11631_v4  ;;  %v17297_v30 = vld [vmem:[#allocation7_spill] sm:$0xff]  ;;  %v17303_v4 = vld [vmem:[#allocation12_spill] sm:$0xff] }
 0x29f   : > { %17285 = vst [vmem:[#allocation5_spill] sm:$0xff] %v11744_v62  ;;  %17286 = vst [vmem:[#allocation6_spill] sm:$0xff] %v11747_v44  ;;  %v11773_v2 = vadd.f32 %v3459_v42, %v17293_v3  ;;  %v11776_v49 = vadd.f32 %v3460_v51, %v17295_v55  ;;  %v11779_v12 = vadd.f32 %v3461_v45, %v17297_v30  ;;  %v11806_v54 = vld [vmem:[%s6195_s3 + $0x48] sm:$0xff]  ;;  %v11820_v36 = vld [vmem:[%s6195_s3 + $0x58] sm:$0xf] }
 0x2a0   : > { %17287 = vst [vmem:[#allocation29_spill] sm:$0xff] %v11750_v32  ;;  %17288 = vst [vmem:[#allocation30_spill] sm:$0xff] %v11753_v15  ;;  %v11782_v46 = vadd.f32 %v3462_v61, %v17299_v18  ;;  %v11785_v6 = vadd.f32 %v3463_v11, %v17301_v57  ;;  %v11788_v25 = vadd.f32 %v3464_v28, %v17303_v4  ;;  %v11827_v37 = vld [vmem:[%s6195_s3 + $0x60] sm:$0xff]  ;;  %v11834_v51 = vld [vmem:[%s6195_s3 + $0x68] sm:$0xff] }
 0x2a1   : > { %17289 = vst [vmem:[#allocation58_spill] sm:$0xff] %v11756_v52  ;;  %17290 = vst [vmem:[#allocation62_spill] sm:$0xff] %v11759_v38  ;;  %v11791_v0 = vadd.f32 %v3465_v21, %v17305_v43  ;;  %v11794_v10 = vadd.f32 %v3466_v63, %v17307_v33  ;;  %v11797_v45 = vadd.f32 %v3467_v14, %v17309_v59  ;;  %v11813_v63 = vld [vmem:[%s6195_s3 + $0x50] sm:$0xff]  ;;  %v11848_v21 = vld [vmem:[%s6195_s3 + $0x78] sm:$0xff] }
 0x2a2   : > { %17291 = vst [vmem:[#allocation63_spill] sm:$0xff] %v11767_v20  ;;  %17292 = vst [vmem:[#allocation67_spill] sm:$0xff] %v11770_v60  ;;  %v11800_v39 = vadd.f32 %v3468_v48, %v17311_v24  ;;  %v11803_v41 = vadd.f32 %v3469_v23, %v17313_v40  ;;  %v11810_v7 = vmul.f32 %v11806_v54, %v11764_v8  ;;  %v11841_v11 = vld [vmem:[%s6195_s3 + $0x70] sm:$0xf]  ;;  %v11855_v48 = vld [vmem:[%s6195_s3 + $0x80] sm:$0xff] }
 0x2a3   : > { %17294 = vst [vmem:[#allocation68_spill] sm:$0xff] %v11773_v2  ;;  %17296 = vst [vmem:[#allocation80_spill] sm:$0xff] %v11776_v49  ;;  %v11817_v16 = vmul.f32 %v11813_v63, %v11764_v8  ;;  %v11824_v27 = vmul.f32 %v11820_v36, %v11764_v8  ;;  %v11831_v42 = vmul.f32 %v11827_v37, %v11764_v8  ;;  %v11862_v3 = vld [vmem:[%s6195_s3 + $0x88] sm:$0xf]  ;;  %v11869_v30 = vld [vmem:[%s6195_s3 + $0x90] sm:$0xff] }
 0x2a4   : > { %17298 = vst [vmem:[#allocation82_spill] sm:$0xff] %v11779_v12  ;;  %17300 = vst [vmem:[#allocation83_spill] sm:$0xff] %v11782_v46  ;;  %v11838_v61 = vmul.f32 %v11834_v51, %v11764_v8  ;;  %v11845_v28 = vmul.f32 %v11841_v11, %v11764_v8  ;;  %v11852_v14 = vmul.f32 %v11848_v21, %v11764_v8  ;;  %v11876_v57 = vld [vmem:[%s6195_s3 + $0x98] sm:$0xff]  ;;  %v11883_v43 = vld [vmem:[%s6195_s3 + $0xa0] sm:$0xf] }
 0x2a5   : > { %17302 = vst [vmem:[#allocation17_spill] sm:$0xff] %v11785_v6  ;;  %17304 = vst [vmem:[#allocation18_spill] sm:$0xff] %v11788_v25  ;;  %v11859_v23 = vmul.f32 %v11855_v48, %v11764_v8  ;;  %v11866_v55 = vmul.f32 %v11862_v3, %v11764_v8  ;;  %v11873_v18 = vmul.f32 %v11869_v30, %v11764_v8  ;;  %v11890_v59 = vld [vmem:[%s6195_s3 + $0xa8] sm:$0xff]  ;;  %v11897_v40 = vld [vmem:[%s6195_s3 + $0xb0] sm:$0xff]  ;;  %v3605_v26 = vrot.slane %v11817_v16, 1 }
 0x2a6   : > { %17306 = vst [vmem:[#allocation31_spill] sm:$0xff] %v11791_v0  ;;  %17308 = vst [vmem:[#allocation32_spill] sm:$0xff] %v11794_v10  ;;  %v11880_v4 = vmul.f32 %v11876_v57, %v11764_v8  ;;  %v11887_v33 = vmul.f32 %v11883_v43, %v11764_v8  ;;  %v11894_v24 = vmul.f32 %v11890_v59, %v11764_v8  ;;  %v11995_v10 = vld [vmem:[%s6195_s3 + $0x120] sm:$0xff]  ;;  %v12002_v0 = vld [vmem:[%s6195_s3 + $0x128] sm:$0xff]  ;;  %v3607_v56 = vrot.slane %v11824_v27, 1 }
 0x2a7   : > { %17310 = vst [vmem:[#allocation60_spill] sm:$0xff] %v11797_v45  ;;  %17312 = vst [vmem:[#allocation64_spill] sm:$0xff] %v11800_v39  ;;  %v11981_v39 = vld [vmem:[%s6195_s3 + $0x110] sm:$0xff]  ;;  %v11988_v45 = vld [vmem:[%s6195_s3 + $0x118] sm:$0xf]  ;;  %v12062_v38 = vmul.f32 %v17272_v19, %v11764_v8  ;;  %v12107_v58 = vmul.f32 %v11764_v8, %v11682_v22  ;;  %v3610_v5 = vrot.slane %v11838_v61, 1 }
 0x2a8   : > { %17314 = vst [vmem:[#allocation65_spill] sm:$0xff] %v11803_v41  ;;  %17315 = vst [vmem:[#allocation69_spill] sm:$0xff] %v11806_v54  ;;  %v11967_v54 = vld [vmem:[%s6195_s3 + $0x100] sm:$0xf]  ;;  %v11974_v41 = vld [vmem:[%s6195_s3 + $0x108] sm:$0xff]  ;;  %v3612_v22 = vrot.slane %v11845_v28, 1 }
 0x2a9   : > { %17316 = vst [vmem:[#allocation70_spill] sm:$0xff] %v11813_v63  ;;  %17317 = vst [vmem:[#allocation35_spill] sm:$0xff] %v11820_v36  ;;  %v11953_v36 = vld [vmem:[%s6195_s3 + $0xf0] sm:$0xff]  ;;  %v11960_v63 = vld [vmem:[%s6195_s3 + $0xf8] sm:$0xff]  ;;  %v3614_v1 = vrot.slane %v11852_v14, 1  ;;  %v3617_v16 = vrot.slane %v11866_v55, 1 }
 0x2aa   : > { %17318 = vst [vmem:[#allocation36_spill] sm:$0xff] %v11827_v37  ;;  %17319 = vst [vmem:[#allocation40_spill] sm:$0xff] %v11834_v51  ;;  %v11939_v51 = vld [vmem:[%s6195_s3 + $0xe0] sm:$0xff]  ;;  %v11946_v37 = vld [vmem:[%s6195_s3 + $0xe8] sm:$0xf]  ;;  %v3619_v61 = vrot.slane %v11873_v18, 1 }
 0x2ab   : > { %17320 = vst [vmem:[#allocation41_spill] sm:$0xff] %v11841_v11  ;;  %17321 = vst [vmem:[#allocation45_spill] sm:$0xff] %v11848_v21  ;;  %v11925_v21 = vld [vmem:[%s6195_s3 + $0xd0] sm:$0xf]  ;;  %v11932_v11 = vld [vmem:[%s6195_s3 + $0xd8] sm:$0xff]  ;;  %v3620_v28 = vrot.slane %v11880_v4, 1 }
 0x2ac   : > { %17322 = vst [vmem:[#allocation46_spill] sm:$0xff] %v11855_v48  ;;  %17323 = vst [vmem:[#allocation49_spill] sm:$0xff] %v11862_v3  ;;  %v11911_v3 = vld [vmem:[%s6195_s3 + $0xc0] sm:$0xff]  ;;  %v11918_v48 = vld [vmem:[%s6195_s3 + $0xc8] sm:$0xff]  ;;  %v3624_v14 = vrot.slane %v11894_v24, 1 }
 0x2ad   : > { %17324 = vst [vmem:[#allocation50_spill] sm:$0xff] %v11869_v30  ;;  %17325 = vst [vmem:[#allocation10_spill] sm:$0xff] %v11876_v57  ;;  %v11901_v57 = vmul.f32 %v11897_v40, %v11764_v8  ;;  %v11904_v30 = vld [vmem:[%s6195_s3 + $0xb8] sm:$0xf]  ;;  %v12009_v25 = vld [vmem:[%s6195_s3 + $0x130] sm:$0xf] }
 0x2ae   : > { %17326 = vst [vmem:[#allocation11_spill] sm:$0xff] %v11883_v43  ;;  %17327 = vst [vmem:[#allocation13_spill] sm:$0xff] %v11890_v59  ;;  %v11908_v43 = vmul.f32 %v11904_v30, %v11764_v8  ;;  %v11915_v59 = vmul.f32 %v11911_v3, %v11764_v8  ;;  %v12016_v6 = vld [vmem:[%s6195_s3 + $0x138] sm:$0xff]  ;;  %v12023_v46 = vld [vmem:[%s6195_s3 + $0x140] sm:$0xff] }
 0x2af   : > { %17328 = vst [vmem:[#allocation14_spill] sm:$0xff] %v11897_v40  ;;  %17329 = vst [vmem:[#allocation16_spill] sm:$0xff] %v11904_v30  ;;  %v11922_v40 = vmul.f32 %v11918_v48, %v11764_v8  ;;  %v11929_v30 = vmul.f32 %v11925_v21, %v11764_v8  ;;  %v12027_v12 = vmul.f32 %v12023_v46, %v11764_v8  ;;  %v12037_v49 = vld [vmem:[%s6195_s3 + $0x150] sm:$0xff]  ;;  %v12051_v60 = vld [vmem:[%s6195_s3 + $0x1c0] sm:$0xf] }
 0x2b0   : > { %17330 = vst [vmem:[#allocation19_spill] sm:$0xff] %v11911_v3  ;;  %17331 = vst [vmem:[#allocation23_spill] sm:$0xff] %v11918_v48  ;;  %v11936_v3 = vmul.f32 %v11932_v11, %v11764_v8  ;;  %v11943_v48 = vmul.f32 %v11939_v51, %v11764_v8  ;;  %v12041_v2 = vmul.f32 %v12037_v49, %v11764_v8  ;;  %v12054_v20 = vld [vmem:[%s6195_s3 + $0x160] sm:$0xf]  ;;  %v12069_v15 = vld [vmem:[%s6195_s3 + $0x178] sm:$0xf] }
 0x2b1   : > { %17332 = vst [vmem:[#allocation24_spill] sm:$0xff] %v11925_v21  ;;  %17333 = vst [vmem:[#allocation37_spill] sm:$0xff] %v11932_v11  ;;  %v11950_v21 = vmul.f32 %v11946_v37, %v11764_v8  ;;  %v11957_v11 = vmul.f32 %v11953_v36, %v11764_v8  ;;  %v17353_v32 = vld [vmem:[#allocation78_spill] sm:$0xff]  ;;  %v12084_v19 = vld [vmem:[%s6195_s3 + $0x190] sm:$0xf]  ;;  %v3629_v55 = vrot.slane %v11915_v59, 1 }
 0x2b2   : > { %17334 = vst [vmem:[#allocation33_spill] sm:$0xff] %v11939_v51  ;;  %17335 = vst [vmem:[#allocation42_spill] sm:$0xff] %v11946_v37  ;;  %v11964_v51 = vmul.f32 %v11960_v63, %v11764_v8  ;;  %v11971_v37 = vmul.f32 %v11967_v54, %v11764_v8  ;;  %v12077_v44 = vmul.f32 %v17353_v32, %v11764_v8  ;;  %v17355_v62 = vld [vmem:[#allocation54_spill] sm:$0xff]  ;;  %v3632_v4 = vrot.slane %v11929_v30, 1 }
 0x2b3   : > { %17336 = vst [vmem:[#allocation79_spill] sm:$0xff] %v11953_v36  ;;  %17337 = vst [vmem:[#allocation71_spill] sm:$0xff] %v11960_v63  ;;  %v11978_v36 = vmul.f32 %v11974_v41, %v11764_v8  ;;  %v11985_v63 = vmul.f32 %v11981_v39, %v11764_v8  ;;  %v12092_v31 = vmul.f32 %v17355_v62, %v11764_v8  ;;  %v12099_v32 = vld [vmem:[%s6195_s3 + $0x1a8] sm:$0xf] }
 0x2b4   : > { %17338 = vst [vmem:[#allocation76_spill] sm:$0xff] %v11967_v54  ;;  %17339 = vst [vmem:[#allocation39_spill] sm:$0xff] %v11974_v41  ;;  %v11992_v54 = vmul.f32 %v11988_v45, %v11764_v8  ;;  %v11999_v41 = vmul.f32 %v11995_v10, %v11764_v8  ;;  %v12115_v62 = vmul.f32 %v11764_v8, %v12051_v60 }
 0x2b5   : > { %17340 = vst [vmem:[#allocation51_spill] sm:$0xff] %v11981_v39  ;;  %17341 = vst [vmem:[#allocation44_spill] sm:$0xff] %v11988_v45  ;;  %v12006_v39 = vmul.f32 %v12002_v0, %v11764_v8  ;;  %v12013_v45 = vmul.f32 %v12009_v25, %v11764_v8 }
 0x2b6   : > { %17342 = vst [vmem:[#allocation56_spill] sm:$0xff] %v11995_v10  ;;  %17343 = vst [vmem:[#allocation47_spill] sm:$0xff] %v12002_v0  ;;  %v12020_v10 = vmul.f32 %v12016_v6, %v11764_v8  ;;  %v12030_v0 = vld [vmem:[%s6195_s3 + $0x148] sm:$0xf] }
 0x2b7   : > { %17344 = vst [vmem:[#allocation48_spill] sm:$0xff] %v12009_v25  ;;  %17345 = vst [vmem:[#allocation61_spill] sm:$0xff] %v12016_v6  ;;  %v12034_v25 = vmul.f32 %v12030_v0, %v11764_v8  ;;  %v12044_v6 = vld [vmem:[%s6195_s3 + $0x158] sm:$0xff] }
 0x2b8   : > { %17346 = vst [vmem:[#allocation52_spill] sm:$0xff] %v12023_v46  ;;  %17347 = vst [vmem:[#allocation53_spill] sm:$0xff] %v12030_v0  ;;  %v12048_v46 = vmul.f32 %v12044_v6, %v11764_v8  ;;  %v12058_v0 = vmul.f32 %v12054_v20, %v11764_v8 }
 0x2b9   : > { %17348 = vst [vmem:[#allocation57_spill] sm:$0xff] %v12037_v49  ;;  %17349 = vst [vmem:[#allocation75_spill] sm:$0xff] %v12044_v6  ;;  %v17351_v49 = vld [vmem:[#allocation77_spill] sm:$0xff]  ;;  %v12073_v6 = vmul.f32 %v12069_v15, %v11764_v8 }
 0x2ba   : > { %17350 = vst [vmem:[#allocation66_spill] sm:$0xff] %v12054_v20  ;;  %v12066_v52 = vmul.f32 %v17351_v49, %v11764_v8  ;;  %17352 = vst [vmem:[#allocation59_spill] sm:$0xff] %v12069_v15  ;;  %v12081_v20 = vmul.f32 %v17275_v9, %v11764_v8  ;;  %v12088_v49 = vmul.f32 %v12084_v19, %v11764_v8  ;;  %v17356_v15 = vld [vmem:[#allocation55_spill] sm:$0xff] }
 0x2bb   : > { %17354 = vst [vmem:[#allocation74_spill] sm:$0xff] %v12084_v19  ;;  %v12096_v50 = vmul.f32 %v17356_v15, %v11764_v8  ;;  %17357 = vst [vmem:[#allocation7_spill] sm:$0xff] %v12099_v32  ;;  %v12103_v9 = vmul.f32 %v12099_v32, %v11764_v8  ;;  %v12111_v19 = vmul.f32 %v11764_v8, %v11689_v13  ;;  %v3604_v15 = vrot.slane %v11810_v7, 1 }
 0x2bc   : > { %v3609_v32 = vrot.slane %v11831_v42, 1  ;;  %v12128_v8 = vsel %vm438_vm0, %v3605_v26, %v3607_v56  ;;  %v3615_v7 = vrot.slane %v11859_v23, 1  ;;  %v12136_v42 = vsel %vm438_vm0, %v3610_v5, %v3612_v22 }
 0x2bd   : > { %v12125_v13 = vsel %vm438_vm0, %v3604_v15, %v3605_v26  ;;  %v3622_v26 = vrot.slane %v11887_v33, 1  ;;  %v12149_v23 = vsel %vm438_vm0, %v3619_v61, %v3620_v28  ;;  %v3625_v22 = vrot.slane %v11901_v57, 1 }
 0x2be   : > { %v12133_v27 = vsel %vm438_vm0, %v3609_v32, %v3610_v5  ;;  %v12141_v15 = vsel %vm438_vm0, %v3614_v1, %v3615_v7  ;;  %v12144_v56 = vsel %vm438_vm0, %v3615_v7, %v3617_v16  ;;  %v3627_v5 = vrot.slane %v11908_v43, 1 }
 0x2bf   : > { %v12155_v18 = vsel %vm438_vm0, %v3620_v28, %v3622_v26  ;;  %v3630_v1 = vrot.slane %v11922_v40, 1  ;;  %v3634_v33 = vrot.slane %v11936_v3, 1  ;;  %v3626_v24 = vsel %vm438_vm0, %v3624_v14, %v3625_v22 }
 0x2c0   : > { %v3628_v32 = vsel %vm438_vm0, %v3625_v22, %v3627_v5  ;;  %v3635_v7 = vrot.slane %v11943_v48, 1  ;;  %v3637_v57 = vrot.slane %v11950_v21, 1  ;;  %v3639_v16 = vrot.slane %v11957_v11, 1 }
 0x2c1   : > { %v3631_v43 = vsel %vm438_vm0, %v3629_v55, %v3630_v1  ;;  %v3633_v59 = vsel %vm438_vm0, %v3630_v1, %v3632_v4  ;;  %v3640_v40 = vrot.slane %v11964_v51, 1  ;;  %v3642_v61 = vrot.slane %v11971_v37, 1 }
 0x2c2   : > { %v3636_v30 = vsel %vm438_vm0, %v3634_v33, %v3635_v7  ;;  %v3638_v3 = vsel %vm438_vm0, %v3635_v7, %v3637_v57  ;;  %v3644_v28 = vrot.slane %v11978_v36, 1  ;;  %v3645_v21 = vrot.slane %v11985_v63, 1 }
 0x2c3   : > { %v3641_v48 = vsel %vm438_vm0, %v3639_v16, %v3640_v40  ;;  %v3647_v26 = vrot.slane %v11992_v54, 1  ;;  %v3649_v14 = vrot.slane %v11999_v41, 1  ;;  %v3643_v11 = vsel %vm438_vm0, %v3640_v40, %v3642_v61 }
 0x2c4   : > { %v3650_v51 = vrot.slane %v12006_v39, 1  ;;  %v3652_v22 = vrot.slane %v12013_v45, 1  ;;  %v3654_v5 = vrot.slane %v12020_v10, 1  ;;  %v3646_v37 = vsel %vm438_vm0, %v3644_v28, %v3645_v21 }
 0x2c5   : > { %v3648_v36 = vsel %vm438_vm0, %v3645_v21, %v3647_v26  ;;  %v3655_v55 = vrot.slane %v12027_v12, 1  ;;  %v3657_v63 = vrot.slane %v12034_v25, 1  ;;  %v3659_v1 = vrot.slane %v12041_v2, 1 }
 0x2c6   : > { %v3651_v54 = vsel %vm438_vm0, %v3649_v14, %v3650_v51  ;;  %v3653_v41 = vsel %vm438_vm0, %v3650_v51, %v3652_v22  ;;  %v3660_v39 = vrot.slane %v12048_v46, 1  ;;  %v3662_v4 = vrot.slane %v12058_v0, 1  ;;  %v17367_v14 = vld [vmem:[#allocation22_spill] sm:$0xff]  ;;  %v17371_v22 = vld [vmem:[#allocation27_spill] sm:$0xff] }
 0x2c7   : > { %v3656_v45 = vsel %vm438_vm0, %v3654_v5, %v3655_v55  ;;  %v3658_v10 = vsel %vm438_vm0, %v3655_v55, %v3657_v63  ;;  %v3664_v33 = vrot.slane %v12062_v38, 1  ;;  %v3665_v25 = vrot.slane %v12066_v52, 1 }
 0x2c8   : > { %v3661_v12 = vsel %vm438_vm0, %v3659_v1, %v3660_v39  ;;  %v3667_v7 = vrot.slane %v12073_v6, 1  ;;  %v3669_v57 = vrot.slane %v12077_v44, 1  ;;  %v3663_v2 = vsel %vm438_vm0, %v3660_v39, %v3662_v4 }
 0x2c9   : > { %v3670_v46 = vrot.slane %v12081_v20, 1  ;;  %v3672_v16 = vrot.slane %v12088_v49, 1  ;;  %v3674_v40 = vrot.slane %v12092_v31, 1  ;;  %v3666_v0 = vsel %vm438_vm0, %v3664_v33, %v3665_v25 }
 0x2ca   : > { %v3668_v38 = vsel %vm438_vm0, %v3665_v25, %v3667_v7  ;;  %v3675_v61 = vrot.slane %v12096_v50, 1  ;;  %v3677_v52 = vrot.slane %v12103_v9, 1  ;;  %v3679_v28 = vrot.slane %v12107_v58, 1  ;;  %v17389_v25 = vld [vmem:[#allocation67_spill] sm:$0xff]  ;;  %v17391_v7 = vld [vmem:[#allocation68_spill] sm:$0xff] }
 0x2cb   : > { %v3671_v6 = vsel %vm438_vm0, %v3669_v57, %v3670_v46  ;;  %v3673_v44 = vsel %vm438_vm0, %v3670_v46, %v3672_v16  ;;  %v3680_v20 = vrot.slane %v12111_v19, 1  ;;  %v3682_v21 = vrot.slane %v12115_v62, 1  ;;  %v17393_v57 = vld [vmem:[#allocation80_spill] sm:$0xff]  ;;  %v17395_v46 = vld [vmem:[#allocation82_spill] sm:$0xff]  ;;  %v17397_v16 = vld [vmem:[#allocation83_spill] sm:$0xff] }
 0x2cc   : > { %v3676_v49 = vsel %vm438_vm0, %v3674_v40, %v3675_v61  ;;  %v3678_v31 = vsel %vm438_vm0, %v3675_v61, %v3677_v52  ;;  %v12213_v26 = vadd.f32 %v12125_v13, %v11705_v53  ;;  %v12218_v9 = vadd.f32 %v12128_v8, %v11708_v35  ;;  %v17361_v35 = vld [vmem:[#allocation81_spill] sm:$0xff] }
 0x2cd   : > { %v3681_v50 = vsel %vm438_vm0, %v3679_v28, %v3680_v20  ;;  %v12222_v58 = vadd.f32 %v12133_v27, %v11711_v17  ;;  %v12226_v19 = vadd.f32 %v12136_v42, %v11714_v34  ;;  %v3683_v62 = vsel %vm438_vm0, %v3680_v20, %v3682_v21  ;;  %v17363_v17 = vld [vmem:[#allocation25_spill] sm:$0xff] }
 0x2ce   : > { %v12231_v13 = vadd.f32 %v12141_v15, %v11717_v29  ;;  %v12235_v53 = vadd.f32 %v12144_v56, %v11720_v47  ;;  %v12239_v8 = vadd.f32 %v12149_v23, %v17361_v35  ;;  %v12243_v27 = vadd.f32 %v12155_v18, %v17363_v17  ;;  %v17365_v34 = vld [vmem:[#allocation21_spill] sm:$0xff]  ;;  %v17369_v29 = vld [vmem:[#allocation26_spill] sm:$0xff] }
 0x2cf   : > { %17358 = vst [vmem:[#allocation8_spill] sm:$0xff] %v12226_v19  ;;  %v12246_v42 = vadd.f32 %v3626_v24, %v17365_v34  ;;  %v12249_v51 = vadd.f32 %v3628_v32, %v17367_v14  ;;  %v12252_v15 = vadd.f32 %v3631_v43, %v17369_v29  ;;  %v12255_v47 = vadd.f32 %v3633_v59, %v17371_v22  ;;  %v17373_v56 = vld [vmem:[#allocation73_spill] sm:$0xff]  ;;  %v17377_v18 = vld [vmem:[#allocation6_spill] sm:$0xff] }
 0x2d0   : > { %17359 = vst [vmem:[#allocation9_spill] sm:$0xff] %v12231_v13  ;;  %17360 = vst [vmem:[#allocation12_spill] sm:$0xff] %v12235_v53  ;;  %v12258_v5 = vadd.f32 %v3636_v30, %v17373_v56  ;;  %v17375_v23 = vld [vmem:[#allocation5_spill] sm:$0xff]  ;;  %v12264_v63 = vadd.f32 %v3641_v48, %v17377_v18  ;;  %v17381_v32 = vld [vmem:[#allocation30_spill] sm:$0xff]  ;;  %v12299_v40 = vadd.f32 %v3666_v0, %v17397_v16 }
 0x2d1   : > { %17362 = vst [vmem:[#allocation15_spill] sm:$0xff] %v12239_v8  ;;  %17364 = vst [vmem:[#allocation20_spill] sm:$0xff] %v12243_v27  ;;  %v12261_v55 = vadd.f32 %v3638_v3, %v17375_v23  ;;  %v17379_v24 = vld [vmem:[#allocation29_spill] sm:$0xff]  ;;  %v12270_v39 = vadd.f32 %v3646_v37, %v17381_v32  ;;  %v17383_v43 = vld [vmem:[#allocation58_spill] sm:$0xff]  ;;  %v12290_v37 = vadd.f32 %v3658_v10, %v17391_v7 }
 0x2d2   : > { %17366 = vst [vmem:[#allocation28_spill] sm:$0xff] %v12246_v42  ;;  %17368 = vst [vmem:[#allocation34_spill] sm:$0xff] %v12249_v51  ;;  %v12267_v1 = vadd.f32 %v3643_v11, %v17379_v24  ;;  %v12273_v4 = vadd.f32 %v3648_v36, %v17383_v43  ;;  %v17385_v59 = vld [vmem:[#allocation62_spill] sm:$0xff]  ;;  %v12281_v30 = vld [vmem:[%s15337_s1 + $0x11] ss:$0 sm:$0xff]  ;;  %v12287_v11 = vadd.f32 %v3656_v45, %v17389_v25 }
 0x2d3   : > { %17370 = vst [vmem:[#allocation72_spill] sm:$0xff] %v12252_v15  ;;  %17372 = vst [vmem:[#allocation77_spill] sm:$0xff] %v12255_v47  ;;  %v12276_v33 = vadd.f32 %v3651_v54, %v17385_v59  ;;  %v17387_v3 = vld [vmem:[#allocation63_spill] sm:$0xff]  ;;  %v12293_v36 = vadd.f32 %v3661_v12, %v17393_v57  ;;  %v12296_v54 = vadd.f32 %v3663_v2, %v17395_v46  ;;  %v17399_v61 = vld [vmem:[#allocation17_spill] sm:$0xff] }
 0x2d4   : > { %17374 = vst [vmem:[#allocation78_spill] sm:$0xff] %v12258_v5  ;;  %17376 = vst [vmem:[#allocation81_spill] sm:$0xff] %v12261_v55  ;;  %v12284_v48 = vadd.f32 %v3653_v41, %v17387_v3  ;;  %v12302_v52 = vadd.f32 %v3668_v38, %v17399_v61  ;;  %v17401_v41 = vld [vmem:[#allocation18_spill] sm:$0xff]  ;;  %v17403_v45 = vld [vmem:[#allocation31_spill] sm:$0xff] }
 0x2d5   : > { %17378 = vst [vmem:[#allocation25_spill] sm:$0xff] %v12264_v63  ;;  %17380 = vst [vmem:[#allocation21_spill] sm:$0xff] %v12267_v1  ;;  %v12305_v28 = vadd.f32 %v3671_v6, %v17401_v41  ;;  %v12308_v20 = vadd.f32 %v3673_v44, %v17403_v45  ;;  %v17405_v10 = vld [vmem:[#allocation32_spill] sm:$0xff]  ;;  %v17411_v0 = vld [vmem:[#allocation65_spill] sm:$0xff] }
 0x2d6   : > { %17382 = vst [vmem:[#allocation22_spill] sm:$0xff] %v12270_v39  ;;  %17384 = vst [vmem:[#allocation26_spill] sm:$0xff] %v12273_v4  ;;  %v12311_v21 = vadd.f32 %v3676_v49, %v17405_v10  ;;  %v17407_v12 = vld [vmem:[#allocation60_spill] sm:$0xff]  ;;  %v12320_v34 = vadd.f32 %v3683_v62, %v17411_v0  ;;  %v17413_v38 = vld [vmem:[#allocation69_spill] sm:$0xff] }
 0x2d7   : > { %17386 = vst [vmem:[#allocation27_spill] sm:$0xff] %v12276_v33  ;;  %17388 = vst [vmem:[#allocation73_spill] sm:$0xff] %v12284_v48  ;;  %v12314_v35 = vadd.f32 %v3678_v31, %v17407_v12  ;;  %v17409_v2 = vld [vmem:[#allocation64_spill] sm:$0xff]  ;;  %v3754_v14 = vmul.f32 %v17413_v38, %v12281_v30  ;;  %v17414_v6 = vld [vmem:[#allocation70_spill] sm:$0xff] }
 0x2d8   : > { %17390 = vst [vmem:[#allocation5_spill] sm:$0xff] %v12287_v11  ;;  %17392 = vst [vmem:[#allocation6_spill] sm:$0xff] %v12290_v37  ;;  %v12317_v17 = vadd.f32 %v3681_v50, %v17409_v2  ;;  %v3755_v29 = vmul.f32 %v17414_v6, %v12281_v30  ;;  %v17415_v44 = vld [vmem:[#allocation35_spill] sm:$0xff]  ;;  %v17416_v49 = vld [vmem:[#allocation36_spill] sm:$0xff] }
 0x2d9   : > { %17394 = vst [vmem:[#allocation29_spill] sm:$0xff] %v12293_v36  ;;  %17396 = vst [vmem:[#allocation30_spill] sm:$0xff] %v12296_v54  ;;  %v3756_v22 = vmul.f32 %v17415_v44, %v12281_v30  ;;  %v3757_v56 = vmul.f32 %v17416_v49, %v12281_v30  ;;  %v17417_v31 = vld [vmem:[#allocation40_spill] sm:$0xff]  ;;  %v17418_v50 = vld [vmem:[#allocation41_spill] sm:$0xff]  ;;  %v3850_v51 = vrot.slane %v3754_v14, 2 }
 0x2da   : > { %17398 = vst [vmem:[#allocation58_spill] sm:$0xff] %v12299_v40  ;;  %17400 = vst [vmem:[#allocation62_spill] sm:$0xff] %v12302_v52  ;;  %v3758_v23 = vmul.f32 %v17417_v31, %v12281_v30  ;;  %v3759_v18 = vmul.f32 %v17418_v50, %v12281_v30  ;;  %v17419_v62 = vld [vmem:[#allocation45_spill] sm:$0xff]  ;;  %v17420_v32 = vld [vmem:[#allocation46_spill] sm:$0xff]  ;;  %v3851_v42 = vrot.slane %v3755_v29, 2 }
 0x2db   : > { %17402 = vst [vmem:[#allocation63_spill] sm:$0xff] %v12305_v28  ;;  %17404 = vst [vmem:[#allocation67_spill] sm:$0xff] %v12308_v20  ;;  %v12336_v24 = vmul.f32 %v17419_v62, %v12281_v30  ;;  %v12340_v43 = vmul.f32 %v17420_v32, %v12281_v30  ;;  %v17421_v59 = vld [vmem:[#allocation49_spill] sm:$0xff]  ;;  %v17422_v25 = vld [vmem:[#allocation50_spill] sm:$0xff]  ;;  %v3855_v27 = vrot.slane %v3757_v56, 2 }
 0x2dc   : > { %17406 = vst [vmem:[#allocation68_spill] sm:$0xff] %v12311_v21  ;;  %17408 = vst [vmem:[#allocation80_spill] sm:$0xff] %v12314_v35  ;;  %v3762_v3 = vmul.f32 %v17421_v59, %v12281_v30  ;;  %v12346_v7 = vmul.f32 %v17422_v25, %v12281_v30  ;;  %v17423_v57 = vld [vmem:[#allocation10_spill] sm:$0xff]  ;;  %v17424_v16 = vld [vmem:[#allocation11_spill] sm:$0xff]  ;;  %v3856_v8 = vrot.slane %v3758_v23, 2  ;;  %v3858_v53 = vrot.slane %v3759_v18, 2 }
 0x2dd   : > { %17410 = vst [vmem:[#allocation82_spill] sm:$0xff] %v12317_v17  ;;  %17412 = vst [vmem:[#allocation83_spill] sm:$0xff] %v12320_v34  ;;  %v12350_v46 = vmul.f32 %v17423_v57, %v12281_v30  ;;  %v12354_v61 = vmul.f32 %v17424_v16, %v12281_v30  ;;  %v17425_v41 = vld [vmem:[#allocation13_spill] sm:$0xff]  ;;  %v17426_v10 = vld [vmem:[#allocation14_spill] sm:$0xff]  ;;  %v12514_v13 = vsel %vm685_vm1, %v3850_v51, %v3851_v42 }
 0x2de   : > { %v12358_v45 = vmul.f32 %v17425_v41, %v12281_v30  ;;  %v12362_v12 = vmul.f32 %v17426_v10, %v12281_v30  ;;  %v17427_v2 = vld [vmem:[#allocation16_spill] sm:$0xff]  ;;  %v17428_v25 = vld [vmem:[#allocation19_spill] sm:$0xff]  ;;  %v17431_v62 = vld [vmem:[#allocation37_spill] sm:$0xff]  ;;  %v3863_v19 = vrot.slane %v3762_v3, 2  ;;  %v12524_v14 = vsel %vm685_vm1, %v3856_v8, %v3858_v53 }
 0x2df   : > { %v12366_v0 = vmul.f32 %v17427_v2, %v12281_v30  ;;  %v12370_v57 = vmul.f32 %v17428_v25, %v12281_v30  ;;  %v17429_v59 = vld [vmem:[#allocation23_spill] sm:$0xff]  ;;  %v17430_v32 = vld [vmem:[#allocation24_spill] sm:$0xff]  ;;  %v12382_v10 = vmul.f32 %v17431_v62, %v12281_v30  ;;  %v17432_v50 = vld [vmem:[#allocation33_spill] sm:$0xff]  ;;  %v3865_v29 = vrot.slane %v12346_v7, 2 }
 0x2e0   : > { %v12374_v16 = vmul.f32 %v17429_v59, %v12281_v30  ;;  %v12378_v41 = vmul.f32 %v17430_v32, %v12281_v30  ;;  %v12386_v2 = vmul.f32 %v17432_v50, %v12281_v30  ;;  %v17433_v31 = vld [vmem:[#allocation42_spill] sm:$0xff]  ;;  %v17434_v49 = vld [vmem:[#allocation79_spill] sm:$0xff]  ;;  %v17436_v62 = vld [vmem:[#allocation76_spill] sm:$0xff]  ;;  %v3870_v23 = vrot.slane %v12358_v45, 2 }
 0x2e1   : > { %v12390_v25 = vmul.f32 %v17433_v31, %v12281_v30  ;;  %v12394_v59 = vmul.f32 %v17434_v49, %v12281_v30  ;;  %v17435_v32 = vld [vmem:[#allocation71_spill] sm:$0xff]  ;;  %v12402_v6 = vmul.f32 %v17436_v62, %v12281_v30  ;;  %v17439_v49 = vld [vmem:[#allocation44_spill] sm:$0xff]  ;;  %v17446_v54 = vld [vmem:[#allocation57_spill] sm:$0xff]  ;;  %v3871_v53 = vrot.slane %v12362_v12, 2 }
 0x2e2   : > { %v12398_v44 = vmul.f32 %v17435_v32, %v12281_v30  ;;  %v17437_v50 = vld [vmem:[#allocation39_spill] sm:$0xff]  ;;  %v12414_v17 = vmul.f32 %v17439_v49, %v12281_v30  ;;  %v17440_v32 = vld [vmem:[#allocation56_spill] sm:$0xff]  ;;  %v17448_v37 = vld [vmem:[#allocation66_spill] sm:$0xff]  ;;  %v3875_v18 = vrot.slane %v12370_v57, 2  ;;  %v3881_v7 = vrot.slane %v12386_v2, 2 }
 0x2e3   : > { %v12406_v38 = vmul.f32 %v17437_v50, %v12281_v30  ;;  %v17438_v31 = vld [vmem:[#allocation51_spill] sm:$0xff]  ;;  %v12418_v35 = vmul.f32 %v17440_v32, %v12281_v30  ;;  %v17442_v50 = vld [vmem:[#allocation48_spill] sm:$0xff]  ;;  %v17445_v32 = vld [vmem:[#allocation53_spill] sm:$0xff]  ;;  %v3885_v45 = vrot.slane %v12394_v59, 2  ;;  %v3888_v12 = vrot.slane %v12402_v6, 2 }
 0x2e4   : > { %v12410_v34 = vmul.f32 %v17438_v31, %v12281_v30  ;;  %v17441_v62 = vld [vmem:[#allocation47_spill] sm:$0xff]  ;;  %v12426_v20 = vmul.f32 %v17442_v50, %v12281_v30  ;;  %v17443_v31 = vld [vmem:[#allocation61_spill] sm:$0xff]  ;;  %v17444_v49 = vld [vmem:[#allocation52_spill] sm:$0xff]  ;;  %v12438_v40 = vmul.f32 %v17445_v32, %v12281_v30 }
 0x2e5   : > { %v12422_v21 = vmul.f32 %v17441_v62, %v12281_v30  ;;  %v12430_v28 = vmul.f32 %v17443_v31, %v12281_v30  ;;  %v12434_v52 = vmul.f32 %v17444_v49, %v12281_v30  ;;  %v12442_v62 = vmul.f32 %v17446_v54, %v12281_v30  ;;  %v17447_v36 = vld [vmem:[#allocation75_spill] sm:$0xff]  ;;  %v12453_v11 = vld [vmem:[%s6195_s3 + $0x168] sm:$0xff]  ;;  %v12471_v33 = vld [vmem:[%s6195_s3 + $0x180] sm:$0xff] }
 0x2e6   : > { %v12446_v50 = vmul.f32 %v17447_v36, %v12281_v30  ;;  %v12450_v31 = vmul.f32 %v17448_v37, %v12281_v30  ;;  %17449 = vst [vmem:[#allocation17_spill] sm:$0xff] %v12453_v11  ;;  %v12457_v49 = vmul.f32 %v12453_v11, %v12281_v30  ;;  %v12460_v32 = vld [vmem:[%s6195_s3 + $0x170] sm:$0xff]  ;;  %17452 = vst [vmem:[#allocation31_spill] sm:$0xff] %v12471_v33  ;;  %v12478_v4 = vld [vmem:[%s6195_s3 + $0x188] sm:$0xff] }
 0x2e7   : > { %17450 = vst [vmem:[#allocation18_spill] sm:$0xff] %v12460_v32  ;;  %v12464_v54 = vmul.f32 %v12460_v32, %v12281_v30  ;;  %v17451_v48 = vld [vmem:[#allocation59_spill] sm:$0xff]  ;;  %v12475_v37 = vmul.f32 %v12471_v33, %v12281_v30  ;;  %17453 = vst [vmem:[#allocation32_spill] sm:$0xff] %v12478_v4  ;;  %v12482_v11 = vmul.f32 %v12478_v4, %v12281_v30  ;;  %v17454_v39 = vld [vmem:[#allocation74_spill] sm:$0xff] }
 0x2e8   : > { %v12468_v36 = vmul.f32 %v17451_v48, %v12281_v30  ;;  %v12486_v32 = vmul.f32 %v17454_v39, %v12281_v30  ;;  %v17455_v1 = vld [vmem:[#allocation54_spill] sm:$0xff]  ;;  %v17456_v63 = vld [vmem:[#allocation55_spill] sm:$0xff] }
 0x2e9   : > { %v12490_v48 = vmul.f32 %v17455_v1, %v12281_v30  ;;  %v12494_v55 = vmul.f32 %v17456_v63, %v12281_v30  ;;  %v17457_v33 = vld [vmem:[#allocation7_spill] sm:$0xff]  ;;  %v17458_v47 = vld [vmem:[#allocation38_spill] sm:$0xff]  ;;  %v12510_v1 = vmul.f32 %v12281_v30, %v12051_v60  ;;  %v3853_v63 = vrot.slane %v3756_v22, 2 }
 0x2ea   : > { %v12498_v5 = vmul.f32 %v17457_v33, %v12281_v30  ;;  %v12502_v4 = vmul.f32 %v12281_v30, %v17458_v47  ;;  %v17459_v15 = vld [vmem:[#allocation43_spill] sm:$0xff]  ;;  %v3860_v33 = vrot.slane %v12336_v24, 2  ;;  %v3866_v22 = vrot.slane %v12350_v46, 2 }
 0x2eb   : > { %v12506_v39 = vmul.f32 %v12281_v30, %v17459_v15  ;;  %v12517_v47 = vsel %vm685_vm1, %v3851_v42, %v3853_v63  ;;  %v3861_v15 = vrot.slane %v12340_v43, 2  ;;  %v12521_v30 = vsel %vm685_vm1, %v3855_v27, %v3856_v8 }
 0x2ec   : > { %v3868_v42 = vrot.slane %v12354_v61, 2  ;;  %v12537_v27 = vsel %vm685_vm1, %v3865_v29, %v3866_v22  ;;  %v3873_v8 = vrot.slane %v12366_v0, 2  ;;  %v3872_v43 = vsel %vm685_vm1, %v3870_v23, %v3871_v53 }
 0x2ed   : > { %v12529_v56 = vsel %vm685_vm1, %v3860_v33, %v3861_v15  ;;  %v12532_v51 = vsel %vm685_vm1, %v3861_v15, %v3863_v19  ;;  %v3876_v33 = vrot.slane %v12374_v16, 2  ;;  %v3878_v19 = vrot.slane %v12378_v41, 2 }
 0x2ee   : > { %v12543_v24 = vsel %vm685_vm1, %v3866_v22, %v3868_v42  ;;  %v3880_v15 = vrot.slane %v12382_v10, 2  ;;  %v3874_v3 = vsel %vm685_vm1, %v3871_v53, %v3873_v8  ;;  %v3883_v46 = vrot.slane %v12390_v25, 2 }
 0x2ef   : > { %v3877_v61 = vsel %vm685_vm1, %v3875_v18, %v3876_v33  ;;  %v3879_v57 = vsel %vm685_vm1, %v3876_v33, %v3878_v19  ;;  %v3886_v16 = vrot.slane %v12398_v44, 2  ;;  %v3890_v0 = vrot.slane %v12406_v38, 2 }
 0x2f0   : > { %v3882_v41 = vsel %vm685_vm1, %v3880_v15, %v3881_v7  ;;  %v3884_v10 = vsel %vm685_vm1, %v3881_v7, %v3883_v46  ;;  %v3891_v25 = vrot.slane %v12410_v34, 2  ;;  %v3893_v63 = vrot.slane %v12414_v17, 2 }
 0x2f1   : > { %v3887_v2 = vsel %vm685_vm1, %v3885_v45, %v3886_v16  ;;  %v3895_v29 = vrot.slane %v12418_v35, 2  ;;  %v3889_v59 = vsel %vm685_vm1, %v3886_v16, %v3888_v12  ;;  %v3896_v44 = vrot.slane %v12422_v21, 2 }
 0x2f2   : > { %v3898_v22 = vrot.slane %v12426_v20, 2  ;;  %v3900_v42 = vrot.slane %v12430_v28, 2  ;;  %v3892_v6 = vsel %vm685_vm1, %v3890_v0, %v3891_v25  ;;  %v3894_v38 = vsel %vm685_vm1, %v3891_v25, %v3893_v63  ;;  %v17463_v25 = vld [vmem:[#allocation9_spill] sm:$0xff] }
 0x2f3   : > { %v3901_v23 = vrot.slane %v12434_v52, 2  ;;  %v3903_v34 = vrot.slane %v12438_v40, 2  ;;  %v3897_v17 = vsel %vm685_vm1, %v3895_v29, %v3896_v44  ;;  %v3905_v53 = vrot.slane %v12442_v62, 2 }
 0x2f4   : > { %v3899_v35 = vsel %vm685_vm1, %v3896_v44, %v3898_v22  ;;  %v3906_v21 = vrot.slane %v12446_v50, 2  ;;  %v3908_v8 = vrot.slane %v12450_v31, 2  ;;  %v3910_v18 = vrot.slane %v12457_v49, 2  ;;  %v17473_v44 = vld [vmem:[#allocation34_spill] sm:$0xff] }
 0x2f5   : > { %v3902_v20 = vsel %vm685_vm1, %v3900_v42, %v3901_v23  ;;  %v3904_v28 = vsel %vm685_vm1, %v3901_v23, %v3903_v34  ;;  %v3911_v40 = vrot.slane %v12464_v54, 2  ;;  %v3913_v33 = vrot.slane %v12468_v36, 2  ;;  %v17477_v23 = vld [vmem:[#allocation77_spill] sm:$0xff]  ;;  %v17479_v34 = vld [vmem:[#allocation78_spill] sm:$0xff] }
 0x2f6   : > { %v3907_v52 = vsel %vm685_vm1, %v3905_v53, %v3906_v21  ;;  %v3915_v19 = vrot.slane %v12475_v37, 2  ;;  %v3909_v62 = vsel %vm685_vm1, %v3906_v21, %v3908_v8  ;;  %v3916_v50 = vrot.slane %v12482_v11, 2 }
 0x2f7   : > { %v3918_v15 = vrot.slane %v12486_v32, 2  ;;  %v3920_v7 = vrot.slane %v12490_v48, 2  ;;  %v3912_v31 = vsel %vm685_vm1, %v3910_v18, %v3911_v40  ;;  %v3914_v49 = vsel %vm685_vm1, %v3911_v40, %v3913_v33 }
 0x2f8   : > { %v3921_v46 = vrot.slane %v12494_v55, 2  ;;  %v3923_v54 = vrot.slane %v12498_v5, 2  ;;  %v3917_v36 = vsel %vm685_vm1, %v3915_v19, %v3916_v50  ;;  %v3925_v45 = vrot.slane %v12502_v4, 2 }
 0x2f9   : > { %v3919_v37 = vsel %vm685_vm1, %v3916_v50, %v3918_v15  ;;  %v3926_v11 = vrot.slane %v12506_v39, 2  ;;  %v3928_v16 = vrot.slane %v12510_v1, 2  ;;  %v12601_v12 = vadd.f32 %v12514_v13, %v12213_v26  ;;  %v17461_v39 = vld [vmem:[#allocation8_spill] sm:$0xff]  ;;  %v17495_v50 = vld [vmem:[#allocation5_spill] sm:$0xff]  ;;  %v17497_v15 = vld [vmem:[#allocation6_spill] sm:$0xff] }
 0x2fa   : > { %v3922_v32 = vsel %vm685_vm1, %v3920_v7, %v3921_v46  ;;  %v3924_v48 = vsel %vm685_vm1, %v3921_v46, %v3923_v54  ;;  %v12606_v55 = vadd.f32 %v12517_v47, %v12218_v9  ;;  %v12610_v4 = vadd.f32 %v12521_v30, %v12222_v58  ;;  %v17465_v13 = vld [vmem:[#allocation12_spill] sm:$0xff]  ;;  %v17467_v9 = vld [vmem:[#allocation15_spill] sm:$0xff]  ;;  %v17499_v7 = vld [vmem:[#allocation29_spill] sm:$0xff] }
 0x2fb   : > { %v3927_v5 = vsel %vm685_vm1, %v3925_v45, %v3926_v11  ;;  %v12614_v0 = vadd.f32 %v12524_v14, %v17461_v39  ;;  %v3929_v1 = vsel %vm685_vm1, %v3926_v11, %v3928_v16  ;;  %v12619_v26 = vadd.f32 %v12529_v56, %v17463_v25  ;;  %v17469_v58 = vld [vmem:[#allocation20_spill] sm:$0xff]  ;;  %v17501_v46 = vld [vmem:[#allocation30_spill] sm:$0xff] }
 0x2fc   : > { %17460 = vst [vmem:[#allocation60_spill] sm:$0xff] %v12610_v4  ;;  %v12623_v63 = vadd.f32 %v12532_v51, %v17465_v13  ;;  %v12627_v47 = vadd.f32 %v12537_v27, %v17467_v9  ;;  %v12631_v30 = vadd.f32 %v12543_v24, %v17469_v58  ;;  %v17471_v14 = vld [vmem:[#allocation28_spill] sm:$0xff]  ;;  %v12637_v22 = vadd.f32 %v3874_v3, %v17473_v44  ;;  %v17481_v27 = vld [vmem:[#allocation81_spill] sm:$0xff]  ;;  %v17487_v3 = vld [vmem:[#allocation22_spill] sm:$0xff] }
 0x2fd   : > { %17462 = vst [vmem:[#allocation64_spill] sm:$0xff] %v12614_v0  ;;  %17464 = vst [vmem:[#allocation65_spill] sm:$0xff] %v12619_v26  ;;  %v12634_v29 = vadd.f32 %v3872_v43, %v17471_v14  ;;  %v17475_v56 = vld [vmem:[#allocation72_spill] sm:$0xff]  ;;  %v12643_v51 = vadd.f32 %v3879_v57, %v17477_v23  ;;  %v12646_v53 = vadd.f32 %v3882_v41, %v17479_v34  ;;  %v17483_v24 = vld [vmem:[#allocation25_spill] sm:$0xff] }
 0x2fe   : > { %17466 = vst [vmem:[#allocation54_spill] sm:$0xff] %v12623_v63  ;;  %17468 = vst [vmem:[#allocation55_spill] sm:$0xff] %v12627_v47  ;;  %v12640_v42 = vadd.f32 %v3877_v61, %v17475_v56  ;;  %v12649_v21 = vadd.f32 %v3884_v10, %v17481_v27  ;;  %v12652_v8 = vadd.f32 %v3887_v2, %v17483_v24  ;;  %v17485_v43 = vld [vmem:[#allocation21_spill] sm:$0xff]  ;;  %v17489_v61 = vld [vmem:[#allocation26_spill] sm:$0xff] }
 0x2ff   : > { %17470 = vst [vmem:[#allocation8_spill] sm:$0xff] %v12631_v30  ;;  %17472 = vst [vmem:[#allocation9_spill] sm:$0xff] %v12634_v29  ;;  %v12655_v18 = vadd.f32 %v3889_v59, %v17485_v43  ;;  %v12658_v40 = vadd.f32 %v3892_v6, %v17487_v3  ;;  %v12661_v33 = vadd.f32 %v3894_v38, %v17489_v61  ;;  %v17491_v57 = vld [vmem:[#allocation27_spill] sm:$0xff]  ;;  %v17493_v10 = vld [vmem:[#allocation73_spill] sm:$0xff] }
 0x300   : > { %17474 = vst [vmem:[#allocation12_spill] sm:$0xff] %v12637_v22  ;;  %17476 = vst [vmem:[#allocation15_spill] sm:$0xff] %v12640_v42  ;;  %v12664_v19 = vadd.f32 %v3897_v17, %v17491_v57  ;;  %v12669_v41 = vld [vmem:[%s15337_s1 + $0x12] ss:$0 sm:$0xff]  ;;  %v12672_v2 = vadd.f32 %v3899_v35, %v17493_v10  ;;  %v12675_v59 = vadd.f32 %v3902_v20, %v17495_v50  ;;  %v17503_v54 = vld [vmem:[#allocation58_spill] sm:$0xff] }
 0x301   : > { %17478 = vst [vmem:[#allocation20_spill] sm:$0xff] %v12643_v51  ;;  %17480 = vst [vmem:[#allocation28_spill] sm:$0xff] %v12646_v53  ;;  %v12678_v6 = vadd.f32 %v3904_v28, %v17497_v15  ;;  %v12681_v38 = vadd.f32 %v3907_v52, %v17499_v7  ;;  %v12684_v17 = vadd.f32 %v3909_v62, %v17501_v46  ;;  %v17505_v11 = vld [vmem:[#allocation62_spill] sm:$0xff]  ;;  %v17507_v35 = vld [vmem:[#allocation63_spill] sm:$0xff] }
 0x302   : > { %17482 = vst [vmem:[#allocation34_spill] sm:$0xff] %v12649_v21  ;;  %17484 = vst [vmem:[#allocation72_spill] sm:$0xff] %v12652_v8  ;;  %v12687_v45 = vadd.f32 %v3912_v31, %v17503_v54  ;;  %v12690_v16 = vadd.f32 %v3914_v49, %v17505_v11  ;;  %v12693_v39 = vadd.f32 %v3917_v36, %v17507_v35  ;;  %v17509_v20 = vld [vmem:[#allocation67_spill] sm:$0xff]  ;;  %v17511_v28 = vld [vmem:[#allocation68_spill] sm:$0xff] }
 0x303   : > { %17486 = vst [vmem:[#allocation77_spill] sm:$0xff] %v12655_v18  ;;  %17488 = vst [vmem:[#allocation78_spill] sm:$0xff] %v12658_v40  ;;  %v12696_v25 = vadd.f32 %v3919_v37, %v17509_v20  ;;  %v12699_v13 = vadd.f32 %v3922_v32, %v17511_v28  ;;  %v17513_v52 = vld [vmem:[#allocation80_spill] sm:$0xff]  ;;  %v17515_v62 = vld [vmem:[#allocation82_spill] sm:$0xff] }
 0x304   : > { %17490 = vst [vmem:[#allocation81_spill] sm:$0xff] %v12661_v33  ;;  %17492 = vst [vmem:[#allocation25_spill] sm:$0xff] %v12664_v19  ;;  %v12702_v9 = vadd.f32 %v3924_v48, %v17513_v52  ;;  %v12705_v58 = vadd.f32 %v3927_v5, %v17515_v62  ;;  %v17517_v31 = vld [vmem:[#allocation83_spill] sm:$0xff]  ;;  %v17519_v49 = vld [vmem:[#allocation69_spill] sm:$0xff] }
 0x305   : > { %17494 = vst [vmem:[#allocation21_spill] sm:$0xff] %v12672_v2  ;;  %17496 = vst [vmem:[#allocation22_spill] sm:$0xff] %v12675_v59  ;;  %v12708_v14 = vadd.f32 %v3929_v1, %v17517_v31  ;;  %v4000_v44 = vmul.f32 %v17519_v49, %v12669_v41  ;;  %v17520_v36 = vld [vmem:[#allocation70_spill] sm:$0xff]  ;;  %v17521_v37 = vld [vmem:[#allocation35_spill] sm:$0xff] }
 0x306   : > { %17498 = vst [vmem:[#allocation26_spill] sm:$0xff] %v12678_v6  ;;  %17500 = vst [vmem:[#allocation27_spill] sm:$0xff] %v12681_v38  ;;  %v4001_v56 = vmul.f32 %v17520_v36, %v12669_v41  ;;  %v4002_v23 = vmul.f32 %v17521_v37, %v12669_v41  ;;  %v17522_v32 = vld [vmem:[#allocation36_spill] sm:$0xff]  ;;  %v17524_v5 = vld [vmem:[#allocation41_spill] sm:$0xff] }
 0x307   : > { %17502 = vst [vmem:[#allocation73_spill] sm:$0xff] %v12684_v17  ;;  %17504 = vst [vmem:[#allocation5_spill] sm:$0xff] %v12687_v45  ;;  %v4003_v34 = vmul.f32 %v17522_v32, %v12669_v41  ;;  %v17523_v48 = vld [vmem:[#allocation40_spill] sm:$0xff]  ;;  %v4005_v24 = vmul.f32 %v17524_v5, %v12669_v41  ;;  %v17525_v1 = vld [vmem:[#allocation45_spill] sm:$0xff]  ;;  %v4096_v22 = vrot.slane %v4000_v44, 3 }
 0x308   : > { %17506 = vst [vmem:[#allocation6_spill] sm:$0xff] %v12690_v16  ;;  %17508 = vst [vmem:[#allocation29_spill] sm:$0xff] %v12693_v39  ;;  %v4004_v27 = vmul.f32 %v17523_v48, %v12669_v41  ;;  %v4006_v43 = vmul.f32 %v17525_v1, %v12669_v41  ;;  %v17526_v3 = vld [vmem:[#allocation46_spill] sm:$0xff]  ;;  %v17527_v57 = vld [vmem:[#allocation49_spill] sm:$0xff]  ;;  %v4097_v29 = vrot.slane %v4001_v56, 3 }
 0x309   : > { %17510 = vst [vmem:[#allocation30_spill] sm:$0xff] %v12696_v25  ;;  %17512 = vst [vmem:[#allocation58_spill] sm:$0xff] %v12699_v13  ;;  %v4007_v61 = vmul.f32 %v17526_v3, %v12669_v41  ;;  %v4008_v10 = vmul.f32 %v17527_v57, %v12669_v41  ;;  %v17528_v50 = vld [vmem:[#allocation50_spill] sm:$0xff]  ;;  %v17530_v54 = vld [vmem:[#allocation11_spill] sm:$0xff]  ;;  %v4101_v30 = vrot.slane %v4003_v34, 3  ;;  %v4104_v63 = vrot.slane %v4005_v24, 3 }
 0x30a   : > { %17514 = vst [vmem:[#allocation62_spill] sm:$0xff] %v12702_v9  ;;  %17516 = vst [vmem:[#allocation63_spill] sm:$0xff] %v12705_v58  ;;  %v4009_v15 = vmul.f32 %v17528_v50, %v12669_v41  ;;  %v17529_v7 = vld [vmem:[#allocation10_spill] sm:$0xff]  ;;  %v12736_v11 = vmul.f32 %v17530_v54, %v12669_v41  ;;  %v17531_v35 = vld [vmem:[#allocation13_spill] sm:$0xff]  ;;  %v4102_v47 = vrot.slane %v4004_v27, 3  ;;  %v12889_v26 = vsel %vm932_vm2, %v4096_v22, %v4097_v29 }
 0x30b   : > { %17518 = vst [vmem:[#allocation67_spill] sm:$0xff] %v12708_v14  ;;  %v12732_v46 = vmul.f32 %v17529_v7, %v12669_v41  ;;  %v12740_v20 = vmul.f32 %v17531_v35, %v12669_v41  ;;  %v17532_v28 = vld [vmem:[#allocation14_spill] sm:$0xff]  ;;  %v17533_v62 = vld [vmem:[#allocation16_spill] sm:$0xff]  ;;  %v17534_v50 = vld [vmem:[#allocation19_spill] sm:$0xff]  ;;  %v4107_v0 = vrot.slane %v4007_v61, 3 }
 0x30c   : > { %v12744_v52 = vmul.f32 %v17532_v28, %v12669_v41  ;;  %v12748_v31 = vmul.f32 %v17533_v62, %v12669_v41  ;;  %v12752_v7 = vmul.f32 %v17534_v50, %v12669_v41  ;;  %v17535_v57 = vld [vmem:[#allocation23_spill] sm:$0xff]  ;;  %v17536_v3 = vld [vmem:[#allocation24_spill] sm:$0xff]  ;;  %v17537_v1 = vld [vmem:[#allocation37_spill] sm:$0xff]  ;;  %v12895_v4 = vsel %vm932_vm2, %v4101_v30, %v4102_v47 }
 0x30d   : > { %v12756_v54 = vmul.f32 %v17535_v57, %v12669_v41  ;;  %v12760_v35 = vmul.f32 %v17536_v3, %v12669_v41  ;;  %v12764_v28 = vmul.f32 %v17537_v1, %v12669_v41  ;;  %v17538_v5 = vld [vmem:[#allocation33_spill] sm:$0xff]  ;;  %v17539_v48 = vld [vmem:[#allocation42_spill] sm:$0xff]  ;;  %v17540_v32 = vld [vmem:[#allocation79_spill] sm:$0xff]  ;;  %v4111_v44 = vrot.slane %v4009_v15, 3 }
 0x30e   : > { %v12768_v62 = vmul.f32 %v17538_v5, %v12669_v41  ;;  %v12772_v50 = vmul.f32 %v17539_v48, %v12669_v41  ;;  %v12776_v57 = vmul.f32 %v17540_v32, %v12669_v41  ;;  %v17541_v37 = vld [vmem:[#allocation71_spill] sm:$0xff]  ;;  %v17542_v36 = vld [vmem:[#allocation76_spill] sm:$0xff]  ;;  %v17554_v6 = vld [vmem:[#allocation66_spill] sm:$0xff]  ;;  %v4112_v56 = vrot.slane %v12732_v46, 3 }
 0x30f   : > { %v12780_v3 = vmul.f32 %v17541_v37, %v12669_v41  ;;  %v12784_v1 = vmul.f32 %v17542_v36, %v12669_v41  ;;  %v17543_v49 = vld [vmem:[#allocation39_spill] sm:$0xff]  ;;  %v17545_v58 = vld [vmem:[#allocation44_spill] sm:$0xff]  ;;  %v17555_v59 = vld [vmem:[#allocation17_spill] sm:$0xff]  ;;  %v4117_v30 = vrot.slane %v12744_v52, 3  ;;  %v4126_v24 = vrot.slane %v12764_v28, 3 }
 0x310   : > { %v12788_v5 = vmul.f32 %v17543_v49, %v12669_v41  ;;  %v17544_v14 = vld [vmem:[#allocation51_spill] sm:$0xff]  ;;  %v12796_v32 = vmul.f32 %v17545_v58, %v12669_v41  ;;  %v17546_v9 = vld [vmem:[#allocation56_spill] sm:$0xff]  ;;  %v17556_v2 = vld [vmem:[#allocation18_spill] sm:$0xff]  ;;  %v12910_v34 = vsel %vm932_vm2, %v4111_v44, %v4112_v56  ;;  %v4129_v15 = vrot.slane %v12772_v50, 3 }
 0x311   : > { %v12792_v48 = vmul.f32 %v17544_v14, %v12669_v41  ;;  %v12800_v37 = vmul.f32 %v17546_v9, %v12669_v41  ;;  %v17547_v36 = vld [vmem:[#allocation47_spill] sm:$0xff]  ;;  %v17548_v49 = vld [vmem:[#allocation48_spill] sm:$0xff]  ;;  %v17549_v14 = vld [vmem:[#allocation61_spill] sm:$0xff]  ;;  %v4134_v28 = vrot.slane %v12784_v1, 3 }
 0x312   : > { %v12804_v13 = vmul.f32 %v17547_v36, %v12669_v41  ;;  %v12808_v25 = vmul.f32 %v17548_v49, %v12669_v41  ;;  %v12812_v39 = vmul.f32 %v17549_v14, %v12669_v41  ;;  %v17550_v58 = vld [vmem:[#allocation52_spill] sm:$0xff]  ;;  %v17551_v9 = vld [vmem:[#allocation53_spill] sm:$0xff]  ;;  %v17553_v38 = vld [vmem:[#allocation75_spill] sm:$0xff]  ;;  %v12832_v14 = vmul.f32 %v17554_v6, %v12669_v41 }
 0x313   : > { %v12816_v16 = vmul.f32 %v17550_v58, %v12669_v41  ;;  %v12820_v45 = vmul.f32 %v17551_v9, %v12669_v41  ;;  %v17552_v36 = vld [vmem:[#allocation57_spill] sm:$0xff]  ;;  %v12828_v49 = vmul.f32 %v17553_v38, %v12669_v41  ;;  %v12836_v58 = vmul.f32 %v17555_v59, %v12669_v41  ;;  %v17557_v19 = vld [vmem:[#allocation59_spill] sm:$0xff]  ;;  %v17559_v40 = vld [vmem:[#allocation32_spill] sm:$0xff] }
 0x314   : > { %v12824_v17 = vmul.f32 %v17552_v36, %v12669_v41  ;;  %v12840_v9 = vmul.f32 %v17556_v2, %v12669_v41  ;;  %v12844_v36 = vmul.f32 %v17557_v19, %v12669_v41  ;;  %v17558_v33 = vld [vmem:[#allocation31_spill] sm:$0xff]  ;;  %v12852_v6 = vmul.f32 %v17559_v40, %v12669_v41  ;;  %v17560_v18 = vld [vmem:[#allocation74_spill] sm:$0xff]  ;;  %v12859_v8 = vld [vmem:[%s6195_s3 + $0x198] sm:$0xff] }
 0x315   : > { %v12848_v38 = vmul.f32 %v17558_v33, %v12669_v41  ;;  %v12856_v59 = vmul.f32 %v17560_v18, %v12669_v41  ;;  %17561 = vst [vmem:[#allocation68_spill] sm:$0xff] %v12859_v8  ;;  %v12863_v2 = vmul.f32 %v12859_v8, %v12669_v41  ;;  %v12866_v19 = vld [vmem:[%s6195_s3 + $0x1a0] sm:$0xff]  ;;  %v17563_v21 = vld [vmem:[#allocation7_spill] sm:$0xff]  ;;  %v17564_v53 = vld [vmem:[#allocation38_spill] sm:$0xff]  ;;  %v12886_v8 = vmul.f32 %v12669_v41, %v12051_v60 }
 0x316   : > { %17562 = vst [vmem:[#allocation80_spill] sm:$0xff] %v12866_v19  ;;  %v12870_v33 = vmul.f32 %v12866_v19, %v12669_v41  ;;  %v12874_v40 = vmul.f32 %v17563_v21, %v12669_v41  ;;  %v12878_v18 = vmul.f32 %v12669_v41, %v17564_v53  ;;  %v17565_v51 = vld [vmem:[#allocation43_spill] sm:$0xff]  ;;  %v4099_v19 = vrot.slane %v4002_v23, 3 }
 0x317   : > { %v12882_v42 = vmul.f32 %v12669_v41, %v17565_v51  ;;  %v4106_v21 = vrot.slane %v4006_v43, 3  ;;  %v4109_v51 = vrot.slane %v4008_v10, 3  ;;  %v12898_v41 = vsel %vm932_vm2, %v4102_v47, %v4104_v63 }
 0x318   : > { %v12892_v53 = vsel %vm932_vm2, %v4097_v29, %v4099_v19  ;;  %v4114_v29 = vrot.slane %v12736_v11, 3  ;;  %v4116_v19 = vrot.slane %v12740_v20, 3  ;;  %v4119_v63 = vrot.slane %v12748_v31, 3 }
 0x319   : > { %v12902_v23 = vsel %vm932_vm2, %v4106_v21, %v4107_v0  ;;  %v12905_v22 = vsel %vm932_vm2, %v4107_v0, %v4109_v51  ;;  %v4121_v47 = vrot.slane %v12752_v7, 3  ;;  %v4122_v21 = vrot.slane %v12756_v54, 3 }
 0x31a   : > { %v12916_v27 = vsel %vm932_vm2, %v4112_v56, %v4114_v29  ;;  %v4124_v0 = vrot.slane %v12760_v35, 3  ;;  %v4118_v43 = vsel %vm932_vm2, %v4116_v19, %v4117_v30  ;;  %v4120_v61 = vsel %vm932_vm2, %v4117_v30, %v4119_v63 }
 0x31b   : > { %v4127_v10 = vrot.slane %v12768_v62, 3  ;;  %v4123_v46 = vsel %vm932_vm2, %v4121_v47, %v4122_v21  ;;  %v4131_v11 = vrot.slane %v12776_v57, 3  ;;  %v4132_v54 = vrot.slane %v12780_v3, 3 }
 0x31c   : > { %v4125_v7 = vsel %vm932_vm2, %v4122_v21, %v4124_v0  ;;  %v4136_v52 = vrot.slane %v12788_v5, 3  ;;  %v4137_v50 = vrot.slane %v12792_v48, 3  ;;  %v4139_v31 = vrot.slane %v12796_v32, 3 }
 0x31d   : > { %v4128_v35 = vsel %vm932_vm2, %v4126_v24, %v4127_v10  ;;  %v4130_v20 = vsel %vm932_vm2, %v4127_v10, %v4129_v15  ;;  %v4133_v62 = vsel %vm932_vm2, %v4131_v11, %v4132_v54  ;;  %v4141_v51 = vrot.slane %v12800_v37, 3 }
 0x31e   : > { %v4135_v57 = vsel %vm932_vm2, %v4132_v54, %v4134_v28  ;;  %v4142_v3 = vrot.slane %v12804_v13, 3  ;;  %v4144_v44 = vrot.slane %v12808_v25, 3  ;;  %v4146_v56 = vrot.slane %v12812_v39, 3  ;;  %v17566_v28 = vld [vmem:[#allocation60_spill] sm:$0xff] }
 0x31f   : > { %v4138_v1 = vsel %vm932_vm2, %v4136_v52, %v4137_v50  ;;  %v4140_v5 = vsel %vm932_vm2, %v4137_v50, %v4139_v31  ;;  %v4147_v29 = vrot.slane %v12816_v16, 3  ;;  %v4149_v48 = vrot.slane %v12820_v45, 3  ;;  %v17570_v50 = vld [vmem:[#allocation65_spill] sm:$0xff] }
 0x320   : > { %v4143_v32 = vsel %vm932_vm2, %v4141_v51, %v4142_v3  ;;  %v4145_v37 = vsel %vm932_vm2, %v4142_v3, %v4144_v44  ;;  %v4151_v19 = vrot.slane %v12824_v17, 3  ;;  %v4152_v13 = vrot.slane %v12828_v49, 3  ;;  %v17580_v44 = vld [vmem:[#allocation12_spill] sm:$0xff] }
 0x321   : > { %v4148_v25 = vsel %vm932_vm2, %v4146_v56, %v4147_v29  ;;  %v4150_v39 = vsel %vm932_vm2, %v4147_v29, %v4149_v48  ;;  %v4154_v30 = vrot.slane %v12832_v14, 3  ;;  %v4156_v63 = vrot.slane %v12836_v58, 3  ;;  %v17584_v48 = vld [vmem:[#allocation20_spill] sm:$0xff] }
 0x322   : > { %v4153_v16 = vsel %vm932_vm2, %v4151_v19, %v4152_v13  ;;  %v4157_v45 = vrot.slane %v12840_v9, 3  ;;  %v4159_v47 = vrot.slane %v12844_v36, 3  ;;  %v4161_v21 = vrot.slane %v12848_v38, 3  ;;  %v17586_v19 = vld [vmem:[#allocation28_spill] sm:$0xff] }
 0x323   : > { %v4155_v17 = vsel %vm932_vm2, %v4152_v13, %v4154_v30  ;;  %v4162_v49 = vrot.slane %v12852_v6, 3  ;;  %v4164_v0 = vrot.slane %v12856_v59, 3  ;;  %v4166_v24 = vrot.slane %v12863_v2, 3 }
 0x324   : > { %v4158_v14 = vsel %vm932_vm2, %v4156_v63, %v4157_v45  ;;  %v4160_v58 = vsel %vm932_vm2, %v4157_v45, %v4159_v47  ;;  %v4167_v10 = vrot.slane %v12870_v33, 3  ;;  %v4169_v9 = vrot.slane %v12874_v40, 3 }
 0x325   : > { %v4163_v36 = vsel %vm932_vm2, %v4161_v21, %v4162_v49  ;;  %v4165_v38 = vsel %vm932_vm2, %v4162_v49, %v4164_v0  ;;  %v4171_v15 = vrot.slane %v12878_v18, 3  ;;  %v4172_v6 = vrot.slane %v12882_v42, 3  ;;  %v17568_v42 = vld [vmem:[#allocation64_spill] sm:$0xff]  ;;  %v17602_v0 = vld [vmem:[#allocation22_spill] sm:$0xff] }
 0x326   : > { %v4168_v59 = vsel %vm932_vm2, %v4166_v24, %v4167_v10  ;;  %v4170_v2 = vsel %vm932_vm2, %v4167_v10, %v4169_v9  ;;  %v4174_v11 = vrot.slane %v12886_v8, 3  ;;  %v12974_v54 = vadd.f32 %v12889_v26, %v12601_v12  ;;  %v17572_v26 = vld [vmem:[#allocation54_spill] sm:$0xff]  ;;  %v17606_v10 = vld [vmem:[#allocation27_spill] sm:$0xff]  ;;  %v17608_v9 = vld [vmem:[#allocation73_spill] sm:$0xff] }
 0x327   : > { %v4173_v40 = vsel %vm932_vm2, %v4171_v15, %v4172_v6  ;;  %v12979_v33 = vadd.f32 %v12892_v53, %v12606_v55  ;;  %v12983_v18 = vadd.f32 %v12895_v4, %v17566_v28  ;;  %v12987_v52 = vadd.f32 %v12898_v41, %v17568_v42  ;;  %v17574_v55 = vld [vmem:[#allocation55_spill] sm:$0xff]  ;;  %v17576_v4 = vld [vmem:[#allocation8_spill] sm:$0xff]  ;;  %v17578_v41 = vld [vmem:[#allocation9_spill] sm:$0xff] }
 0x328   : > { %v4175_v8 = vsel %vm932_vm2, %v4172_v6, %v4174_v11  ;;  %v12992_v12 = vadd.f32 %v12902_v23, %v17570_v50  ;;  %v12996_v31 = vadd.f32 %v12905_v22, %v17572_v26  ;;  %v13000_v53 = vadd.f32 %v12910_v34, %v17574_v55  ;;  %v17582_v23 = vld [vmem:[#allocation15_spill] sm:$0xff]  ;;  %v17588_v34 = vld [vmem:[#allocation34_spill] sm:$0xff]  ;;  %v17610_v15 = vld [vmem:[#allocation5_spill] sm:$0xff] }
 0x329   : > { %17567 = vst [vmem:[#allocation82_spill] sm:$0xff] %v12983_v18  ;;  %17569 = vst [vmem:[#allocation83_spill] sm:$0xff] %v12987_v52  ;;  %v13004_v51 = vadd.f32 %v12916_v27, %v17576_v4  ;;  %v13007_v3 = vadd.f32 %v4118_v43, %v17578_v41  ;;  %v13010_v56 = vadd.f32 %v4120_v61, %v17580_v44  ;;  %v17590_v27 = vld [vmem:[#allocation72_spill] sm:$0xff]  ;;  %v17592_v43 = vld [vmem:[#allocation77_spill] sm:$0xff] }
 0x32a   : > { %17571 = vst [vmem:[#allocation38_spill] sm:$0xff] %v12992_v12  ;;  %17573 = vst [vmem:[#allocation43_spill] sm:$0xff] %v12996_v31  ;;  %v13013_v29 = vadd.f32 %v4123_v46, %v17582_v23  ;;  %v13016_v22 = vadd.f32 %v4125_v7, %v17584_v48  ;;  %v13019_v13 = vadd.f32 %v4128_v35, %v17586_v19  ;;  %v17594_v61 = vld [vmem:[#allocation78_spill] sm:$0xff]  ;;  %v17596_v46 = vld [vmem:[#allocation81_spill] sm:$0xff] }
 0x32b   : > { %17575 = vst [vmem:[#allocation60_spill] sm:$0xff] %v13000_v53  ;;  %17577 = vst [vmem:[#allocation64_spill] sm:$0xff] %v13004_v51  ;;  %v13022_v30 = vadd.f32 %v4130_v20, %v17588_v34  ;;  %v13025_v63 = vadd.f32 %v4133_v62, %v17590_v27  ;;  %v13028_v45 = vadd.f32 %v4135_v57, %v17592_v43  ;;  %v17598_v7 = vld [vmem:[#allocation25_spill] sm:$0xff]  ;;  %v13042_v35 = vld [vmem:[%s15337_s1 + $0x13] ss:$0 sm:$0xff] }
 0x32c   : > { %17579 = vst [vmem:[#allocation65_spill] sm:$0xff] %v13007_v3  ;;  %17581 = vst [vmem:[#allocation54_spill] sm:$0xff] %v13010_v56  ;;  %v13031_v47 = vadd.f32 %v4138_v1, %v17594_v61  ;;  %v13034_v21 = vadd.f32 %v4140_v5, %v17596_v46  ;;  %v13037_v49 = vadd.f32 %v4143_v32, %v17598_v7  ;;  %v17600_v20 = vld [vmem:[#allocation21_spill] sm:$0xff]  ;;  %v17604_v24 = vld [vmem:[#allocation26_spill] sm:$0xff] }
 0x32d   : > { %17583 = vst [vmem:[#allocation55_spill] sm:$0xff] %v13013_v29  ;;  %17585 = vst [vmem:[#allocation8_spill] sm:$0xff] %v13016_v22  ;;  %v13045_v62 = vadd.f32 %v4145_v37, %v17600_v20  ;;  %v13048_v57 = vadd.f32 %v4148_v25, %v17602_v0  ;;  %v13051_v1 = vadd.f32 %v4150_v39, %v17604_v24  ;;  %v17612_v11 = vld [vmem:[#allocation6_spill] sm:$0xff]  ;;  %v17614_v37 = vld [vmem:[#allocation29_spill] sm:$0xff] }
 0x32e   : > { %17587 = vst [vmem:[#allocation9_spill] sm:$0xff] %v13019_v13  ;;  %17589 = vst [vmem:[#allocation12_spill] sm:$0xff] %v13022_v30  ;;  %v13054_v5 = vadd.f32 %v4153_v16, %v17606_v10  ;;  %v13057_v32 = vadd.f32 %v4155_v17, %v17608_v9  ;;  %v13060_v6 = vadd.f32 %v4158_v14, %v17610_v15  ;;  %v17616_v25 = vld [vmem:[#allocation30_spill] sm:$0xff]  ;;  %v17622_v17 = vld [vmem:[#allocation63_spill] sm:$0xff] }
 0x32f   : > { %17591 = vst [vmem:[#allocation15_spill] sm:$0xff] %v13025_v63  ;;  %17593 = vst [vmem:[#allocation20_spill] sm:$0xff] %v13028_v45  ;;  %v13063_v28 = vadd.f32 %v4160_v58, %v17612_v11  ;;  %v13066_v42 = vadd.f32 %v4163_v36, %v17614_v37  ;;  %v13069_v50 = vadd.f32 %v4165_v38, %v17616_v25  ;;  %v17618_v39 = vld [vmem:[#allocation58_spill] sm:$0xff]  ;;  %v17624_v14 = vld [vmem:[#allocation67_spill] sm:$0xff] }
 0x330   : > { %17595 = vst [vmem:[#allocation28_spill] sm:$0xff] %v13031_v47  ;;  %17597 = vst [vmem:[#allocation34_spill] sm:$0xff] %v13034_v21  ;;  %v13072_v26 = vadd.f32 %v4168_v59, %v17618_v39  ;;  %v17620_v16 = vld [vmem:[#allocation62_spill] sm:$0xff]  ;;  %v13078_v4 = vadd.f32 %v4173_v40, %v17622_v17  ;;  %v13081_v41 = vadd.f32 %v4175_v8, %v17624_v14  ;;  %v17626_v58 = vld [vmem:[#allocation69_spill] sm:$0xff] }
 0x331   : > { %17599 = vst [vmem:[#allocation72_spill] sm:$0xff] %v13037_v49  ;;  %17601 = vst [vmem:[#allocation77_spill] sm:$0xff] %v13045_v62  ;;  %v13075_v55 = vadd.f32 %v4170_v2, %v17620_v16  ;;  %v4246_v44 = vmul.f32 %v17626_v58, %v13042_v35  ;;  %v17627_v36 = vld [vmem:[#allocation70_spill] sm:$0xff]  ;;  %v17628_v38 = vld [vmem:[#allocation35_spill] sm:$0xff] }
 0x332   : > { %17603 = vst [vmem:[#allocation78_spill] sm:$0xff] %v13048_v57  ;;  %17605 = vst [vmem:[#allocation81_spill] sm:$0xff] %v13051_v1  ;;  %v4247_v23 = vmul.f32 %v17627_v36, %v13042_v35  ;;  %v4248_v48 = vmul.f32 %v17628_v38, %v13042_v35  ;;  %v17629_v59 = vld [vmem:[#allocation36_spill] sm:$0xff]  ;;  %v17631_v40 = vld [vmem:[#allocation41_spill] sm:$0xff] }
 0x333   : > { %17607 = vst [vmem:[#allocation25_spill] sm:$0xff] %v13054_v5  ;;  %17609 = vst [vmem:[#allocation21_spill] sm:$0xff] %v13057_v32  ;;  %v4249_v19 = vmul.f32 %v17629_v59, %v13042_v35  ;;  %v17630_v2 = vld [vmem:[#allocation40_spill] sm:$0xff]  ;;  %v4251_v27 = vmul.f32 %v17631_v40, %v13042_v35  ;;  %v17632_v8 = vld [vmem:[#allocation45_spill] sm:$0xff]  ;;  %v4342_v29 = vrot.slane %v4246_v44, 4 }
 0x334   : > { %17611 = vst [vmem:[#allocation22_spill] sm:$0xff] %v13060_v6  ;;  %17613 = vst [vmem:[#allocation26_spill] sm:$0xff] %v13063_v28  ;;  %v4250_v34 = vmul.f32 %v17630_v2, %v13042_v35  ;;  %v4252_v43 = vmul.f32 %v17632_v8, %v13042_v35  ;;  %v17633_v61 = vld [vmem:[#allocation46_spill] sm:$0xff]  ;;  %v17634_v7 = vld [vmem:[#allocation49_spill] sm:$0xff]  ;;  %v4343_v56 = vrot.slane %v4247_v23, 4 }
 0x335   : > { %17615 = vst [vmem:[#allocation27_spill] sm:$0xff] %v13066_v42  ;;  %17617 = vst [vmem:[#allocation73_spill] sm:$0xff] %v13069_v50  ;;  %v4253_v46 = vmul.f32 %v17633_v61, %v13042_v35  ;;  %v4254_v20 = vmul.f32 %v17634_v7, %v13042_v35  ;;  %v17635_v0 = vld [vmem:[#allocation50_spill] sm:$0xff]  ;;  %v17637_v15 = vld [vmem:[#allocation11_spill] sm:$0xff]  ;;  %v4347_v3 = vrot.slane %v4249_v19, 4  ;;  %v4350_v53 = vrot.slane %v4251_v27, 4 }
 0x336   : > { %17619 = vst [vmem:[#allocation5_spill] sm:$0xff] %v13072_v26  ;;  %17621 = vst [vmem:[#allocation6_spill] sm:$0xff] %v13075_v55  ;;  %v4255_v24 = vmul.f32 %v17635_v0, %v13042_v35  ;;  %v17636_v10 = vld [vmem:[#allocation10_spill] sm:$0xff]  ;;  %v13109_v11 = vmul.f32 %v17637_v15, %v13042_v35  ;;  %v17638_v37 = vld [vmem:[#allocation13_spill] sm:$0xff]  ;;  %v4348_v51 = vrot.slane %v4250_v34, 4  ;;  %v4352_v31 = vrot.slane %v4252_v43, 4 }
 0x337   : > { %17623 = vst [vmem:[#allocation29_spill] sm:$0xff] %v13078_v4  ;;  %17625 = vst [vmem:[#allocation30_spill] sm:$0xff] %v13081_v41  ;;  %v13105_v9 = vmul.f32 %v17636_v10, %v13042_v35  ;;  %v13113_v25 = vmul.f32 %v17638_v37, %v13042_v35  ;;  %v17639_v39 = vld [vmem:[#allocation14_spill] sm:$0xff]  ;;  %v17640_v17 = vld [vmem:[#allocation16_spill] sm:$0xff]  ;;  %v4353_v52 = vrot.slane %v4253_v46, 4 }
 0x338   : > { %v13117_v16 = vmul.f32 %v17639_v39, %v13042_v35  ;;  %v13121_v14 = vmul.f32 %v17640_v17, %v13042_v35  ;;  %v17641_v58 = vld [vmem:[#allocation19_spill] sm:$0xff]  ;;  %v17643_v2 = vld [vmem:[#allocation24_spill] sm:$0xff]  ;;  %v17644_v8 = vld [vmem:[#allocation37_spill] sm:$0xff]  ;;  %v13268_v18 = vsel %vm1179_vm3, %v4347_v3, %v4348_v51 }
 0x339   : > { %v13125_v36 = vmul.f32 %v17641_v58, %v13042_v35  ;;  %v17642_v38 = vld [vmem:[#allocation23_spill] sm:$0xff]  ;;  %v13133_v40 = vmul.f32 %v17643_v2, %v13042_v35  ;;  %v13137_v61 = vmul.f32 %v17644_v8, %v13042_v35  ;;  %v17645_v7 = vld [vmem:[#allocation33_spill] sm:$0xff]  ;;  %v17646_v10 = vld [vmem:[#allocation42_spill] sm:$0xff]  ;;  %v4358_v44 = vrot.slane %v13105_v9, 4 }
 0x33a   : > { %v13129_v59 = vmul.f32 %v17642_v38, %v13042_v35  ;;  %v13141_v0 = vmul.f32 %v17645_v7, %v13042_v35  ;;  %v13145_v15 = vmul.f32 %v17646_v10, %v13042_v35  ;;  %v17647_v37 = vld [vmem:[#allocation79_spill] sm:$0xff]  ;;  %v17649_v38 = vld [vmem:[#allocation76_spill] sm:$0xff]  ;;  %v17656_v42 = vld [vmem:[#allocation61_spill] sm:$0xff]  ;;  %v13275_v23 = vsel %vm1179_vm3, %v4352_v31, %v4353_v52 }
 0x33b   : > { %v13149_v39 = vmul.f32 %v17647_v37, %v13042_v35  ;;  %v17648_v17 = vld [vmem:[#allocation71_spill] sm:$0xff]  ;;  %v13157_v2 = vmul.f32 %v17649_v38, %v13042_v35  ;;  %v17652_v4 = vld [vmem:[#allocation44_spill] sm:$0xff]  ;;  %v17663_v62 = vld [vmem:[#allocation18_spill] sm:$0xff]  ;;  %v4363_v3 = vrot.slane %v13117_v16, 4  ;;  %v4372_v27 = vrot.slane %v13137_v61, 4 }
 0x33c   : > { %v13153_v58 = vmul.f32 %v17648_v17, %v13042_v35  ;;  %v17650_v8 = vld [vmem:[#allocation39_spill] sm:$0xff]  ;;  %v13169_v37 = vmul.f32 %v17652_v4, %v13042_v35  ;;  %v17653_v55 = vld [vmem:[#allocation56_spill] sm:$0xff]  ;;  %v17667_v45 = vld [vmem:[#allocation74_spill] sm:$0xff]  ;;  %v4368_v31 = vrot.slane %v13129_v59, 4 }
 0x33d   : > { %v13161_v7 = vmul.f32 %v17650_v8, %v13042_v35  ;;  %v17651_v41 = vld [vmem:[#allocation51_spill] sm:$0xff]  ;;  %v13173_v17 = vmul.f32 %v17653_v55, %v13042_v35  ;;  %v17655_v50 = vld [vmem:[#allocation48_spill] sm:$0xff]  ;;  %v17658_v55 = vld [vmem:[#allocation53_spill] sm:$0xff]  ;;  %v4380_v59 = vrot.slane %v13157_v2, 4 }
 0x33e   : > { %v13165_v10 = vmul.f32 %v17651_v41, %v13042_v35  ;;  %v17654_v26 = vld [vmem:[#allocation47_spill] sm:$0xff]  ;;  %v13181_v8 = vmul.f32 %v17655_v50, %v13042_v35  ;;  %v13185_v41 = vmul.f32 %v17656_v42, %v13042_v35  ;;  %v17657_v4 = vld [vmem:[#allocation52_spill] sm:$0xff]  ;;  %v13193_v6 = vmul.f32 %v17658_v55, %v13042_v35  ;;  %v17661_v42 = vld [vmem:[#allocation66_spill] sm:$0xff] }
 0x33f   : > { %v13177_v38 = vmul.f32 %v17654_v26, %v13042_v35  ;;  %v13189_v28 = vmul.f32 %v17657_v4, %v13042_v35  ;;  %v17659_v26 = vld [vmem:[#allocation57_spill] sm:$0xff]  ;;  %v17660_v50 = vld [vmem:[#allocation75_spill] sm:$0xff]  ;;  %v13205_v1 = vmul.f32 %v17661_v42, %v13042_v35  ;;  %v13213_v55 = vmul.f32 %v17663_v62, %v13042_v35  ;;  %v17666_v47 = vld [vmem:[#allocation32_spill] sm:$0xff] }
 0x340   : > { %v13197_v32 = vmul.f32 %v17659_v26, %v13042_v35  ;;  %v13201_v5 = vmul.f32 %v17660_v50, %v13042_v35  ;;  %v17662_v4 = vld [vmem:[#allocation17_spill] sm:$0xff]  ;;  %v17664_v49 = vld [vmem:[#allocation59_spill] sm:$0xff]  ;;  %v13225_v42 = vmul.f32 %v17666_v47, %v13042_v35  ;;  %v17668_v63 = vld [vmem:[#allocation68_spill] sm:$0xff]  ;;  %v4378_v16 = vrot.slane %v13153_v58, 4 }
 0x341   : > { %v13209_v57 = vmul.f32 %v17662_v4, %v13042_v35  ;;  %v13217_v26 = vmul.f32 %v17664_v49, %v13042_v35  ;;  %v17665_v21 = vld [vmem:[#allocation31_spill] sm:$0xff]  ;;  %v13229_v4 = vmul.f32 %v17667_v45, %v13042_v35  ;;  %v13233_v62 = vmul.f32 %v17668_v63, %v13042_v35  ;;  %v17669_v30 = vld [vmem:[#allocation80_spill] sm:$0xff] }
 0x342   : > { %v13221_v50 = vmul.f32 %v17665_v21, %v13042_v35  ;;  %v13237_v49 = vmul.f32 %v17669_v30, %v13042_v35  ;;  %v17670_v13 = vld [vmem:[#allocation7_spill] sm:$0xff]  ;;  %v13251_v45 = vld [vmem:[%s6195_s3 + $0x1b8] sm:$0xff]  ;;  %v13259_v30 = vmul.f32 %v13042_v35, %v12051_v60  ;;  %v13271_v60 = vsel %vm1179_vm3, %v4348_v51, %v4350_v53 }
 0x343   : > { %v13241_v21 = vmul.f32 %v17670_v13, %v13042_v35  ;;  %v13244_v22 = vld [vmem:[%s6195_s3 + $0x1b0] sm:$0xff]  ;;  %17672 = vst [vmem:[#allocation62_spill] sm:$0xff] %v13251_v45  ;;  %v13255_v63 = vmul.f32 %v13251_v45, %v13042_v35  ;;  %v4345_v13 = vrot.slane %v4248_v48, 4  ;;  %v4355_v45 = vrot.slane %v4254_v20, 4 }
 0x344   : > { %17671 = vst [vmem:[#allocation58_spill] sm:$0xff] %v13244_v22  ;;  %v13248_v47 = vmul.f32 %v13244_v22, %v13042_v35  ;;  %v13262_v22 = vsel %vm1179_vm3, %v4342_v29, %v4343_v56  ;;  %v4357_v35 = vrot.slane %v4255_v24, 4  ;;  %v4362_v48 = vrot.slane %v13113_v25, 4 }
 0x345   : > { %v13265_v12 = vsel %vm1179_vm3, %v4343_v56, %v4345_v13  ;;  %v13278_v29 = vsel %vm1179_vm3, %v4353_v52, %v4355_v45  ;;  %v4360_v56 = vrot.slane %v13109_v11, 4  ;;  %v4365_v53 = vrot.slane %v13121_v14, 4 }
 0x346   : > { %v13283_v19 = vsel %vm1179_vm3, %v4357_v35, %v4358_v44  ;;  %v4367_v51 = vrot.slane %v13125_v36, 4  ;;  %v4370_v52 = vrot.slane %v13133_v40, 4  ;;  %v4364_v43 = vsel %vm1179_vm3, %v4362_v48, %v4363_v3 }
 0x347   : > { %v13289_v34 = vsel %vm1179_vm3, %v4358_v44, %v4360_v56  ;;  %v4366_v46 = vsel %vm1179_vm3, %v4363_v3, %v4365_v53  ;;  %v4373_v20 = vrot.slane %v13141_v0, 4  ;;  %v4375_v24 = vrot.slane %v13145_v15, 4 }
 0x348   : > { %v4369_v9 = vsel %vm1179_vm3, %v4367_v51, %v4368_v31  ;;  %v4371_v11 = vsel %vm1179_vm3, %v4368_v31, %v4370_v52  ;;  %v4377_v25 = vrot.slane %v13149_v39, 4  ;;  %v4382_v40 = vrot.slane %v13161_v7, 4 }
 0x349   : > { %v4374_v14 = vsel %vm1179_vm3, %v4372_v27, %v4373_v20  ;;  %v4376_v36 = vsel %vm1179_vm3, %v4373_v20, %v4375_v24  ;;  %v4383_v0 = vrot.slane %v13165_v10, 4  ;;  %v4385_v15 = vrot.slane %v13169_v37, 4 }
 0x34a   : > { %v4379_v61 = vsel %vm1179_vm3, %v4377_v25, %v4378_v16  ;;  %v4387_v45 = vrot.slane %v13173_v17, 4  ;;  %v4381_v39 = vsel %vm1179_vm3, %v4378_v16, %v4380_v59  ;;  %v4388_v58 = vrot.slane %v13177_v38, 4  ;;  %v17673_v16 = vld [vmem:[#allocation82_spill] sm:$0xff] }
 0x34b   : > { %v4390_v13 = vrot.slane %v13181_v8, 4  ;;  %v4392_v35 = vrot.slane %v13185_v41, 4  ;;  %v4384_v2 = vsel %vm1179_vm3, %v4382_v40, %v4383_v0  ;;  %v4386_v7 = vsel %vm1179_vm3, %v4383_v0, %v4385_v15  ;;  %v17675_v40 = vld [vmem:[#allocation38_spill] sm:$0xff] }
 0x34c   : > { %v4393_v44 = vrot.slane %v13189_v28, 4  ;;  %v4395_v10 = vrot.slane %v13193_v6, 4  ;;  %v4389_v37 = vsel %vm1179_vm3, %v4387_v45, %v4388_v58  ;;  %v4397_v56 = vrot.slane %v13197_v32, 4 }
 0x34d   : > { %v4391_v17 = vsel %vm1179_vm3, %v4388_v58, %v4390_v13  ;;  %v4398_v38 = vrot.slane %v13201_v5, 4  ;;  %v4400_v48 = vrot.slane %v13205_v1, 4  ;;  %v4402_v3 = vrot.slane %v13209_v57, 4  ;;  %v17680_v58 = vld [vmem:[#allocation54_spill] sm:$0xff] }
 0x34e   : > { %v4394_v8 = vsel %vm1179_vm3, %v4392_v35, %v4393_v44  ;;  %v4396_v41 = vsel %vm1179_vm3, %v4393_v44, %v4395_v10  ;;  %v4403_v6 = vrot.slane %v13213_v55, 4  ;;  %v4405_v53 = vrot.slane %v13217_v26, 4  ;;  %v17682_v44 = vld [vmem:[#allocation8_spill] sm:$0xff]  ;;  %v17683_v10 = vld [vmem:[#allocation9_spill] sm:$0xff] }
 0x34f   : > { %v4399_v28 = vsel %vm1179_vm3, %v4397_v56, %v4398_v38  ;;  %v4407_v51 = vrot.slane %v13221_v50, 4  ;;  %v4401_v32 = vsel %vm1179_vm3, %v4398_v38, %v4400_v48  ;;  %v4408_v5 = vrot.slane %v13225_v42, 4 }
 0x350   : > { %v4410_v31 = vrot.slane %v13229_v4, 4  ;;  %v4412_v52 = vrot.slane %v13233_v62, 4  ;;  %v4404_v1 = vsel %vm1179_vm3, %v4402_v3, %v4403_v6  ;;  %v4406_v57 = vsel %vm1179_vm3, %v4403_v6, %v4405_v53 }
 0x351   : > { %v4413_v27 = vrot.slane %v13237_v49, 4  ;;  %v4415_v55 = vrot.slane %v13241_v21, 4  ;;  %v4409_v26 = vsel %vm1179_vm3, %v4407_v51, %v4408_v5  ;;  %v4417_v20 = vrot.slane %v13248_v47, 4 }
 0x352   : > { %v4411_v50 = vsel %vm1179_vm3, %v4408_v5, %v4410_v31  ;;  %v4418_v42 = vrot.slane %v13255_v63, 4  ;;  %v4420_v24 = vrot.slane %v13259_v30, 4  ;;  %v13347_v25 = vadd.f32 %v13262_v22, %v12974_v54  ;;  %v17674_v63 = vld [vmem:[#allocation83_spill] sm:$0xff]  ;;  %v17693_v31 = vld [vmem:[#allocation25_spill] sm:$0xff] }
 0x353   : > { %v4414_v4 = vsel %vm1179_vm3, %v4412_v52, %v4413_v27  ;;  %v4416_v62 = vsel %vm1179_vm3, %v4413_v27, %v4415_v55  ;;  %v13352_v49 = vadd.f32 %v13265_v12, %v12979_v33  ;;  %v13356_v47 = vadd.f32 %v13268_v18, %v17673_v16  ;;  %v17676_v22 = vld [vmem:[#allocation43_spill] sm:$0xff]  ;;  %v17677_v33 = vld [vmem:[#allocation60_spill] sm:$0xff]  ;;  %v17695_v55 = vld [vmem:[#allocation22_spill] sm:$0xff] }
 0x354   : > { %v4419_v21 = vsel %vm1179_vm3, %v4417_v20, %v4418_v42  ;;  %v13360_v59 = vadd.f32 %v13271_v60, %v17674_v63  ;;  %v4421_v30 = vsel %vm1179_vm3, %v4418_v42, %v4420_v24  ;;  %v13365_v54 = vadd.f32 %v13275_v23, %v17675_v40  ;;  %v17678_v18 = vld [vmem:[#allocation64_spill] sm:$0xff]  ;;  %v17679_v60 = vld [vmem:[#allocation65_spill] sm:$0xff]  ;;  %v17681_v23 = vld [vmem:[#allocation55_spill] sm:$0xff] }
 0x355   : > { %v13369_v0 = vadd.f32 %v13278_v29, %v17676_v22  ;;  %v13373_v12 = vadd.f32 %v13283_v19, %v17677_v33  ;;  %v13377_v15 = vadd.f32 %v13289_v34, %v17678_v18  ;;  %v13380_v45 = vadd.f32 %v4364_v43, %v17679_v60  ;;  %v17684_v19 = vld [vmem:[#allocation12_spill] sm:$0xff]  ;;  %v17685_v34 = vld [vmem:[#allocation15_spill] sm:$0xff]  ;;  %v17697_v42 = vld [vmem:[#allocation26_spill] sm:$0xff] }
 0x356   : > { %v13383_v13 = vadd.f32 %v4366_v46, %v17680_v58  ;;  %v13386_v35 = vadd.f32 %v4369_v9, %v17681_v23  ;;  %v13389_v29 = vadd.f32 %v4371_v11, %v17682_v44  ;;  %v13392_v56 = vadd.f32 %v4374_v14, %v17683_v10  ;;  %v17686_v43 = vld [vmem:[#allocation20_spill] sm:$0xff]  ;;  %v17688_v9 = vld [vmem:[#allocation34_spill] sm:$0xff]  ;;  %v13415_v14 = vld [vmem:[%s15337_s1 + $0x14] ss:$0 sm:$0xff] }
 0x357   : > { %v13395_v38 = vadd.f32 %v4376_v36, %v17684_v19  ;;  %v13398_v48 = vadd.f32 %v4379_v61, %v17685_v34  ;;  %v13401_v3 = vadd.f32 %v4381_v39, %v17686_v43  ;;  %v17687_v46 = vld [vmem:[#allocation28_spill] sm:$0xff]  ;;  %v13407_v53 = vadd.f32 %v4386_v7, %v17688_v9  ;;  %v17690_v36 = vld [vmem:[#allocation77_spill] sm:$0xff]  ;;  %v17691_v39 = vld [vmem:[#allocation78_spill] sm:$0xff] }
 0x358   : > { %v13404_v6 = vadd.f32 %v4384_v2, %v17687_v46  ;;  %v17689_v11 = vld [vmem:[#allocation72_spill] sm:$0xff]  ;;  %v13418_v61 = vadd.f32 %v4391_v17, %v17690_v36  ;;  %v13421_v5 = vadd.f32 %v4394_v8, %v17691_v39  ;;  %v17692_v2 = vld [vmem:[#allocation81_spill] sm:$0xff]  ;;  %v13427_v52 = vadd.f32 %v4399_v28, %v17693_v31  ;;  %v17699_v8 = vld [vmem:[#allocation27_spill] sm:$0xff] }
 0x359   : > { %v13410_v51 = vadd.f32 %v4389_v37, %v17689_v11  ;;  %v13424_v7 = vadd.f32 %v4396_v41, %v17692_v2  ;;  %v17694_v37 = vld [vmem:[#allocation21_spill] sm:$0xff]  ;;  %v13433_v20 = vadd.f32 %v4404_v1, %v17695_v55  ;;  %v13436_v17 = vadd.f32 %v4406_v57, %v17697_v42  ;;  %v17705_v40 = vld [vmem:[#allocation6_spill] sm:$0xff]  ;;  %v13477_v58 = vld [vmem:[%s6195_s3 + $0x90] sm:$0xff] }
 0x35a   : > { %v13430_v27 = vadd.f32 %v4401_v32, %v17694_v37  ;;  %v13439_v24 = vadd.f32 %v4409_v26, %v17699_v8  ;;  %v17701_v16 = vld [vmem:[#allocation73_spill] sm:$0xff]  ;;  %v13448_v32 = vadd.f32 %v4416_v62, %v17705_v40  ;;  %v17709_v33 = vld [vmem:[#allocation30_spill] sm:$0xff]  ;;  %v13467_v62 = vld [vmem:[%s6195_s3 + $0x78] sm:$0xff]  ;;  %17715 = vst [vmem:[#allocation10_spill] sm:$0xff] %v13477_v58  ;;  %v4496_v23 = vmul.f32 %v13477_v58, %v13415_v14 }
 0x35b   : > { %17696 = vst [vmem:[#allocation63_spill] sm:$0xff] %v13433_v20  ;;  %17698 = vst [vmem:[#allocation67_spill] sm:$0xff] %v13436_v17  ;;  %v13442_v41 = vadd.f32 %v4411_v50, %v17701_v16  ;;  %v17703_v28 = vld [vmem:[#allocation5_spill] sm:$0xff]  ;;  %v13454_v57 = vadd.f32 %v4421_v30, %v17709_v33  ;;  %v13462_v18 = vld [vmem:[%s6195_s3 + $0x68] sm:$0xff] }
 0x35c   : > { %17700 = vst [vmem:[#allocation69_spill] sm:$0xff] %v13439_v24  ;;  %v13445_v63 = vadd.f32 %v4414_v4, %v17703_v28  ;;  %17706 = vst [vmem:[#allocation36_spill] sm:$0xff] %v13448_v32  ;;  %v17707_v1 = vld [vmem:[#allocation29_spill] sm:$0xff]  ;;  %v4493_v4 = vmul.f32 %v13462_v18, %v13415_v14  ;;  %v13482_v44 = vld [vmem:[%s6195_s3 + $0x98] sm:$0xff] }
 0x35d   : > { %17702 = vst [vmem:[#allocation70_spill] sm:$0xff] %v13442_v41  ;;  %v13451_v22 = vadd.f32 %v4419_v21, %v17707_v1  ;;  %17710 = vst [vmem:[#allocation41_spill] sm:$0xff] %v13454_v57  ;;  %v13457_v26 = vld [vmem:[%s6195_s3 + $0x60] sm:$0xff]  ;;  %v4494_v21 = vmul.f32 %v13467_v62, %v13415_v14  ;;  %v4497_v10 = vmul.f32 %v13482_v44, %v13415_v14  ;;  %v13487_v19 = vld [vmem:[%s6195_s3 + $0xa8] sm:$0xff] }
 0x35e   : > { %17704 = vst [vmem:[#allocation35_spill] sm:$0xff] %v13445_v63  ;;  %17711 = vst [vmem:[#allocation45_spill] sm:$0xff] %v13457_v26  ;;  %v4492_v50 = vmul.f32 %v13457_v26, %v13415_v14  ;;  %v13472_v30 = vld [vmem:[%s6195_s3 + $0x80] sm:$0xff]  ;;  %v4498_v34 = vmul.f32 %v13487_v19, %v13415_v14  ;;  %v13492_v43 = vld [vmem:[%s6195_s3 + $0xb0] sm:$0xff] }
 0x35f   : > { %17708 = vst [vmem:[#allocation40_spill] sm:$0xff] %v13451_v22  ;;  %17712 = vst [vmem:[#allocation46_spill] sm:$0xff] %v13462_v18  ;;  %v4495_v60 = vmul.f32 %v13472_v30, %v13415_v14  ;;  %v4499_v46 = vmul.f32 %v13492_v43, %v13415_v14  ;;  %v13497_v9 = vld [vmem:[%s6195_s3 + $0xc0] sm:$0xff]  ;;  %v13502_v36 = vld [vmem:[%s6195_s3 + $0xc8] sm:$0xff] }
 0x360   : > { %17713 = vst [vmem:[#allocation49_spill] sm:$0xff] %v13467_v62  ;;  %17714 = vst [vmem:[#allocation50_spill] sm:$0xff] %v13472_v30  ;;  %v4500_v11 = vmul.f32 %v13497_v9, %v13415_v14  ;;  %v4501_v39 = vmul.f32 %v13502_v36, %v13415_v14  ;;  %v13507_v2 = vld [vmem:[%s6195_s3 + $0xd8] sm:$0xff]  ;;  %v13512_v37 = vld [vmem:[%s6195_s3 + $0xe0] sm:$0xff] }
 0x361   : > { %17716 = vst [vmem:[#allocation11_spill] sm:$0xff] %v13482_v44  ;;  %17717 = vst [vmem:[#allocation13_spill] sm:$0xff] %v13487_v19  ;;  %v4502_v31 = vmul.f32 %v13507_v2, %v13415_v14  ;;  %v4503_v55 = vmul.f32 %v13512_v37, %v13415_v14  ;;  %v13517_v42 = vld [vmem:[%s6195_s3 + $0xf0] sm:$0xff]  ;;  %v13522_v16 = vld [vmem:[%s6195_s3 + $0xf8] sm:$0xff] }
 0x362   : > { %17718 = vst [vmem:[#allocation14_spill] sm:$0xff] %v13492_v43  ;;  %17719 = vst [vmem:[#allocation16_spill] sm:$0xff] %v13497_v9  ;;  %v4504_v8 = vmul.f32 %v13517_v42, %v13415_v14  ;;  %v4505_v28 = vmul.f32 %v13522_v16, %v13415_v14  ;;  %v13527_v40 = vld [vmem:[%s6195_s3 + $0x108] sm:$0xff]  ;;  %v13550_v43 = vld [vmem:[%s6195_s3 + $0x138] sm:$0xff] }
 0x363   : > { %17720 = vst [vmem:[#allocation19_spill] sm:$0xff] %v13502_v36  ;;  %17721 = vst [vmem:[#allocation23_spill] sm:$0xff] %v13507_v2  ;;  %v4506_v1 = vmul.f32 %v13527_v40, %v13415_v14  ;;  %v13532_v33 = vld [vmem:[%s6195_s3 + $0x1c8] sm:$0xff]  ;;  %v13555_v19 = vld [vmem:[%s6195_s3 + $0x1d0] sm:$0xff] }
 0x364   : > { %17722 = vst [vmem:[#allocation24_spill] sm:$0xff] %v13512_v37  ;;  %17723 = vst [vmem:[#allocation37_spill] sm:$0xff] %v13517_v42  ;;  %v13535_v37 = vld [vmem:[%s6195_s3 + $0x110] sm:$0xff]  ;;  %v13540_v42 = vld [vmem:[%s6195_s3 + $0x120] sm:$0xff] }
 0x365   : > { %17724 = vst [vmem:[#allocation33_spill] sm:$0xff] %v13522_v16  ;;  %17725 = vst [vmem:[#allocation42_spill] sm:$0xff] %v13527_v40  ;;  %v4507_v2 = vmul.f32 %v13535_v37, %v13415_v14  ;;  %v4508_v36 = vmul.f32 %v13540_v42, %v13415_v14  ;;  %v13545_v9 = vld [vmem:[%s6195_s3 + $0x128] sm:$0xff]  ;;  %v4510_v40 = vmul.f32 %v13550_v43, %v13415_v14  ;;  %v13558_v44 = vld [vmem:[%s6195_s3 + $0x140] sm:$0xff] }
 0x366   : > { %17726 = vst [vmem:[#allocation79_spill] sm:$0xff] %v13532_v33  ;;  %17727 = vst [vmem:[#allocation71_spill] sm:$0xff] %v13535_v37  ;;  %v4509_v16 = vmul.f32 %v13545_v9, %v13415_v14  ;;  %v4511_v37 = vmul.f32 %v13558_v44, %v13415_v14  ;;  %v13563_v58 = vld [vmem:[%s6195_s3 + $0x150] sm:$0xff]  ;;  %v13568_v30 = vld [vmem:[%s6195_s3 + $0x158] sm:$0xff] }
 0x367   : > { %17728 = vst [vmem:[#allocation76_spill] sm:$0xff] %v13540_v42  ;;  %17729 = vst [vmem:[#allocation39_spill] sm:$0xff] %v13545_v9  ;;  %v4512_v42 = vmul.f32 %v13563_v58, %v13415_v14  ;;  %v4513_v9 = vmul.f32 %v13568_v30, %v13415_v14  ;;  %v17735_v62 = vld [vmem:[#allocation17_spill] sm:$0xff]  ;;  %v17736_v18 = vld [vmem:[#allocation18_spill] sm:$0xff] }
 0x368   : > { %17730 = vst [vmem:[#allocation51_spill] sm:$0xff] %v13550_v43  ;;  %17731 = vst [vmem:[#allocation44_spill] sm:$0xff] %v13555_v19  ;;  %v4514_v43 = vmul.f32 %v17735_v62, %v13415_v14  ;;  %v4515_v26 = vmul.f32 %v17736_v18, %v13415_v14  ;;  %v17737_v57 = vld [vmem:[#allocation31_spill] sm:$0xff]  ;;  %v17739_v63 = vld [vmem:[#allocation68_spill] sm:$0xff]  ;;  %v4522_v18 = vmul.f32 %v13415_v14, %v13532_v33 }
 0x369   : > { %17732 = vst [vmem:[#allocation56_spill] sm:$0xff] %v13558_v44  ;;  %17733 = vst [vmem:[#allocation47_spill] sm:$0xff] %v13563_v58  ;;  %v4516_v22 = vmul.f32 %v17737_v57, %v13415_v14  ;;  %v17738_v44 = vld [vmem:[#allocation32_spill] sm:$0xff]  ;;  %v4518_v58 = vmul.f32 %v17739_v63, %v13415_v14  ;;  %v17742_v62 = vld [vmem:[#allocation62_spill] sm:$0xff]  ;;  %v4523_v57 = vmul.f32 %v13415_v14, %v13555_v19 }
 0x36a   : > { %17734 = vst [vmem:[#allocation48_spill] sm:$0xff] %v13568_v30  ;;  %v4517_v32 = vmul.f32 %v17738_v44, %v13415_v14  ;;  %v17740_v41 = vld [vmem:[#allocation80_spill] sm:$0xff]  ;;  %v17741_v30 = vld [vmem:[#allocation58_spill] sm:$0xff]  ;;  %v4521_v20 = vmul.f32 %v17742_v62, %v13415_v14  ;;  %v13593_v44 = vadd.f32 %v4492_v50, %v13347_v25  ;;  %v13596_v63 = vadd.f32 %v4493_v4, %v13352_v49  ;;  %v17763_v4 = vld [vmem:[#allocation67_spill] sm:$0xff] }
 0x36b   : > { %v4519_v24 = vmul.f32 %v17740_v41, %v13415_v14  ;;  %v4520_v17 = vmul.f32 %v17741_v30, %v13415_v14  ;;  %v13599_v41 = vadd.f32 %v4494_v21, %v13356_v47  ;;  %v13602_v30 = vadd.f32 %v4495_v60, %v13360_v59 }
 0x36c   : > { %v13605_v62 = vadd.f32 %v4496_v23, %v13365_v54  ;;  %v13608_v33 = vadd.f32 %v4497_v10, %v13369_v0  ;;  %v13611_v14 = vadd.f32 %v4498_v34, %v13373_v12  ;;  %v13614_v25 = vadd.f32 %v4499_v46, %v13377_v15  ;;  %v17769_v23 = vld [vmem:[#allocation35_spill] sm:$0xff]  ;;  %v17771_v10 = vld [vmem:[#allocation36_spill] sm:$0xff] }
 0x36d   : > { %v13617_v49 = vadd.f32 %v4500_v11, %v13380_v45  ;;  %v13620_v47 = vadd.f32 %v4501_v39, %v13383_v13  ;;  %v13623_v59 = vadd.f32 %v4502_v31, %v13386_v35  ;;  %v13626_v54 = vadd.f32 %v4503_v55, %v13389_v29 }
 0x36e   : > { %17743 = vst [vmem:[#allocation61_spill] sm:$0xff] %v13611_v14  ;;  %17744 = vst [vmem:[#allocation52_spill] sm:$0xff] %v13614_v25  ;;  %v13629_v0 = vadd.f32 %v4504_v8, %v13392_v56  ;;  %v13632_v12 = vadd.f32 %v4505_v28, %v13395_v38  ;;  %v13635_v15 = vadd.f32 %v4506_v1, %v13398_v48  ;;  %v13652_v56 = vld [vmem:[%s15337_s1 + $0x15] ss:$0 sm:$0xff] }
 0x36f   : > { %17745 = vst [vmem:[#allocation53_spill] sm:$0xff] %v13617_v49  ;;  %17746 = vst [vmem:[#allocation57_spill] sm:$0xff] %v13620_v47  ;;  %v13638_v45 = vadd.f32 %v4507_v2, %v13401_v3  ;;  %v13641_v13 = vadd.f32 %v4508_v36, %v13404_v6  ;;  %v13644_v35 = vadd.f32 %v4509_v16, %v13407_v53  ;;  %v17781_v36 = vld [vmem:[#allocation50_spill] sm:$0xff]  ;;  %v13732_v16 = vld [vmem:[%s6195_s3 + $0xa0] sm:$0xf] }
 0x370   : > { %17747 = vst [vmem:[#allocation75_spill] sm:$0xff] %v13623_v59  ;;  %17748 = vst [vmem:[#allocation66_spill] sm:$0xff] %v13626_v54  ;;  %v13647_v29 = vadd.f32 %v4510_v40, %v13410_v51  ;;  %v13655_v38 = vadd.f32 %v4511_v37, %v13418_v61  ;;  %v13658_v48 = vadd.f32 %v4512_v42, %v13421_v5  ;;  %v17761_v51 = vld [vmem:[#allocation63_spill] sm:$0xff]  ;;  %v17765_v61 = vld [vmem:[#allocation69_spill] sm:$0xff] }
 0x371   : > { %17749 = vst [vmem:[#allocation59_spill] sm:$0xff] %v13629_v0  ;;  %17750 = vst [vmem:[#allocation74_spill] sm:$0xff] %v13632_v12  ;;  %v13661_v3 = vadd.f32 %v4513_v9, %v13424_v7  ;;  %v13664_v6 = vadd.f32 %v4514_v43, %v13427_v52  ;;  %v13667_v53 = vadd.f32 %v4515_v26, %v13430_v27  ;;  %v17767_v5 = vld [vmem:[#allocation70_spill] sm:$0xff]  ;;  %v17773_v27 = vld [vmem:[#allocation40_spill] sm:$0xff] }
 0x372   : > { %17751 = vst [vmem:[#allocation7_spill] sm:$0xff] %v13635_v15  ;;  %17752 = vst [vmem:[#allocation82_spill] sm:$0xff] %v13638_v45  ;;  %v13670_v50 = vadd.f32 %v4516_v22, %v17761_v51  ;;  %v13673_v21 = vadd.f32 %v4517_v32, %v17763_v4  ;;  %v13676_v60 = vadd.f32 %v4518_v58, %v17765_v61  ;;  %v17775_v22 = vld [vmem:[#allocation41_spill] sm:$0xff]  ;;  %v13717_v2 = vld [vmem:[%s6195_s3 + $0x88] sm:$0xf] }
 0x373   : > { %17753 = vst [vmem:[#allocation83_spill] sm:$0xff] %v13641_v13  ;;  %17754 = vst [vmem:[#allocation38_spill] sm:$0xff] %v13644_v35  ;;  %v13679_v7 = vadd.f32 %v4519_v24, %v17767_v5  ;;  %v13682_v52 = vadd.f32 %v4520_v17, %v17769_v23  ;;  %v13685_v34 = vadd.f32 %v4521_v20, %v17771_v10  ;;  %v17777_v58 = vld [vmem:[#allocation45_spill] sm:$0xff]  ;;  %v17778_v24 = vld [vmem:[#allocation46_spill] sm:$0xff] }
 0x374   : > { %17755 = vst [vmem:[#allocation43_spill] sm:$0xff] %v13647_v29  ;;  %17756 = vst [vmem:[#allocation60_spill] sm:$0xff] %v13655_v38  ;;  %v13688_v26 = vadd.f32 %v4522_v18, %v17773_v27  ;;  %v13691_v32 = vadd.f32 %v4523_v57, %v17775_v22  ;;  %v13695_v43 = vmul.f32 %v17777_v58, %v13652_v56  ;;  %v13702_v17 = vld [vmem:[%s6195_s3 + $0x70] sm:$0xf]  ;;  %v17780_v9 = vld [vmem:[#allocation49_spill] sm:$0xff] }
 0x375   : > { %17757 = vst [vmem:[#allocation64_spill] sm:$0xff] %v13658_v48  ;;  %17758 = vst [vmem:[#allocation65_spill] sm:$0xff] %v13661_v3  ;;  %v13699_v46 = vmul.f32 %v17778_v24, %v13652_v56  ;;  %v13706_v20 = vmul.f32 %v13702_v17, %v13652_v56  ;;  %v13710_v11 = vmul.f32 %v17780_v9, %v13652_v56  ;;  %v17783_v37 = vld [vmem:[#allocation10_spill] sm:$0xff]  ;;  %v17784_v42 = vld [vmem:[#allocation11_spill] sm:$0xff] }
 0x376   : > { %17759 = vst [vmem:[#allocation54_spill] sm:$0xff] %v13664_v6  ;;  %17760 = vst [vmem:[#allocation55_spill] sm:$0xff] %v13667_v53  ;;  %v13714_v39 = vmul.f32 %v17781_v36, %v13652_v56  ;;  %v13721_v31 = vmul.f32 %v13717_v2, %v13652_v56  ;;  %v13725_v55 = vmul.f32 %v17783_v37, %v13652_v56  ;;  %v17786_v40 = vld [vmem:[#allocation13_spill] sm:$0xff]  ;;  %v17787_v18 = vld [vmem:[#allocation14_spill] sm:$0xff] }
 0x377   : > { %17762 = vst [vmem:[#allocation8_spill] sm:$0xff] %v13670_v50  ;;  %17764 = vst [vmem:[#allocation9_spill] sm:$0xff] %v13673_v21  ;;  %v13729_v8 = vmul.f32 %v17784_v42, %v13652_v56  ;;  %v13736_v28 = vmul.f32 %v13732_v16, %v13652_v56  ;;  %v13740_v1 = vmul.f32 %v17786_v40, %v13652_v56  ;;  %v13747_v51 = vld [vmem:[%s6195_s3 + $0xb8] sm:$0xf]  ;;  %v17790_v23 = vld [vmem:[#allocation19_spill] sm:$0xff]  ;;  %v4659_v47 = vrot.slane %v13699_v46, 1 }
 0x378   : > { %17766 = vst [vmem:[#allocation12_spill] sm:$0xff] %v13676_v60  ;;  %17768 = vst [vmem:[#allocation15_spill] sm:$0xff] %v13679_v7  ;;  %v13744_v57 = vmul.f32 %v17787_v18, %v13652_v56  ;;  %v13751_v4 = vmul.f32 %v13747_v51, %v13652_v56  ;;  %v17789_v61 = vld [vmem:[#allocation16_spill] sm:$0xff]  ;;  %v13759_v10 = vmul.f32 %v17790_v23, %v13652_v56  ;;  %v13762_v27 = vld [vmem:[%s6195_s3 + $0xd0] sm:$0xf]  ;;  %v4661_v49 = vrot.slane %v13706_v20, 1 }
 0x379   : > { %17770 = vst [vmem:[#allocation20_spill] sm:$0xff] %v13682_v52  ;;  %17772 = vst [vmem:[#allocation28_spill] sm:$0xff] %v13685_v34  ;;  %v13755_v5 = vmul.f32 %v17789_v61, %v13652_v56  ;;  %v13766_v22 = vmul.f32 %v13762_v27, %v13652_v56  ;;  %v17792_v18 = vld [vmem:[#allocation23_spill] sm:$0xff]  ;;  %v13777_v61 = vld [vmem:[%s6195_s3 + $0xe8] sm:$0xf]  ;;  %v4664_v25 = vrot.slane %v13714_v39, 1 }
 0x37a   : > { %17774 = vst [vmem:[#allocation34_spill] sm:$0xff] %v13688_v26  ;;  %17776 = vst [vmem:[#allocation72_spill] sm:$0xff] %v13691_v32  ;;  %v13770_v40 = vmul.f32 %v17792_v18, %v13652_v56  ;;  %v13781_v23 = vmul.f32 %v13777_v61, %v13652_v56  ;;  %v17795_v42 = vld [vmem:[#allocation37_spill] sm:$0xff]  ;;  %v17798_v36 = vld [vmem:[#allocation42_spill] sm:$0xff]  ;;  %v4668_v14 = vrot.slane %v13725_v55, 1  ;;  %v4671_v46 = vrot.slane %v13736_v28, 1 }
 0x37b   : > { %17779 = vst [vmem:[#allocation77_spill] sm:$0xff] %v13702_v17  ;;  %17782 = vst [vmem:[#allocation78_spill] sm:$0xff] %v13717_v2  ;;  %v13785_v37 = vmul.f32 %v17795_v42, %v13652_v56  ;;  %v13792_v18 = vld [vmem:[%s6195_s3 + $0x100] sm:$0xf]  ;;  %v13800_v9 = vmul.f32 %v17798_v36, %v13652_v56  ;;  %v13807_v17 = vld [vmem:[%s6195_s3 + $0x118] sm:$0xf] }
 0x37c   : > { %17785 = vst [vmem:[#allocation81_spill] sm:$0xff] %v13732_v16  ;;  %17788 = vst [vmem:[#allocation25_spill] sm:$0xff] %v13747_v51  ;;  %v17793_v51 = vld [vmem:[#allocation24_spill] sm:$0xff]  ;;  %v17802_v58 = vld [vmem:[#allocation39_spill] sm:$0xff]  ;;  %v4673_v39 = vrot.slane %v13740_v1, 1  ;;  %v4678_v55 = vrot.slane %v13755_v5, 1 }
 0x37d   : > { %17791 = vst [vmem:[#allocation21_spill] sm:$0xff] %v13762_v27  ;;  %v13774_v16 = vmul.f32 %v17793_v51, %v13652_v56  ;;  %17794 = vst [vmem:[#allocation22_spill] sm:$0xff] %v13777_v61  ;;  %v17796_v27 = vld [vmem:[#allocation33_spill] sm:$0xff]  ;;  %v13796_v51 = vmul.f32 %v13792_v18, %v13652_v56  ;;  %v17799_v61 = vld [vmem:[#allocation71_spill] sm:$0xff]  ;;  %v13819_v36 = vmul.f32 %v17802_v58, %v13652_v56  ;;  %v4683_v28 = vrot.slane %v13770_v40, 1 }
 0x37e   : > { %v13789_v2 = vmul.f32 %v17796_v27, %v13652_v56  ;;  %17797 = vst [vmem:[#allocation26_spill] sm:$0xff] %v13792_v18  ;;  %v13804_v42 = vmul.f32 %v17799_v61, %v13652_v56  ;;  %17800 = vst [vmem:[#allocation27_spill] sm:$0xff] %v13807_v17  ;;  %v13811_v27 = vmul.f32 %v13807_v17, %v13652_v56  ;;  %v17801_v24 = vld [vmem:[#allocation76_spill] sm:$0xff]  ;;  %v13822_v32 = vld [vmem:[%s6195_s3 + $0x130] sm:$0xf] }
 0x37f   : > { %v13815_v18 = vmul.f32 %v17801_v24, %v13652_v56  ;;  %17803 = vst [vmem:[#allocation73_spill] sm:$0xff] %v13822_v32  ;;  %v13826_v61 = vmul.f32 %v13822_v32, %v13652_v56  ;;  %v17804_v26 = vld [vmem:[#allocation51_spill] sm:$0xff]  ;;  %v17805_v24 = vld [vmem:[#allocation56_spill] sm:$0xff]  ;;  %v13837_v52 = vld [vmem:[%s6195_s3 + $0x148] sm:$0xf] }
 0x380   : > { %v13830_v17 = vmul.f32 %v17804_v26, %v13652_v56  ;;  %v13834_v34 = vmul.f32 %v17805_v24, %v13652_v56  ;;  %17806 = vst [vmem:[#allocation5_spill] sm:$0xff] %v13837_v52  ;;  %v13841_v58 = vmul.f32 %v13837_v52, %v13652_v56  ;;  %v17807_v7 = vld [vmem:[#allocation47_spill] sm:$0xff]  ;;  %v17808_v60 = vld [vmem:[#allocation48_spill] sm:$0xff]  ;;  %v13852_v21 = vld [vmem:[%s6195_s3 + $0x160] sm:$0xf] }
 0x381   : > { %v13845_v32 = vmul.f32 %v17807_v7, %v13652_v56  ;;  %v13849_v26 = vmul.f32 %v17808_v60, %v13652_v56  ;;  %17809 = vst [vmem:[#allocation6_spill] sm:$0xff] %v13852_v21  ;;  %v13856_v24 = vmul.f32 %v13852_v21, %v13652_v56  ;;  %v13859_v50 = vld [vmem:[%s6195_s3 + $0x168] sm:$0xff]  ;;  %v13866_v53 = vld [vmem:[%s6195_s3 + $0x170] sm:$0xff]  ;;  %v13873_v60 = vld [vmem:[%s6195_s3 + $0x1d8] sm:$0xf] }
 0x382   : > { %17810 = vst [vmem:[#allocation29_spill] sm:$0xff] %v13859_v50  ;;  %v13863_v52 = vmul.f32 %v13859_v50, %v13652_v56  ;;  %17811 = vst [vmem:[#allocation30_spill] sm:$0xff] %v13866_v53  ;;  %v13870_v7 = vmul.f32 %v13866_v53, %v13652_v56  ;;  %v13876_v6 = vld [vmem:[%s6195_s3 + $0x178] sm:$0xf]  ;;  %v13883_v3 = vld [vmem:[%s6195_s3 + $0x180] sm:$0xff] }
 0x383   : > { %17812 = vst [vmem:[#allocation17_spill] sm:$0xff] %v13876_v6  ;;  %v13880_v21 = vmul.f32 %v13876_v6, %v13652_v56  ;;  %17813 = vst [vmem:[#allocation18_spill] sm:$0xff] %v13883_v3  ;;  %v13887_v50 = vmul.f32 %v13883_v3, %v13652_v56  ;;  %v13890_v48 = vld [vmem:[%s6195_s3 + $0x188] sm:$0xff]  ;;  %v13897_v38 = vld [vmem:[%s6195_s3 + $0x190] sm:$0xf] }
 0x384   : > { %17814 = vst [vmem:[#allocation31_spill] sm:$0xff] %v13890_v48  ;;  %v13894_v53 = vmul.f32 %v13890_v48, %v13652_v56  ;;  %17815 = vst [vmem:[#allocation32_spill] sm:$0xff] %v13897_v38  ;;  %v13901_v29 = vmul.f32 %v13897_v38, %v13652_v56  ;;  %v17816_v6 = vld [vmem:[#allocation68_spill] sm:$0xff]  ;;  %v13912_v45 = vld [vmem:[%s6195_s3 + $0x1a8] sm:$0xf] }
 0x385   : > { %v13905_v35 = vmul.f32 %v17816_v6, %v13652_v56  ;;  %v17817_v13 = vld [vmem:[#allocation80_spill] sm:$0xff]  ;;  %17818 = vst [vmem:[#allocation63_spill] sm:$0xff] %v13912_v45  ;;  %v13916_v48 = vmul.f32 %v13912_v45, %v13652_v56  ;;  %v17819_v15 = vld [vmem:[#allocation58_spill] sm:$0xff]  ;;  %v13927_v6 = vld [vmem:[%s6195_s3 + $0x1c0] sm:$0xf]  ;;  %v13939_v45 = vmul.f32 %v13652_v56, %v13555_v19 }
 0x386   : > { %v13909_v3 = vmul.f32 %v17817_v13, %v13652_v56  ;;  %v13920_v12 = vmul.f32 %v17819_v15, %v13652_v56  ;;  %v17820_v38 = vld [vmem:[#allocation62_spill] sm:$0xff]  ;;  %17821 = vst [vmem:[#allocation67_spill] sm:$0xff] %v13927_v6  ;;  %v13931_v13 = vmul.f32 %v13927_v6, %v13652_v56  ;;  %v17822_v54 = vld [vmem:[#allocation79_spill] sm:$0xff]  ;;  %v13943_v15 = vmul.f32 %v13652_v56, %v13873_v60 }
 0x387   : > { %v13924_v0 = vmul.f32 %v17820_v38, %v13652_v56  ;;  %v13935_v59 = vmul.f32 %v13652_v56, %v17822_v54  ;;  %v4658_v38 = vrot.slane %v13695_v43, 1  ;;  %v4663_v6 = vrot.slane %v13710_v11, 1 }
 0x388   : > { %v4666_v54 = vrot.slane %v13721_v31, 1  ;;  %v13956_v56 = vsel %vm438_vm0, %v4659_v47, %v4661_v49  ;;  %v4669_v43 = vrot.slane %v13729_v8, 1  ;;  %v4674_v31 = vrot.slane %v13744_v57, 1 }
 0x389   : > { %v13953_v19 = vsel %vm438_vm0, %v4658_v38, %v4659_v47  ;;  %v13961_v20 = vsel %vm438_vm0, %v4663_v6, %v4664_v25  ;;  %v4676_v47 = vrot.slane %v13751_v4, 1  ;;  %v4686_v57 = vrot.slane %v13781_v23, 1 }
 0x38a   : > { %v13964_v11 = vsel %vm438_vm0, %v4664_v25, %v4666_v54  ;;  %v13969_v38 = vsel %vm438_vm0, %v4668_v14, %v4669_v43  ;;  %v13972_v49 = vsel %vm438_vm0, %v4669_v43, %v4671_v46  ;;  %v13977_v8 = vsel %vm438_vm0, %v4673_v39, %v4674_v31 }
 0x38b   : > { %v4679_v25 = vrot.slane %v13759_v10, 1  ;;  %v4681_v54 = vrot.slane %v13766_v22, 1  ;;  %v13983_v1 = vsel %vm438_vm0, %v4674_v31, %v4676_v47  ;;  %v4684_v14 = vrot.slane %v13774_v16, 1 }
 0x38c   : > { %v4688_v4 = vrot.slane %v13785_v37, 1  ;;  %v4689_v43 = vrot.slane %v13789_v2, 1  ;;  %v4691_v10 = vrot.slane %v13796_v51, 1  ;;  %v4693_v46 = vrot.slane %v13800_v9, 1 }
 0x38d   : > { %v4680_v5 = vsel %vm438_vm0, %v4678_v55, %v4679_v25  ;;  %v4682_v6 = vsel %vm438_vm0, %v4679_v25, %v4681_v54  ;;  %v4685_v22 = vsel %vm438_vm0, %v4683_v28, %v4684_v14  ;;  %v4687_v40 = vsel %vm438_vm0, %v4684_v14, %v4686_v57 }
 0x38e   : > { %v4694_v16 = vrot.slane %v13804_v42, 1  ;;  %v4690_v23 = vsel %vm438_vm0, %v4688_v4, %v4689_v43  ;;  %v4692_v37 = vsel %vm438_vm0, %v4689_v43, %v4691_v10  ;;  %v4696_v39 = vrot.slane %v13811_v27, 1 }
 0x38f   : > { %v4698_v31 = vrot.slane %v13815_v18, 1  ;;  %v4699_v51 = vrot.slane %v13819_v36, 1  ;;  %v4701_v47 = vrot.slane %v13826_v61, 1  ;;  %v4703_v55 = vrot.slane %v13830_v17, 1 }
 0x390   : > { %v4695_v2 = vsel %vm438_vm0, %v4693_v46, %v4694_v16  ;;  %v4697_v9 = vsel %vm438_vm0, %v4694_v16, %v4696_v39  ;;  %v4704_v42 = vrot.slane %v13834_v34, 1  ;;  %v4706_v25 = vrot.slane %v13841_v58, 1 }
 0x391   : > { %v4708_v54 = vrot.slane %v13845_v32, 1  ;;  %v4700_v27 = vsel %vm438_vm0, %v4698_v31, %v4699_v51  ;;  %v4702_v18 = vsel %vm438_vm0, %v4699_v51, %v4701_v47  ;;  %v4709_v28 = vrot.slane %v13849_v26, 1 }
 0x392   : > { %v4711_v36 = vrot.slane %v13856_v24, 1  ;;  %v4705_v61 = vsel %vm438_vm0, %v4703_v55, %v4704_v42  ;;  %v4707_v17 = vsel %vm438_vm0, %v4704_v42, %v4706_v25  ;;  %v4713_v14 = vrot.slane %v13863_v52, 1  ;;  %v17833_v55 = vld [vmem:[#allocation57_spill] sm:$0xff]  ;;  %v17837_v25 = vld [vmem:[#allocation66_spill] sm:$0xff] }
 0x393   : > { %v4714_v34 = vrot.slane %v13870_v7, 1  ;;  %v4710_v58 = vsel %vm438_vm0, %v4708_v54, %v4709_v28  ;;  %v4716_v57 = vrot.slane %v13880_v21, 1  ;;  %v4718_v4 = vrot.slane %v13887_v50, 1 }
 0x394   : > { %v4712_v32 = vsel %vm438_vm0, %v4709_v28, %v4711_v36  ;;  %v4719_v24 = vrot.slane %v13894_v53, 1  ;;  %v4721_v43 = vrot.slane %v13901_v29, 1  ;;  %v4723_v10 = vrot.slane %v13905_v35, 1 }
 0x395   : > { %v4715_v26 = vsel %vm438_vm0, %v4713_v14, %v4714_v34  ;;  %v4717_v52 = vsel %vm438_vm0, %v4714_v34, %v4716_v57  ;;  %v4724_v7 = vrot.slane %v13909_v3, 1  ;;  %v4726_v46 = vrot.slane %v13916_v48, 1 }
 0x396   : > { %v4728_v16 = vrot.slane %v13920_v12, 1  ;;  %v4720_v21 = vsel %vm438_vm0, %v4718_v4, %v4719_v24  ;;  %v4722_v50 = vsel %vm438_vm0, %v4719_v24, %v4721_v43  ;;  %v4729_v39 = vrot.slane %v13924_v0, 1  ;;  %v17855_v24 = vld [vmem:[#allocation64_spill] sm:$0xff]  ;;  %v17857_v43 = vld [vmem:[#allocation65_spill] sm:$0xff] }
 0x397   : > { %v4731_v53 = vrot.slane %v13931_v13, 1  ;;  %v4725_v29 = vsel %vm438_vm0, %v4723_v10, %v4724_v7  ;;  %v4727_v35 = vsel %vm438_vm0, %v4724_v7, %v4726_v46  ;;  %v4733_v31 = vrot.slane %v13935_v59, 1  ;;  %v17859_v10 = vld [vmem:[#allocation54_spill] sm:$0xff]  ;;  %v17861_v7 = vld [vmem:[#allocation55_spill] sm:$0xff]  ;;  %v17863_v46 = vld [vmem:[#allocation8_spill] sm:$0xff] }
 0x398   : > { %v4734_v3 = vrot.slane %v13939_v45, 1  ;;  %v4730_v48 = vsel %vm438_vm0, %v4728_v16, %v4729_v39  ;;  %v4736_v51 = vrot.slane %v13943_v15, 1  ;;  %v14041_v47 = vadd.f32 %v13953_v19, %v13593_v44 }
 0x399   : > { %v4732_v12 = vsel %vm438_vm0, %v4729_v39, %v4731_v53  ;;  %v14046_v13 = vadd.f32 %v13956_v56, %v13596_v63  ;;  %v14050_v59 = vadd.f32 %v13961_v20, %v13599_v41  ;;  %v14054_v45 = vadd.f32 %v13964_v11, %v13602_v30  ;;  %v17827_v63 = vld [vmem:[#allocation61_spill] sm:$0xff]  ;;  %v17829_v41 = vld [vmem:[#allocation52_spill] sm:$0xff] }
 0x39a   : > { %v4735_v0 = vsel %vm438_vm0, %v4733_v31, %v4734_v3  ;;  %v4737_v15 = vsel %vm438_vm0, %v4734_v3, %v4736_v51  ;;  %v14059_v19 = vadd.f32 %v13969_v38, %v13605_v62  ;;  %v14063_v44 = vadd.f32 %v13972_v49, %v13608_v33  ;;  %v17831_v30 = vld [vmem:[#allocation53_spill] sm:$0xff]  ;;  %v17835_v62 = vld [vmem:[#allocation75_spill] sm:$0xff] }
 0x39b   : > { %17823 = vst [vmem:[#allocation69_spill] sm:$0xff] %v14050_v59  ;;  %17824 = vst [vmem:[#allocation70_spill] sm:$0xff] %v14054_v45  ;;  %v14067_v56 = vadd.f32 %v13977_v8, %v17827_v63  ;;  %v14071_v20 = vadd.f32 %v13983_v1, %v17829_v41  ;;  %v14074_v11 = vadd.f32 %v4680_v5, %v17831_v30  ;;  %v17839_v49 = vld [vmem:[#allocation59_spill] sm:$0xff]  ;;  %v17841_v8 = vld [vmem:[#allocation74_spill] sm:$0xff] }
 0x39c   : > { %17825 = vst [vmem:[#allocation35_spill] sm:$0xff] %v14059_v19  ;;  %17826 = vst [vmem:[#allocation36_spill] sm:$0xff] %v14063_v44  ;;  %v14077_v42 = vadd.f32 %v4682_v6, %v17833_v55  ;;  %v14080_v38 = vadd.f32 %v4685_v22, %v17835_v62  ;;  %v14083_v33 = vadd.f32 %v4687_v40, %v17837_v25  ;;  %v17843_v1 = vld [vmem:[#allocation7_spill] sm:$0xff]  ;;  %v17845_v5 = vld [vmem:[#allocation82_spill] sm:$0xff] }
 0x39d   : > { %17828 = vst [vmem:[#allocation40_spill] sm:$0xff] %v14067_v56  ;;  %17830 = vst [vmem:[#allocation41_spill] sm:$0xff] %v14071_v20  ;;  %v14086_v54 = vadd.f32 %v4690_v23, %v17839_v49  ;;  %v14089_v28 = vadd.f32 %v4692_v37, %v17841_v8  ;;  %v14092_v36 = vadd.f32 %v4695_v2, %v17843_v1  ;;  %v17847_v6 = vld [vmem:[#allocation83_spill] sm:$0xff]  ;;  %v17849_v22 = vld [vmem:[#allocation38_spill] sm:$0xff] }
 0x39e   : > { %17832 = vst [vmem:[#allocation68_spill] sm:$0xff] %v14074_v11  ;;  %17834 = vst [vmem:[#allocation80_spill] sm:$0xff] %v14077_v42  ;;  %v14095_v14 = vadd.f32 %v4697_v9, %v17845_v5  ;;  %v14098_v34 = vadd.f32 %v4700_v27, %v17847_v6  ;;  %v14101_v57 = vadd.f32 %v4702_v18, %v17849_v22  ;;  %v17851_v40 = vld [vmem:[#allocation43_spill] sm:$0xff]  ;;  %v17853_v37 = vld [vmem:[#allocation60_spill] sm:$0xff] }
 0x39f   : > { %17836 = vst [vmem:[#allocation61_spill] sm:$0xff] %v14080_v38  ;;  %17838 = vst [vmem:[#allocation52_spill] sm:$0xff] %v14083_v33  ;;  %v14104_v4 = vadd.f32 %v4705_v61, %v17851_v40  ;;  %v14109_v23 = vld [vmem:[%s15337_s1 + $0x16] ss:$0 sm:$0xff]  ;;  %v14112_v2 = vadd.f32 %v4707_v17, %v17853_v37  ;;  %v14115_v9 = vadd.f32 %v4710_v58, %v17855_v24  ;;  %v17865_v39 = vld [vmem:[#allocation9_spill] sm:$0xff] }
 0x3a0   : > { %17840 = vst [vmem:[#allocation53_spill] sm:$0xff] %v14086_v54  ;;  %17842 = vst [vmem:[#allocation57_spill] sm:$0xff] %v14089_v28  ;;  %v14118_v27 = vadd.f32 %v4712_v32, %v17857_v43  ;;  %v14121_v18 = vadd.f32 %v4715_v26, %v17859_v10  ;;  %v14124_v61 = vadd.f32 %v4717_v52, %v17861_v7  ;;  %v17867_v17 = vld [vmem:[#allocation12_spill] sm:$0xff]  ;;  %v17869_v58 = vld [vmem:[#allocation15_spill] sm:$0xff] }
 0x3a1   : > { %17844 = vst [vmem:[#allocation75_spill] sm:$0xff] %v14092_v36  ;;  %17846 = vst [vmem:[#allocation66_spill] sm:$0xff] %v14095_v14  ;;  %v14127_v16 = vadd.f32 %v4720_v21, %v17863_v46  ;;  %v14130_v53 = vadd.f32 %v4722_v50, %v17865_v39  ;;  %v14133_v31 = vadd.f32 %v4725_v29, %v17867_v17  ;;  %v17871_v32 = vld [vmem:[#allocation20_spill] sm:$0xff]  ;;  %v17875_v52 = vld [vmem:[#allocation34_spill] sm:$0xff] }
 0x3a2   : > { %17848 = vst [vmem:[#allocation59_spill] sm:$0xff] %v14098_v34  ;;  %17850 = vst [vmem:[#allocation74_spill] sm:$0xff] %v14101_v57  ;;  %v14136_v3 = vadd.f32 %v4727_v35, %v17869_v58  ;;  %v14139_v51 = vadd.f32 %v4730_v48, %v17871_v32  ;;  %v17873_v26 = vld [vmem:[#allocation28_spill] sm:$0xff]  ;;  %v14145_v41 = vadd.f32 %v4735_v0, %v17875_v52  ;;  %v17879_v50 = vld [vmem:[#allocation45_spill] sm:$0xff] }
 0x3a3   : > { %17852 = vst [vmem:[#allocation7_spill] sm:$0xff] %v14104_v4  ;;  %17854 = vst [vmem:[#allocation82_spill] sm:$0xff] %v14112_v2  ;;  %v14142_v63 = vadd.f32 %v4732_v12, %v17873_v26  ;;  %v17877_v21 = vld [vmem:[#allocation72_spill] sm:$0xff]  ;;  %v4808_v55 = vmul.f32 %v17879_v50, %v14109_v23  ;;  %v17880_v29 = vld [vmem:[#allocation46_spill] sm:$0xff] }
 0x3a4   : > { %17856 = vst [vmem:[#allocation83_spill] sm:$0xff] %v14115_v9  ;;  %17858 = vst [vmem:[#allocation38_spill] sm:$0xff] %v14118_v27  ;;  %v14148_v30 = vadd.f32 %v4737_v15, %v17877_v21  ;;  %v4809_v62 = vmul.f32 %v17880_v29, %v14109_v23  ;;  %v17881_v35 = vld [vmem:[#allocation77_spill] sm:$0xff]  ;;  %v17883_v12 = vld [vmem:[#allocation50_spill] sm:$0xff] }
 0x3a5   : > { %17860 = vst [vmem:[#allocation43_spill] sm:$0xff] %v14121_v18  ;;  %17862 = vst [vmem:[#allocation60_spill] sm:$0xff] %v14124_v61  ;;  %v4810_v25 = vmul.f32 %v17881_v35, %v14109_v23  ;;  %v17882_v48 = vld [vmem:[#allocation49_spill] sm:$0xff]  ;;  %v4812_v8 = vmul.f32 %v17883_v12, %v14109_v23  ;;  %v17884_v0 = vld [vmem:[#allocation78_spill] sm:$0xff]  ;;  %v4904_v42 = vrot.slane %v4808_v55, 2 }
 0x3a6   : > { %17864 = vst [vmem:[#allocation64_spill] sm:$0xff] %v14127_v16  ;;  %17866 = vst [vmem:[#allocation65_spill] sm:$0xff] %v14130_v53  ;;  %v4811_v49 = vmul.f32 %v17882_v48, %v14109_v23  ;;  %v4813_v1 = vmul.f32 %v17884_v0, %v14109_v23  ;;  %v17885_v15 = vld [vmem:[#allocation10_spill] sm:$0xff]  ;;  %v17886_v6 = vld [vmem:[#allocation11_spill] sm:$0xff]  ;;  %v4905_v11 = vrot.slane %v4809_v62, 2 }
 0x3a7   : > { %17868 = vst [vmem:[#allocation54_spill] sm:$0xff] %v14133_v31  ;;  %17870 = vst [vmem:[#allocation55_spill] sm:$0xff] %v14136_v3  ;;  %v4814_v5 = vmul.f32 %v17885_v15, %v14109_v23  ;;  %v4815_v22 = vmul.f32 %v17886_v6, %v14109_v23  ;;  %v17887_v40 = vld [vmem:[#allocation81_spill] sm:$0xff]  ;;  %v17889_v10 = vld [vmem:[#allocation14_spill] sm:$0xff]  ;;  %v4910_v56 = vrot.slane %v4812_v8, 2 }
 0x3a8   : > { %17872 = vst [vmem:[#allocation8_spill] sm:$0xff] %v14139_v51  ;;  %17874 = vst [vmem:[#allocation9_spill] sm:$0xff] %v14142_v63  ;;  %v4816_v37 = vmul.f32 %v17887_v40, %v14109_v23  ;;  %v17888_v24 = vld [vmem:[#allocation13_spill] sm:$0xff]  ;;  %v14172_v7 = vmul.f32 %v17889_v10, %v14109_v23  ;;  %v17891_v17 = vld [vmem:[#allocation16_spill] sm:$0xff]  ;;  %v4909_v20 = vrot.slane %v4811_v49, 2  ;;  %v4912_v44 = vrot.slane %v4813_v1, 2 }
 0x3a9   : > { %17876 = vst [vmem:[#allocation12_spill] sm:$0xff] %v14145_v41  ;;  %17878 = vst [vmem:[#allocation15_spill] sm:$0xff] %v14148_v30  ;;  %v4817_v43 = vmul.f32 %v17888_v24, %v14109_v23  ;;  %v17890_v46 = vld [vmem:[#allocation25_spill] sm:$0xff]  ;;  %v14180_v58 = vmul.f32 %v17891_v17, %v14109_v23  ;;  %v17892_v32 = vld [vmem:[#allocation19_spill] sm:$0xff]  ;;  %v14329_v19 = vsel %vm685_vm1, %v4904_v42, %v4905_v11  ;;  %v4915_v45 = vrot.slane %v4815_v22, 2 }
 0x3aa   : > { %v14176_v39 = vmul.f32 %v17890_v46, %v14109_v23  ;;  %v14184_v26 = vmul.f32 %v17892_v32, %v14109_v23  ;;  %v17893_v52 = vld [vmem:[#allocation21_spill] sm:$0xff]  ;;  %v17894_v24 = vld [vmem:[#allocation23_spill] sm:$0xff]  ;;  %v17895_v40 = vld [vmem:[#allocation24_spill] sm:$0xff]  ;;  %v14335_v59 = vsel %vm685_vm1, %v4909_v20, %v4910_v56  ;;  %v4920_v62 = vrot.slane %v14172_v7, 2 }
 0x3ab   : > { %v14188_v21 = vmul.f32 %v17893_v52, %v14109_v23  ;;  %v14192_v10 = vmul.f32 %v17894_v24, %v14109_v23  ;;  %v14196_v46 = vmul.f32 %v17895_v40, %v14109_v23  ;;  %v17896_v6 = vld [vmem:[#allocation22_spill] sm:$0xff]  ;;  %v17897_v15 = vld [vmem:[#allocation37_spill] sm:$0xff]  ;;  %v17901_v35 = vld [vmem:[#allocation71_spill] sm:$0xff]  ;;  %v4919_v55 = vrot.slane %v4817_v43, 2 }
 0x3ac   : > { %v14200_v17 = vmul.f32 %v17896_v6, %v14109_v23  ;;  %v14204_v32 = vmul.f32 %v17897_v15, %v14109_v23  ;;  %v17898_v0 = vld [vmem:[#allocation33_spill] sm:$0xff]  ;;  %v17899_v12 = vld [vmem:[#allocation26_spill] sm:$0xff]  ;;  %v14220_v6 = vmul.f32 %v17901_v35, %v14109_v23  ;;  %v17902_v29 = vld [vmem:[#allocation27_spill] sm:$0xff]  ;;  %v4924_v49 = vrot.slane %v14180_v58, 2 }
 0x3ad   : > { %v14208_v52 = vmul.f32 %v17898_v0, %v14109_v23  ;;  %v14212_v24 = vmul.f32 %v17899_v12, %v14109_v23  ;;  %v17900_v48 = vld [vmem:[#allocation42_spill] sm:$0xff]  ;;  %v14224_v15 = vmul.f32 %v17902_v29, %v14109_v23  ;;  %v17903_v50 = vld [vmem:[#allocation76_spill] sm:$0xff]  ;;  %v17904_v12 = vld [vmem:[#allocation39_spill] sm:$0xff]  ;;  %v14350_v8 = vsel %vm685_vm1, %v4919_v55, %v4920_v62 }
 0x3ae   : > { %v14216_v40 = vmul.f32 %v17900_v48, %v14109_v23  ;;  %v14228_v0 = vmul.f32 %v17903_v50, %v14109_v23  ;;  %v14232_v30 = vmul.f32 %v17904_v12, %v14109_v23  ;;  %v17905_v48 = vld [vmem:[#allocation73_spill] sm:$0xff]  ;;  %v17906_v35 = vld [vmem:[#allocation51_spill] sm:$0xff]  ;;  %v17907_v29 = vld [vmem:[#allocation56_spill] sm:$0xff]  ;;  %v4925_v20 = vrot.slane %v14184_v26, 2 }
 0x3af   : > { %v14236_v41 = vmul.f32 %v17905_v48, %v14109_v23  ;;  %v14240_v63 = vmul.f32 %v17906_v35, %v14109_v23  ;;  %v14244_v51 = vmul.f32 %v17907_v29, %v14109_v23  ;;  %v17908_v50 = vld [vmem:[#allocation5_spill] sm:$0xff]  ;;  %v17909_v12 = vld [vmem:[#allocation47_spill] sm:$0xff]  ;;  %v17910_v53 = vld [vmem:[#allocation48_spill] sm:$0xff]  ;;  %v4937_v43 = vrot.slane %v14212_v24, 2 }
 0x3b0   : > { %v14248_v3 = vmul.f32 %v17908_v50, %v14109_v23  ;;  %v14252_v31 = vmul.f32 %v17909_v12, %v14109_v23  ;;  %v14256_v48 = vmul.f32 %v17910_v53, %v14109_v23  ;;  %v17911_v16 = vld [vmem:[#allocation6_spill] sm:$0xff]  ;;  %v17912_v61 = vld [vmem:[#allocation29_spill] sm:$0xff]  ;;  %v17916_v2 = vld [vmem:[#allocation31_spill] sm:$0xff]  ;;  %v4944_v26 = vrot.slane %v14228_v0, 2 }
 0x3b1   : > { %v14260_v35 = vmul.f32 %v17911_v16, %v14109_v23  ;;  %v14264_v29 = vmul.f32 %v17912_v61, %v14109_v23  ;;  %v17913_v18 = vld [vmem:[#allocation30_spill] sm:$0xff]  ;;  %v17914_v27 = vld [vmem:[#allocation17_spill] sm:$0xff]  ;;  %v14280_v16 = vmul.f32 %v17916_v2, %v14109_v23  ;;  %v17917_v4 = vld [vmem:[#allocation32_spill] sm:$0xff]  ;;  %v4945_v24 = vrot.slane %v14232_v30, 2 }
 0x3b2   : > { %v14268_v50 = vmul.f32 %v17913_v18, %v14109_v23  ;;  %v14272_v12 = vmul.f32 %v17914_v27, %v14109_v23  ;;  %v17915_v9 = vld [vmem:[#allocation18_spill] sm:$0xff]  ;;  %v14284_v61 = vmul.f32 %v17917_v4, %v14109_v23  ;;  %v14287_v57 = vld [vmem:[%s6195_s3 + $0x198] sm:$0xff]  ;;  %v14294_v27 = vld [vmem:[%s6195_s3 + $0x1a0] sm:$0xff]  ;;  %v4952_v55 = vrot.slane %v14248_v3, 2 }
 0x3b3   : > { %v14276_v53 = vmul.f32 %v17915_v9, %v14109_v23  ;;  %17918 = vst [vmem:[#allocation20_spill] sm:$0xff] %v14287_v57  ;;  %v14291_v18 = vmul.f32 %v14287_v57, %v14109_v23  ;;  %17919 = vst [vmem:[#allocation28_spill] sm:$0xff] %v14294_v27  ;;  %v14298_v9 = vmul.f32 %v14294_v27, %v14109_v23  ;;  %v17920_v34 = vld [vmem:[#allocation63_spill] sm:$0xff]  ;;  %v17921_v14 = vld [vmem:[#allocation58_spill] sm:$0xff]  ;;  %v4957_v30 = vrot.slane %v14260_v35, 2 }
 0x3b4   : > { %v14302_v2 = vmul.f32 %v17920_v34, %v14109_v23  ;;  %v14306_v4 = vmul.f32 %v17921_v14, %v14109_v23  ;;  %v17922_v36 = vld [vmem:[#allocation62_spill] sm:$0xff]  ;;  %v17923_v57 = vld [vmem:[#allocation67_spill] sm:$0xff]  ;;  %v17925_v38 = vld [vmem:[#allocation44_spill] sm:$0xff]  ;;  %v14326_v14 = vmul.f32 %v14109_v23, %v13873_v60  ;;  %v4965_v35 = vrot.slane %v14280_v16, 2 }
 0x3b5   : > { %v14310_v28 = vmul.f32 %v17922_v36, %v14109_v23  ;;  %v14314_v54 = vmul.f32 %v17923_v57, %v14109_v23  ;;  %v17924_v33 = vld [vmem:[#allocation79_spill] sm:$0xff]  ;;  %v14322_v34 = vmul.f32 %v14109_v23, %v17925_v38  ;;  %v4907_v36 = vrot.slane %v4810_v25, 2 }
 0x3b6   : > { %v14318_v27 = vmul.f32 %v14109_v23, %v17924_v33  ;;  %v4914_v57 = vrot.slane %v4814_v5, 2  ;;  %v4917_v38 = vrot.slane %v4816_v37, 2  ;;  %v14338_v23 = vsel %vm685_vm1, %v4910_v56, %v4912_v44 }
 0x3b7   : > { %v14332_v33 = vsel %vm685_vm1, %v4905_v11, %v4907_v36  ;;  %v4922_v11 = vrot.slane %v14176_v39, 2  ;;  %v4927_v44 = vrot.slane %v14188_v21, 2  ;;  %v4929_v56 = vrot.slane %v14192_v10, 2 }
 0x3b8   : > { %v14342_v25 = vsel %vm685_vm1, %v4914_v57, %v4915_v45  ;;  %v14345_v42 = vsel %vm685_vm1, %v4915_v45, %v4917_v38  ;;  %v4930_v57 = vrot.slane %v14196_v46, 2  ;;  %v4932_v45 = vrot.slane %v14200_v17, 2 }
 0x3b9   : > { %v14356_v1 = vsel %vm685_vm1, %v4920_v62, %v4922_v11  ;;  %v4934_v38 = vrot.slane %v14204_v32, 2  ;;  %v4926_v5 = vsel %vm685_vm1, %v4924_v49, %v4925_v20  ;;  %v4928_v22 = vsel %vm685_vm1, %v4925_v20, %v4927_v44 }
 0x3ba   : > { %v4935_v37 = vrot.slane %v14208_v52, 2  ;;  %v4931_v7 = vsel %vm685_vm1, %v4929_v56, %v4930_v57  ;;  %v4933_v10 = vsel %vm685_vm1, %v4930_v57, %v4932_v45  ;;  %v4939_v39 = vrot.slane %v14216_v40, 2 }
 0x3bb   : > { %v4940_v46 = vrot.slane %v14220_v6, 2  ;;  %v4942_v32 = vrot.slane %v14224_v15, 2  ;;  %v4947_v21 = vrot.slane %v14236_v41, 2  ;;  %v4949_v36 = vrot.slane %v14240_v63, 2 }
 0x3bc   : > { %v4936_v17 = vsel %vm685_vm1, %v4934_v38, %v4935_v37  ;;  %v4938_v58 = vsel %vm685_vm1, %v4935_v37, %v4937_v43  ;;  %v4950_v6 = vrot.slane %v14244_v51, 2  ;;  %v4954_v62 = vrot.slane %v14252_v31, 2 }
 0x3bd   : > { %v4941_v52 = vsel %vm685_vm1, %v4939_v39, %v4940_v46  ;;  %v4943_v40 = vsel %vm685_vm1, %v4940_v46, %v4942_v32  ;;  %v4946_v15 = vsel %vm685_vm1, %v4944_v26, %v4945_v24  ;;  %v4948_v0 = vsel %vm685_vm1, %v4945_v24, %v4947_v21  ;;  %v17926_v32 = vld [vmem:[#allocation69_spill] sm:$0xff]  ;;  %v17930_v24 = vld [vmem:[#allocation35_spill] sm:$0xff] }
 0x3be   : > { %v4955_v11 = vrot.slane %v14256_v48, 2  ;;  %v4951_v41 = vsel %vm685_vm1, %v4949_v36, %v4950_v6  ;;  %v4953_v63 = vsel %vm685_vm1, %v4950_v6, %v4952_v55  ;;  %v4959_v49 = vrot.slane %v14264_v29, 2  ;;  %v17940_v55 = vld [vmem:[#allocation80_spill] sm:$0xff] }
 0x3bf   : > { %v4960_v51 = vrot.slane %v14268_v50, 2  ;;  %v4962_v20 = vrot.slane %v14272_v12, 2  ;;  %v4964_v44 = vrot.slane %v14276_v53, 2  ;;  %v4967_v56 = vrot.slane %v14284_v61, 2 }
 0x3c0   : > { %v4956_v3 = vsel %vm685_vm1, %v4954_v62, %v4955_v11  ;;  %v4958_v31 = vsel %vm685_vm1, %v4955_v11, %v4957_v30  ;;  %v4969_v57 = vrot.slane %v14291_v18, 2  ;;  %v4970_v50 = vrot.slane %v14298_v9, 2  ;;  %v17944_v30 = vld [vmem:[#allocation52_spill] sm:$0xff] }
 0x3c1   : > { %v4961_v48 = vsel %vm685_vm1, %v4959_v49, %v4960_v51  ;;  %v4963_v29 = vsel %vm685_vm1, %v4960_v51, %v4962_v20  ;;  %v4972_v45 = vrot.slane %v14302_v2, 2  ;;  %v4974_v38 = vrot.slane %v14306_v4, 2  ;;  %v17946_v49 = vld [vmem:[#allocation53_spill] sm:$0xff] }
 0x3c2   : > { %v4966_v12 = vsel %vm685_vm1, %v4964_v44, %v4965_v35  ;;  %v4968_v53 = vsel %vm685_vm1, %v4965_v35, %v4967_v56  ;;  %v4975_v37 = vrot.slane %v14310_v28, 2  ;;  %v4977_v16 = vrot.slane %v14314_v54, 2 }
 0x3c3   : > { %v4971_v61 = vsel %vm685_vm1, %v4969_v57, %v4970_v50  ;;  %v4973_v18 = vsel %vm685_vm1, %v4970_v50, %v4972_v45  ;;  %v4979_v43 = vrot.slane %v14318_v27, 2  ;;  %v4980_v9 = vrot.slane %v14322_v34, 2  ;;  %v17928_v34 = vld [vmem:[#allocation70_spill] sm:$0xff]  ;;  %v17962_v45 = vld [vmem:[#allocation83_spill] sm:$0xff] }
 0x3c4   : > { %v4976_v2 = vsel %vm685_vm1, %v4974_v38, %v4975_v37  ;;  %v4978_v4 = vsel %vm685_vm1, %v4975_v37, %v4977_v16  ;;  %v4982_v39 = vrot.slane %v14326_v14, 2  ;;  %v14414_v46 = vadd.f32 %v14329_v19, %v14041_v47  ;;  %v17932_v19 = vld [vmem:[#allocation36_spill] sm:$0xff]  ;;  %v17964_v38 = vld [vmem:[#allocation38_spill] sm:$0xff]  ;;  %v17966_v37 = vld [vmem:[#allocation43_spill] sm:$0xff] }
 0x3c5   : > { %v4981_v54 = vsel %vm685_vm1, %v4979_v43, %v4980_v9  ;;  %v14419_v28 = vadd.f32 %v14332_v33, %v14046_v13  ;;  %v14423_v27 = vadd.f32 %v14335_v59, %v17926_v32  ;;  %v14427_v26 = vadd.f32 %v14338_v23, %v17928_v34  ;;  %v17934_v13 = vld [vmem:[#allocation40_spill] sm:$0xff]  ;;  %v17936_v59 = vld [vmem:[#allocation41_spill] sm:$0xff] }
 0x3c6   : > { %v4983_v14 = vsel %vm685_vm1, %v4980_v9, %v4982_v39  ;;  %v14432_v47 = vadd.f32 %v14342_v25, %v17930_v24  ;;  %v14436_v21 = vadd.f32 %v14345_v42, %v17932_v19  ;;  %v14440_v33 = vadd.f32 %v14350_v8, %v17934_v13  ;;  %v17938_v23 = vld [vmem:[#allocation68_spill] sm:$0xff]  ;;  %v17942_v25 = vld [vmem:[#allocation61_spill] sm:$0xff] }
 0x3c7   : > { %17927 = vst [vmem:[#allocation34_spill] sm:$0xff] %v14423_v27  ;;  %17929 = vst [vmem:[#allocation72_spill] sm:$0xff] %v14427_v26  ;;  %v14444_v36 = vadd.f32 %v14356_v1, %v17936_v59  ;;  %v14447_v6 = vadd.f32 %v4926_v5, %v17938_v23  ;;  %v14450_v62 = vadd.f32 %v4928_v22, %v17940_v55  ;;  %v17948_v8 = vld [vmem:[#allocation57_spill] sm:$0xff]  ;;  %v17950_v1 = vld [vmem:[#allocation75_spill] sm:$0xff] }
 0x3c8   : > { %17931 = vst [vmem:[#allocation58_spill] sm:$0xff] %v14432_v47  ;;  %17933 = vst [vmem:[#allocation62_spill] sm:$0xff] %v14436_v21  ;;  %v14453_v11 = vadd.f32 %v4931_v7, %v17942_v25  ;;  %v14456_v42 = vadd.f32 %v4933_v10, %v17944_v30  ;;  %v14459_v51 = vadd.f32 %v4936_v17, %v17946_v49  ;;  %v17952_v5 = vld [vmem:[#allocation66_spill] sm:$0xff]  ;;  %v17954_v22 = vld [vmem:[#allocation59_spill] sm:$0xff] }
 0x3c9   : > { %17935 = vst [vmem:[#allocation69_spill] sm:$0xff] %v14440_v33  ;;  %17937 = vst [vmem:[#allocation70_spill] sm:$0xff] %v14444_v36  ;;  %v14462_v20 = vadd.f32 %v4938_v58, %v17948_v8  ;;  %v14465_v44 = vadd.f32 %v4941_v52, %v17950_v1  ;;  %v14468_v35 = vadd.f32 %v4943_v40, %v17952_v5  ;;  %v17956_v7 = vld [vmem:[#allocation74_spill] sm:$0xff]  ;;  %v17958_v10 = vld [vmem:[#allocation7_spill] sm:$0xff] }
 0x3ca   : > { %17939 = vst [vmem:[#allocation35_spill] sm:$0xff] %v14447_v6  ;;  %17941 = vst [vmem:[#allocation36_spill] sm:$0xff] %v14450_v62  ;;  %v14471_v56 = vadd.f32 %v4946_v15, %v17954_v22  ;;  %v14474_v57 = vadd.f32 %v4948_v0, %v17956_v7  ;;  %v14477_v50 = vadd.f32 %v4951_v41, %v17958_v10  ;;  %v14482_v17 = vld [vmem:[%s15337_s1 + $0x17] ss:$0 sm:$0xff]  ;;  %v17960_v58 = vld [vmem:[#allocation82_spill] sm:$0xff] }
 0x3cb   : > { %17943 = vst [vmem:[#allocation40_spill] sm:$0xff] %v14453_v11  ;;  %17945 = vst [vmem:[#allocation41_spill] sm:$0xff] %v14456_v42  ;;  %v14485_v52 = vadd.f32 %v4953_v63, %v17960_v58  ;;  %v14488_v40 = vadd.f32 %v4956_v3, %v17962_v45  ;;  %v14491_v15 = vadd.f32 %v4958_v31, %v17964_v38  ;;  %v17968_v16 = vld [vmem:[#allocation60_spill] sm:$0xff]  ;;  %v17972_v39 = vld [vmem:[#allocation65_spill] sm:$0xff] }
 0x3cc   : > { %17947 = vst [vmem:[#allocation68_spill] sm:$0xff] %v14459_v51  ;;  %17949 = vst [vmem:[#allocation80_spill] sm:$0xff] %v14462_v20  ;;  %v14494_v0 = vadd.f32 %v4961_v48, %v17966_v37  ;;  %v14497_v41 = vadd.f32 %v4963_v29, %v17968_v16  ;;  %v17970_v43 = vld [vmem:[#allocation64_spill] sm:$0xff]  ;;  %v14503_v32 = vadd.f32 %v4968_v53, %v17972_v39  ;;  %v17974_v63 = vld [vmem:[#allocation54_spill] sm:$0xff] }
 0x3cd   : > { %17951 = vst [vmem:[#allocation61_spill] sm:$0xff] %v14465_v44  ;;  %17953 = vst [vmem:[#allocation52_spill] sm:$0xff] %v14468_v35  ;;  %v14500_v9 = vadd.f32 %v4966_v12, %v17970_v43  ;;  %v14506_v34 = vadd.f32 %v4971_v61, %v17974_v63  ;;  %v17976_v3 = vld [vmem:[#allocation55_spill] sm:$0xff]  ;;  %v17978_v31 = vld [vmem:[#allocation8_spill] sm:$0xff] }
 0x3ce   : > { %17955 = vst [vmem:[#allocation53_spill] sm:$0xff] %v14471_v56  ;;  %17957 = vst [vmem:[#allocation57_spill] sm:$0xff] %v14474_v57  ;;  %v14509_v24 = vadd.f32 %v4973_v18, %v17976_v3  ;;  %v14512_v19 = vadd.f32 %v4976_v2, %v17978_v31  ;;  %v17980_v48 = vld [vmem:[#allocation9_spill] sm:$0xff]  ;;  %v17982_v29 = vld [vmem:[#allocation12_spill] sm:$0xff] }
 0x3cf   : > { %17959 = vst [vmem:[#allocation75_spill] sm:$0xff] %v14477_v50  ;;  %17961 = vst [vmem:[#allocation66_spill] sm:$0xff] %v14485_v52  ;;  %v14515_v13 = vadd.f32 %v4978_v4, %v17980_v48  ;;  %v14518_v59 = vadd.f32 %v4981_v54, %v17982_v29  ;;  %v17984_v12 = vld [vmem:[#allocation15_spill] sm:$0xff]  ;;  %v17986_v53 = vld [vmem:[#allocation45_spill] sm:$0xff] }
 0x3d0   : > { %17963 = vst [vmem:[#allocation59_spill] sm:$0xff] %v14488_v40  ;;  %17965 = vst [vmem:[#allocation74_spill] sm:$0xff] %v14491_v15  ;;  %v14521_v23 = vadd.f32 %v4983_v14, %v17984_v12  ;;  %v5054_v55 = vmul.f32 %v17986_v53, %v14482_v17  ;;  %v17987_v61 = vld [vmem:[#allocation46_spill] sm:$0xff]  ;;  %v17988_v18 = vld [vmem:[#allocation77_spill] sm:$0xff] }
 0x3d1   : > { %17967 = vst [vmem:[#allocation7_spill] sm:$0xff] %v14494_v0  ;;  %17969 = vst [vmem:[#allocation82_spill] sm:$0xff] %v14497_v41  ;;  %v5055_v25 = vmul.f32 %v17987_v61, %v14482_v17  ;;  %v5056_v30 = vmul.f32 %v17988_v18, %v14482_v17  ;;  %v17989_v2 = vld [vmem:[#allocation49_spill] sm:$0xff]  ;;  %v17990_v4 = vld [vmem:[#allocation50_spill] sm:$0xff] }
 0x3d2   : > { %17971 = vst [vmem:[#allocation83_spill] sm:$0xff] %v14500_v9  ;;  %17973 = vst [vmem:[#allocation38_spill] sm:$0xff] %v14503_v32  ;;  %v5057_v49 = vmul.f32 %v17989_v2, %v14482_v17  ;;  %v5058_v8 = vmul.f32 %v17990_v4, %v14482_v17  ;;  %v17991_v54 = vld [vmem:[#allocation78_spill] sm:$0xff]  ;;  %v17993_v22 = vld [vmem:[#allocation11_spill] sm:$0xff]  ;;  %v5150_v62 = vrot.slane %v5054_v55, 3 }
 0x3d3   : > { %17975 = vst [vmem:[#allocation43_spill] sm:$0xff] %v14506_v34  ;;  %17977 = vst [vmem:[#allocation60_spill] sm:$0xff] %v14509_v24  ;;  %v5059_v1 = vmul.f32 %v17991_v54, %v14482_v17  ;;  %v17992_v14 = vld [vmem:[#allocation10_spill] sm:$0xff]  ;;  %v5061_v7 = vmul.f32 %v17993_v22, %v14482_v17  ;;  %v17994_v10 = vld [vmem:[#allocation81_spill] sm:$0xff]  ;;  %v5151_v6 = vrot.slane %v5055_v25, 3 }
 0x3d4   : > { %17979 = vst [vmem:[#allocation64_spill] sm:$0xff] %v14512_v19  ;;  %17981 = vst [vmem:[#allocation65_spill] sm:$0xff] %v14515_v13  ;;  %v5060_v5 = vmul.f32 %v17992_v14, %v14482_v17  ;;  %v5062_v58 = vmul.f32 %v17994_v10, %v14482_v17  ;;  %v17995_v45 = vld [vmem:[#allocation13_spill] sm:$0xff]  ;;  %v17996_v37 = vld [vmem:[#allocation14_spill] sm:$0xff]  ;;  %v5155_v36 = vrot.slane %v5057_v49, 3  ;;  %v5156_v33 = vrot.slane %v5058_v8, 3 }
 0x3d5   : > { %17983 = vst [vmem:[#allocation54_spill] sm:$0xff] %v14518_v59  ;;  %17985 = vst [vmem:[#allocation55_spill] sm:$0xff] %v14521_v23  ;;  %v5063_v38 = vmul.f32 %v17995_v45, %v14482_v17  ;;  %v14545_v16 = vmul.f32 %v17996_v37, %v14482_v17  ;;  %v17997_v43 = vld [vmem:[#allocation25_spill] sm:$0xff]  ;;  %v17998_v63 = vld [vmem:[#allocation16_spill] sm:$0xff]  ;;  %v5158_v21 = vrot.slane %v5059_v1, 3  ;;  %v14702_v47 = vsel %vm932_vm2, %v5150_v62, %v5151_v6 }
 0x3d6   : > { %v14549_v39 = vmul.f32 %v17997_v43, %v14482_v17  ;;  %v14553_v3 = vmul.f32 %v17998_v63, %v14482_v17  ;;  %v17999_v31 = vld [vmem:[#allocation19_spill] sm:$0xff]  ;;  %v18000_v29 = vld [vmem:[#allocation21_spill] sm:$0xff]  ;;  %v18002_v2 = vld [vmem:[#allocation24_spill] sm:$0xff]  ;;  %v5161_v26 = vrot.slane %v5061_v7, 3  ;;  %v14708_v27 = vsel %vm932_vm2, %v5155_v36, %v5156_v33 }
 0x3d7   : > { %v14557_v48 = vmul.f32 %v17999_v31, %v14482_v17  ;;  %v14561_v12 = vmul.f32 %v18000_v29, %v14482_v17  ;;  %v18001_v53 = vld [vmem:[#allocation23_spill] sm:$0xff]  ;;  %v14569_v4 = vmul.f32 %v18002_v2, %v14482_v17  ;;  %v18003_v14 = vld [vmem:[#allocation22_spill] sm:$0xff]  ;;  %v18004_v45 = vld [vmem:[#allocation37_spill] sm:$0xff]  ;;  %v5165_v55 = vrot.slane %v5063_v38, 3 }
 0x3d8   : > { %v14565_v61 = vmul.f32 %v18001_v53, %v14482_v17  ;;  %v14573_v22 = vmul.f32 %v18003_v14, %v14482_v17  ;;  %v14577_v37 = vmul.f32 %v18004_v45, %v14482_v17  ;;  %v18005_v63 = vld [vmem:[#allocation33_spill] sm:$0xff]  ;;  %v18006_v29 = vld [vmem:[#allocation26_spill] sm:$0xff]  ;;  %v18008_v10 = vld [vmem:[#allocation71_spill] sm:$0xff]  ;;  %v5166_v25 = vrot.slane %v14545_v16, 3 }
 0x3d9   : > { %v14581_v31 = vmul.f32 %v18005_v63, %v14482_v17  ;;  %v14585_v53 = vmul.f32 %v18006_v29, %v14482_v17  ;;  %v18007_v43 = vld [vmem:[#allocation42_spill] sm:$0xff]  ;;  %v14593_v14 = vmul.f32 %v18008_v10, %v14482_v17  ;;  %v18009_v54 = vld [vmem:[#allocation27_spill] sm:$0xff]  ;;  %v18010_v18 = vld [vmem:[#allocation76_spill] sm:$0xff]  ;;  %v5171_v36 = vrot.slane %v14557_v48, 3 }
 0x3da   : > { %v14589_v2 = vmul.f32 %v18007_v43, %v14482_v17  ;;  %v14597_v45 = vmul.f32 %v18009_v54, %v14482_v17  ;;  %v14601_v63 = vmul.f32 %v18010_v18, %v14482_v17  ;;  %v18011_v23 = vld [vmem:[#allocation39_spill] sm:$0xff]  ;;  %v18012_v59 = vld [vmem:[#allocation73_spill] sm:$0xff]  ;;  %v18014_v54 = vld [vmem:[#allocation56_spill] sm:$0xff]  ;;  %v14723_v49 = vsel %vm932_vm2, %v5165_v55, %v5166_v25 }
 0x3db   : > { %v14605_v29 = vmul.f32 %v18011_v23, %v14482_v17  ;;  %v14609_v43 = vmul.f32 %v18012_v59, %v14482_v17  ;;  %v18013_v13 = vld [vmem:[#allocation51_spill] sm:$0xff]  ;;  %v14617_v19 = vmul.f32 %v18014_v54, %v14482_v17  ;;  %v18015_v18 = vld [vmem:[#allocation5_spill] sm:$0xff]  ;;  %v18017_v59 = vld [vmem:[#allocation48_spill] sm:$0xff]  ;;  %v5180_v1 = vrot.slane %v14577_v37, 3 }
 0x3dc   : > { %v14613_v10 = vmul.f32 %v18013_v13, %v14482_v17  ;;  %v14621_v24 = vmul.f32 %v18015_v18, %v14482_v17  ;;  %v18016_v23 = vld [vmem:[#allocation47_spill] sm:$0xff]  ;;  %v14629_v32 = vmul.f32 %v18017_v59, %v14482_v17  ;;  %v18018_v13 = vld [vmem:[#allocation6_spill] sm:$0xff]  ;;  %v18019_v54 = vld [vmem:[#allocation29_spill] sm:$0xff]  ;;  %v5183_v38 = vrot.slane %v14585_v53, 3 }
 0x3dd   : > { %v14625_v34 = vmul.f32 %v18016_v23, %v14482_v17  ;;  %v14633_v9 = vmul.f32 %v18018_v13, %v14482_v17  ;;  %v14637_v41 = vmul.f32 %v18019_v54, %v14482_v17  ;;  %v18020_v0 = vld [vmem:[#allocation30_spill] sm:$0xff]  ;;  %v18021_v15 = vld [vmem:[#allocation17_spill] sm:$0xff]  ;;  %v18023_v52 = vld [vmem:[#allocation31_spill] sm:$0xff]  ;;  %v5186_v48 = vrot.slane %v14593_v14, 3 }
 0x3de   : > { %v14641_v18 = vmul.f32 %v18020_v0, %v14482_v17  ;;  %v14645_v23 = vmul.f32 %v18021_v15, %v14482_v17  ;;  %v18022_v40 = vld [vmem:[#allocation18_spill] sm:$0xff]  ;;  %v14653_v13 = vmul.f32 %v18023_v52, %v14482_v17  ;;  %v18024_v50 = vld [vmem:[#allocation32_spill] sm:$0xff]  ;;  %v18027_v35 = vld [vmem:[#allocation63_spill] sm:$0xff]  ;;  %v5193_v53 = vrot.slane %v14609_v43, 3 }
 0x3df   : > { %v14649_v59 = vmul.f32 %v18022_v40, %v14482_v17  ;;  %v14657_v54 = vmul.f32 %v18024_v50, %v14482_v17  ;;  %v18025_v57 = vld [vmem:[#allocation20_spill] sm:$0xff]  ;;  %v14669_v40 = vmul.f32 %v18027_v35, %v14482_v17  ;;  %v14672_v44 = vld [vmem:[%s6195_s3 + $0x1b0] sm:$0xff]  ;;  %v5196_v14 = vrot.slane %v14617_v19, 3 }
 0x3e0   : > { %v14661_v0 = vmul.f32 %v18025_v57, %v14482_v17  ;;  %v18026_v56 = vld [vmem:[#allocation28_spill] sm:$0xff]  ;;  %18028 = vst [vmem:[#allocation8_spill] sm:$0xff] %v14672_v44  ;;  %v14676_v52 = vmul.f32 %v14672_v44, %v14482_v17  ;;  %v18030_v20 = vld [vmem:[#allocation67_spill] sm:$0xff]  ;;  %v14699_v44 = vmul.f32 %v14482_v17, %v13873_v60  ;;  %v5198_v55 = vrot.slane %v14621_v24, 3 }
 0x3e1   : > { %v14665_v15 = vmul.f32 %v18026_v56, %v14482_v17  ;;  %v14679_v50 = vld [vmem:[%s6195_s3 + $0x1b8] sm:$0xff]  ;;  %v14687_v56 = vmul.f32 %v18030_v20, %v14482_v17  ;;  %v18031_v51 = vld [vmem:[#allocation79_spill] sm:$0xff]  ;;  %v5160_v20 = vrot.slane %v5060_v5, 3  ;;  %v5206_v19 = vrot.slane %v14641_v18, 3 }
 0x3e2   : > { %18029 = vst [vmem:[#allocation9_spill] sm:$0xff] %v14679_v50  ;;  %v14683_v57 = vmul.f32 %v14679_v50, %v14482_v17  ;;  %v14691_v35 = vmul.f32 %v14482_v17, %v18031_v51  ;;  %v18032_v42 = vld [vmem:[#allocation44_spill] sm:$0xff]  ;;  %v5153_v50 = vrot.slane %v5056_v30, 3 }
 0x3e3   : > { %v14695_v11 = vmul.f32 %v14482_v17, %v18032_v42  ;;  %v5163_v42 = vrot.slane %v5062_v58, 3  ;;  %v14711_v17 = vsel %vm932_vm2, %v5156_v33, %v5158_v21  ;;  %v14715_v30 = vsel %vm932_vm2, %v5160_v20, %v5161_v26 }
 0x3e4   : > { %v14705_v51 = vsel %vm932_vm2, %v5151_v6, %v5153_v50  ;;  %v5168_v6 = vrot.slane %v14549_v39, 3  ;;  %v5170_v50 = vrot.slane %v14553_v3, 3  ;;  %v5173_v21 = vrot.slane %v14561_v12, 3 }
 0x3e5   : > { %v14718_v62 = vsel %vm932_vm2, %v5161_v26, %v5163_v42  ;;  %v5175_v33 = vrot.slane %v14565_v61, 3  ;;  %v5176_v20 = vrot.slane %v14569_v4, 3  ;;  %v5178_v26 = vrot.slane %v14573_v22, 3 }
 0x3e6   : > { %v14729_v8 = vsel %vm932_vm2, %v5166_v25, %v5168_v6  ;;  %v5172_v5 = vsel %vm932_vm2, %v5170_v50, %v5171_v36  ;;  %v5174_v7 = vsel %vm932_vm2, %v5171_v36, %v5173_v21  ;;  %v5181_v58 = vrot.slane %v14581_v31, 3 }
 0x3e7   : > { %v5177_v16 = vsel %vm932_vm2, %v5175_v33, %v5176_v20  ;;  %v5179_v39 = vsel %vm932_vm2, %v5176_v20, %v5178_v26  ;;  %v5185_v3 = vrot.slane %v14589_v2, 3  ;;  %v5188_v4 = vrot.slane %v14597_v45, 3 }
 0x3e8   : > { %v5182_v12 = vsel %vm932_vm2, %v5180_v1, %v5181_v58  ;;  %v5184_v61 = vsel %vm932_vm2, %v5181_v58, %v5183_v38  ;;  %v5190_v22 = vrot.slane %v14601_v63, 3  ;;  %v5191_v31 = vrot.slane %v14605_v29, 3 }
 0x3e9   : > { %v5187_v37 = vsel %vm932_vm2, %v5185_v3, %v5186_v48  ;;  %v5195_v42 = vrot.slane %v14613_v10, 3  ;;  %v5189_v2 = vsel %vm932_vm2, %v5186_v48, %v5188_v4  ;;  %v5200_v25 = vrot.slane %v14625_v34, 3  ;;  %v18033_v4 = vld [vmem:[#allocation34_spill] sm:$0xff] }
 0x3ea   : > { %v5192_v45 = vsel %vm932_vm2, %v5190_v22, %v5191_v31  ;;  %v5194_v63 = vsel %vm932_vm2, %v5191_v31, %v5193_v53  ;;  %v5201_v6 = vrot.slane %v14629_v32, 3  ;;  %v5203_v29 = vrot.slane %v14633_v9, 3  ;;  %v18035_v31 = vld [vmem:[#allocation58_spill] sm:$0xff] }
 0x3eb   : > { %v5197_v43 = vsel %vm932_vm2, %v5195_v42, %v5196_v14  ;;  %v5199_v10 = vsel %vm932_vm2, %v5196_v14, %v5198_v55  ;;  %v5205_v50 = vrot.slane %v14637_v41, 3  ;;  %v5208_v36 = vrot.slane %v14645_v23, 3  ;;  %v18043_v55 = vld [vmem:[#allocation36_spill] sm:$0xff] }
 0x3ec   : > { %v5202_v24 = vsel %vm932_vm2, %v5200_v25, %v5201_v6  ;;  %v5204_v34 = vsel %vm932_vm2, %v5201_v6, %v5203_v29  ;;  %v5210_v21 = vrot.slane %v14649_v59, 3  ;;  %v5211_v9 = vrot.slane %v14653_v13, 3  ;;  %v18047_v29 = vld [vmem:[#allocation41_spill] sm:$0xff] }
 0x3ed   : > { %v5207_v32 = vsel %vm932_vm2, %v5205_v50, %v5206_v19  ;;  %v5213_v33 = vrot.slane %v14657_v54, 3  ;;  %v5215_v20 = vrot.slane %v14661_v0, 3  ;;  %v5209_v41 = vsel %vm932_vm2, %v5206_v19, %v5208_v36  ;;  %v18049_v50 = vld [vmem:[#allocation68_spill] sm:$0xff] }
 0x3ee   : > { %v5216_v18 = vrot.slane %v14665_v15, 3  ;;  %v5218_v26 = vrot.slane %v14669_v40, 3  ;;  %v5220_v1 = vrot.slane %v14676_v52, 3  ;;  %v5212_v23 = vsel %vm932_vm2, %v5210_v21, %v5211_v9 }
 0x3ef   : > { %v5214_v59 = vsel %vm932_vm2, %v5211_v9, %v5213_v33  ;;  %v5221_v58 = vrot.slane %v14683_v57, 3  ;;  %v5223_v13 = vrot.slane %v14687_v56, 3  ;;  %v5225_v38 = vrot.slane %v14691_v35, 3 }
 0x3f0   : > { %v5217_v54 = vsel %vm932_vm2, %v5215_v20, %v5216_v18  ;;  %v5219_v0 = vsel %vm932_vm2, %v5216_v18, %v5218_v26  ;;  %v5226_v15 = vrot.slane %v14695_v11, 3  ;;  %v5228_v3 = vrot.slane %v14699_v44, 3  ;;  %v18034_v11 = vld [vmem:[#allocation72_spill] sm:$0xff] }
 0x3f1   : > { %v5222_v40 = vsel %vm932_vm2, %v5220_v1, %v5221_v58  ;;  %v5224_v52 = vsel %vm932_vm2, %v5221_v58, %v5223_v13  ;;  %v14787_v48 = vadd.f32 %v14702_v47, %v14414_v46  ;;  %v14792_v57 = vadd.f32 %v14705_v51, %v14419_v28  ;;  %v18036_v47 = vld [vmem:[#allocation62_spill] sm:$0xff]  ;;  %v18037_v28 = vld [vmem:[#allocation69_spill] sm:$0xff] }
 0x3f2   : > { %v5227_v56 = vsel %vm932_vm2, %v5225_v38, %v5226_v15  ;;  %v14796_v35 = vadd.f32 %v14708_v27, %v18033_v4  ;;  %v14800_v22 = vadd.f32 %v14711_v17, %v18034_v11  ;;  %v5229_v44 = vsel %vm932_vm2, %v5226_v15, %v5228_v3  ;;  %v18039_v27 = vld [vmem:[#allocation70_spill] sm:$0xff]  ;;  %v18041_v17 = vld [vmem:[#allocation35_spill] sm:$0xff]  ;;  %v18079_v11 = vld [vmem:[#allocation60_spill] sm:$0xff] }
 0x3f3   : > { %v14805_v46 = vadd.f32 %v14715_v30, %v18035_v31  ;;  %v14809_v53 = vadd.f32 %v14718_v62, %v18036_v47  ;;  %v14813_v51 = vadd.f32 %v14723_v49, %v18037_v28  ;;  %v14817_v42 = vadd.f32 %v14729_v8, %v18039_v27  ;;  %v18045_v30 = vld [vmem:[#allocation40_spill] sm:$0xff]  ;;  %v18053_v8 = vld [vmem:[#allocation61_spill] sm:$0xff]  ;;  %v18073_v38 = vld [vmem:[#allocation83_spill] sm:$0xff] }
 0x3f4   : > { %v14820_v14 = vadd.f32 %v5172_v5, %v18041_v17  ;;  %v14823_v25 = vadd.f32 %v5174_v7, %v18043_v55  ;;  %v14826_v6 = vadd.f32 %v5177_v16, %v18045_v30  ;;  %v14829_v62 = vadd.f32 %v5179_v39, %v18047_v29  ;;  %v18051_v49 = vld [vmem:[#allocation80_spill] sm:$0xff]  ;;  %v18057_v7 = vld [vmem:[#allocation53_spill] sm:$0xff]  ;;  %v18061_v39 = vld [vmem:[#allocation75_spill] sm:$0xff] }
 0x3f5   : > { %18038 = vst [vmem:[#allocation12_spill] sm:$0xff] %v14813_v51  ;;  %18040 = vst [vmem:[#allocation15_spill] sm:$0xff] %v14817_v42  ;;  %v14832_v19 = vadd.f32 %v5182_v12, %v18049_v50  ;;  %v14835_v36 = vadd.f32 %v5184_v61, %v18051_v49  ;;  %v14838_v21 = vadd.f32 %v5187_v37, %v18053_v8  ;;  %v18055_v5 = vld [vmem:[#allocation52_spill] sm:$0xff]  ;;  %v18059_v16 = vld [vmem:[#allocation57_spill] sm:$0xff] }
 0x3f6   : > { %18042 = vst [vmem:[#allocation45_spill] sm:$0xff] %v14820_v14  ;;  %18044 = vst [vmem:[#allocation46_spill] sm:$0xff] %v14823_v25  ;;  %v14841_v9 = vadd.f32 %v5189_v2, %v18055_v5  ;;  %v14844_v33 = vadd.f32 %v5192_v45, %v18057_v7  ;;  %v14847_v20 = vadd.f32 %v5194_v63, %v18059_v16  ;;  %v14855_v12 = vld [vmem:[%s15337_s1 + $0x18] ss:$0 sm:$0xff]  ;;  %v18063_v61 = vld [vmem:[#allocation66_spill] sm:$0xff] }
 0x3f7   : > { %18046 = vst [vmem:[#allocation49_spill] sm:$0xff] %v14826_v6  ;;  %18048 = vst [vmem:[#allocation50_spill] sm:$0xff] %v14829_v62  ;;  %v14850_v18 = vadd.f32 %v5197_v43, %v18061_v39  ;;  %v14858_v37 = vadd.f32 %v5199_v10, %v18063_v61  ;;  %v18065_v2 = vld [vmem:[#allocation59_spill] sm:$0xff]  ;;  %v18067_v45 = vld [vmem:[#allocation74_spill] sm:$0xff]  ;;  %v14873_v15 = vadd.f32 %v5212_v23, %v18073_v38 }
 0x3f8   : > { %18050 = vst [vmem:[#allocation10_spill] sm:$0xff] %v14832_v19  ;;  %18052 = vst [vmem:[#allocation11_spill] sm:$0xff] %v14835_v36  ;;  %v14861_v26 = vadd.f32 %v5202_v24, %v18065_v2  ;;  %v14864_v1 = vadd.f32 %v5204_v34, %v18067_v45  ;;  %v18069_v63 = vld [vmem:[#allocation7_spill] sm:$0xff]  ;;  %v18071_v43 = vld [vmem:[#allocation82_spill] sm:$0xff]  ;;  %v14882_v34 = vadd.f32 %v5219_v0, %v18079_v11 }
 0x3f9   : > { %18054 = vst [vmem:[#allocation13_spill] sm:$0xff] %v14838_v21  ;;  %18056 = vst [vmem:[#allocation14_spill] sm:$0xff] %v14841_v9  ;;  %v14867_v58 = vadd.f32 %v5207_v32, %v18069_v63  ;;  %v14870_v13 = vadd.f32 %v5209_v41, %v18071_v43  ;;  %v18075_v3 = vld [vmem:[#allocation38_spill] sm:$0xff]  ;;  %v18077_v4 = vld [vmem:[#allocation43_spill] sm:$0xff] }
 0x3fa   : > { %18058 = vst [vmem:[#allocation16_spill] sm:$0xff] %v14844_v33  ;;  %18060 = vst [vmem:[#allocation19_spill] sm:$0xff] %v14847_v20  ;;  %v14876_v10 = vadd.f32 %v5214_v59, %v18075_v3  ;;  %v14879_v24 = vadd.f32 %v5217_v54, %v18077_v4  ;;  %v18081_v31 = vld [vmem:[#allocation64_spill] sm:$0xff]  ;;  %v18083_v47 = vld [vmem:[#allocation65_spill] sm:$0xff] }
 0x3fb   : > { %18062 = vst [vmem:[#allocation23_spill] sm:$0xff] %v14850_v18  ;;  %18064 = vst [vmem:[#allocation24_spill] sm:$0xff] %v14858_v37  ;;  %v14885_v32 = vadd.f32 %v5222_v40, %v18081_v31  ;;  %v14888_v41 = vadd.f32 %v5224_v52, %v18083_v47  ;;  %v18085_v28 = vld [vmem:[#allocation54_spill] sm:$0xff]  ;;  %v18087_v27 = vld [vmem:[#allocation55_spill] sm:$0xff] }
 0x3fc   : > { %18066 = vst [vmem:[#allocation37_spill] sm:$0xff] %v14861_v26  ;;  %18068 = vst [vmem:[#allocation33_spill] sm:$0xff] %v14864_v1  ;;  %v14891_v23 = vadd.f32 %v5227_v56, %v18085_v28  ;;  %v14894_v59 = vadd.f32 %v5229_v44, %v18087_v27  ;;  %v6003_v54 = vld [vmem:[%s6195_s3 + $0x60] sm:$0xff]  ;;  %v6004_v0 = vld [vmem:[%s6195_s3 + $0x68] sm:$0xff] }
 0x3fd   : > { %18070 = vst [vmem:[#allocation42_spill] sm:$0xff] %v14867_v58  ;;  %18072 = vst [vmem:[#allocation71_spill] sm:$0xff] %v14870_v13  ;;  %v14898_v17 = vmul.f32 %v6003_v54, %v14855_v12  ;;  %v14902_v40 = vmul.f32 %v6004_v0, %v14855_v12  ;;  %v18089_v55 = vld [vmem:[#allocation77_spill] sm:$0xff]  ;;  %v6005_v56 = vld [vmem:[%s6195_s3 + $0x78] sm:$0xff] }
 0x3fe   : > { %18074 = vst [vmem:[#allocation76_spill] sm:$0xff] %v14873_v15  ;;  %18076 = vst [vmem:[#allocation39_spill] sm:$0xff] %v14876_v10  ;;  %v14906_v52 = vmul.f32 %v18089_v55, %v14855_v12  ;;  %v14910_v30 = vmul.f32 %v6005_v56, %v14855_v12  ;;  %v6006_v44 = vld [vmem:[%s6195_s3 + $0x80] sm:$0xff]  ;;  %v18090_v50 = vld [vmem:[#allocation78_spill] sm:$0xff] }
 0x3ff   : > { %18078 = vst [vmem:[#allocation51_spill] sm:$0xff] %v14879_v24  ;;  %18080 = vst [vmem:[#allocation56_spill] sm:$0xff] %v14882_v34  ;;  %v14914_v29 = vmul.f32 %v6006_v44, %v14855_v12  ;;  %v14918_v49 = vmul.f32 %v18090_v50, %v14855_v12  ;;  %v6007_v8 = vld [vmem:[%s6195_s3 + $0x90] sm:$0xff]  ;;  %v6008_v7 = vld [vmem:[%s6195_s3 + $0x98] sm:$0xff]  ;;  %v5396_v25 = vrot.slane %v14898_v17, 4 }
 0x400   : > { %18082 = vst [vmem:[#allocation47_spill] sm:$0xff] %v14885_v32  ;;  %18084 = vst [vmem:[#allocation48_spill] sm:$0xff] %v14888_v41  ;;  %v14922_v5 = vmul.f32 %v6007_v8, %v14855_v12  ;;  %v14926_v16 = vmul.f32 %v6008_v7, %v14855_v12  ;;  %v18091_v39 = vld [vmem:[#allocation81_spill] sm:$0xff]  ;;  %v6009_v2 = vld [vmem:[%s6195_s3 + $0xa8] sm:$0xff]  ;;  %v5399_v14 = vrot.slane %v14906_v52, 4 }
 0x401   : > { %18086 = vst [vmem:[#allocation79_spill] sm:$0xff] %v14891_v23  ;;  %18088 = vst [vmem:[#allocation44_spill] sm:$0xff] %v14894_v59  ;;  %v14930_v61 = vmul.f32 %v18091_v39, %v14855_v12  ;;  %v14934_v45 = vmul.f32 %v6009_v2, %v14855_v12  ;;  %v6010_v63 = vld [vmem:[%s6195_s3 + $0xb0] sm:$0xff]  ;;  %v18092_v38 = vld [vmem:[#allocation25_spill] sm:$0xff]  ;;  %v5402_v42 = vrot.slane %v14914_v29, 4 }
 0x402   : > { %v14938_v43 = vmul.f32 %v6010_v63, %v14855_v12  ;;  %v14942_v3 = vmul.f32 %v18092_v38, %v14855_v12  ;;  %v6011_v4 = vld [vmem:[%s6195_s3 + $0xc0] sm:$0xff]  ;;  %v6012_v31 = vld [vmem:[%s6195_s3 + $0xc8] sm:$0xff]  ;;  %v6013_v54 = vld [vmem:[%s6195_s3 + $0xd8] sm:$0xff]  ;;  %v5406_v51 = vrot.slane %v14922_v5, 4 }
 0x403   : > { %v14946_v11 = vmul.f32 %v6011_v4, %v14855_v12  ;;  %v14950_v47 = vmul.f32 %v6012_v31, %v14855_v12  ;;  %v18093_v28 = vld [vmem:[#allocation21_spill] sm:$0xff]  ;;  %v14958_v0 = vmul.f32 %v6013_v54, %v14855_v12  ;;  %v18094_v44 = vld [vmem:[#allocation22_spill] sm:$0xff]  ;;  %v6015_v8 = vld [vmem:[%s6195_s3 + $0xf0] sm:$0xff]  ;;  %v5409_v17 = vrot.slane %v14930_v61, 4 }
 0x404   : > { %v14954_v27 = vmul.f32 %v18093_v28, %v14855_v12  ;;  %v6014_v55 = vld [vmem:[%s6195_s3 + $0xe0] sm:$0xff]  ;;  %v14966_v50 = vmul.f32 %v18094_v44, %v14855_v12  ;;  %v14970_v7 = vmul.f32 %v6015_v8, %v14855_v12  ;;  %v6016_v39 = vld [vmem:[%s6195_s3 + $0xf8] sm:$0xff]  ;;  %v18095_v63 = vld [vmem:[#allocation26_spill] sm:$0xff]  ;;  %v5412_v29 = vrot.slane %v14938_v43, 4 }
 0x405   : > { %v14962_v56 = vmul.f32 %v6014_v55, %v14855_v12  ;;  %v14974_v2 = vmul.f32 %v6016_v39, %v14855_v12  ;;  %v14978_v38 = vmul.f32 %v18095_v63, %v14855_v12  ;;  %v6017_v4 = vld [vmem:[%s6195_s3 + $0x108] sm:$0xff]  ;;  %v6018_v28 = vld [vmem:[%s6195_s3 + $0x110] sm:$0xff]  ;;  %v6019_v8 = vld [vmem:[%s6195_s3 + $0x120] sm:$0xff]  ;;  %v5416_v5 = vrot.slane %v14946_v11, 4 }
 0x406   : > { %v14982_v31 = vmul.f32 %v6017_v4, %v14855_v12  ;;  %v14986_v54 = vmul.f32 %v6018_v28, %v14855_v12  ;;  %v18096_v55 = vld [vmem:[#allocation27_spill] sm:$0xff]  ;;  %v14994_v39 = vmul.f32 %v6019_v8, %v14855_v12  ;;  %v6020_v63 = vld [vmem:[%s6195_s3 + $0x128] sm:$0xff]  ;;  %v18097_v4 = vld [vmem:[#allocation73_spill] sm:$0xff]  ;;  %v5419_v61 = vrot.slane %v14954_v27, 4 }
 0x407   : > { %v14990_v44 = vmul.f32 %v18096_v55, %v14855_v12  ;;  %v14998_v59 = vmul.f32 %v6020_v63, %v14855_v12  ;;  %v15002_v23 = vmul.f32 %v18097_v4, %v14855_v12  ;;  %v6021_v41 = vld [vmem:[%s6195_s3 + $0x138] sm:$0xff]  ;;  %v6022_v32 = vld [vmem:[%s6195_s3 + $0x140] sm:$0xff]  ;;  %v6023_v24 = vld [vmem:[%s6195_s3 + $0x150] sm:$0xff]  ;;  %v5429_v27 = vrot.slane %v14978_v38, 4 }
 0x408   : > { %v15006_v28 = vmul.f32 %v6021_v41, %v14855_v12  ;;  %v15010_v55 = vmul.f32 %v6022_v32, %v14855_v12  ;;  %v18098_v34 = vld [vmem:[#allocation5_spill] sm:$0xff]  ;;  %v15018_v63 = vmul.f32 %v6023_v24, %v14855_v12  ;;  %v6024_v10 = vld [vmem:[%s6195_s3 + $0x158] sm:$0xff]  ;;  %v18099_v41 = vld [vmem:[#allocation6_spill] sm:$0xff]  ;;  %v5436_v38 = vrot.slane %v14994_v39, 4 }
 0x409   : > { %v15014_v8 = vmul.f32 %v18098_v34, %v14855_v12  ;;  %v15022_v4 = vmul.f32 %v6024_v10, %v14855_v12  ;;  %v15026_v15 = vmul.f32 %v18099_v41, %v14855_v12  ;;  %v18100_v32 = vld [vmem:[#allocation29_spill] sm:$0xff]  ;;  %v18101_v34 = vld [vmem:[#allocation30_spill] sm:$0xff]  ;;  %v18104_v37 = vld [vmem:[#allocation31_spill] sm:$0xff] }
 0x40a   : > { %v15030_v13 = vmul.f32 %v18100_v32, %v14855_v12  ;;  %v15034_v58 = vmul.f32 %v18101_v34, %v14855_v12  ;;  %v18102_v24 = vld [vmem:[#allocation17_spill] sm:$0xff]  ;;  %v18103_v10 = vld [vmem:[#allocation18_spill] sm:$0xff]  ;;  %v15046_v41 = vmul.f32 %v18104_v37, %v14855_v12  ;;  %v18105_v18 = vld [vmem:[#allocation32_spill] sm:$0xff] }
 0x40b   : > { %v15038_v1 = vmul.f32 %v18102_v24, %v14855_v12  ;;  %v15042_v26 = vmul.f32 %v18103_v10, %v14855_v12  ;;  %v15050_v32 = vmul.f32 %v18105_v18, %v14855_v12  ;;  %v18106_v20 = vld [vmem:[#allocation20_spill] sm:$0xff]  ;;  %v18108_v9 = vld [vmem:[#allocation63_spill] sm:$0xff]  ;;  %v18110_v36 = vld [vmem:[#allocation9_spill] sm:$0xff] }
 0x40c   : > { %v15054_v34 = vmul.f32 %v18106_v20, %v14855_v12  ;;  %v18107_v33 = vld [vmem:[#allocation28_spill] sm:$0xff]  ;;  %v15062_v10 = vmul.f32 %v18108_v9, %v14855_v12  ;;  %v15070_v18 = vmul.f32 %v18110_v36, %v14855_v12  ;;  %v18111_v19 = vld [vmem:[#allocation67_spill] sm:$0xff]  ;;  %v6025_v62 = vld [vmem:[%s6195_s3 + $0x1c8] sm:$0xff]  ;;  %v5397_v36 = vrot.slane %v14902_v40, 4 }
 0x40d   : > { %v15058_v24 = vmul.f32 %v18107_v33, %v14855_v12  ;;  %v18109_v21 = vld [vmem:[#allocation8_spill] sm:$0xff]  ;;  %v15074_v20 = vmul.f32 %v18111_v19, %v14855_v12  ;;  %v15078_v33 = vmul.f32 %v6025_v62, %v14855_v12  ;;  %v6026_v6 = vld [vmem:[%s6195_s3 + $0x1d0] sm:$0xff]  ;;  %v5401_v19 = vrot.slane %v14910_v30, 4  ;;  %s167_s3 = sand.u32 1, %s6089_s10  }
 0x40e   : > { %v15066_v37 = vmul.f32 %v18109_v21, %v14855_v12  ;;  %v15082_v9 = vmul.f32 %v6026_v6, %v14855_v12  ;;  %v15086_v21 = vmul.f32 %v14855_v12, %v13873_v60  ;;  %v5404_v62 = vrot.slane %v14918_v49, 4  ;;  %s5683_s26 = sshll.u32 %s167_s3, 8  ;;  %s15290_s5 = scalar_lea.sflag [#allocation3], %s167_s3 }
 0x40f   : > { %v15096_v6 = vsel %vm1179_vm3, %v5396_v25, %v5397_v36  ;;  %v15099_v60 = vsel %vm1179_vm3, %v5397_v36, %v5399_v14  ;;  %v5407_v12 = vrot.slane %v14926_v16, 4  ;;  %v15104_v40 = vsel %vm1179_vm3, %v5401_v19, %v5402_v42  ;;  %s15213_s27 = scalar_lea.vmem [#allocation2], %s5683_s26 }
 0x410   : > { %v15107_v52 = vsel %vm1179_vm3, %v5402_v42, %v5404_v62  ;;  %v5411_v30 = vrot.slane %v14934_v45, 4  ;;  %v5414_v49 = vrot.slane %v14942_v3, 4  ;;  %v5417_v42 = vrot.slane %v14950_v47, 4  ;;  %s5587_s29 = sshll.u32 %s15213_s27, 4  ;;  %s15276_s29 = int_to_ptr.vmem [resolvable:$true] %s5587_s29 }
 0x411   : > { %v15112_v25 = vsel %vm1179_vm3, %v5406_v51, %v5407_v12  ;;  %v15115_v14 = vsel %vm1179_vm3, %v5407_v12, %v5409_v17  ;;  %v5421_v45 = vrot.slane %v14958_v0, 4  ;;  %v5422_v51 = vrot.slane %v14962_v56, 4  ;;  %s6027_s6 = scalar_lea.vmem %s15276_s29, 4096  ;;  %p6034_p1 = scmp.lt.s32.totalorder %s15276_s29, %s6032_s8 }
 0x412   : > { %v15120_v16 = vsel %vm1179_vm3, %v5411_v30, %v5412_v29  ;;  %v15126_v43 = vsel %vm1179_vm3, %v5412_v29, %v5414_v49  ;;  %v5424_v36 = vrot.slane %v14966_v50, 4  ;;  %v5426_v3 = vrot.slane %v14970_v7, 4  ;;  %p6028_p12 = scmp.ne.s32.totalorder %s15276_s29, %s6027_s6  ;;  %p6035_p2 = scmp.lt.s32.totalorder %s6033_s15, %s6027_s6 }
 0x413   : > { %v15132_v11 = vsel %vm1179_vm3, %v5416_v5, %v5417_v42  ;;  %v15135_v19 = vsel %vm1179_vm3, %v5417_v42, %v5419_v61  ;;  %v5427_v47 = vrot.slane %v14974_v2, 4  ;;  %v15140_v0 = vsel %vm1179_vm3, %v5421_v45, %v5422_v51 }
 0x414   : > { %v15143_v56 = vsel %vm1179_vm3, %v5422_v51, %v5424_v36  ;;  %v5431_v50 = vrot.slane %v14982_v31, 4  ;;  %v5432_v7 = vrot.slane %v14986_v54, 4  ;;  %v5434_v2 = vrot.slane %v14990_v44, 4  ;;  %p6029_p13 = pnand %p6028_p12, %p6165_p4  ;;  %p6036_p3 = por %p6035_p2, %p6034_p1 }
 0x415   : > { %v15148_v62 = vsel %vm1179_vm3, %v5426_v3, %v5427_v47  ;;  %v15151_v12 = vsel %vm1179_vm3, %v5427_v47, %v5429_v27  ;;  %v5437_v30 = vrot.slane %v14998_v59, 4  ;;  %v5439_v29 = vrot.slane %v15002_v23, 4 }
 0x416   : > { %v5433_v17 = vsel %vm1179_vm3, %v5431_v50, %v5432_v7  ;;  %v5441_v31 = vrot.slane %v15006_v28, 4  ;;  %v5435_v54 = vsel %vm1179_vm3, %v5432_v7, %v5434_v2  ;;  %v5442_v49 = vrot.slane %v15010_v55, 4  ;;  %p6030_p0 = pneg %p6029_p13 }
 0x417   : > { %v5444_v5 = vrot.slane %v15014_v8, 4  ;;  %v5446_v42 = vrot.slane %v15018_v63, 4  ;;  %v5438_v44 = vsel %vm1179_vm3, %v5436_v38, %v5437_v30  ;;  %v5440_v39 = vsel %vm1179_vm3, %v5437_v30, %v5439_v29 }
 0x418   : > { %v5447_v59 = vrot.slane %v15022_v4, 4  ;;  %v5449_v23 = vrot.slane %v15026_v15, 4  ;;  %v5443_v28 = vsel %vm1179_vm3, %v5441_v31, %v5442_v49  ;;  %v5451_v55 = vrot.slane %v15030_v13, 4  ;;  %p6037_p5 = pnand %p6036_p3, %p6030_p0 }
 0x419   : > { %v5445_v61 = vsel %vm1179_vm3, %v5442_v49, %v5444_v5  ;;  %v5452_v45 = vrot.slane %v15034_v58, 4  ;;  %v5454_v51 = vrot.slane %v15038_v1, 4  ;;  %v5456_v36 = vrot.slane %v15042_v26, 4  ;;  %v18120_v49 = vld [vmem:[#allocation13_spill] sm:$0xff] }
 0x41a   : > { %v5448_v8 = vsel %vm1179_vm3, %v5446_v42, %v5447_v59  ;;  %v5450_v63 = vsel %vm1179_vm3, %v5447_v59, %v5449_v23  ;;  %v5457_v4 = vrot.slane %v15046_v41, 4  ;;  %v5459_v3 = vrot.slane %v15050_v32, 4  ;;  %v18122_v59 = vld [vmem:[#allocation16_spill] sm:$0xff] }
 0x41b   : > { %v5453_v15 = vsel %vm1179_vm3, %v5451_v55, %v5452_v45  ;;  %v5461_v13 = vrot.slane %v15054_v34, 4  ;;  %v5455_v58 = vsel %vm1179_vm3, %v5452_v45, %v5454_v51  ;;  %v5462_v47 = vrot.slane %v15058_v24, 4  ;;  %v18124_v45 = vld [vmem:[#allocation23_spill] sm:$0xff] }
 0x41c   : > { %v5464_v27 = vrot.slane %v15062_v10, 4  ;;  %v5466_v1 = vrot.slane %v15066_v37, 4  ;;  %v5458_v26 = vsel %vm1179_vm3, %v5456_v36, %v5457_v4  ;;  %v5460_v50 = vsel %vm1179_vm3, %v5457_v4, %v5459_v3  ;;  %v18128_v4 = vld [vmem:[#allocation42_spill] sm:$0xff] }
 0x41d   : > { %v5467_v7 = vrot.slane %v15070_v18, 4  ;;  %v5469_v41 = vrot.slane %v15074_v20, 4  ;;  %v5463_v32 = vsel %vm1179_vm3, %v5461_v13, %v5462_v47  ;;  %v5471_v2 = vrot.slane %v15078_v33, 4  ;;  %v18130_v13 = vld [vmem:[#allocation76_spill] sm:$0xff] }
 0x41e   : > { %v5465_v34 = vsel %vm1179_vm3, %v5462_v47, %v5464_v27  ;;  %v5472_v24 = vrot.slane %v15082_v9, 4  ;;  %v5474_v38 = vrot.slane %v15086_v21, 4  ;;  %v5508_v30 = vadd.f32 %v15096_v6, %v14787_v48  ;;  %v18112_v48 = vld [vmem:[#allocation12_spill] sm:$0xff]  ;;  %v18131_v27 = vld [vmem:[#allocation39_spill] sm:$0xff] }
 0x41f   : > { %v5468_v10 = vsel %vm1179_vm3, %v5466_v1, %v5467_v7  ;;  %v5470_v37 = vsel %vm1179_vm3, %v5467_v7, %v5469_v41  ;;  %v5509_v20 = vadd.f32 %v15099_v60, %v14792_v57  ;;  %v5510_v29 = vadd.f32 %v15104_v40, %v14796_v35  ;;  %v18113_v57 = vld [vmem:[#allocation15_spill] sm:$0xff]  ;;  %v18116_v40 = vld [vmem:[#allocation49_spill] sm:$0xff]  ;;  %v18135_v41 = vld [vmem:[#allocation48_spill] sm:$0xff] }
 0x420   : > { %v5473_v18 = vsel %vm1179_vm3, %v5471_v2, %v5472_v24  ;;  %v5511_v33 = vadd.f32 %v15107_v52, %v14800_v22  ;;  %v5475_v9 = vsel %vm1179_vm3, %v5472_v24, %v5474_v38  ;;  %v5512_v31 = vadd.f32 %v15112_v25, %v14805_v46  ;;  %5540 = vst [vmem:[%s15213_s27] sm:$0xff] %v5508_v30  ;;  %v18114_v22 = vld [vmem:[#allocation45_spill] sm:$0xff]  ;;  %v18117_v25 = vld [vmem:[#allocation50_spill] sm:$0xff]  ;;  %v18132_v1 = vld [vmem:[#allocation51_spill] sm:$0xff] }
 0x421   : > { %v5513_v21 = vadd.f32 %v15115_v14, %v14809_v53  ;;  %v5514_v6 = vadd.f32 %v15120_v16, %v18112_v48  ;;  %v5515_v35 = vadd.f32 %v15126_v43, %v18113_v57  ;;  %v5516_v46 = vadd.f32 %v15132_v11, %v18114_v22  ;;  %v18115_v53 = vld [vmem:[#allocation46_spill] sm:$0xff]  ;;  %5541 = vst [vmem:[%s15213_s27 + $0x8] sm:$0xff] %v5509_v20  ;;  %v18119_v11 = vld [vmem:[#allocation11_spill] sm:$0xff] }
 0x422   : > { %v5517_v60 = vadd.f32 %v15135_v19, %v18115_v53  ;;  %v5518_v52 = vadd.f32 %v15140_v0, %v18116_v40  ;;  %5542 = vst [vmem:[%s15213_s27 + $0x10] sm:$0xff] %v5510_v29  ;;  %5543 = vst [vmem:[%s15213_s27 + $0x18] sm:$0xff] %v5511_v33  ;;  %v5519_v14 = vadd.f32 %v15143_v56, %v18117_v25  ;;  %v18118_v16 = vld [vmem:[#allocation10_spill] sm:$0xff]  ;;  %v18123_v56 = vld [vmem:[#allocation19_spill] sm:$0xff] }
 0x423   : > { %v5520_v43 = vadd.f32 %v15148_v62, %v18118_v16  ;;  %v5521_v19 = vadd.f32 %v15151_v12, %v18119_v11  ;;  %v5522_v5 = vadd.f32 %v5433_v17, %v18120_v49  ;;  %5544 = vst [vmem:[%s15213_s27 + $0x20] sm:$0xff] %v5512_v31  ;;  %5545 = vst [vmem:[%s15213_s27 + $0x28] sm:$0xff] %v5513_v21  ;;  %v18121_v0 = vld [vmem:[#allocation14_spill] sm:$0xff]  ;;  %v18125_v12 = vld [vmem:[#allocation24_spill] sm:$0xff] }
 0x424   : > { %5546 = vst [vmem:[%s15213_s27 + $0x30] sm:$0xff] %v5514_v6  ;;  %v5523_v42 = vadd.f32 %v5435_v54, %v18121_v0  ;;  %v5524_v23 = vadd.f32 %v5438_v44, %v18122_v59  ;;  %v5525_v55 = vadd.f32 %v5440_v39, %v18123_v56  ;;  %v5526_v62 = vadd.f32 %v5443_v28, %v18124_v45  ;;  %v18126_v54 = vld [vmem:[#allocation37_spill] sm:$0xff]  ;;  %v18129_v28 = vld [vmem:[#allocation71_spill] sm:$0xff] }
 0x425   : > { %5547 = vst [vmem:[%s15213_s27 + $0x38] sm:$0xff] %v5515_v35  ;;  %5548 = vst [vmem:[%s15213_s27 + $0x40] sm:$0xff] %v5516_v46  ;;  %v5527_v17 = vadd.f32 %v5445_v61, %v18125_v12  ;;  %v5528_v51 = vadd.f32 %v5448_v8, %v18126_v54  ;;  %v18127_v44 = vld [vmem:[#allocation33_spill] sm:$0xff]  ;;  %v5530_v39 = vadd.f32 %v5453_v15, %v18128_v4  ;;  %v18134_v7 = vld [vmem:[#allocation47_spill] sm:$0xff] }
 0x426   : > { %5549 = vst [vmem:[%s15213_s27 + $0x48] sm:$0xff] %v5517_v60  ;;  %5550 = vst [vmem:[%s15213_s27 + $0x50] sm:$0xff] %v5518_v52  ;;  %v5529_v36 = vadd.f32 %v5450_v63, %v18127_v44  ;;  %v5531_v3 = vadd.f32 %v5455_v58, %v18129_v28  ;;  %v5532_v47 = vadd.f32 %v5458_v26, %v18130_v13  ;;  %v18133_v63 = vld [vmem:[#allocation56_spill] sm:$0xff] }
 0x427   : > { %5551 = vst [vmem:[%s15213_s27 + $0x58] sm:$0xff] %v5519_v14  ;;  %5552 = vst [vmem:[%s15213_s27 + $0x60] sm:$0xff] %v5520_v43  ;;  %v5533_v61 = vadd.f32 %v5460_v50, %v18131_v27  ;;  %v5534_v8 = vadd.f32 %v5463_v32, %v18132_v1  ;;  %v5535_v15 = vadd.f32 %v5465_v34, %v18133_v63  ;;  %v18136_v50 = vld [vmem:[#allocation79_spill] sm:$0xff]  ;;  %v18137_v34 = vld [vmem:[#allocation44_spill] sm:$0xff] }
 0x428   : > { %5553 = vst [vmem:[%s15213_s27 + $0x68] sm:$0xff] %v5521_v19  ;;  %5554 = vst [vmem:[%s15213_s27 + $0x70] sm:$0xff] %v5522_v5  ;;  %v5536_v58 = vadd.f32 %v5468_v10, %v18134_v7  ;;  %v5537_v26 = vadd.f32 %v5470_v37, %v18135_v41  ;;  %v5538_v32 = vadd.f32 %v5473_v18, %v18136_v50 }
 0x429   : > { %5555 = vst [vmem:[%s15213_s27 + $0x78] sm:$0xff] %v5523_v42  ;;  %5556 = vst [vmem:[%s15213_s27 + $0x80] sm:$0xff] %v5524_v23  ;;  %v5539_v2 = vadd.f32 %v5475_v9, %v18137_v34 }
 0x42a   : > { %5557 = vst [vmem:[%s15213_s27 + $0x88] sm:$0xff] %v5525_v55  ;;  %5558 = vst [vmem:[%s15213_s27 + $0x90] sm:$0xff] %v5526_v62 }
 0x42b   : > { %5559 = vst [vmem:[%s15213_s27 + $0x98] sm:$0xff] %v5527_v17  ;;  %5560 = vst [vmem:[%s15213_s27 + $0xa0] sm:$0xff] %v5528_v51 }
 0x42c   : > { %5561 = vst [vmem:[%s15213_s27 + $0xa8] sm:$0xff] %v5529_v36  ;;  %5562 = vst [vmem:[%s15213_s27 + $0xb0] sm:$0xff] %v5530_v39 }
 0x42d   : > { %5563 = vst [vmem:[%s15213_s27 + $0xb8] sm:$0xff] %v5531_v3  ;;  %5564 = vst [vmem:[%s15213_s27 + $0xc0] sm:$0xff] %v5532_v47 }
 0x42e   : > { %5565 = vst [vmem:[%s15213_s27 + $0xc8] sm:$0xff] %v5533_v61  ;;  %5566 = vst [vmem:[%s15213_s27 + $0xd0] sm:$0xff] %v5534_v8 }
 0x42f   : > { %5567 = vst [vmem:[%s15213_s27 + $0xd8] sm:$0xff] %v5535_v15  ;;  %5568 = vst [vmem:[%s15213_s27 + $0xe0] sm:$0xff] %v5536_v58 }
 0x430   : > { %5569 = vst [vmem:[%s15213_s27 + $0xe8] sm:$0xff] %v5537_v26  ;;  %5570 = vst [vmem:[%s15213_s27 + $0xf0] sm:$0xff] %v5538_v32 }
 0x431   : > { %5571 = vst [vmem:[%s15213_s27 + $0xf8] sm:$0xff] %v5539_v2 }
 0x432   : > { %6040 = shalt.err (!%p6037_p5)
}
 0x433   : > { %s6041_s16 = scalar_lea.hbm %s15274_s4, 4096  ;;  %s6045_s23 = scalar_lea.hbm %s15338_s2, 8192 }
 0x434   : > { %p6042_p6 = scmp.ne.s32.totalorder %s15274_s4, %s6041_s16  ;;  %p6046_p10 = scmp.lt.u32.totalorder %s15274_s4, %s15338_s2 }
 0x435   : > { %p6047_p11 = scmp.lt.u32.totalorder %s6045_s23, %s6041_s16  ;;  %p6049_p13 = scmp.lt.u32.totalorder %s6041_s16, %s15274_s4 }
 0x436   : > { %p6043_p7 = pnand %p6042_p6, %p6165_p4 }
 0x437   : > { %p6048_p12 = por %p6047_p11, %p6046_p10 }
 0x438   : > { %p6044_p9 = pneg %p6043_p7 }
 0x439   : > { %p6050_p0 = por %p6049_p13, %p6048_p12 }
 0x43b   : > { %p6051_p1 = pnand %p6050_p0, %p6044_p9 }
 0x43d   : > { %6054 = shalt.err (!%p6051_p1)
}
 0x43e   : > { %s6108_s3 = smov 128   ;;  %s6109_s26 = smov 8  }
 0x43f   : > { %5717 = dma.vmem_to_hbm [thread:$0]  (%p6165_p4), %s15276_s29, 4096, %s15274_s4, %s15290_s5, %s6108_s3, %s6108_s3, %s6109_s26  }
 0x440 PF: > { %p5723_p2 = scmp.ge.s32.totalorder %s6105_s14, 2  ;;  %s5602_s27 = sand.u32 1, %s6085_s9  }
 0x441   : > { %s5603_s28 = scalar_lea.sflag [#allocation3], %s5602_s27 }
 0x442   : > { %p5720_p3 = pnand %p5723_p2, %p6172_p8 }
 0x444   : > { %6080 = dma.done.wait (!%p5720_p3), %s5603_s28, 4096  }
 0x445   : > { %6082 = vsyncadd (!%p5720_p3), %s5603_s28, 4294963200  ;;  %s15_s14 = sadd.s32 1, %s6105_s14   ;;  %s18138_s9 = smov %s6089_s10 }
 0x446   : > { %p12_p5 = scmp.ge.s32.totalorder %s15_s14, 4   ;;  %s18139_s10 = smov %s6093_s11 }
 0x447   : > { %s18140_s11 = smov %s6178_s22  ;;  %s18141_s12 = smov %s6101_s13 }
 0x448   : > { %s18142_s13 = smov %s18144_s17  ;;  %14 = sbr.rel (!%p12_p5) target bundleno = 4 (0x4), region = 66 }
 0x44f   :  { %5608 = vsyncpa [#allocation3], 1 }
 0x450   :  { %5610 = vsyncpa [#allocation3 + $0x1], 1 }

</bundles_post_ra>
